<compile_context>
chip_gen: v5e
topology: v5e:2x2
jax: 0.10.0
libtpu: 0.0.40
codegen_flags: <defaults>
</compile_context>

<pallas_src>
import functools
import math

import jax
import jax.numpy as jnp
import numpy as np
from jax.experimental import pallas as pl
from jax.experimental.pallas import tpu as pltpu

NUM_LANES = 128


def _lane_fit(x, width):
    """Fit a (rows, 128) lane-replicated stat tensor to `width` lanes."""
    if width == NUM_LANES:
        return x
    if width < NUM_LANES:
        return x[:, :width]
    assert width % NUM_LANES == 0
    return jnp.tile(x, (1, width // NUM_LANES))


# ----------------------------------------------------------------------------
# Pallas flash-attention kernel (dense_attn): returns softmax(QK^T*scale)V and
# the per-row log-sum-exp.  Online-softmax accumulation over the KV grid axis.
# ----------------------------------------------------------------------------
def _flash_attn_kernel(q_ref, k_ref, v_ref, o_ref, lse_ref,
                       q_sc, m_sc, l_sc, acc_sc, *, scale, exp_dtype):
    ki = pl.program_id(2)
    head_dim = q_ref.shape[-1]

    @pl.when(ki == 0)
    def _init():
        # Fold the softmax scale into Q once per (bh, q-tile): removes a
        # (tq, tk) VPU multiply from every KV step.
        q_sc[...] = (q_ref[...].astype(jnp.float32) * scale).astype(q_sc.dtype)
        m_sc[...] = jnp.full_like(m_sc, -jnp.inf)
        l_sc[...] = jnp.zeros_like(l_sc)
        acc_sc[...] = jnp.zeros_like(acc_sc)

    # NT matmul on the MXU: contract the last dims of Q and K directly (no XLU
    # transpose of the (tk, D) K tile); bf16 operands, f32 accumulation.
    s = jax.lax.dot_general(
        q_sc[...], k_ref[...],
        dimension_numbers=(((1,), (1,)), ((), ())),
        preferred_element_type=jnp.float32)                    # (tq, tk) f32
    block_k = s.shape[-1]

    m_prev = m_sc[...]                                          # (tq, 128)
    l_prev = l_sc[...]                                          # (tq, 128)
    m_cur = jnp.max(s, axis=-1, keepdims=True)                  # (tq, 1)
    m_next = jnp.maximum(m_prev, m_cur)                         # (tq, 128)

    # The (tq, tk) exp is the EUP-bound op of the inner loop; bf16 on chips
    # with a bf16 EUP (v6e/v7x), f32 on v5e.  Feeds the PV matmul directly.
    s_shifted = s - _lane_fit(m_next, block_k)
    p = jnp.exp(s_shifted.astype(exp_dtype))                    # (tq, tk)

    alpha = jnp.exp(m_prev - m_next)                            # (tq, 128)
    # Row sum with f32 accumulation (bf16 accumulation of tk terms is too lossy).
    l_sc[...] = alpha * l_prev + jnp.sum(
        p.astype(jnp.float32), axis=-1, keepdims=True)
    # P@V on the MXU, f32 accumulation into acc_sc.
    pv = jax.lax.dot(p.astype(v_ref.dtype), v_ref[...],
                     preferred_element_type=jnp.float32)        # (tq, D) f32
    acc_sc[...] = acc_sc[...] * _lane_fit(alpha, head_dim) + pv
    m_sc[...] = m_next

    @pl.when(ki == pl.num_programs(2) - 1)
    def _finalize():
        l = l_sc[...]
        inv_l = pl.reciprocal(l, approx=True)    # EUP slot; feeds o only
        o_ref[...] = (acc_sc[...] * _lane_fit(inv_l, head_dim)).astype(o_ref.dtype)
        # Exact log path for the stored LSE (no approx reciprocal here).
        lse = m_sc[...] + jnp.log(l)
        lse_ref[...] = lse[:, :1].astype(lse_ref.dtype)


def _default_exp_dtype():
    """bf16 exp on chips with a bf16 EUP (v6e/v7x); f32 on v5e and older."""
    try:
        kind = jax.devices()[0].device_kind.lower()
    except Exception:
        return jnp.bfloat16
    if any(tag in kind for tag in ("v2", "v3", "v4", "v5")):
        return jnp.float32
    return jnp.bfloat16


def dense_attn(q, k, v, *, tq=512, tk=256, exp_dtype=None):
    """Pallas equivalent of chipmunk.ops.dense_attn -> (o, lse).

    o   : [B, H, Sq, D] in the input dtype
    lse : [B, H, Sq, 1] float32

    Inputs are cast to bf16 for the MXU (accumulation stays f32); with the
    default grid this matches a dense f32 SDPA to well under 2e-2 absolute.
    Keep tk=256 on all generations; if profiling on v5e shows exposed K/V DMA
    waits, add pipeline_mode=pl.Buffered(3) on the K/V BlockSpecs.
    """
    B, H, Sq, D = q.shape
    Sk = k.shape[2]
    out_dtype = q.dtype
    scale = 1.0 / math.sqrt(D)
    if exp_dtype is None:
        exp_dtype = _default_exp_dtype()

    tq = min(tq, Sq)
    tk = min(tk, Sk)
    assert Sq % tq == 0 and Sk % tk == 0, "seq must be a multiple of the tile"
    assert tq % 8 == 0, "tq must be a multiple of 8 (sublane tiling)"
    assert tk % NUM_LANES == 0, "tk must be a multiple of 128 (lane tiling)"

    # bf16 operands for the MXU; halves K/V HBM + VMEM traffic if callers hand
    # us f32.  (B, H) is flattened into one "parallel" grid axis so the v7x
    # megacore split stays balanced (keep B*H*(Sq//tq) even when tuning tq).
    cast = lambda x: x if x.dtype == jnp.bfloat16 else x.astype(jnp.bfloat16)
    q3 = cast(q).reshape(B * H, Sq, D)
    k3 = cast(k).reshape(B * H, Sk, D)
    v3 = cast(v).reshape(B * H, Sk, D)

    kernel = functools.partial(_flash_attn_kernel, scale=scale,
                               exp_dtype=exp_dtype)
    grid = (B * H, Sq // tq, Sk // tk)

    o, lse = pl.pallas_call(
        kernel,
        out_shape=(
            jax.ShapeDtypeStruct((B * H, Sq, D), out_dtype),
            jax.ShapeDtypeStruct((B * H, Sq, 1), jnp.float32),
        ),
        grid_spec=pltpu.PrefetchScalarGridSpec(
            num_scalar_prefetch=0,
            grid=grid,
            in_specs=[
                pl.BlockSpec((None, tq, D), lambda b, qi, ki: (b, qi, 0)),
                pl.BlockSpec((None, tk, D), lambda b, qi, ki: (b, ki, 0)),
                pl.BlockSpec((None, tk, D), lambda b, qi, ki: (b, ki, 0)),
            ],
            out_specs=[
                pl.BlockSpec((None, tq, D), lambda b, qi, ki: (b, qi, 0)),
                pl.BlockSpec((None, tq, 1), lambda b, qi, ki: (b, qi, 0)),
            ],
            scratch_shapes=[
                pltpu.VMEM((tq, D), jnp.bfloat16),          # scaled Q tile
                pltpu.VMEM((tq, NUM_LANES), jnp.float32),   # running max (lane-replicated)
                pltpu.VMEM((tq, NUM_LANES), jnp.float32),   # running sum (lane-replicated)
                pltpu.VMEM((tq, D), jnp.float32),           # output accumulator
            ],
        ),
        compiler_params=pltpu.CompilerParams(
            dimension_semantics=("parallel", "parallel", "arbitrary")),
    )(q3, k3, v3)

    return o.reshape(B, H, Sq, D), lse.reshape(B, H, Sq, 1)


# ----------------------------------------------------------------------------
# Minimal JAX re-implementation of the module's control flow around the kernel.
# ----------------------------------------------------------------------------
GLOBAL_CONFIG = {
    "attn": {
        "is_enabled": True,
        "first_n_dense_layers": 1,
    },
    "num_model_invocations_per_inference_step": 1,
}


class LayerCounter:
    def __init__(self):
        self.cur_inference_step = 0
        self.cur_model_invocation_per_step = 0

    def should_do_full_attn_step(self):
        return True  # synthetic: always the dense/full branch

    def increment(self):
        pass


class SparseDiffAttn:
    """JAX/Pallas port of the dense branches of chipmunk SparseDiffAttn."""

    def __init__(self, layer_num: int, layer_counter: LayerCounter):
        self.layer_num = layer_num
        self.layer_counter = layer_counter
        self.storage = {}  # stands in for AttnStorage (lse constants, caches)

    def _fast_attention(self, q, k, v, inference_step, do_full_step):
        attn_config = GLOBAL_CONFIG["attn"]
        if self.layer_num < attn_config["first_n_dense_layers"]:
            o, _ = dense_attn(q, k, v)
            return o
        if do_full_step and inference_step == 0:
            o, lse = dense_attn(q, k, v)
            # module does: lse[..., k.shape[-2]:, :] = 0  (zero padded rows)
            kv_len = k.shape[-2]
            row = jnp.arange(lse.shape[-2])[None, None, :, None]
            lse = jnp.where(row < kv_len, lse, 0.0)
            self.storage["lse_constants"] = lse
            return o
        # TODO(synk): sparse-delta branches (dense_colsum_attn, csp_attn,
        # mask_to_indices, bitpack/bitunpack) are custom CUDA/Triton ops with
        # no clean Pallas port here; fall back to dense attention.
        o, _ = dense_attn(q, k, v)
        return o

    def forward(self, q, k, v):
        if not GLOBAL_CONFIG["attn"]["is_enabled"]:
            o, _ = dense_attn(q, k, v)  # == F.scaled_dot_product_attention
            return o
        do_full_step = self.layer_counter.should_do_full_attn_step()
        inference_step = self.layer_counter.cur_inference_step
        out = self._fast_attention(q, k, v, inference_step, do_full_step)
        self.layer_counter.increment()
        return out

    __call__ = forward


# ----------------------------------------------------------------------------
# Reference + driver
# ----------------------------------------------------------------------------
def _reference_sdpa(q, k, v):
    d = q.shape[-1]
    qf = q.astype(jnp.float32)
    kf = k.astype(jnp.float32)
    vf = v.astype(jnp.float32)
    s = jnp.einsum("bhqd,bhkd->bhqk", qf, kf,
                   precision=jax.lax.Precision.HIGHEST) / math.sqrt(d)
    p = jax.nn.softmax(s, axis=-1)
    o = jnp.einsum("bhqk,bhkd->bhqd", p, vf,
                   precision=jax.lax.Precision.HIGHEST)
    lse = jax.scipy.special.logsumexp(s, axis=-1, keepdims=True)
    return o.astype(q.dtype), lse


if __name__ == "__main__":
    B, H, S, D = 2, 4, 512, 64
    key = jax.random.PRNGKey(0)
    kq, kk, kv = jax.random.split(key, 3)
    q = jax.random.normal(kq, (B, H, S, D), dtype=jnp.float32)
    k = jax.random.normal(kk, (B, H, S, D), dtype=jnp.float32)
    v = jax.random.normal(kv, (B, H, S, D), dtype=jnp.float32)

    module = SparseDiffAttn(layer_num=2, layer_counter=LayerCounter())
    out = module(q, k, v)
    out = jax.block_until_ready(out)

    o_ref, lse_ref = _reference_sdpa(q, k, v)
    # bf16 MXU operands (+ bf16 exp on v6e/v7x) + approx reciprocal on the
    # output normalization: error vs. the f32 reference stays well within 2e-2.
    np.testing.assert_allclose(np.asarray(out), np.asarray(o_ref),
                               rtol=2e-2, atol=2e-2)
    lse_stored = jax.block_until_ready(module.storage["lse_constants"])
    np.testing.assert_allclose(np.asarray(lse_stored), np.asarray(lse_ref),
                               rtol=2e-2, atol=2e-2)

    print("KERNEL_OK")
</pallas_src>

<mosaic_0001>
module attributes {stable_mosaic.version = 11 : i64} {
  func.func @_flash_attn_kernel(%arg0: i32, %arg1: i32, %arg2: i32, %arg3: memref<1x512x64xbf16, #tpu.memory_space<vmem>>, %arg4: memref<1x256x64xbf16, #tpu.memory_space<vmem>>, %arg5: memref<1x256x64xbf16, #tpu.memory_space<vmem>>, %arg6: memref<1x512x64xf32, #tpu.memory_space<vmem>>, %arg7: memref<1x512x1xf32, #tpu.memory_space<vmem>>, %arg8: memref<512x64xbf16, #tpu.memory_space<vmem>>, %arg9: memref<512x128xf32, #tpu.memory_space<vmem>>, %arg10: memref<512x128xf32, #tpu.memory_space<vmem>>, %arg11: memref<512x64xf32, #tpu.memory_space<vmem>>) attributes {dimension_semantics = [#tpu.dimension_semantics<parallel>, #tpu.dimension_semantics<parallel>, #tpu.dimension_semantics<arbitrary>], iteration_bounds = array<i64: 8, 1, 2>, scalar_prefetch = 0 : i64, scratch_operands = 4 : i64, tpu.core_type = #tpu.core_type<tc>, window_params = [{transform_indices = @transform_0, window_bounds = array<i64: 1, 512, 64>}, {transform_indices = @transform_1, window_bounds = array<i64: 1, 256, 64>}, {transform_indices = @transform_2, window_bounds = array<i64: 1, 256, 64>}, {transform_indices = @transform_3, window_bounds = array<i64: 1, 512, 64>}, {transform_indices = @transform_4, window_bounds = array<i64: 1, 512, 1>}]} {
    %c0_i32 = arith.constant 0 : i32
    %0 = arith.cmpi eq, %arg2, %c0_i32 : i32
    %1 = arith.extui %0 : i1 to i32
    %c0_i32_0 = arith.constant 0 : i32
    %2 = arith.cmpi ne, %1, %c0_i32_0 : i32
    scf.if %2 {
      %c0_24 = arith.constant 0 : index
      %c0_25 = arith.constant 0 : index
      %c0_26 = arith.constant 0 : index
      %38 = vector.load %arg3[%c0_24, %c0_25, %c0_26] : memref<1x512x64xbf16, #tpu.memory_space<vmem>>, vector<1x512x64xbf16>
      %39 = vector.shape_cast %38 : vector<1x512x64xbf16> to vector<512x64xbf16>
      %40 = arith.extf %39 : vector<512x64xbf16> to vector<512x64xf32>
      %cst_27 = arith.constant 1.250000e-01 : f32
      %41 = vector.broadcast %cst_27 : f32 to vector<512x64xf32>
      %42 = arith.mulf %40, %41 : vector<512x64xf32>
      %43 = arith.truncf %42 : vector<512x64xf32> to vector<512x64xbf16>
      %c0_28 = arith.constant 0 : index
      %c0_29 = arith.constant 0 : index
      %44 = vector.load %arg8[%c0_28, %c0_29] : memref<512x64xbf16, #tpu.memory_space<vmem>>, vector<512x64xbf16>
      tpu.vector_store %arg8[%c0_28, %c0_29], %43 {strides = array<i32>} : memref<512x64xbf16, #tpu.memory_space<vmem>>, vector<512x64xbf16>,
      %cst_30 = arith.constant 0xFF800000 : f32
      %45 = vector.broadcast %cst_30 : f32 to vector<512x128xf32>
      %c0_31 = arith.constant 0 : index
      %c0_32 = arith.constant 0 : index
      %46 = vector.load %arg9[%c0_31, %c0_32] : memref<512x128xf32, #tpu.memory_space<vmem>>, vector<512x128xf32>
      tpu.vector_store %arg9[%c0_31, %c0_32], %45 {strides = array<i32>} : memref<512x128xf32, #tpu.memory_space<vmem>>, vector<512x128xf32>,
      %cst_33 = arith.constant 0.000000e+00 : f32
      %47 = vector.broadcast %cst_33 : f32 to vector<512x128xf32>
      %c0_34 = arith.constant 0 : index
      %c0_35 = arith.constant 0 : index
      %48 = vector.load %arg10[%c0_34, %c0_35] : memref<512x128xf32, #tpu.memory_space<vmem>>, vector<512x128xf32>
      tpu.vector_store %arg10[%c0_34, %c0_35], %47 {strides = array<i32>} : memref<512x128xf32, #tpu.memory_space<vmem>>, vector<512x128xf32>,
      %cst_36 = arith.constant 0.000000e+00 : f32
      %49 = vector.broadcast %cst_36 : f32 to vector<512x64xf32>
      %c0_37 = arith.constant 0 : index
      %c0_38 = arith.constant 0 : index
      %50 = vector.load %arg11[%c0_37, %c0_38] : memref<512x64xf32, #tpu.memory_space<vmem>>, vector<512x64xf32>
      tpu.vector_store %arg11[%c0_37, %c0_38], %49 {strides = array<i32>} : memref<512x64xf32, #tpu.memory_space<vmem>>, vector<512x64xf32>,
    } else {
    }
    %c0 = arith.constant 0 : index
    %c0_1 = arith.constant 0 : index
    %3 = vector.load %arg8[%c0, %c0_1] : memref<512x64xbf16, #tpu.memory_space<vmem>>, vector<512x64xbf16>
    %c0_2 = arith.constant 0 : index
    %c0_3 = arith.constant 0 : index
    %c0_4 = arith.constant 0 : index
    %4 = vector.load %arg4[%c0_2, %c0_3, %c0_4] : memref<1x256x64xbf16, #tpu.memory_space<vmem>>, vector<1x256x64xbf16>
    %5 = vector.shape_cast %4 : vector<1x256x64xbf16> to vector<256x64xbf16>
    %cst = arith.constant dense<0.000000e+00> : vector<512x256xf32>
    %6 = tpu.matmul %3, %5, %cst {dimension_numbers = #tpu.dot_dimension_numbers<[1], [1], [0], [0], [0, 0, 1, 0], [], []>} : vector<512x64xbf16>, vector<256x64xbf16>, vector<512x256xf32> -> vector<512x256xf32>
    %c0_5 = arith.constant 0 : index
    %c0_6 = arith.constant 0 : index
    %7 = vector.load %arg9[%c0_5, %c0_6] : memref<512x128xf32, #tpu.memory_space<vmem>>, vector<512x128xf32>
    %c0_7 = arith.constant 0 : index
    %c0_8 = arith.constant 0 : index
    %8 = vector.load %arg10[%c0_7, %c0_8] : memref<512x128xf32, #tpu.memory_space<vmem>>, vector<512x128xf32>
    %cst_9 = arith.constant dense<0xFF800000> : vector<512xf32>
    %9 = vector.multi_reduction <maximumf>, %6, %cst_9 [1] : vector<512x256xf32> to vector<512xf32>
    %10 = vector.shape_cast %9 : vector<512xf32> to vector<512x1xf32>
    %11 = vector.broadcast %10 : vector<512x1xf32> to vector<512x128xf32>
    %12 = arith.maximumf %7, %11 : vector<512x128xf32>
    %13 = tpu.concatenate %12, %12 in 1 : vector<512x128xf32>, vector<512x128xf32> -> vector<512x256xf32>
    %14 = arith.subf %6, %13 : vector<512x256xf32>
    %15 = arith.truncf %14 : vector<512x256xf32> to vector<512x256xbf16>
    %16 = math.exp %15 : vector<512x256xbf16>
    %17 = arith.subf %7, %12 : vector<512x128xf32>
    %18 = math.exp %17 : vector<512x128xf32>
    %19 = arith.mulf %18, %8 : vector<512x128xf32>
    %20 = arith.extf %16 : vector<512x256xbf16> to vector<512x256xf32>
    %cst_10 = arith.constant dense<0.000000e+00> : vector<512xf32>
    %21 = vector.multi_reduction <add>, %20, %cst_10 [1] : vector<512x256xf32> to vector<512xf32>
    %22 = vector.shape_cast %21 : vector<512xf32> to vector<512x1xf32>
    %23 = vector.broadcast %22 : vector<512x1xf32> to vector<512x128xf32>
    %24 = arith.addf %19, %23 : vector<512x128xf32>
    %c0_11 = arith.constant 0 : index
    %c0_12 = arith.constant 0 : index
    %25 = vector.load %arg10[%c0_11, %c0_12] : memref<512x128xf32, #tpu.memory_space<vmem>>, vector<512x128xf32>
    tpu.vector_store %arg10[%c0_11, %c0_12], %24 {strides = array<i32>} : memref<512x128xf32, #tpu.memory_space<vmem>>, vector<512x128xf32>,
    %c0_13 = arith.constant 0 : index
    %c0_14 = arith.constant 0 : index
    %c0_15 = arith.constant 0 : index
    %26 = vector.load %arg5[%c0_13, %c0_14, %c0_15] : memref<1x256x64xbf16, #tpu.memory_space<vmem>>, vector<1x256x64xbf16>
    %27 = vector.shape_cast %26 : vector<1x256x64xbf16> to vector<256x64xbf16>
    %cst_16 = arith.constant dense<0.000000e+00> : vector<512x64xf32>
    %28 = tpu.matmul %16, %27, %cst_16 {dimension_numbers = #tpu.dot_dimension_numbers<[1], [0], [0], [1], [0, 0, 1, 1], [], []>} : vector<512x256xbf16>, vector<256x64xbf16>, vector<512x64xf32> -> vector<512x64xf32>
    %c0_17 = arith.constant 0 : index
    %c0_18 = arith.constant 0 : index
    %29 = vector.load %arg11[%c0_17, %c0_18] : memref<512x64xf32, #tpu.memory_space<vmem>>, vector<512x64xf32>
    %30 = vector.extract_strided_slice %18 {offsets = [0, 0], sizes = [512, 64], strides = [1, 1]} : vector<512x128xf32> to vector<512x64xf32>
    %31 = arith.mulf %29, %30 : vector<512x64xf32>
    %32 = arith.addf %31, %28 : vector<512x64xf32>
    %c0_19 = arith.constant 0 : index
    %c0_20 = arith.constant 0 : index
    %33 = vector.load %arg11[%c0_19, %c0_20] : memref<512x64xf32, #tpu.memory_space<vmem>>, vector<512x64xf32>
    tpu.vector_store %arg11[%c0_19, %c0_20], %32 {strides = array<i32>} : memref<512x64xf32, #tpu.memory_space<vmem>>, vector<512x64xf32>,
    %c0_21 = arith.constant 0 : index
    %c0_22 = arith.constant 0 : index
    %34 = vector.load %arg9[%c0_21, %c0_22] : memref<512x128xf32, #tpu.memory_space<vmem>>, vector<512x128xf32>
    tpu.vector_store %arg9[%c0_21, %c0_22], %12 {strides = array<i32>} : memref<512x128xf32, #tpu.memory_space<vmem>>, vector<512x128xf32>,
    %c1_i32 = arith.constant 1 : i32
    %35 = arith.cmpi eq, %arg2, %c1_i32 : i32
    %36 = arith.extui %35 : i1 to i32
    %c0_i32_23 = arith.constant 0 : i32
    %37 = arith.cmpi ne, %36, %c0_i32_23 : i32
    scf.if %37 {
      %c0_24 = arith.constant 0 : index
      %c0_25 = arith.constant 0 : index
      %38 = vector.load %arg10[%c0_24, %c0_25] : memref<512x128xf32, #tpu.memory_space<vmem>>, vector<512x128xf32>
      %39 = tpu.reciprocal %38 {approx = true} : vector<512x128xf32> -> vector<512x128xf32>
      %c0_26 = arith.constant 0 : index
      %c0_27 = arith.constant 0 : index
      %40 = vector.load %arg11[%c0_26, %c0_27] : memref<512x64xf32, #tpu.memory_space<vmem>>, vector<512x64xf32>
      %41 = vector.extract_strided_slice %39 {offsets = [0, 0], sizes = [512, 64], strides = [1, 1]} : vector<512x128xf32> to vector<512x64xf32>
      %42 = arith.mulf %40, %41 : vector<512x64xf32>
      %c0_28 = arith.constant 0 : index
      %c0_29 = arith.constant 0 : index
      %c0_30 = arith.constant 0 : index
      %43 = vector.load %arg6[%c0_28, %c0_29, %c0_30] : memref<1x512x64xf32, #tpu.memory_space<vmem>>, vector<1x512x64xf32>
      %44 = vector.shape_cast %43 : vector<1x512x64xf32> to vector<512x64xf32>
      %45 = vector.shape_cast %42 : vector<512x64xf32> to vector<1x512x64xf32>
      tpu.vector_store %arg6[%c0_28, %c0_29, %c0_30], %45 {strides = array<i32>} : memref<1x512x64xf32, #tpu.memory_space<vmem>>, vector<1x512x64xf32>,
      %c0_31 = arith.constant 0 : index
      %c0_32 = arith.constant 0 : index
      %46 = vector.load %arg9[%c0_31, %c0_32] : memref<512x128xf32, #tpu.memory_space<vmem>>, vector<512x128xf32>
      %47 = math.log %38 : vector<512x128xf32>
      %48 = arith.addf %46, %47 : vector<512x128xf32>
      %49 = vector.extract_strided_slice %48 {offsets = [0, 0], sizes = [512, 1], strides = [1, 1]} : vector<512x128xf32> to vector<512x1xf32>
      %c0_33 = arith.constant 0 : index
      %c0_34 = arith.constant 0 : index
      %c0_35 = arith.constant 0 : index
      %50 = vector.load %arg7[%c0_33, %c0_34, %c0_35] : memref<1x512x1xf32, #tpu.memory_space<vmem>>, vector<1x512x1xf32>
      %51 = vector.shape_cast %50 : vector<1x512x1xf32> to vector<512x1xf32>
      %52 = vector.shape_cast %49 : vector<512x1xf32> to vector<1x512x1xf32>
      tpu.vector_store %arg7[%c0_33, %c0_34, %c0_35], %52 {strides = array<i32>} : memref<1x512x1xf32, #tpu.memory_space<vmem>>, vector<1x512x1xf32>,
    } else {
    }
    return
  }
  func.func @transform_0(%arg0: i32, %arg1: i32, %arg2: i32) -> (i32, i32, i32) {
    %c0_i32 = arith.constant 0 : i32
    %c0_i32_0 = arith.constant 0 : i32
    return %arg0, %arg1, %c0_i32 : i32, i32, i32
  }
  func.func @transform_1(%arg0: i32, %arg1: i32, %arg2: i32) -> (i32, i32, i32) {
    %c0_i32 = arith.constant 0 : i32
    %c0_i32_0 = arith.constant 0 : i32
    return %arg0, %arg2, %c0_i32 : i32, i32, i32
  }
  func.func @transform_2(%arg0: i32, %arg1: i32, %arg2: i32) -> (i32, i32, i32) {
    %c0_i32 = arith.constant 0 : i32
    %c0_i32_0 = arith.constant 0 : i32
    return %arg0, %arg2, %c0_i32 : i32, i32, i32
  }
  func.func @transform_3(%arg0: i32, %arg1: i32, %arg2: i32) -> (i32, i32, i32) {
    %c0_i32 = arith.constant 0 : i32
    %c0_i32_0 = arith.constant 0 : i32
    return %arg0, %arg1, %c0_i32 : i32, i32, i32
  }
  func.func @transform_4(%arg0: i32, %arg1: i32, %arg2: i32) -> (i32, i32, i32) {
    %c0_i32 = arith.constant 0 : i32
    %c0_i32_0 = arith.constant 0 : i32
    return %arg0, %arg1, %c0_i32 : i32, i32, i32
  }
}

</mosaic_0001>

<bundles_post_ra>
// kernel: tpu_custom_call.1
= control target key start
LH: loop header
LB: loop body
LE: loop exit
PB: predicated region body
PF: predicated region fallthrough
CT: control target
= control target key end

     0   :  { %s6331_s15 = smov 0   ;;  %s6333_s16 = smov 0   ;;  %s9245_s0 = inlined_call_operand.vmem [shape: bf16[8,512,64], index: 0, kind: input, shape index: {}]   ;;  %s9246_s1 = inlined_call_operand.vmem [shape: bf16[8,512,64], index: 1, kind: input, shape index: {}]   ;;  %s9247_s2 = inlined_call_operand.vmem [shape: bf16[8,512,64], index: 2, kind: input, shape index: {}]   ;;  %s9248_s3 = inlined_call_operand.vmem [shape: f32[8,512,64], index: 3, kind: output, shape index: {0}]   ;;  %s9249_s4 = inlined_call_operand.vmem [shape: f32[8,512,1], index: 4, kind: output, shape index: {1}]  }
   0x1   :  { %s6335_s17 = smov 0   ;;  %s6337_s18 = smov 0  }
   0x2   :  { %s6339_s19 = smov 0  }
   0x3 LB: > { %s27_s20 = sadd.s32 1, %s6294_s17  ;;  %s34_s21 = sadd.s32 1, %s6298_s18  ;;  %s6302_s19 = sphi %s6339_s19, %s15_s19   ;;  %s6298_s18 = sphi %s6337_s18, %s9825_s18   ;;  %s6294_s17 = sphi %s6335_s17, %s9824_s17   ;;  %s6290_s16 = sphi %s6333_s16, %s9823_s16   ;;  %s6286_s15 = sphi %s6331_s15, %s9822_s15  }
   0x4   : > { %p28_p0 = scmp.ge.s32.totalorder %s27_s20, 2  ;;  %p5019_p1 = scmp.ge.s32.totalorder %s6302_s19, 1 }
   0x5   : > { %p229_p2 = scmp.lt.s32.totalorder %s6302_s19, 17 }
   0x6   : > { %s9827_s20 = smov (%p28_p0, %s27_s20), 0  ;;  %s9829_s21 = smov (!%p28_p0, %s34_s21), %s6298_s18 }
   0x7   : > { %p230_p3 = pnand %p5019_p1, %p229_p2  ;;  %p36_p4 = scmp.ge.s32.totalorder %s9829_s21, 8 }
   0x9   : > { %s9831_s21 = smov (%p36_p4, %s9829_s21), 0  ;;  %233 = sbr.rel (%p230_p3) target bundleno = 1430 (0x596), region = 32 }
   0xe   : > { %p291_p5 = scmp.lt.s32.totalorder %s6290_s16, 7  ;;  %s5022_s22 = sshll.u32 %s6286_s15, 5 }
   0xf   : > { %p303_p6 = scmp.lt.s32.totalorder %s5022_s22, 63  ;;  %p5032_p7 = scmp.ne.s32.totalorder %s6286_s15, 0 }
  0x10   : > { %s9833_s16 = smov (!%p291_p5, %s6290_s16), 7 }
  0x11   : > { %s9835_s22 = smov (!%p303_p6, %s5022_s22), 63  ;;  %s5356_s23 = sshll.u32 %s9833_s16, 8 }
  0x12   : > { %s5023_s24 = sshll.u32 %s9833_s16, 6  ;;  %s6367_s27 = scalar_lea.vmem %s9245_s0, %s5356_s23 }
  0x13   : > { %s306_s28 = sadd.s32 %s5023_s24, %s9835_s22  ;;  %s5357_s30 = sshll.u32 %s9833_s16, 9 }
  0x14   : > { %s5024_s29 = sshll.u32 %s306_s28, 2  ;;  %s6382_s13 = scalar_lea.vmem %s9248_s3, %s5357_s30 }
  0x15   : > { %s6372_s7 = scalar_lea.vmem %s9246_s1, %s5024_s29  ;;  %s6377_s10 = scalar_lea.vmem %s9247_s2, %s5024_s29 }
  0x16   : > { %s6387_s22 = scalar_lea.vmem %s9249_s4, %s5357_s30  ;;  %343 = sbr.rel (%p5032_p7) target bundleno = 290 (0x122), region = 36 }
  0x1b   : > { %v5424_v0 = vld [vmem:[%s6367_s27] sm:$0xff]   ;;  %v5551_v1 = vld [vmem:[%s6367_s27 + $0x8] sm:$0xff]   ;;  %v5552_v2 = vld [vmem:[%s6367_s27 + $0x10] sm:$0xff]   ;;  %vm600_vm0 = vcmask 519168   ;;  %vm793_vm1 = vcmask 523264  }
  0x1c   : > { %v5425_v3 = vunpack.c.l.bf16 %v5424_v0  ;;  %v5426_v4 = vunpack.c.h.bf16 %v5424_v0  ;;  %v5429_v5 = vunpack.c.l.bf16 %v5551_v1  ;;  %v5430_v6 = vunpack.c.h.bf16 %v5551_v1  ;;  %v5553_v7 = vld [vmem:[%s6367_s27 + $0x18] sm:$0xff]   ;;  %v5554_v18 = vld [vmem:[%s6367_s27 + $0x20] sm:$0xff]   ;;  %v5555_v19 = vld [vmem:[%s6367_s27 + $0x28] sm:$0xff]  }
  0x1d   : > { %v5433_v8 = vunpack.c.l.bf16 %v5552_v2  ;;  %v5434_v9 = vunpack.c.h.bf16 %v5552_v2  ;;  %v5437_v10 = vunpack.c.l.bf16 %v5553_v7  ;;  %v5438_v11 = vunpack.c.h.bf16 %v5553_v7  ;;  %v5556_v24 = vld [vmem:[%s6367_s27 + $0x30] sm:$0xff]   ;;  %v5557_v25 = vld [vmem:[%s6367_s27 + $0x38] sm:$0xff]   ;;  %v5558_v44 = vld [vmem:[%s6367_s27 + $0x40] sm:$0xff]  }
  0x1e   : > { %v472_v12 = vmul.f32 0.125, %v5425_v3  ;;  %v473_v13 = vmul.f32 0.125, %v5426_v4  ;;  %v474_v14 = vmul.f32 0.125, %v5429_v5  ;;  %v475_v15 = vmul.f32 0.125, %v5430_v6  ;;  %v5559_v45 = vld [vmem:[%s6367_s27 + $0x48] sm:$0xff]   ;;  %v5560_v51 = vld [vmem:[%s6367_s27 + $0x50] sm:$0xff]  }
  0x1f   : > { %v476_v16 = vmul.f32 0.125, %v5433_v8  ;;  %v477_v17 = vmul.f32 0.125, %v5434_v9  ;;  %v478_v23 = vmul.f32 0.125, %v5437_v10  ;;  %v479_v28 = vmul.f32 0.125, %v5438_v11  ;;  %v5561_v59 = vld [vmem:[%s6367_s27 + $0x58] sm:$0xff]   ;;  %v5562_v2 = vld [vmem:[%s6367_s27 + $0x60] sm:$0xff]  }
  0x20   : > { %v536_v20 = vpack.c.bf16 %v472_v12, %v472_v12  ;;  %v537_v21 = vpack.c.bf16 %v473_v13, %v473_v13  ;;  %v538_v22 = vpack.c.bf16 %v474_v14, %v474_v14  ;;  %v539_v26 = vpack.c.bf16 %v475_v15, %v475_v15  ;;  %v5563_v9 = vld [vmem:[%s6367_s27 + $0x68] sm:$0xff]  }
  0x21   : > { %v540_v27 = vpack.c.bf16 %v476_v16, %v476_v16  ;;  %v5441_v29 = vunpack.c.l.bf16 %v5554_v18  ;;  %v5442_v30 = vunpack.c.h.bf16 %v5554_v18  ;;  %v5445_v31 = vunpack.c.l.bf16 %v5555_v19  ;;  %v5564_v16 = vld [vmem:[%s6367_s27 + $0x70] sm:$0xff]  }
  0x22   : > { %601 = vst.msk [vmem:[#allocation2] sm:$0xf] %vm600_vm0, %v536_v20  ;;  %v5446_v32 = vunpack.c.h.bf16 %v5555_v19  ;;  %v541_v33 = vpack.c.bf16 %v477_v17, %v477_v17  ;;  %v5449_v34 = vunpack.c.l.bf16 %v5556_v24  ;;  %v5450_v35 = vunpack.c.h.bf16 %v5556_v24 }
  0x23   : > { %602 = vst.msk [vmem:[#allocation2 + $0x4] sm:$0xf] %vm600_vm0, %v537_v21  ;;  %v5453_v36 = vunpack.c.l.bf16 %v5557_v25  ;;  %v542_v37 = vpack.c.bf16 %v478_v23, %v478_v23  ;;  %v480_v38 = vmul.f32 0.125, %v5441_v29  ;;  %v481_v39 = vmul.f32 0.125, %v5442_v30  ;;  %v5565_v23 = vld [vmem:[%s6367_s27 + $0x78] sm:$0xff]   ;;  %v5566_v30 = vld [vmem:[%s6367_s27 + $0x80] sm:$0xff]  }
  0x24   : > { %603 = vst.msk [vmem:[#allocation2 + $0x8] sm:$0xf] %vm600_vm0, %v538_v22  ;;  %v482_v40 = vmul.f32 0.125, %v5445_v31  ;;  %v543_v41 = vpack.c.bf16 %v479_v28, %v479_v28  ;;  %v483_v42 = vmul.f32 0.125, %v5446_v32  ;;  %v5454_v43 = vunpack.c.h.bf16 %v5557_v25 }
  0x25   : > { %604 = vst.msk [vmem:[#allocation2 + $0xc] sm:$0xf] %vm600_vm0, %v539_v26  ;;  %v544_v46 = vpack.c.bf16 %v480_v38, %v480_v38  ;;  %v484_v47 = vmul.f32 0.125, %v5449_v34  ;;  %v545_v48 = vpack.c.bf16 %v481_v39, %v481_v39  ;;  %v485_v49 = vmul.f32 0.125, %v5450_v35 }
  0x26   : > { %605 = vst.msk [vmem:[#allocation2 + $0x10] sm:$0xf] %vm600_vm0, %v540_v27  ;;  %v486_v50 = vmul.f32 0.125, %v5453_v36  ;;  %v546_v52 = vpack.c.bf16 %v482_v40, %v482_v40  ;;  %v5457_v53 = vunpack.c.l.bf16 %v5558_v44  ;;  %v5458_v54 = vunpack.c.h.bf16 %v5558_v44  ;;  %v5568_v44 = vld [vmem:[%s6367_s27 + $0x90] sm:$0xff]  }
  0x27   : > { %606 = vst.msk [vmem:[#allocation2 + $0x14] sm:$0xf] %vm600_vm0, %v541_v33  ;;  %v5461_v55 = vunpack.c.l.bf16 %v5559_v45  ;;  %v547_v56 = vpack.c.bf16 %v483_v42, %v483_v42  ;;  %v487_v57 = vmul.f32 0.125, %v5454_v43  ;;  %v5462_v58 = vunpack.c.h.bf16 %v5559_v45 }
  0x28   : > { %607 = vst.msk [vmem:[#allocation2 + $0x18] sm:$0xf] %vm600_vm0, %v542_v37  ;;  %v548_v60 = vpack.c.bf16 %v484_v47, %v484_v47  ;;  %v488_v61 = vmul.f32 0.125, %v5457_v53  ;;  %v5465_v62 = vunpack.c.l.bf16 %v5560_v51  ;;  %v549_v63 = vpack.c.bf16 %v485_v49, %v485_v49  ;;  %v5567_v37 = vld [vmem:[%s6367_s27 + $0x88] sm:$0xff]  }
  0x29   : > { %608 = vst.msk [vmem:[#allocation2 + $0x1c] sm:$0xf] %vm600_vm0, %v543_v41  ;;  %v489_v0 = vmul.f32 0.125, %v5458_v54  ;;  %v5466_v1 = vunpack.c.h.bf16 %v5560_v51  ;;  %v550_v3 = vpack.c.bf16 %v486_v50, %v486_v50  ;;  %v490_v4 = vmul.f32 0.125, %v5461_v55  ;;  %v5569_v51 = vld [vmem:[%s6367_s27 + $0x98] sm:$0xff]  }
  0x2a   : > { %609 = vst.msk [vmem:[#allocation2 + $0x20] sm:$0xf] %vm600_vm0, %v544_v46  ;;  %v5469_v5 = vunpack.c.l.bf16 %v5561_v59  ;;  %v551_v6 = vpack.c.bf16 %v487_v57, %v487_v57  ;;  %v491_v7 = vmul.f32 0.125, %v5462_v58  ;;  %v5470_v8 = vunpack.c.h.bf16 %v5561_v59  ;;  %v5570_v58 = vld [vmem:[%s6367_s27 + $0xa0] sm:$0xff]  }
  0x2b   : > { %610 = vst.msk [vmem:[#allocation2 + $0x24] sm:$0xf] %vm600_vm0, %v545_v48  ;;  %v552_v10 = vpack.c.bf16 %v488_v61, %v488_v61  ;;  %v492_v11 = vmul.f32 0.125, %v5465_v62  ;;  %v5473_v12 = vunpack.c.l.bf16 %v5562_v2  ;;  %v553_v13 = vpack.c.bf16 %v489_v0, %v489_v0 }
  0x2c   : > { %611 = vst.msk [vmem:[#allocation2 + $0x28] sm:$0xf] %vm600_vm0, %v546_v52  ;;  %v493_v14 = vmul.f32 0.125, %v5466_v1  ;;  %v5474_v15 = vunpack.c.h.bf16 %v5562_v2  ;;  %v554_v17 = vpack.c.bf16 %v490_v4, %v490_v4  ;;  %v494_v18 = vmul.f32 0.125, %v5469_v5  ;;  %v5571_v1 = vld [vmem:[%s6367_s27 + $0xa8] sm:$0xff]  }
  0x2d   : > { %612 = vst.msk [vmem:[#allocation2 + $0x2c] sm:$0xf] %vm600_vm0, %v547_v56  ;;  %v5477_v19 = vunpack.c.l.bf16 %v5563_v9  ;;  %v555_v20 = vpack.c.bf16 %v491_v7, %v491_v7  ;;  %v495_v21 = vmul.f32 0.125, %v5470_v8  ;;  %v5478_v22 = vunpack.c.h.bf16 %v5563_v9  ;;  %v5572_v8 = vld [vmem:[%s6367_s27 + $0xb0] sm:$0xff]  }
  0x2e   : > { %613 = vst.msk [vmem:[#allocation2 + $0x30] sm:$0xf] %vm600_vm0, %v548_v60  ;;  %v556_v24 = vpack.c.bf16 %v492_v11, %v492_v11  ;;  %v496_v25 = vmul.f32 0.125, %v5473_v12  ;;  %v5481_v26 = vunpack.c.l.bf16 %v5564_v16  ;;  %v557_v27 = vpack.c.bf16 %v493_v14, %v493_v14 }
  0x2f   : > { %614 = vst.msk [vmem:[#allocation2 + $0x34] sm:$0xf] %vm600_vm0, %v549_v63  ;;  %v497_v28 = vmul.f32 0.125, %v5474_v15  ;;  %v5482_v29 = vunpack.c.h.bf16 %v5564_v16  ;;  %v558_v31 = vpack.c.bf16 %v494_v18, %v494_v18  ;;  %v498_v32 = vmul.f32 0.125, %v5477_v19  ;;  %v5573_v15 = vld [vmem:[%s6367_s27 + $0xb8] sm:$0xff]  }
  0x30   : > { %615 = vst.msk [vmem:[#allocation2 + $0x38] sm:$0xf] %vm600_vm0, %v550_v3  ;;  %v5485_v33 = vunpack.c.l.bf16 %v5565_v23  ;;  %v559_v34 = vpack.c.bf16 %v495_v21, %v495_v21  ;;  %v499_v35 = vmul.f32 0.125, %v5478_v22  ;;  %v5486_v36 = vunpack.c.h.bf16 %v5565_v23  ;;  %v5574_v22 = vld [vmem:[%s6367_s27 + $0xc0] sm:$0xff]  }
  0x31   : > { %616 = vst.msk [vmem:[#allocation2 + $0x3c] sm:$0xf] %vm600_vm0, %v551_v6  ;;  %v560_v38 = vpack.c.bf16 %v496_v25, %v496_v25  ;;  %v500_v39 = vmul.f32 0.125, %v5481_v26  ;;  %v5489_v40 = vunpack.c.l.bf16 %v5566_v30  ;;  %v561_v41 = vpack.c.bf16 %v497_v28, %v497_v28 }
  0x32   : > { %617 = vst.msk [vmem:[#allocation2 + $0x40] sm:$0xf] %vm600_vm0, %v552_v10  ;;  %v501_v42 = vmul.f32 0.125, %v5482_v29  ;;  %v5490_v43 = vunpack.c.h.bf16 %v5566_v30  ;;  %v562_v45 = vpack.c.bf16 %v498_v32, %v498_v32  ;;  %v502_v46 = vmul.f32 0.125, %v5485_v33  ;;  %v5575_v29 = vld [vmem:[%s6367_s27 + $0xc8] sm:$0xff]  }
  0x33   : > { %618 = vst.msk [vmem:[#allocation2 + $0x44] sm:$0xf] %vm600_vm0, %v553_v13  ;;  %v5493_v47 = vunpack.c.l.bf16 %v5567_v37  ;;  %v563_v48 = vpack.c.bf16 %v499_v35, %v499_v35  ;;  %v503_v49 = vmul.f32 0.125, %v5486_v36  ;;  %v5494_v50 = vunpack.c.h.bf16 %v5567_v37  ;;  %v5576_v36 = vld [vmem:[%s6367_s27 + $0xd0] sm:$0xff]  }
  0x34   : > { %619 = vst.msk [vmem:[#allocation2 + $0x48] sm:$0xf] %vm600_vm0, %v554_v17  ;;  %v564_v52 = vpack.c.bf16 %v500_v39, %v500_v39  ;;  %v504_v53 = vmul.f32 0.125, %v5489_v40  ;;  %v5497_v54 = vunpack.c.l.bf16 %v5568_v44  ;;  %v565_v55 = vpack.c.bf16 %v501_v42, %v501_v42 }
  0x35   : > { %620 = vst.msk [vmem:[#allocation2 + $0x4c] sm:$0xf] %vm600_vm0, %v555_v20  ;;  %v505_v56 = vmul.f32 0.125, %v5490_v43  ;;  %v5498_v57 = vunpack.c.h.bf16 %v5568_v44  ;;  %v566_v59 = vpack.c.bf16 %v502_v46, %v502_v46  ;;  %v506_v60 = vmul.f32 0.125, %v5493_v47  ;;  %v5577_v43 = vld [vmem:[%s6367_s27 + $0xd8] sm:$0xff]  }
  0x36   : > { %621 = vst.msk [vmem:[#allocation2 + $0x50] sm:$0xf] %vm600_vm0, %v556_v24  ;;  %v5501_v61 = vunpack.c.l.bf16 %v5569_v51  ;;  %v567_v62 = vpack.c.bf16 %v503_v49, %v503_v49  ;;  %v507_v63 = vmul.f32 0.125, %v5494_v50  ;;  %v5502_v0 = vunpack.c.h.bf16 %v5569_v51  ;;  %v5578_v50 = vld [vmem:[%s6367_s27 + $0xe0] sm:$0xff]  }
  0x37   : > { %622 = vst.msk [vmem:[#allocation2 + $0x54] sm:$0xf] %vm600_vm0, %v557_v27  ;;  %v568_v2 = vpack.c.bf16 %v504_v53, %v504_v53  ;;  %v508_v3 = vmul.f32 0.125, %v5497_v54  ;;  %v5505_v4 = vunpack.c.l.bf16 %v5570_v58  ;;  %v569_v5 = vpack.c.bf16 %v505_v56, %v505_v56 }
  0x38   : > { %623 = vst.msk [vmem:[#allocation2 + $0x58] sm:$0xf] %vm600_vm0, %v558_v31  ;;  %v509_v6 = vmul.f32 0.125, %v5498_v57  ;;  %v5506_v7 = vunpack.c.h.bf16 %v5570_v58  ;;  %v570_v9 = vpack.c.bf16 %v506_v60, %v506_v60  ;;  %v510_v10 = vmul.f32 0.125, %v5501_v61  ;;  %v5579_v57 = vld [vmem:[%s6367_s27 + $0xe8] sm:$0xff]  }
  0x39   : > { %624 = vst.msk [vmem:[#allocation2 + $0x5c] sm:$0xf] %vm600_vm0, %v559_v34  ;;  %v5509_v11 = vunpack.c.l.bf16 %v5571_v1  ;;  %v571_v12 = vpack.c.bf16 %v507_v63, %v507_v63  ;;  %v511_v13 = vmul.f32 0.125, %v5502_v0  ;;  %v5510_v14 = vunpack.c.h.bf16 %v5571_v1  ;;  %v5580_v0 = vld [vmem:[%s6367_s27 + $0xf0] sm:$0xff]  }
  0x3a   : > { %625 = vst.msk [vmem:[#allocation2 + $0x60] sm:$0xf] %vm600_vm0, %v560_v38  ;;  %v572_v16 = vpack.c.bf16 %v508_v3, %v508_v3  ;;  %v512_v17 = vmul.f32 0.125, %v5505_v4  ;;  %v5513_v18 = vunpack.c.l.bf16 %v5572_v8  ;;  %v573_v19 = vpack.c.bf16 %v509_v6, %v509_v6 }
  0x3b   : > { %626 = vst.msk [vmem:[#allocation2 + $0x64] sm:$0xf] %vm600_vm0, %v561_v41  ;;  %v513_v20 = vmul.f32 0.125, %v5506_v7  ;;  %v5514_v21 = vunpack.c.h.bf16 %v5572_v8  ;;  %v574_v23 = vpack.c.bf16 %v510_v10, %v510_v10  ;;  %v514_v24 = vmul.f32 0.125, %v5509_v11  ;;  %v5581_v7 = vld [vmem:[%s6367_s27 + $0xf8] sm:$0xff]  }
  0x3c   : > { %627 = vst.msk [vmem:[#allocation2 + $0x68] sm:$0xf] %vm600_vm0, %v562_v45  ;;  %v5517_v25 = vunpack.c.l.bf16 %v5573_v15  ;;  %v575_v26 = vpack.c.bf16 %v511_v13, %v511_v13  ;;  %v515_v27 = vmul.f32 0.125, %v5510_v14  ;;  %v5518_v28 = vunpack.c.h.bf16 %v5573_v15 }
  0x3d   : > { %628 = vst.msk [vmem:[#allocation2 + $0x6c] sm:$0xf] %vm600_vm0, %v563_v48  ;;  %v576_v30 = vpack.c.bf16 %v512_v17, %v512_v17  ;;  %v516_v31 = vmul.f32 0.125, %v5513_v18  ;;  %v5521_v32 = vunpack.c.l.bf16 %v5574_v22  ;;  %v577_v33 = vpack.c.bf16 %v513_v20, %v513_v20 }
  0x3e   : > { %629 = vst.msk [vmem:[#allocation2 + $0x70] sm:$0xf] %vm600_vm0, %v564_v52  ;;  %v517_v34 = vmul.f32 0.125, %v5514_v21  ;;  %v5522_v35 = vunpack.c.h.bf16 %v5574_v22  ;;  %v578_v37 = vpack.c.bf16 %v514_v24, %v514_v24  ;;  %v518_v38 = vmul.f32 0.125, %v5517_v25 }
  0x3f   : > { %630 = vst.msk [vmem:[#allocation2 + $0x74] sm:$0xf] %vm600_vm0, %v565_v55  ;;  %v5525_v39 = vunpack.c.l.bf16 %v5575_v29  ;;  %v579_v40 = vpack.c.bf16 %v515_v27, %v515_v27  ;;  %v519_v41 = vmul.f32 0.125, %v5518_v28  ;;  %v5526_v42 = vunpack.c.h.bf16 %v5575_v29 }
  0x40   : > { %631 = vst.msk [vmem:[#allocation2 + $0x78] sm:$0xf] %vm600_vm0, %v566_v59  ;;  %v580_v44 = vpack.c.bf16 %v516_v31, %v516_v31  ;;  %v520_v45 = vmul.f32 0.125, %v5521_v32  ;;  %v5529_v46 = vunpack.c.l.bf16 %v5576_v36  ;;  %v581_v47 = vpack.c.bf16 %v517_v34, %v517_v34 }
  0x41   : > { %632 = vst.msk [vmem:[#allocation2 + $0x7c] sm:$0xf] %vm600_vm0, %v567_v62  ;;  %v521_v48 = vmul.f32 0.125, %v5522_v35  ;;  %v5530_v49 = vunpack.c.h.bf16 %v5576_v36  ;;  %v582_v51 = vpack.c.bf16 %v518_v38, %v518_v38  ;;  %v522_v52 = vmul.f32 0.125, %v5525_v39 }
  0x42   : > { %633 = vst.msk [vmem:[#allocation2 + $0x80] sm:$0xf] %vm600_vm0, %v568_v2  ;;  %v5533_v53 = vunpack.c.l.bf16 %v5577_v43  ;;  %v583_v54 = vpack.c.bf16 %v519_v41, %v519_v41  ;;  %v523_v55 = vmul.f32 0.125, %v5526_v42  ;;  %v5534_v56 = vunpack.c.h.bf16 %v5577_v43 }
  0x43   : > { %634 = vst.msk [vmem:[#allocation2 + $0x84] sm:$0xf] %vm600_vm0, %v569_v5  ;;  %v584_v58 = vpack.c.bf16 %v520_v45, %v520_v45  ;;  %v524_v59 = vmul.f32 0.125, %v5529_v46  ;;  %v5537_v60 = vunpack.c.l.bf16 %v5578_v50  ;;  %v585_v61 = vpack.c.bf16 %v521_v48, %v521_v48 }
  0x44   : > { %635 = vst.msk [vmem:[#allocation2 + $0x88] sm:$0xf] %vm600_vm0, %v570_v9  ;;  %v525_v62 = vmul.f32 0.125, %v5530_v49  ;;  %v5538_v63 = vunpack.c.h.bf16 %v5578_v50  ;;  %v586_v1 = vpack.c.bf16 %v522_v52, %v522_v52  ;;  %v526_v2 = vmul.f32 0.125, %v5533_v53 }
  0x45   : > { %636 = vst.msk [vmem:[#allocation2 + $0x8c] sm:$0xf] %vm600_vm0, %v571_v12  ;;  %v5541_v3 = vunpack.c.l.bf16 %v5579_v57  ;;  %v587_v4 = vpack.c.bf16 %v523_v55, %v523_v55  ;;  %v527_v5 = vmul.f32 0.125, %v5534_v56  ;;  %v5542_v6 = vunpack.c.h.bf16 %v5579_v57 }
  0x46   : > { %637 = vst.msk [vmem:[#allocation2 + $0x90] sm:$0xf] %vm600_vm0, %v572_v16  ;;  %v588_v8 = vpack.c.bf16 %v524_v59, %v524_v59  ;;  %v528_v9 = vmul.f32 0.125, %v5537_v60  ;;  %v5545_v10 = vunpack.c.l.bf16 %v5580_v0  ;;  %v589_v11 = vpack.c.bf16 %v525_v62, %v525_v62 }
  0x47   : > { %638 = vst.msk [vmem:[#allocation2 + $0x94] sm:$0xf] %vm600_vm0, %v573_v19  ;;  %v529_v12 = vmul.f32 0.125, %v5538_v63  ;;  %v5546_v13 = vunpack.c.h.bf16 %v5580_v0  ;;  %v590_v14 = vpack.c.bf16 %v526_v2, %v526_v2  ;;  %v530_v15 = vmul.f32 0.125, %v5541_v3 }
  0x48   : > { %639 = vst.msk [vmem:[#allocation2 + $0x98] sm:$0xf] %vm600_vm0, %v574_v23  ;;  %v5549_v16 = vunpack.c.l.bf16 %v5581_v7  ;;  %v591_v17 = vpack.c.bf16 %v527_v5, %v527_v5  ;;  %v531_v18 = vmul.f32 0.125, %v5542_v6  ;;  %v5550_v19 = vunpack.c.h.bf16 %v5581_v7 }
  0x49   : > { %640 = vst.msk [vmem:[#allocation2 + $0x9c] sm:$0xf] %vm600_vm0, %v575_v26  ;;  %v592_v20 = vpack.c.bf16 %v528_v9, %v528_v9  ;;  %v532_v21 = vmul.f32 0.125, %v5545_v10  ;;  %v593_v22 = vpack.c.bf16 %v529_v12, %v529_v12  ;;  %v533_v23 = vmul.f32 0.125, %v5546_v13 }
  0x4a   : > { %641 = vst.msk [vmem:[#allocation2 + $0xa0] sm:$0xf] %vm600_vm0, %v576_v30  ;;  %v594_v24 = vpack.c.bf16 %v530_v15, %v530_v15  ;;  %v534_v25 = vmul.f32 0.125, %v5549_v16  ;;  %v595_v26 = vpack.c.bf16 %v531_v18, %v531_v18  ;;  %v535_v27 = vmul.f32 0.125, %v5550_v19 }
  0x4b   : > { %642 = vst.msk [vmem:[#allocation2 + $0xa4] sm:$0xf] %vm600_vm0, %v577_v33  ;;  %v596_v28 = vpack.c.bf16 %v532_v21, %v532_v21  ;;  %v597_v29 = vpack.c.bf16 %v533_v23, %v533_v23  ;;  %v6304_v32 = vmov -inf   ;;  %v6305_v33 = vmov 0.0  }
  0x4c   : > { %643 = vst.msk [vmem:[#allocation2 + $0xa8] sm:$0xf] %vm600_vm0, %v578_v37  ;;  %v598_v30 = vpack.c.bf16 %v534_v25, %v534_v25  ;;  %v599_v31 = vpack.c.bf16 %v535_v27, %v535_v27 }
  0x4d   : > { %644 = vst.msk [vmem:[#allocation2 + $0xac] sm:$0xf] %vm600_vm0, %v579_v40 }
  0x4e   : > { %645 = vst.msk [vmem:[#allocation2 + $0xb0] sm:$0xf] %vm600_vm0, %v580_v44 }
  0x4f   : > { %646 = vst.msk [vmem:[#allocation2 + $0xb4] sm:$0xf] %vm600_vm0, %v581_v47 }
  0x50   : > { %647 = vst.msk [vmem:[#allocation2 + $0xb8] sm:$0xf] %vm600_vm0, %v582_v51 }
  0x51   : > { %648 = vst.msk [vmem:[#allocation2 + $0xbc] sm:$0xf] %vm600_vm0, %v583_v54 }
  0x52   : > { %649 = vst.msk [vmem:[#allocation2 + $0xc0] sm:$0xf] %vm600_vm0, %v584_v58 }
  0x53   : > { %650 = vst.msk [vmem:[#allocation2 + $0xc4] sm:$0xf] %vm600_vm0, %v585_v61 }
  0x54   : > { %651 = vst.msk [vmem:[#allocation2 + $0xc8] sm:$0xf] %vm600_vm0, %v586_v1 }
  0x55   : > { %652 = vst.msk [vmem:[#allocation2 + $0xcc] sm:$0xf] %vm600_vm0, %v587_v4 }
  0x56   : > { %653 = vst.msk [vmem:[#allocation2 + $0xd0] sm:$0xf] %vm600_vm0, %v588_v8 }
  0x57   : > { %654 = vst.msk [vmem:[#allocation2 + $0xd4] sm:$0xf] %vm600_vm0, %v589_v11 }
  0x58   : > { %655 = vst.msk [vmem:[#allocation2 + $0xd8] sm:$0xf] %vm600_vm0, %v590_v14 }
  0x59   : > { %656 = vst.msk [vmem:[#allocation2 + $0xdc] sm:$0xf] %vm600_vm0, %v591_v17 }
  0x5a   : > { %657 = vst.msk [vmem:[#allocation2 + $0xe0] sm:$0xf] %vm600_vm0, %v592_v20 }
  0x5b   : > { %658 = vst.msk [vmem:[#allocation2 + $0xe4] sm:$0xf] %vm600_vm0, %v593_v22 }
  0x5c   : > { %659 = vst.msk [vmem:[#allocation2 + $0xe8] sm:$0xf] %vm600_vm0, %v594_v24 }
  0x5d   : > { %660 = vst.msk [vmem:[#allocation2 + $0xec] sm:$0xf] %vm600_vm0, %v595_v26 }
  0x5e   : > { %661 = vst.msk [vmem:[#allocation2 + $0xf0] sm:$0xf] %vm600_vm0, %v596_v28 }
  0x5f   : > { %662 = vst.msk [vmem:[#allocation2 + $0xf4] sm:$0xf] %vm600_vm0, %v597_v29 }
  0x60   : > { %663 = vst.msk [vmem:[#allocation2 + $0xf8] sm:$0xf] %vm600_vm0, %v598_v30 }
  0x61   : > { %664 = vst.msk [vmem:[#allocation2 + $0xfc] sm:$0xf] %vm600_vm0, %v599_v31 }
  0x62   : > { %665 = vst [vmem:[#allocation3 + $0xb0] sm:$0xff] %v6304_v32 }
  0x63   : > { %666 = vst [vmem:[#allocation3 + $0x1b0] sm:$0xff] %v6304_v32 }
  0x64   : > { %667 = vst [vmem:[#allocation3 + $0xd8] sm:$0xff] %v6304_v32 }
  0x65   : > { %668 = vst [vmem:[#allocation3 + $0x18] sm:$0xff] %v6304_v32 }
  0x66   : > { %669 = vst [vmem:[#allocation3 + $0x50] sm:$0xff] %v6304_v32 }
  0x67   : > { %670 = vst [vmem:[#allocation3 + $0x168] sm:$0xff] %v6304_v32 }
  0x68   : > { %671 = vst [vmem:[#allocation3 + $0x130] sm:$0xff] %v6304_v32 }
  0x69   : > { %672 = vst [vmem:[#allocation3 + $0x48] sm:$0xff] %v6304_v32 }
  0x6a   : > { %673 = vst [vmem:[#allocation3 + $0x180] sm:$0xff] %v6304_v32 }
  0x6b   : > { %674 = vst [vmem:[#allocation3 + $0x110] sm:$0xff] %v6304_v32 }
  0x6c   : > { %675 = vst [vmem:[#allocation3 + $0x118] sm:$0xff] %v6304_v32 }
  0x6d   : > { %676 = vst [vmem:[#allocation3 + $0x98] sm:$0xff] %v6304_v32 }
  0x6e   : > { %677 = vst [vmem:[#allocation3 + $0x120] sm:$0xff] %v6304_v32 }
  0x6f   : > { %678 = vst [vmem:[#allocation3 + $0x150] sm:$0xff] %v6304_v32 }
  0x70   : > { %679 = vst [vmem:[#allocation3 + $0x108] sm:$0xff] %v6304_v32 }
  0x71   : > { %680 = vst [vmem:[#allocation3 + $0x60] sm:$0xff] %v6304_v32 }
  0x72   : > { %681 = vst [vmem:[#allocation3 + $0xe0] sm:$0xff] %v6304_v32 }
  0x73   : > { %682 = vst [vmem:[#allocation3 + $0x188] sm:$0xff] %v6304_v32 }
  0x74   : > { %683 = vst [vmem:[#allocation3 + $0x138] sm:$0xff] %v6304_v32 }
  0x75   : > { %684 = vst [vmem:[#allocation3 + $0x140] sm:$0xff] %v6304_v32 }
  0x76   : > { %685 = vst [vmem:[#allocation3 + $0x80] sm:$0xff] %v6304_v32 }
  0x77   : > { %686 = vst [vmem:[#allocation3 + $0x1a8] sm:$0xff] %v6304_v32 }
  0x78   : > { %687 = vst [vmem:[#allocation3 + $0x1b8] sm:$0xff] %v6304_v32 }
  0x79   : > { %688 = vst [vmem:[#allocation3 + $0x28] sm:$0xff] %v6304_v32 }
  0x7a   : > { %689 = vst [vmem:[#allocation3 + $0x1e8] sm:$0xff] %v6304_v32 }
  0x7b   : > { %690 = vst [vmem:[#allocation3 + $0xf8] sm:$0xff] %v6304_v32 }
  0x7c   : > { %691 = vst [vmem:[#allocation3 + $0x160] sm:$0xff] %v6304_v32 }
  0x7d   : > { %692 = vst [vmem:[#allocation3 + $0x30] sm:$0xff] %v6304_v32 }
  0x7e   : > { %693 = vst [vmem:[#allocation3 + $0x1e0] sm:$0xff] %v6304_v32 }
  0x7f   : > { %694 = vst [vmem:[#allocation3] sm:$0xff] %v6304_v32 }
  0x80   : > { %695 = vst [vmem:[#allocation3 + $0xf0] sm:$0xff] %v6304_v32 }
  0x81   : > { %696 = vst [vmem:[#allocation3 + $0x8] sm:$0xff] %v6304_v32 }
  0x82   : > { %697 = vst [vmem:[#allocation3 + $0x148] sm:$0xff] %v6304_v32 }
  0x83   : > { %698 = vst [vmem:[#allocation3 + $0x1d0] sm:$0xff] %v6304_v32 }
  0x84   : > { %699 = vst [vmem:[#allocation3 + $0x100] sm:$0xff] %v6304_v32 }
  0x85   : > { %700 = vst [vmem:[#allocation3 + $0xc8] sm:$0xff] %v6304_v32 }
  0x86   : > { %701 = vst [vmem:[#allocation3 + $0x40] sm:$0xff] %v6304_v32 }
  0x87   : > { %702 = vst [vmem:[#allocation3 + $0x1f8] sm:$0xff] %v6304_v32 }
  0x88   : > { %703 = vst [vmem:[#allocation3 + $0x20] sm:$0xff] %v6304_v32 }
  0x89   : > { %704 = vst [vmem:[#allocation3 + $0x128] sm:$0xff] %v6304_v32 }
  0x8a   : > { %705 = vst [vmem:[#allocation3 + $0x1a0] sm:$0xff] %v6304_v32 }
  0x8b   : > { %706 = vst [vmem:[#allocation3 + $0x1f0] sm:$0xff] %v6304_v32 }
  0x8c   : > { %707 = vst [vmem:[#allocation3 + $0xe8] sm:$0xff] %v6304_v32 }
  0x8d   : > { %708 = vst [vmem:[#allocation3 + $0x78] sm:$0xff] %v6304_v32 }
  0x8e   : > { %709 = vst [vmem:[#allocation3 + $0x70] sm:$0xff] %v6304_v32 }
  0x8f   : > { %710 = vst [vmem:[#allocation3 + $0x90] sm:$0xff] %v6304_v32 }
  0x90   : > { %711 = vst [vmem:[#allocation3 + $0x1d8] sm:$0xff] %v6304_v32 }
  0x91   : > { %712 = vst [vmem:[#allocation3 + $0xd0] sm:$0xff] %v6304_v32 }
  0x92   : > { %713 = vst [vmem:[#allocation3 + $0xb8] sm:$0xff] %v6304_v32 }
  0x93   : > { %714 = vst [vmem:[#allocation3 + $0x88] sm:$0xff] %v6304_v32 }
  0x94   : > { %715 = vst [vmem:[#allocation3 + $0xa8] sm:$0xff] %v6304_v32 }
  0x95   : > { %716 = vst [vmem:[#allocation3 + $0x1c8] sm:$0xff] %v6304_v32 }
  0x96   : > { %717 = vst [vmem:[#allocation3 + $0x170] sm:$0xff] %v6304_v32 }
  0x97   : > { %718 = vst [vmem:[#allocation3 + $0x178] sm:$0xff] %v6304_v32 }
  0x98   : > { %719 = vst [vmem:[#allocation3 + $0x68] sm:$0xff] %v6304_v32 }
  0x99   : > { %720 = vst [vmem:[#allocation3 + $0x190] sm:$0xff] %v6304_v32 }
  0x9a   : > { %721 = vst [vmem:[#allocation3 + $0x198] sm:$0xff] %v6304_v32 }
  0x9b   : > { %722 = vst [vmem:[#allocation3 + $0x38] sm:$0xff] %v6304_v32 }
  0x9c   : > { %723 = vst [vmem:[#allocation3 + $0xc0] sm:$0xff] %v6304_v32 }
  0x9d   : > { %724 = vst [vmem:[#allocation3 + $0x1c0] sm:$0xff] %v6304_v32 }
  0x9e   : > { %725 = vst [vmem:[#allocation3 + $0x158] sm:$0xff] %v6304_v32 }
  0x9f   : > { %726 = vst [vmem:[#allocation3 + $0x10] sm:$0xff] %v6304_v32 }
  0xa0   : > { %727 = vst [vmem:[#allocation3 + $0x58] sm:$0xff] %v6304_v32 }
  0xa1   : > { %728 = vst [vmem:[#allocation3 + $0xa0] sm:$0xff] %v6304_v32 }
  0xa2   : > { %729 = vst [vmem:[#allocation4 + $0x68] sm:$0xff] %v6305_v33 }
  0xa3   : > { %730 = vst [vmem:[#allocation4 + $0x150] sm:$0xff] %v6305_v33 }
  0xa4   : > { %731 = vst [vmem:[#allocation4 + $0x70] sm:$0xff] %v6305_v33 }
  0xa5   : > { %732 = vst [vmem:[#allocation4 + $0x160] sm:$0xff] %v6305_v33 }
  0xa6   : > { %733 = vst [vmem:[#allocation4 + $0xd0] sm:$0xff] %v6305_v33 }
  0xa7   : > { %734 = vst [vmem:[#allocation4 + $0xd8] sm:$0xff] %v6305_v33 }
  0xa8   : > { %735 = vst [vmem:[#allocation4 + $0x1e0] sm:$0xff] %v6305_v33 }
  0xa9   : > { %736 = vst [vmem:[#allocation4 + $0x30] sm:$0xff] %v6305_v33 }
  0xaa   : > { %737 = vst [vmem:[#allocation4 + $0x148] sm:$0xff] %v6305_v33 }
  0xab   : > { %738 = vst [vmem:[#allocation4 + $0x50] sm:$0xff] %v6305_v33 }
  0xac   : > { %739 = vst [vmem:[#allocation4 + $0x1f0] sm:$0xff] %v6305_v33 }
  0xad   : > { %740 = vst [vmem:[#allocation4 + $0x130] sm:$0xff] %v6305_v33 }
  0xae   : > { %741 = vst [vmem:[#allocation4 + $0x190] sm:$0xff] %v6305_v33 }
  0xaf   : > { %742 = vst [vmem:[#allocation4 + $0x8] sm:$0xff] %v6305_v33 }
  0xb0   : > { %743 = vst [vmem:[#allocation4 + $0x88] sm:$0xff] %v6305_v33 }
  0xb1   : > { %744 = vst [vmem:[#allocation4 + $0x38] sm:$0xff] %v6305_v33 }
  0xb2   : > { %745 = vst [vmem:[#allocation4 + $0xe0] sm:$0xff] %v6305_v33 }
  0xb3   : > { %746 = vst [vmem:[#allocation4 + $0x10] sm:$0xff] %v6305_v33 }
  0xb4   : > { %747 = vst [vmem:[#allocation4 + $0x1a8] sm:$0xff] %v6305_v33 }
  0xb5   : > { %748 = vst [vmem:[#allocation4 + $0xa0] sm:$0xff] %v6305_v33 }
  0xb6   : > { %749 = vst [vmem:[#allocation4 + $0x1c0] sm:$0xff] %v6305_v33 }
  0xb7   : > { %750 = vst [vmem:[#allocation4 + $0x78] sm:$0xff] %v6305_v33 }
  0xb8   : > { %751 = vst [vmem:[#allocation4 + $0x108] sm:$0xff] %v6305_v33 }
  0xb9   : > { %752 = vst [vmem:[#allocation4 + $0x80] sm:$0xff] %v6305_v33 }
  0xba   : > { %753 = vst [vmem:[#allocation4 + $0x58] sm:$0xff] %v6305_v33 }
  0xbb   : > { %754 = vst [vmem:[#allocation4 + $0x48] sm:$0xff] %v6305_v33 }
  0xbc   : > { %755 = vst [vmem:[#allocation4 + $0x40] sm:$0xff] %v6305_v33 }
  0xbd   : > { %756 = vst [vmem:[#allocation4 + $0x1a0] sm:$0xff] %v6305_v33 }
  0xbe   : > { %757 = vst [vmem:[#allocation4 + $0x198] sm:$0xff] %v6305_v33 }
  0xbf   : > { %758 = vst [vmem:[#allocation4 + $0xe8] sm:$0xff] %v6305_v33 }
  0xc0   : > { %759 = vst [vmem:[#allocation4 + $0x168] sm:$0xff] %v6305_v33 }
  0xc1   : > { %760 = vst [vmem:[#allocation4 + $0x158] sm:$0xff] %v6305_v33 }
  0xc2   : > { %761 = vst [vmem:[#allocation4 + $0x1d8] sm:$0xff] %v6305_v33 }
  0xc3   : > { %762 = vst [vmem:[#allocation4 + $0x28] sm:$0xff] %v6305_v33 }
  0xc4   : > { %763 = vst [vmem:[#allocation4] sm:$0xff] %v6305_v33 }
  0xc5   : > { %764 = vst [vmem:[#allocation4 + $0x1c8] sm:$0xff] %v6305_v33 }
  0xc6   : > { %765 = vst [vmem:[#allocation4 + $0x1e8] sm:$0xff] %v6305_v33 }
  0xc7   : > { %766 = vst [vmem:[#allocation4 + $0x140] sm:$0xff] %v6305_v33 }
  0xc8   : > { %767 = vst [vmem:[#allocation4 + $0x60] sm:$0xff] %v6305_v33 }
  0xc9   : > { %768 = vst [vmem:[#allocation4 + $0x98] sm:$0xff] %v6305_v33 }
  0xca   : > { %769 = vst [vmem:[#allocation4 + $0x1b8] sm:$0xff] %v6305_v33 }
  0xcb   : > { %770 = vst [vmem:[#allocation4 + $0x100] sm:$0xff] %v6305_v33 }
  0xcc   : > { %771 = vst [vmem:[#allocation4 + $0xc8] sm:$0xff] %v6305_v33 }
  0xcd   : > { %772 = vst [vmem:[#allocation4 + $0xf8] sm:$0xff] %v6305_v33 }
  0xce   : > { %773 = vst [vmem:[#allocation4 + $0x178] sm:$0xff] %v6305_v33 }
  0xcf   : > { %774 = vst [vmem:[#allocation4 + $0x180] sm:$0xff] %v6305_v33 }
  0xd0   : > { %775 = vst [vmem:[#allocation4 + $0xb0] sm:$0xff] %v6305_v33 }
  0xd1   : > { %776 = vst [vmem:[#allocation4 + $0x110] sm:$0xff] %v6305_v33 }
  0xd2   : > { %777 = vst [vmem:[#allocation4 + $0x20] sm:$0xff] %v6305_v33 }
  0xd3   : > { %778 = vst [vmem:[#allocation4 + $0xb8] sm:$0xff] %v6305_v33 }
  0xd4   : > { %779 = vst [vmem:[#allocation4 + $0x120] sm:$0xff] %v6305_v33 }
  0xd5   : > { %780 = vst [vmem:[#allocation4 + $0x90] sm:$0xff] %v6305_v33 }
  0xd6   : > { %781 = vst [vmem:[#allocation4 + $0xa8] sm:$0xff] %v6305_v33 }
  0xd7   : > { %782 = vst [vmem:[#allocation4 + $0xc0] sm:$0xff] %v6305_v33 }
  0xd8   : > { %783 = vst [vmem:[#allocation4 + $0x138] sm:$0xff] %v6305_v33 }
  0xd9   : > { %784 = vst [vmem:[#allocation4 + $0x188] sm:$0xff] %v6305_v33 }
  0xda   : > { %785 = vst [vmem:[#allocation4 + $0x1b0] sm:$0xff] %v6305_v33 }
  0xdb   : > { %786 = vst [vmem:[#allocation4 + $0x18] sm:$0xff] %v6305_v33 }
  0xdc   : > { %787 = vst [vmem:[#allocation4 + $0xf0] sm:$0xff] %v6305_v33 }
  0xdd   : > { %788 = vst [vmem:[#allocation4 + $0x128] sm:$0xff] %v6305_v33 }
  0xde   : > { %789 = vst [vmem:[#allocation4 + $0x1f8] sm:$0xff] %v6305_v33 }
  0xdf   : > { %790 = vst [vmem:[#allocation4 + $0x170] sm:$0xff] %v6305_v33 }
  0xe0   : > { %791 = vst [vmem:[#allocation4 + $0x1d0] sm:$0xff] %v6305_v33 }
  0xe1   : > { %792 = vst [vmem:[#allocation4 + $0x118] sm:$0xff] %v6305_v33 }
  0xe2   : > { %794 = vst.msk [vmem:[#allocation5] sm:$0xff] %vm793_vm1, %v6305_v33 }
  0xe3   : > { %795 = vst.msk [vmem:[#allocation5 + $0x8] sm:$0xff] %vm793_vm1, %v6305_v33 }
  0xe4   : > { %796 = vst.msk [vmem:[#allocation5 + $0x10] sm:$0xff] %vm793_vm1, %v6305_v33 }
  0xe5   : > { %797 = vst.msk [vmem:[#allocation5 + $0x18] sm:$0xff] %vm793_vm1, %v6305_v33 }
  0xe6   : > { %798 = vst.msk [vmem:[#allocation5 + $0x20] sm:$0xff] %vm793_vm1, %v6305_v33 }
  0xe7   : > { %799 = vst.msk [vmem:[#allocation5 + $0x28] sm:$0xff] %vm793_vm1, %v6305_v33 }
  0xe8   : > { %800 = vst.msk [vmem:[#allocation5 + $0x30] sm:$0xff] %vm793_vm1, %v6305_v33 }
  0xe9   : > { %801 = vst.msk [vmem:[#allocation5 + $0x38] sm:$0xff] %vm793_vm1, %v6305_v33 }
  0xea   : > { %802 = vst.msk [vmem:[#allocation5 + $0x40] sm:$0xff] %vm793_vm1, %v6305_v33 }
  0xeb   : > { %803 = vst.msk [vmem:[#allocation5 + $0x48] sm:$0xff] %vm793_vm1, %v6305_v33 }
  0xec   : > { %804 = vst.msk [vmem:[#allocation5 + $0x50] sm:$0xff] %vm793_vm1, %v6305_v33 }
  0xed   : > { %805 = vst.msk [vmem:[#allocation5 + $0x58] sm:$0xff] %vm793_vm1, %v6305_v33 }
  0xee   : > { %806 = vst.msk [vmem:[#allocation5 + $0x60] sm:$0xff] %vm793_vm1, %v6305_v33 }
  0xef   : > { %807 = vst.msk [vmem:[#allocation5 + $0x68] sm:$0xff] %vm793_vm1, %v6305_v33 }
  0xf0   : > { %808 = vst.msk [vmem:[#allocation5 + $0x70] sm:$0xff] %vm793_vm1, %v6305_v33 }
  0xf1   : > { %809 = vst.msk [vmem:[#allocation5 + $0x78] sm:$0xff] %vm793_vm1, %v6305_v33 }
  0xf2   : > { %810 = vst.msk [vmem:[#allocation5 + $0x80] sm:$0xff] %vm793_vm1, %v6305_v33 }
  0xf3   : > { %811 = vst.msk [vmem:[#allocation5 + $0x88] sm:$0xff] %vm793_vm1, %v6305_v33 }
  0xf4   : > { %812 = vst.msk [vmem:[#allocation5 + $0x90] sm:$0xff] %vm793_vm1, %v6305_v33 }
  0xf5   : > { %813 = vst.msk [vmem:[#allocation5 + $0x98] sm:$0xff] %vm793_vm1, %v6305_v33 }
  0xf6   : > { %814 = vst.msk [vmem:[#allocation5 + $0xa0] sm:$0xff] %vm793_vm1, %v6305_v33 }
  0xf7   : > { %815 = vst.msk [vmem:[#allocation5 + $0xa8] sm:$0xff] %vm793_vm1, %v6305_v33 }
  0xf8   : > { %816 = vst.msk [vmem:[#allocation5 + $0xb0] sm:$0xff] %vm793_vm1, %v6305_v33 }
  0xf9   : > { %817 = vst.msk [vmem:[#allocation5 + $0xb8] sm:$0xff] %vm793_vm1, %v6305_v33 }
  0xfa   : > { %818 = vst.msk [vmem:[#allocation5 + $0xc0] sm:$0xff] %vm793_vm1, %v6305_v33 }
  0xfb   : > { %819 = vst.msk [vmem:[#allocation5 + $0xc8] sm:$0xff] %vm793_vm1, %v6305_v33 }
  0xfc   : > { %820 = vst.msk [vmem:[#allocation5 + $0xd0] sm:$0xff] %vm793_vm1, %v6305_v33 }
  0xfd   : > { %821 = vst.msk [vmem:[#allocation5 + $0xd8] sm:$0xff] %vm793_vm1, %v6305_v33 }
  0xfe   : > { %822 = vst.msk [vmem:[#allocation5 + $0xe0] sm:$0xff] %vm793_vm1, %v6305_v33 }
  0xff   : > { %823 = vst.msk [vmem:[#allocation5 + $0xe8] sm:$0xff] %vm793_vm1, %v6305_v33 }
 0x100   : > { %824 = vst.msk [vmem:[#allocation5 + $0xf0] sm:$0xff] %vm793_vm1, %v6305_v33 }
 0x101   : > { %825 = vst.msk [vmem:[#allocation5 + $0xf8] sm:$0xff] %vm793_vm1, %v6305_v33 }
 0x102   : > { %826 = vst.msk [vmem:[#allocation5 + $0x100] sm:$0xff] %vm793_vm1, %v6305_v33 }
 0x103   : > { %827 = vst.msk [vmem:[#allocation5 + $0x108] sm:$0xff] %vm793_vm1, %v6305_v33 }
 0x104   : > { %828 = vst.msk [vmem:[#allocation5 + $0x110] sm:$0xff] %vm793_vm1, %v6305_v33 }
 0x105   : > { %829 = vst.msk [vmem:[#allocation5 + $0x118] sm:$0xff] %vm793_vm1, %v6305_v33 }
 0x106   : > { %830 = vst.msk [vmem:[#allocation5 + $0x120] sm:$0xff] %vm793_vm1, %v6305_v33 }
 0x107   : > { %831 = vst.msk [vmem:[#allocation5 + $0x128] sm:$0xff] %vm793_vm1, %v6305_v33 }
 0x108   : > { %832 = vst.msk [vmem:[#allocation5 + $0x130] sm:$0xff] %vm793_vm1, %v6305_v33 }
 0x109   : > { %833 = vst.msk [vmem:[#allocation5 + $0x138] sm:$0xff] %vm793_vm1, %v6305_v33 }
 0x10a   : > { %834 = vst.msk [vmem:[#allocation5 + $0x140] sm:$0xff] %vm793_vm1, %v6305_v33 }
 0x10b   : > { %835 = vst.msk [vmem:[#allocation5 + $0x148] sm:$0xff] %vm793_vm1, %v6305_v33 }
 0x10c   : > { %836 = vst.msk [vmem:[#allocation5 + $0x150] sm:$0xff] %vm793_vm1, %v6305_v33 }
 0x10d   : > { %837 = vst.msk [vmem:[#allocation5 + $0x158] sm:$0xff] %vm793_vm1, %v6305_v33 }
 0x10e   : > { %838 = vst.msk [vmem:[#allocation5 + $0x160] sm:$0xff] %vm793_vm1, %v6305_v33 }
 0x10f   : > { %839 = vst.msk [vmem:[#allocation5 + $0x168] sm:$0xff] %vm793_vm1, %v6305_v33 }
 0x110   : > { %840 = vst.msk [vmem:[#allocation5 + $0x170] sm:$0xff] %vm793_vm1, %v6305_v33 }
 0x111   : > { %841 = vst.msk [vmem:[#allocation5 + $0x178] sm:$0xff] %vm793_vm1, %v6305_v33 }
 0x112   : > { %842 = vst.msk [vmem:[#allocation5 + $0x180] sm:$0xff] %vm793_vm1, %v6305_v33 }
 0x113   : > { %843 = vst.msk [vmem:[#allocation5 + $0x188] sm:$0xff] %vm793_vm1, %v6305_v33 }
 0x114   : > { %844 = vst.msk [vmem:[#allocation5 + $0x190] sm:$0xff] %vm793_vm1, %v6305_v33 }
 0x115   : > { %845 = vst.msk [vmem:[#allocation5 + $0x198] sm:$0xff] %vm793_vm1, %v6305_v33 }
 0x116   : > { %846 = vst.msk [vmem:[#allocation5 + $0x1a0] sm:$0xff] %vm793_vm1, %v6305_v33 }
 0x117   : > { %847 = vst.msk [vmem:[#allocation5 + $0x1a8] sm:$0xff] %vm793_vm1, %v6305_v33 }
 0x118   : > { %848 = vst.msk [vmem:[#allocation5 + $0x1b0] sm:$0xff] %vm793_vm1, %v6305_v33 }
 0x119   : > { %849 = vst.msk [vmem:[#allocation5 + $0x1b8] sm:$0xff] %vm793_vm1, %v6305_v33 }
 0x11a   : > { %850 = vst.msk [vmem:[#allocation5 + $0x1c0] sm:$0xff] %vm793_vm1, %v6305_v33 }
 0x11b   : > { %851 = vst.msk [vmem:[#allocation5 + $0x1c8] sm:$0xff] %vm793_vm1, %v6305_v33 }
 0x11c   : > { %852 = vst.msk [vmem:[#allocation5 + $0x1d0] sm:$0xff] %vm793_vm1, %v6305_v33 }
 0x11d   : > { %853 = vst.msk [vmem:[#allocation5 + $0x1d8] sm:$0xff] %vm793_vm1, %v6305_v33 }
 0x11e   : > { %854 = vst.msk [vmem:[#allocation5 + $0x1e0] sm:$0xff] %vm793_vm1, %v6305_v33 }
 0x11f   : > { %855 = vst.msk [vmem:[#allocation5 + $0x1e8] sm:$0xff] %vm793_vm1, %v6305_v33 }
 0x120   : > { %856 = vst.msk [vmem:[#allocation5 + $0x1f0] sm:$0xff] %vm793_vm1, %v6305_v33 }
 0x121   : > { %857 = vst.msk [vmem:[#allocation5 + $0x1f8] sm:$0xff] %vm793_vm1, %v6305_v33 }
 0x122 PF: > { %v5398_v34 = vld [vmem:[%s6372_s7 + $0x38] sm:$0xff]  ;;  %vm1194_vm2 = vcmask 523264   ;;  %v5397_v38 = vld [vmem:[%s6372_s7 + $0x30] sm:$0xff]  ;;  %v5396_v42 = vld [vmem:[%s6372_s7 + $0x28] sm:$0xff]  ;;  %p5353_p8 = scmp.ne.s32.totalorder %s6286_s15, 1 }
 0x123   : > { %v5406_v35 = vld [vmem:[%s6372_s7 + $0x78] sm:$0xff]  ;;  %v1313_v36 = vsel %vm1194_vm2, %v5398_v34, 0  ;;  %v5405_v39 = vld [vmem:[%s6372_s7 + $0x70] sm:$0xff]  ;;  %v1310_v40 = vsel %vm1194_vm2, %v5397_v38, 0  ;;  %v5404_v43 = vld [vmem:[%s6372_s7 + $0x68] sm:$0xff]  ;;  %v1307_v44 = vsel %vm1194_vm2, %v5396_v42, 0 }
 0x124   : > { %v1337_v37 = vsel %vm1194_vm2, %v5406_v35, 0  ;;  %1339 = vmatpush.bf16.xpose.msra.mxu0 %v1313_v36  ;;  %v1334_v41 = vsel %vm1194_vm2, %v5405_v39, 0  ;;  %v1331_v45 = vsel %vm1194_vm2, %v5404_v43, 0  ;;  %v5395_v46 = vld [vmem:[%s6372_s7 + $0x20] sm:$0xff]  ;;  %v5394_v50 = vld [vmem:[%s6372_s7 + $0x18] sm:$0xff]  ;;  %v5393_v54 = vld [vmem:[%s6372_s7 + $0x10] sm:$0xff] }
 0x125   : > { %1508 = vmatpush.bf16.xpose.msra.mxu1 %v1337_v37  ;;  %v5403_v47 = vld [vmem:[%s6372_s7 + $0x60] sm:$0xff]  ;;  %v1304_v48 = vsel %vm1194_vm2, %v5395_v46, 0  ;;  %v5402_v51 = vld [vmem:[%s6372_s7 + $0x58] sm:$0xff]  ;;  %v1301_v52 = vsel %vm1194_vm2, %v5394_v50, 0  ;;  %v5401_v55 = vld [vmem:[%s6372_s7 + $0x50] sm:$0xff]  ;;  %v1298_v56 = vsel %vm1194_vm2, %v5393_v54, 0 }
 0x126   : > { %v1328_v49 = vsel %vm1194_vm2, %v5403_v47, 0  ;;  %v1325_v53 = vsel %vm1194_vm2, %v5402_v51, 0  ;;  %v1322_v57 = vsel %vm1194_vm2, %v5401_v55, 0  ;;  %v5392_v58 = vld [vmem:[%s6372_s7 + $0x8] sm:$0xff]  ;;  %v5391_v62 = vld [vmem:[%s6372_s7] sm:$0xff]  ;;  %v5361_v4 = vld [vmem:[#allocation2 + $0x10] sm:$0xff] }
 0x127   : > { %v5400_v59 = vld [vmem:[%s6372_s7 + $0x48] sm:$0xff]  ;;  %v1295_v60 = vsel %vm1194_vm2, %v5392_v58, 0  ;;  %v5399_v63 = vld [vmem:[%s6372_s7 + $0x40] sm:$0xff]  ;;  %v1292_v0 = vsel %vm1194_vm2, %v5391_v62, 0  ;;  %v5362_v5 = vld [vmem:[#allocation2 + $0x18] sm:$0xff] }
 0x128   : > { %v1319_v61 = vsel %vm1194_vm2, %v5400_v59, 0  ;;  %v1316_v1 = vsel %vm1194_vm2, %v5399_v63, 0  ;;  %v5359_v2 = vld [vmem:[#allocation2] sm:$0xff]  ;;  %v5360_v3 = vld [vmem:[#allocation2 + $0x8] sm:$0xff]  ;;  %v5365_v8 = vld [vmem:[#allocation2 + $0x30] sm:$0xff] }
 0x129   : > { %v5363_v6 = vld [vmem:[#allocation2 + $0x20] sm:$0xff]  ;;  %v5364_v7 = vld [vmem:[#allocation2 + $0x28] sm:$0xff]  ;;  %v5366_v9 = vld [vmem:[#allocation2 + $0x38] sm:$0xff] }
 0x12a   : > { %v5367_v10 = vld [vmem:[#allocation2 + $0x40] sm:$0xff]  ;;  %v5368_v17 = vld [vmem:[#allocation2 + $0x48] sm:$0xff]  ;;  %v5369_v24 = vld [vmem:[#allocation2 + $0x50] sm:$0xff] }
 0x12b   : > { %v5370_v31 = vld [vmem:[#allocation2 + $0x58] sm:$0xff]  ;;  %v5371_v38 = vld [vmem:[#allocation2 + $0x60] sm:$0xff]  ;;  %v5413_v51 = vld [vmem:[%s6377_s10 + $0x30] sm:$0xff] }
 0x12c   : > { %1340 = vmatpush.bf16.xpose.msra.mxu0 %v1310_v40  ;;  %v5422_v50 = vld [vmem:[%s6377_s10 + $0x78] sm:$0xff]  ;;  %v5411_v58 = vld [vmem:[%s6377_s10 + $0x20] sm:$0xff] }
 0x12d   : > { %1509 = vmatpush.bf16.xpose.msra.mxu1 %v1334_v41  ;;  %3702 = vmatpush.bf16.msra.mxu3 %v5422_v50  ;;  %v5419_v59 = vld [vmem:[%s6377_s10 + $0x60] sm:$0xff] }
 0x134   : > { %1341 = vmatpush.bf16.xpose.msra.mxu0 %v1307_v44 }
 0x135   : > { %1510 = vmatpush.bf16.xpose.msra.mxu1 %v1331_v45  ;;  %v5372_v45 = vld [vmem:[#allocation2 + $0x68] sm:$0xff] }
 0x13c   : > { %1342 = vmatpush.bf16.xpose.msra.mxu0 %v1304_v48 }
 0x13d   : > { %1511 = vmatpush.bf16.xpose.msra.mxu1 %v1328_v49  ;;  %v5414_v49 = vld [vmem:[%s6377_s10 + $0x38] sm:$0xff] }
 0x13e   : > { %3533 = vmatpush.bf16.msra.mxu2 %v5414_v49 }
 0x142   : > { %3534 = vmatpush.bf16.msra.mxu2 %v5413_v51 }
 0x144   : > { %1343 = vmatpush.bf16.xpose.msra.mxu0 %v1301_v52  ;;  %v5421_v52 = vld [vmem:[%s6377_s10 + $0x70] sm:$0xff] }
 0x145   : > { %1512 = vmatpush.bf16.xpose.msra.mxu1 %v1325_v53  ;;  %3703 = vmatpush.bf16.msra.mxu3 %v5421_v52 }
 0x14c   : > { %1344 = vmatpush.bf16.xpose.msra.mxu0 %v1298_v56  ;;  %v5412_v56 = vld [vmem:[%s6377_s10 + $0x28] sm:$0xff] }
 0x14d   : > { %1513 = vmatpush.bf16.xpose.msra.mxu1 %v1322_v57  ;;  %v5420_v57 = vld [vmem:[%s6377_s10 + $0x68] sm:$0xff]  ;;  %3535 = vmatpush.bf16.msra.mxu2 %v5412_v56 }
 0x14e   : > { %3704 = vmatpush.bf16.msra.mxu3 %v5420_v57 }
 0x151   : > { %3536 = vmatpush.bf16.msra.mxu2 %v5411_v58 }
 0x152   : > { %3705 = vmatpush.bf16.msra.mxu3 %v5419_v59  ;;  %v6950_v59 = vld [vmem:[#allocation3 + $0xd8] sm:$0xff] }
 0x154   : > { %1345 = vmatpush.bf16.xpose.msra.mxu0 %v1295_v60  ;;  %v5373_v60 = vld [vmem:[#allocation2 + $0x70] sm:$0xff] }
 0x155   : > { %1514 = vmatpush.bf16.xpose.msra.mxu1 %v1319_v61 }
 0x15c   : > { %1346 = vmatpush.bf16.xpose.msra.mxu0 %v1292_v0  ;;  %v5410_v0 = vld [vmem:[%s6377_s10 + $0x18] sm:$0xff] }
 0x15d   : > { %1515 = vmatpush.bf16.xpose.msra.mxu1 %v1316_v1  ;;  %v5418_v1 = vld [vmem:[%s6377_s10 + $0x58] sm:$0xff]  ;;  %3537 = vmatpush.bf16.msra.mxu2 %v5410_v0 }
 0x15e   : > { %3706 = vmatpush.bf16.msra.mxu3 %v5418_v1 }
 0x163   : > { %5225 = vmatmul.msk.bf16.vlgmr.msra.gmra.mxu0 %vm1194_vm2, %v5359_v2 }
 0x164   : > { %5257 = vmatmul.msk.bf16.vlgmr.msra.gmra.mxu1 %vm1194_vm2, %v5359_v2  ;;  %v5409_v2 = vld [vmem:[%s6377_s10 + $0x10] sm:$0xff] }
 0x165   : > { %3538 = vmatpush.bf16.msra.mxu2 %v5409_v2 }
 0x173   : > { %5226 = vmatmul.msk.bf16.gmra.mxu0 %vm1194_vm2, %v5360_v3 }
 0x174   : > { %5258 = vmatmul.msk.bf16.gmra.mxu1 %vm1194_vm2, %v5360_v3  ;;  %v5417_v3 = vld [vmem:[%s6377_s10 + $0x50] sm:$0xff] }
 0x175   : > { %3707 = vmatpush.bf16.msra.mxu3 %v5417_v3 }
 0x183   : > { %5227 = vmatmul.msk.bf16.gmra.mxu0 %vm1194_vm2, %v5361_v4 }
 0x184   : > { %5259 = vmatmul.msk.bf16.gmra.mxu1 %vm1194_vm2, %v5361_v4 }
 0x193   : > { %5228 = vmatmul.msk.bf16.gmra.mxu0 %vm1194_vm2, %v5362_v5 }
 0x194   : > { %5260 = vmatmul.msk.bf16.gmra.mxu1 %vm1194_vm2, %v5362_v5 }
 0x1a3   : > { %5229 = vmatmul.msk.bf16.gmra.mxu0 %vm1194_vm2, %v5363_v6 }
 0x1a4   : > { %5261 = vmatmul.msk.bf16.gmra.mxu1 %vm1194_vm2, %v5363_v6 }
 0x1b3   : > { %5230 = vmatmul.msk.bf16.gmra.mxu0 %vm1194_vm2, %v5364_v7 }
 0x1b4   : > { %5262 = vmatmul.msk.bf16.gmra.mxu1 %vm1194_vm2, %v5364_v7  ;;  %v5408_v7 = vld [vmem:[%s6377_s10 + $0x8] sm:$0xff] }
 0x1b5   : > { %3539 = vmatpush.bf16.msra.mxu2 %v5408_v7 }
 0x1c3   : > { %5231 = vmatmul.msk.bf16.gmra.mxu0 %vm1194_vm2, %v5365_v8 }
 0x1c4   : > { %5263 = vmatmul.msk.bf16.gmra.mxu1 %vm1194_vm2, %v5365_v8  ;;  %v5416_v8 = vld [vmem:[%s6377_s10 + $0x48] sm:$0xff] }
 0x1c5   : > { %3708 = vmatpush.bf16.msra.mxu3 %v5416_v8 }
 0x1d3   : > { %5232 = vmatmul.msk.bf16.gmra.mxu0 %vm1194_vm2, %v5366_v9 }
 0x1d4   : > { %5264 = vmatmul.msk.bf16.gmra.mxu1 %vm1194_vm2, %v5366_v9  ;;  %v5407_v9 = vld [vmem:[%s6377_s10] sm:$0xff] }
 0x1d5   : > { %3540 = vmatpush.bf16.msra.mxu2 %v5407_v9 }
 0x1e0   : > { %v6790_v11 = vpop.f32.mrf.mxu0 }
 0x1e1   : > { %v6792_v12 = vpop.f32.mrf.mxu1 }
 0x1e2   : > { %v1805_v13 = vmax.f32 %v6790_v11, %v6792_v12 }
 0x1e3   : > { %5233 = vmatmul.msk.bf16.gmra.mxu0 %vm1194_vm2, %v5367_v10 }
 0x1e4   : > { %5265 = vmatmul.msk.bf16.gmra.mxu1 %vm1194_vm2, %v5367_v10  ;;  %1806 = vmax.xlane.f32.xlu0 %v1805_v13  ;;  %v5415_v10 = vld [vmem:[%s6377_s10 + $0x40] sm:$0xff]  ;;  %v5374_v13 = vld [vmem:[#allocation2 + $0x78] sm:$0xff] }
 0x1e5   : > { %3709 = vmatpush.bf16.msra.mxu3 %v5415_v10 }
 0x1e8   : > { %v6798_v14 = vpop.f32.mrf.mxu0 }
 0x1e9   : > { %v6800_v15 = vpop.f32.mrf.mxu1 }
 0x1ea   : > { %v1808_v16 = vmax.f32 %v6798_v14, %v6800_v15 }
 0x1ec   : > { %1809 = vmax.xlane.f32.xlu0 %v1808_v16 }
 0x1f0   : > { %v6804_v18 = vpop.f32.mrf.mxu0 }
 0x1f1   : > { %v6806_v19 = vpop.f32.mrf.mxu1 }
 0x1f2   : > { %v1811_v20 = vmax.f32 %v6804_v18, %v6806_v19 }
 0x1f3   : > { %5234 = vmatmul.msk.bf16.gmra.mxu0 %vm1194_vm2, %v5368_v17 }
 0x1f4   : > { %5266 = vmatmul.msk.bf16.gmra.mxu1 %vm1194_vm2, %v5368_v17  ;;  %1812 = vmax.xlane.f32.xlu1 %v1811_v20 }
 0x1f8   : > { %v6812_v21 = vpop.f32.mrf.mxu0 }
 0x1f9   : > { %v6814_v22 = vpop.f32.mrf.mxu1 }
 0x1fa   : > { %v1814_v23 = vmax.f32 %v6812_v21, %v6814_v22 }
 0x1fc   : > { %1815 = vmax.xlane.f32.xlu1 %v1814_v23  ;;  %v6912_v23 = vld [vmem:[#allocation3 + $0xb0] sm:$0xff] }
 0x200   : > { %v6818_v25 = vpop.f32.mrf.mxu0 }
 0x201   : > { %v6820_v26 = vpop.f32.mrf.mxu1 }
 0x202   : > { %v1817_v27 = vmax.f32 %v6818_v25, %v6820_v26 }
 0x203   : > { %5235 = vmatmul.msk.bf16.gmra.mxu0 %vm1194_vm2, %v5369_v24 }
 0x204   : > { %5267 = vmatmul.msk.bf16.gmra.mxu1 %vm1194_vm2, %v5369_v24  ;;  %1818 = vmax.xlane.f32.xlu2 %v1817_v27 }
 0x208   : > { %v6826_v28 = vpop.f32.mrf.mxu0 }
 0x209   : > { %v6828_v29 = vpop.f32.mrf.mxu1 }
 0x20a   : > { %v1820_v30 = vmax.f32 %v6826_v28, %v6828_v29 }
 0x20c   : > { %1821 = vmax.xlane.f32.xlu2 %v1820_v30 }
 0x210   : > { %v6832_v32 = vpop.f32.mrf.mxu0 }
 0x211   : > { %v6834_v33 = vpop.f32.mrf.mxu1 }
 0x212   : > { %v1823_v34 = vmax.f32 %v6832_v32, %v6834_v33 }
 0x213   : > { %5236 = vmatmul.msk.bf16.gmra.mxu0 %vm1194_vm2, %v5370_v31 }
 0x214   : > { %5268 = vmatmul.msk.bf16.gmra.mxu1 %vm1194_vm2, %v5370_v31  ;;  %1824 = vmax.xlane.f32.xlu0 %v1823_v34 }
 0x218   : > { %v6840_v35 = vpop.f32.mrf.mxu0 }
 0x219   : > { %v6842_v36 = vpop.f32.mrf.mxu1 }
 0x21a   : > { %v1826_v37 = vmax.f32 %v6840_v35, %v6842_v36 }
 0x21c   : > { %1827 = vmax.xlane.f32.xlu1 %v1826_v37 }
 0x220   : > { %v6846_v39 = vpop.f32.mrf.mxu0 }
 0x221   : > { %v6848_v40 = vpop.f32.mrf.mxu1 }
 0x222   : > { %v1829_v41 = vmax.f32 %v6846_v39, %v6848_v40 }
 0x223   : > { %5237 = vmatmul.msk.bf16.gmra.mxu0 %vm1194_vm2, %v5371_v38 }
 0x224   : > { %5269 = vmatmul.msk.bf16.gmra.mxu1 %vm1194_vm2, %v5371_v38  ;;  %1830 = vmax.xlane.f32.xlu2 %v1829_v41  ;;  %v6926_v38 = vld [vmem:[#allocation3 + $0x1b0] sm:$0xff] }
 0x228   : > { %v6854_v42 = vpop.f32.mrf.mxu0 }
 0x229   : > { %v6856_v43 = vpop.f32.mrf.mxu1 }
 0x22a   : > { %v1832_v44 = vmax.f32 %v6854_v42, %v6856_v43 }
 0x22c   : > { %1833 = vmax.xlane.f32.xlu0 %v1832_v44  ;;  %v5375_v44 = vld [vmem:[#allocation2 + $0x80] sm:$0xff] }
 0x230   : > { %v6860_v46 = vpop.f32.mrf.mxu0 }
 0x231   : > { %v6862_v47 = vpop.f32.mrf.mxu1 }
 0x232   : > { %v1835_v48 = vmax.f32 %v6860_v46, %v6862_v47 }
 0x233   : > { %5238 = vmatmul.msk.bf16.gmra.mxu0 %vm1194_vm2, %v5372_v45 }
 0x234   : > { %5270 = vmatmul.msk.bf16.gmra.mxu1 %vm1194_vm2, %v5372_v45  ;;  %1836 = vmax.xlane.f32.xlu1 %v1835_v48 }
 0x238   : > { %v6872_v53 = vpop.f32.mrf.mxu0 }
 0x239   : > { %v6874_v54 = vpop.f32.mrf.mxu1 }
 0x23a   : > { %v1838_v55 = vmax.f32 %v6872_v53, %v6874_v54 }
 0x23c   : > { %1839 = vmax.xlane.f32.xlu2 %v1838_v55 }
 0x240   : > { %v6882_v61 = vpop.f32.mrf.mxu0 }
 0x241   : > { %v6884_v62 = vpop.f32.mrf.mxu1 }
 0x242   : > { %v1841_v63 = vmax.f32 %v6882_v61, %v6884_v62 }
 0x243   : > { %5239 = vmatmul.msk.bf16.gmra.mxu0 %vm1194_vm2, %v5373_v60 }
 0x244   : > { %5271 = vmatmul.msk.bf16.gmra.mxu1 %vm1194_vm2, %v5373_v60  ;;  %1842 = vmax.xlane.f32.xlu0 %v1841_v63 }
 0x248   : > { %v6894_v4 = vpop.f32.mrf.mxu0 }
 0x249   : > { %v6896_v5 = vpop.f32.mrf.mxu1 }
 0x24a   : > { %v1844_v6 = vmax.f32 %v6894_v4, %v6896_v5 }
 0x24c   : > { %1845 = vmax.xlane.f32.xlu1 %v1844_v6 }
 0x250   : > { %v6904_v16 = vpop.f32.mrf.mxu0 }
 0x251   : > { %v6906_v17 = vpop.f32.mrf.mxu1 }
 0x252   : > { %v1847_v20 = vmax.f32 %v6904_v16, %v6906_v17 }
 0x253   : > { %5240 = vmatmul.msk.bf16.gmra.mxu0 %vm1194_vm2, %v5374_v13 }
 0x254   : > { %5272 = vmatmul.msk.bf16.gmra.mxu1 %vm1194_vm2, %v5374_v13  ;;  %1848 = vmax.xlane.f32.xlu2 %v1847_v20  ;;  %v6964_v13 = vld [vmem:[#allocation3 + $0x18] sm:$0xff] }
 0x257   : > { %v1807_v24 = vpop.xlane.xlu0 %1806 }
 0x258   : > { %v6915_v27 = vmax.f32 %v6912_v23, %v1807_v24  ;;  %v6917_v30 = vpop.f32.mrf.mxu0  ;;  %v5376_v24 = vld [vmem:[#allocation2 + $0x88] sm:$0xff] }
 0x259   : > { %v6919_v31 = vpop.f32.mrf.mxu1 }
 0x25a   : > { %v1850_v34 = vmax.f32 %v6917_v30, %v6919_v31  ;;  %4127 = vst [vmem:[#allocation3 + $0xb0] sm:$0xff] %v6915_v27  ;;  %v2061_v50 = vsub.f32 %v6790_v11, %v6915_v27  ;;  %v2062_v52 = vsub.f32 %v6792_v12, %v6915_v27 }
 0x25c   : > { %1851 = vmax.xlane.f32.xlu0 %v1850_v34 }
 0x25f   : > { %v1810_v41 = vpop.xlane.xlu0 %1809 }
 0x260   : > { %v6929_v45 = vmax.f32 %v6926_v38, %v1810_v41  ;;  %v6931_v48 = vpop.f32.mrf.mxu0 }
 0x261   : > { %v6933_v49 = vpop.f32.mrf.mxu1 }
 0x262   : > { %v1853_v51 = vmax.f32 %v6931_v48, %v6933_v49  ;;  %v2063_v55 = vsub.f32 %v6798_v14, %v6929_v45  ;;  %v2064_v56 = vsub.f32 %v6800_v15, %v6929_v45  ;;  %4128 = vst [vmem:[#allocation3 + $0x1b0] sm:$0xff] %v6929_v45 }
 0x263   : > { %5241 = vmatmul.msk.bf16.gmra.mxu0 %vm1194_vm2, %v5375_v44 }
 0x264   : > { %5273 = vmatmul.msk.bf16.gmra.mxu1 %vm1194_vm2, %v5375_v44  ;;  %v2189_v11 = vpack.c.bf16 %v2063_v55, %v2061_v50  ;;  %v2190_v58 = vpack.c.bf16 %v2064_v56, %v2062_v52  ;;  %1854 = vmax.xlane.f32.xlu1 %v1853_v51 }
 0x266   : > { %v2253_v12 = vunpack.c.l.bf16 %v2189_v11  ;;  %v2255_v60 = vunpack.c.h.bf16 %v2189_v11  ;;  %v2254_v14 = vunpack.c.l.bf16 %v2190_v58  ;;  %v2256_v0 = vunpack.c.h.bf16 %v2190_v58 }
 0x267   : > { %v1813_v63 = vpop.xlane.xlu1 %1812 }
 0x268   : > { %v6953_v15 = vmax.f32 %v6950_v59, %v1813_v63  ;;  %v6955_v1 = vpop.f32.mrf.mxu0  ;;  %v2381_v3 = vmul.f32 1.442695, %v2253_v12  ;;  %v2385_v6 = vmul.f32 1.442695, %v2255_v60  ;;  %v2383_v7 = vmul.f32 1.442695, %v2254_v14 }
 0x269   : > { %v6957_v2 = vpop.f32.mrf.mxu1  ;;  %v2387_v9 = vmul.f32 1.442695, %v2256_v0 }
 0x26a   : > { %v1856_v8 = vmax.f32 %v6955_v1, %v6957_v2  ;;  %4129 = vst [vmem:[#allocation3 + $0xd8] sm:$0xff] %v6953_v15  ;;  %5624 = vpow2.f32 %v2381_v3  ;;  %v2065_v52 = vsub.f32 %v6804_v18, %v6953_v15  ;;  %v2066_v55 = vsub.f32 %v6806_v19, %v6953_v15 }
 0x26b   : > { %5626 = vpow2.f32 %v2385_v6 }
 0x26c   : > { %1857 = vmax.xlane.f32.xlu2 %v1856_v8  ;;  %5628 = vpow2.f32 %v2383_v7 }
 0x26d   : > { %5630 = vpow2.f32 %v2387_v9 }
 0x26f   : > { %v1816_v20 = vpop.xlane.xlu1 %1815 }
 0x270   : > { %v5625_v34 = vpop.eup %5624  ;;  %v6967_v41 = vmax.f32 %v6964_v13, %v1816_v20  ;;  %v6969_v44 = vpop.f32.mrf.mxu0 }
 0x271   : > { %v6971_v50 = vpop.f32.mrf.mxu1  ;;  %v5627_v51 = vpop.eup %5626 }
 0x272   : > { %v1859_v56 = vmax.f32 %v6969_v44, %v6971_v50  ;;  %v5629_v11 = vpop.eup %5628  ;;  %v2067_v58 = vsub.f32 %v6812_v21, %v6967_v41  ;;  %v2068_v12 = vsub.f32 %v6814_v22, %v6967_v41  ;;  %4130 = vst [vmem:[#allocation3 + $0x18] sm:$0xff] %v6967_v41  ;;  %v2637_v14 = vpack.c.bf16 %v5627_v51, %v5625_v34  ;;  %v6988_v21 = vld [vmem:[#allocation3 + $0x50] sm:$0xff] }
 0x273   : > { %v5631_v18 = vpop.eup %5630  ;;  %5242 = vmatmul.msk.bf16.gmra.mxu0 %vm1194_vm2, %v5376_v24 }
 0x274   : > { %5274 = vmatmul.msk.bf16.gmra.mxu1 %vm1194_vm2, %v5376_v24  ;;  %v2191_v19 = vpack.c.bf16 %v2067_v58, %v2065_v52  ;;  %v2192_v63 = vpack.c.bf16 %v2068_v12, %v2066_v55  ;;  %3541 = vmatmul.bf16.vlgmr.msra.gmra.mxu2 %v2637_v14  ;;  %v2638_v0 = vpack.c.bf16 %v5631_v18, %v5629_v11  ;;  %v2957_v3 = vunpack.c.l.bf16 %v2637_v14 }
 0x275   : > { %1860 = vmax.xlane.f32.xlu0 %v1859_v56  ;;  %v2959_v22 = vunpack.c.h.bf16 %v2637_v14 }
 0x276   : > { %3710 = vmatmul.bf16.vlgmr.msra.gmra.mxu3 %v2638_v0  ;;  %v2257_v6 = vunpack.c.l.bf16 %v2191_v19  ;;  %v2259_v7 = vunpack.c.h.bf16 %v2191_v19  ;;  %v2258_v8 = vunpack.c.l.bf16 %v2192_v63  ;;  %v2260_v20 = vunpack.c.h.bf16 %v2192_v63  ;;  %v7006_v63 = vld [vmem:[#allocation3 + $0x168] sm:$0xff] }
 0x277   : > { %v1819_v9 = vpop.xlane.xlu2 %1818  ;;  %v2958_v34 = vunpack.c.l.bf16 %v2638_v0  ;;  %v2960_v51 = vunpack.c.h.bf16 %v2638_v0 }
 0x278   : > { %v6991_v60 = vmax.f32 %v6988_v21, %v1819_v9  ;;  %v6993_v24 = vpop.f32.mrf.mxu0  ;;  %v2389_v55 = vmul.f32 1.442695, %v2257_v6  ;;  %v2393_v56 = vmul.f32 1.442695, %v2259_v7  ;;  %v2391_v11 = vmul.f32 1.442695, %v2258_v8 }
 0x279   : > { %v6995_v52 = vpop.f32.mrf.mxu1  ;;  %v2395_v12 = vmul.f32 1.442695, %v2260_v20  ;;  %v6999_v14 = vadd.f32 %v2958_v34, %v2957_v3  ;;  %v7001_v18 = vadd.f32 %v2960_v51, %v2959_v22  ;;  %v5377_v6 = vld [vmem:[#allocation2 + $0x90] sm:$0xff] }
 0x27a   : > { %v1862_v58 = vmax.f32 %v6993_v24, %v6995_v52  ;;  %4131 = vst [vmem:[#allocation3 + $0x50] sm:$0xff] %v6991_v60  ;;  %5632 = vpow2.f32 %v2389_v55  ;;  %v2069_v20 = vsub.f32 %v6818_v25, %v6991_v60  ;;  %v2070_v34 = vsub.f32 %v6820_v26, %v6991_v60 }
 0x27b   : > { %9392 = vst [vmem:[#allocation6_spill] sm:$0xff] %v6999_v14  ;;  %5634 = vpow2.f32 %v2393_v56 }
 0x27c   : > { %9393 = vst [vmem:[#allocation7_spill] sm:$0xff] %v7001_v18  ;;  %1863 = vmax.xlane.f32.xlu1 %v1862_v58  ;;  %5636 = vpow2.f32 %v2391_v11 }
 0x27d   : > { %5638 = vpow2.f32 %v2395_v12 }
 0x27f   : > { %v1822_v0 = vpop.xlane.xlu2 %1821 }
 0x280   : > { %v5633_v7 = vpop.eup %5632  ;;  %v7009_v3 = vmax.f32 %v7006_v63, %v1822_v0  ;;  %v7011_v22 = vpop.f32.mrf.mxu0 }
 0x281   : > { %v7013_v8 = vpop.f32.mrf.mxu1  ;;  %v5635_v9 = vpop.eup %5634 }
 0x282   : > { %9394 = vst [vmem:[#allocation8_spill] sm:$0xff] %v7009_v3  ;;  %v1865_v51 = vmax.f32 %v7011_v22, %v7013_v8  ;;  %v5637_v55 = vpop.eup %5636  ;;  %v2071_v56 = vsub.f32 %v6826_v28, %v7009_v3  ;;  %v2072_v11 = vsub.f32 %v6828_v29, %v7009_v3  ;;  %v2639_v12 = vpack.c.bf16 %v5635_v9, %v5633_v7  ;;  %v7030_v28 = vld [vmem:[#allocation3 + $0x130] sm:$0xff] }
 0x283   : > { %4132 = vst [vmem:[#allocation3 + $0x168] sm:$0xff] %v7009_v3  ;;  %v5639_v25 = vpop.eup %5638  ;;  %5243 = vmatmul.msk.bf16.gmra.mxu0 %vm1194_vm2, %v5377_v6 }
 0x284   : > { %5275 = vmatmul.msk.bf16.gmra.mxu1 %vm1194_vm2, %v5377_v6  ;;  %v2193_v26 = vpack.c.bf16 %v2071_v56, %v2069_v20  ;;  %v2194_v0 = vpack.c.bf16 %v2072_v11, %v2070_v34  ;;  %3546 = vmatmul.bf16.gmra.mxu2 %v2639_v12  ;;  %v2640_v19 = vpack.c.bf16 %v5639_v25, %v5637_v55  ;;  %v2963_v10 = vunpack.c.h.bf16 %v2639_v12 }
 0x285   : > { %1866 = vmax.xlane.f32.xlu2 %v1865_v51  ;;  %v2961_v29 = vunpack.c.l.bf16 %v2639_v12 }
 0x286   : > { %3715 = vmatmul.bf16.gmra.mxu3 %v2640_v19  ;;  %v2261_v57 = vunpack.c.l.bf16 %v2193_v26  ;;  %v2263_v58 = vunpack.c.h.bf16 %v2193_v26  ;;  %v2262_v37 = vunpack.c.l.bf16 %v2194_v0  ;;  %v2264_v7 = vunpack.c.h.bf16 %v2194_v0 }
 0x287   : > { %v1825_v18 = vpop.xlane.xlu0 %1824  ;;  %v2964_v9 = vunpack.c.h.bf16 %v2640_v19  ;;  %v2962_v14 = vunpack.c.l.bf16 %v2640_v19 }
 0x288   : > { %v7033_v3 = vmax.f32 %v7030_v28, %v1825_v18  ;;  %v7035_v6 = vpop.f32.mrf.mxu0  ;;  %v2397_v34 = vmul.f32 1.442695, %v2261_v57  ;;  %v2401_v51 = vmul.f32 1.442695, %v2263_v58  ;;  %v2399_v55 = vmul.f32 1.442695, %v2262_v37 }
 0x289   : > { %v7037_v20 = vpop.f32.mrf.mxu1  ;;  %v2403_v11 = vmul.f32 1.442695, %v2264_v7  ;;  %v7041_v12 = vadd.f32 %v2964_v9, %v2963_v10  ;;  %v7043_v25 = vadd.f32 %v2962_v14, %v2961_v29  ;;  %v7048_v18 = vld [vmem:[#allocation3 + $0x48] sm:$0xff]  ;;  %v5378_v10 = vld [vmem:[#allocation2 + $0x98] sm:$0xff] }
 0x28a   : > { %v1868_v56 = vmax.f32 %v7035_v6, %v7037_v20  ;;  %4133 = vst [vmem:[#allocation3 + $0x130] sm:$0xff] %v7033_v3  ;;  %5640 = vpow2.f32 %v2397_v34  ;;  %v2073_v14 = vsub.f32 %v6832_v32, %v7033_v3  ;;  %v2074_v26 = vsub.f32 %v6834_v33, %v7033_v3 }
 0x28b   : > { %9395 = vst [vmem:[#allocation9_spill] sm:$0xff] %v7041_v12  ;;  %5642 = vpow2.f32 %v2401_v51  ;;  %v7072_v51 = vld [vmem:[#allocation3 + $0x180] sm:$0xff] }
 0x28c   : > { %9396 = vst [vmem:[#allocation10_spill] sm:$0xff] %v7043_v25  ;;  %1869 = vmax.xlane.f32.xlu0 %v1868_v56  ;;  %5644 = vpow2.f32 %v2399_v55 }
 0x28d   : > { %9397 = vst [vmem:[#allocation11_spill] sm:$0xff] %v7048_v18  ;;  %5646 = vpow2.f32 %v2403_v11 }
 0x28e   : > { %9399 = vst [vmem:[#allocation13_spill] sm:$0xff] %v7072_v51 }
 0x28f   : > { %v1828_v37 = vpop.xlane.xlu1 %1827 }
 0x290   : > { %v7051_v57 = vmax.f32 %v7048_v18, %v1828_v37  ;;  %v5641_v58 = vpop.eup %5640  ;;  %v7057_v0 = vpop.f32.mrf.mxu0 }
 0x291   : > { %v7059_v29 = vpop.f32.mrf.mxu1  ;;  %v5643_v7 = vpop.eup %5642 }
 0x292   : > { %9398 = vst [vmem:[#allocation12_spill] sm:$0xff] %v7051_v57  ;;  %v2075_v9 = vsub.f32 %v6840_v35, %v7051_v57  ;;  %v2076_v34 = vsub.f32 %v6842_v36, %v7051_v57  ;;  %v1871_v32 = vmax.f32 %v7057_v0, %v7059_v29  ;;  %v5645_v33 = vpop.eup %5644  ;;  %v2641_v55 = vpack.c.bf16 %v5643_v7, %v5641_v58 }
 0x293   : > { %4134 = vst [vmem:[#allocation3 + $0x48] sm:$0xff] %v7051_v57  ;;  %v5647_v56 = vpop.eup %5646  ;;  %5244 = vmatmul.msk.bf16.gmra.mxu0 %vm1194_vm2, %v5378_v10 }
 0x294   : > { %v2195_v11 = vpack.c.bf16 %v2075_v9, %v2073_v14  ;;  %v2196_v37 = vpack.c.bf16 %v2076_v34, %v2074_v26  ;;  %5276 = vmatmul.msk.bf16.gmra.mxu1 %vm1194_vm2, %v5378_v10  ;;  %3551 = vmatmul.bf16.gmra.mxu2 %v2641_v55  ;;  %v2642_v35 = vpack.c.bf16 %v5647_v56, %v5645_v33  ;;  %v2965_v36 = vunpack.c.l.bf16 %v2641_v55 }
 0x295   : > { %1872 = vmax.xlane.f32.xlu1 %v1871_v32  ;;  %v2967_v19 = vunpack.c.h.bf16 %v2641_v55 }
 0x296   : > { %v2265_v25 = vunpack.c.l.bf16 %v2195_v11  ;;  %v2267_v12 = vunpack.c.h.bf16 %v2195_v11  ;;  %v2266_v57 = vunpack.c.l.bf16 %v2196_v37  ;;  %3720 = vmatmul.bf16.gmra.mxu3 %v2642_v35  ;;  %v2268_v18 = vunpack.c.h.bf16 %v2196_v37 }
 0x297   : > { %v2966_v58 = vunpack.c.l.bf16 %v2642_v35  ;;  %v2968_v7 = vunpack.c.h.bf16 %v2642_v35  ;;  %v1831_v14 = vpop.xlane.xlu2 %1830  ;;  %v5379_v35 = vld [vmem:[#allocation2 + $0xa0] sm:$0xff] }
 0x298   : > { %v2405_v26 = vmul.f32 1.442695, %v2265_v25  ;;  %v2409_v9 = vmul.f32 1.442695, %v2267_v12  ;;  %v2407_v34 = vmul.f32 1.442695, %v2266_v57  ;;  %v7075_v10 = vmax.f32 %v7072_v51, %v1831_v14  ;;  %v7077_v33 = vpop.f32.mrf.mxu0 }
 0x299   : > { %v7079_v32 = vpop.f32.mrf.mxu1  ;;  %v2411_v55 = vmul.f32 1.442695, %v2268_v18  ;;  %v7081_v56 = vadd.f32 %v2966_v58, %v2965_v36  ;;  %v7083_v11 = vadd.f32 %v2968_v7, %v2967_v19  ;;  %v7090_v25 = vld [vmem:[#allocation3 + $0x110] sm:$0xff] }
 0x29a   : > { %9400 = vst [vmem:[#allocation14_spill] sm:$0xff] %v7075_v10  ;;  %v1874_v37 = vmax.f32 %v7077_v33, %v7079_v32  ;;  %5648 = vpow2.f32 %v2405_v26  ;;  %v2077_v58 = vsub.f32 %v6846_v39, %v7075_v10  ;;  %v2078_v7 = vsub.f32 %v6848_v40, %v7075_v10 }
 0x29b   : > { %9401 = vst [vmem:[#allocation15_spill] sm:$0xff] %v7081_v56  ;;  %5650 = vpow2.f32 %v2409_v9 }
 0x29c   : > { %9402 = vst [vmem:[#allocation16_spill] sm:$0xff] %v7083_v11  ;;  %1875 = vmax.xlane.f32.xlu2 %v1874_v37  ;;  %5652 = vpow2.f32 %v2407_v34 }
 0x29d   : > { %4135 = vst [vmem:[#allocation3 + $0x180] sm:$0xff] %v7075_v10  ;;  %5654 = vpow2.f32 %v2411_v55  ;;  %v7114_v10 = vld [vmem:[#allocation3 + $0x118] sm:$0xff] }
 0x29e   : > { %9403 = vst [vmem:[#allocation17_spill] sm:$0xff] %v7090_v25 }
 0x29f   : > { %v1834_v18 = vpop.xlane.xlu0 %1833  ;;  %9405 = vst [vmem:[#allocation19_spill] sm:$0xff] %v7114_v10 }
 0x2a0   : > { %v5649_v57 = vpop.eup %5648  ;;  %v7093_v19 = vmax.f32 %v7090_v25, %v1834_v18  ;;  %v7099_v14 = vpop.f32.mrf.mxu0 }
 0x2a1   : > { %v5651_v36 = vpop.eup %5650  ;;  %v7101_v26 = vpop.f32.mrf.mxu1 }
 0x2a2   : > { %9404 = vst [vmem:[#allocation18_spill] sm:$0xff] %v7093_v19  ;;  %v5653_v9 = vpop.eup %5652  ;;  %v2079_v34 = vsub.f32 %v6854_v42, %v7093_v19  ;;  %v2080_v55 = vsub.f32 %v6856_v43, %v7093_v19  ;;  %v2643_v39 = vpack.c.bf16 %v5651_v36, %v5649_v57  ;;  %v1877_v40 = vmax.f32 %v7099_v14, %v7101_v26 }
 0x2a3   : > { %4136 = vst [vmem:[#allocation3 + $0x110] sm:$0xff] %v7093_v19  ;;  %v5655_v18 = vpop.eup %5654  ;;  %5245 = vmatmul.msk.bf16.gmra.mxu0 %vm1194_vm2, %v5379_v35 }
 0x2a4   : > { %v2197_v12 = vpack.c.bf16 %v2079_v34, %v2077_v58  ;;  %v2198_v11 = vpack.c.bf16 %v2080_v55, %v2078_v7  ;;  %v2644_v56 = vpack.c.bf16 %v5655_v18, %v5653_v9  ;;  %5277 = vmatmul.msk.bf16.gmra.mxu1 %vm1194_vm2, %v5379_v35  ;;  %3556 = vmatmul.bf16.gmra.mxu2 %v2643_v39  ;;  %v2969_v42 = vunpack.c.l.bf16 %v2643_v39 }
 0x2a5   : > { %1878 = vmax.xlane.f32.xlu0 %v1877_v40  ;;  %v2971_v43 = vunpack.c.h.bf16 %v2643_v39 }
 0x2a6   : > { %v2269_v37 = vunpack.c.l.bf16 %v2197_v12  ;;  %v2271_v19 = vunpack.c.h.bf16 %v2197_v12  ;;  %v2270_v57 = vunpack.c.l.bf16 %v2198_v11  ;;  %3725 = vmatmul.bf16.gmra.mxu3 %v2644_v56  ;;  %v2272_v36 = vunpack.c.h.bf16 %v2198_v11 }
 0x2a7   : > { %v2970_v25 = vunpack.c.l.bf16 %v2644_v56  ;;  %v2972_v51 = vunpack.c.h.bf16 %v2644_v56  ;;  %v1837_v58 = vpop.xlane.xlu1 %1836 }
 0x2a8   : > { %v2413_v7 = vmul.f32 1.442695, %v2269_v37  ;;  %v2417_v9 = vmul.f32 1.442695, %v2271_v19  ;;  %v2415_v34 = vmul.f32 1.442695, %v2270_v57  ;;  %v7117_v55 = vmax.f32 %v7114_v10, %v1837_v58  ;;  %v7119_v35 = vpop.f32.mrf.mxu0 }
 0x2a9   : > { %v7121_v18 = vpop.f32.mrf.mxu1  ;;  %v2419_v39 = vmul.f32 1.442695, %v2272_v36  ;;  %v7123_v40 = vadd.f32 %v2970_v25, %v2969_v42  ;;  %v7125_v12 = vadd.f32 %v2972_v51, %v2971_v43  ;;  %v7132_v19 = vld [vmem:[#allocation3 + $0x98] sm:$0xff]  ;;  %v5380_v42 = vld [vmem:[#allocation2 + $0xa8] sm:$0xff] }
 0x2aa   : > { %9406 = vst [vmem:[#allocation20_spill] sm:$0xff] %v7117_v55  ;;  %v1880_v11 = vmax.f32 %v7119_v35, %v7121_v18  ;;  %5656 = vpow2.f32 %v2413_v7  ;;  %v2081_v57 = vsub.f32 %v6860_v46, %v7117_v55  ;;  %v2082_v36 = vsub.f32 %v6862_v47, %v7117_v55 }
 0x2ab   : > { %9407 = vst [vmem:[#allocation21_spill] sm:$0xff] %v7123_v40  ;;  %5658 = vpow2.f32 %v2417_v9 }
 0x2ac   : > { %9408 = vst [vmem:[#allocation22_spill] sm:$0xff] %v7125_v12  ;;  %1881 = vmax.xlane.f32.xlu1 %v1880_v11  ;;  %5660 = vpow2.f32 %v2415_v34 }
 0x2ad   : > { %4137 = vst [vmem:[#allocation3 + $0x118] sm:$0xff] %v7117_v55  ;;  %5662 = vpow2.f32 %v2419_v39  ;;  %v7156_v55 = vld [vmem:[#allocation3 + $0x120] sm:$0xff] }
 0x2ae   : > { %9409 = vst [vmem:[#allocation23_spill] sm:$0xff] %v7132_v19 }
 0x2af   : > { %v1840_v37 = vpop.xlane.xlu2 %1839  ;;  %9411 = vst [vmem:[#allocation25_spill] sm:$0xff] %v7156_v55 }
 0x2b0   : > { %v5657_v25 = vpop.eup %5656  ;;  %v7135_v51 = vmax.f32 %v7132_v19, %v1840_v37  ;;  %v7141_v58 = vpop.f32.mrf.mxu0 }
 0x2b1   : > { %v5659_v43 = vpop.eup %5658  ;;  %v7143_v7 = vpop.f32.mrf.mxu1 }
 0x2b2   : > { %9410 = vst [vmem:[#allocation24_spill] sm:$0xff] %v7135_v51  ;;  %v5661_v9 = vpop.eup %5660  ;;  %v2083_v34 = vsub.f32 %v6872_v53, %v7135_v51  ;;  %v2084_v39 = vsub.f32 %v6874_v54, %v7135_v51  ;;  %v2645_v46 = vpack.c.bf16 %v5659_v43, %v5657_v25  ;;  %v1883_v47 = vmax.f32 %v7141_v58, %v7143_v7 }
 0x2b3   : > { %4138 = vst [vmem:[#allocation3 + $0x98] sm:$0xff] %v7135_v51  ;;  %v5663_v37 = vpop.eup %5662  ;;  %5246 = vmatmul.msk.bf16.gmra.mxu0 %vm1194_vm2, %v5380_v42 }
 0x2b4   : > { %v2199_v56 = vpack.c.bf16 %v2083_v34, %v2081_v57  ;;  %v2200_v12 = vpack.c.bf16 %v2084_v39, %v2082_v36  ;;  %v2646_v40 = vpack.c.bf16 %v5663_v37, %v5661_v9  ;;  %5278 = vmatmul.msk.bf16.gmra.mxu1 %vm1194_vm2, %v5380_v42  ;;  %3561 = vmatmul.bf16.gmra.mxu2 %v2645_v46  ;;  %v2975_v53 = vunpack.c.h.bf16 %v2645_v46 }
 0x2b5   : > { %1884 = vmax.xlane.f32.xlu2 %v1883_v47  ;;  %v2973_v54 = vunpack.c.l.bf16 %v2645_v46 }
 0x2b6   : > { %v2273_v11 = vunpack.c.l.bf16 %v2199_v56  ;;  %v2275_v51 = vunpack.c.h.bf16 %v2199_v56  ;;  %v2274_v25 = vunpack.c.l.bf16 %v2200_v12  ;;  %3730 = vmatmul.bf16.gmra.mxu3 %v2646_v40  ;;  %v2276_v43 = vunpack.c.h.bf16 %v2200_v12 }
 0x2b7   : > { %v2976_v19 = vunpack.c.h.bf16 %v2646_v40  ;;  %v2974_v10 = vunpack.c.l.bf16 %v2646_v40  ;;  %v1843_v57 = vpop.xlane.xlu0 %1842 }
 0x2b8   : > { %v2421_v36 = vmul.f32 1.442695, %v2273_v11  ;;  %v2425_v9 = vmul.f32 1.442695, %v2275_v51  ;;  %v2423_v34 = vmul.f32 1.442695, %v2274_v25  ;;  %v7159_v39 = vmax.f32 %v7156_v55, %v1843_v57  ;;  %v7161_v42 = vpop.f32.mrf.mxu0 }
 0x2b9   : > { %v7163_v37 = vpop.f32.mrf.mxu1  ;;  %v2427_v46 = vmul.f32 1.442695, %v2276_v43  ;;  %v7165_v47 = vadd.f32 %v2976_v19, %v2975_v53  ;;  %v7167_v56 = vadd.f32 %v2974_v10, %v2973_v54  ;;  %v7174_v51 = vld [vmem:[#allocation3 + $0x150] sm:$0xff] }
 0x2ba   : > { %9412 = vst [vmem:[#allocation26_spill] sm:$0xff] %v7159_v39  ;;  %v1886_v12 = vmax.f32 %v7161_v42, %v7163_v37  ;;  %5664 = vpow2.f32 %v2421_v36  ;;  %v5381_v53 = vld [vmem:[#allocation2 + $0xb0] sm:$0xff]  ;;  %v2085_v25 = vsub.f32 %v6882_v61, %v7159_v39  ;;  %v2086_v43 = vsub.f32 %v6884_v62, %v7159_v39 }
 0x2bb   : > { %9413 = vst [vmem:[#allocation27_spill] sm:$0xff] %v7165_v47  ;;  %5666 = vpow2.f32 %v2425_v9 }
 0x2bc   : > { %9414 = vst [vmem:[#allocation28_spill] sm:$0xff] %v7167_v56  ;;  %1887 = vmax.xlane.f32.xlu0 %v1886_v12  ;;  %5668 = vpow2.f32 %v2423_v34 }
 0x2bd   : > { %4139 = vst [vmem:[#allocation3 + $0x120] sm:$0xff] %v7159_v39  ;;  %5670 = vpow2.f32 %v2427_v46  ;;  %v7198_v39 = vld [vmem:[#allocation3 + $0x108] sm:$0xff] }
 0x2be   : > { %9415 = vst [vmem:[#allocation29_spill] sm:$0xff] %v7174_v51 }
 0x2bf   : > { %v1846_v11 = vpop.xlane.xlu1 %1845  ;;  %9417 = vst [vmem:[#allocation31_spill] sm:$0xff] %v7198_v39 }
 0x2c0   : > { %v5665_v19 = vpop.eup %5664  ;;  %v7177_v10 = vmax.f32 %v7174_v51, %v1846_v11  ;;  %v7183_v57 = vpop.f32.mrf.mxu0 }
 0x2c1   : > { %v5667_v54 = vpop.eup %5666  ;;  %v7185_v36 = vpop.f32.mrf.mxu1 }
 0x2c2   : > { %9416 = vst [vmem:[#allocation30_spill] sm:$0xff] %v7177_v10  ;;  %v5669_v9 = vpop.eup %5668  ;;  %v2087_v34 = vsub.f32 %v6894_v4, %v7177_v10  ;;  %v2088_v46 = vsub.f32 %v6896_v5, %v7177_v10  ;;  %v2647_v61 = vpack.c.bf16 %v5667_v54, %v5665_v19  ;;  %v1889_v62 = vmax.f32 %v7183_v57, %v7185_v36 }
 0x2c3   : > { %4140 = vst [vmem:[#allocation3 + $0x150] sm:$0xff] %v7177_v10  ;;  %v5671_v11 = vpop.eup %5670  ;;  %5247 = vmatmul.msk.bf16.gmra.mxu0 %vm1194_vm2, %v5381_v53 }
 0x2c4   : > { %v2201_v40 = vpack.c.bf16 %v2087_v34, %v2085_v25  ;;  %v2202_v56 = vpack.c.bf16 %v2088_v46, %v2086_v43  ;;  %v2648_v47 = vpack.c.bf16 %v5671_v11, %v5669_v9  ;;  %5279 = vmatmul.msk.bf16.gmra.mxu1 %vm1194_vm2, %v5381_v53  ;;  %3566 = vmatmul.bf16.gmra.mxu2 %v2647_v61  ;;  %v2977_v4 = vunpack.c.l.bf16 %v2647_v61 }
 0x2c5   : > { %1890 = vmax.xlane.f32.xlu1 %v1889_v62  ;;  %v2979_v5 = vunpack.c.h.bf16 %v2647_v61 }
 0x2c6   : > { %v2277_v12 = vunpack.c.l.bf16 %v2201_v40  ;;  %v2279_v10 = vunpack.c.h.bf16 %v2201_v40  ;;  %v2278_v19 = vunpack.c.l.bf16 %v2202_v56  ;;  %3735 = vmatmul.bf16.gmra.mxu3 %v2648_v47  ;;  %v2280_v54 = vunpack.c.h.bf16 %v2202_v56 }
 0x2c7   : > { %v2978_v51 = vunpack.c.l.bf16 %v2648_v47  ;;  %v2980_v55 = vunpack.c.h.bf16 %v2648_v47  ;;  %v1849_v25 = vpop.xlane.xlu2 %1848 }
 0x2c8   : > { %v2429_v43 = vmul.f32 1.442695, %v2277_v12  ;;  %v2433_v9 = vmul.f32 1.442695, %v2279_v10  ;;  %v2431_v34 = vmul.f32 1.442695, %v2278_v19  ;;  %v7201_v46 = vmax.f32 %v7198_v39, %v1849_v25  ;;  %v7203_v53 = vpop.f32.mrf.mxu0 }
 0x2c9   : > { %v7205_v11 = vpop.f32.mrf.mxu1  ;;  %v2435_v61 = vmul.f32 1.442695, %v2280_v54  ;;  %v7207_v62 = vadd.f32 %v2978_v51, %v2977_v4  ;;  %v7209_v40 = vadd.f32 %v2980_v55, %v2979_v5  ;;  %v7216_v10 = vld [vmem:[#allocation3 + $0x60] sm:$0xff]  ;;  %v5382_v4 = vld [vmem:[#allocation2 + $0xb8] sm:$0xff] }
 0x2ca   : > { %9418 = vst [vmem:[#allocation32_spill] sm:$0xff] %v7201_v46  ;;  %v1892_v56 = vmax.f32 %v7203_v53, %v7205_v11  ;;  %5672 = vpow2.f32 %v2429_v43  ;;  %v2089_v19 = vsub.f32 %v6904_v16, %v7201_v46  ;;  %v2090_v54 = vsub.f32 %v6906_v17, %v7201_v46 }
 0x2cb   : > { %9419 = vst [vmem:[#allocation33_spill] sm:$0xff] %v7207_v62  ;;  %5674 = vpow2.f32 %v2433_v9 }
 0x2cc   : > { %9420 = vst [vmem:[#allocation34_spill] sm:$0xff] %v7209_v40  ;;  %1893 = vmax.xlane.f32.xlu2 %v1892_v56  ;;  %5676 = vpow2.f32 %v2431_v34 }
 0x2cd   : > { %4141 = vst [vmem:[#allocation3 + $0x108] sm:$0xff] %v7201_v46  ;;  %5678 = vpow2.f32 %v2435_v61  ;;  %v7240_v46 = vld [vmem:[#allocation3 + $0xe0] sm:$0xff] }
 0x2ce   : > { %9421 = vst [vmem:[#allocation35_spill] sm:$0xff] %v7216_v10 }
 0x2cf   : > { %v1852_v12 = vpop.xlane.xlu0 %1851  ;;  %9423 = vst [vmem:[#allocation37_spill] sm:$0xff] %v7240_v46 }
 0x2d0   : > { %v5673_v51 = vpop.eup %5672  ;;  %v7219_v55 = vmax.f32 %v7216_v10, %v1852_v12  ;;  %v7225_v25 = vpop.f32.mrf.mxu0 }
 0x2d1   : > { %v5675_v5 = vpop.eup %5674  ;;  %v7227_v43 = vpop.f32.mrf.mxu1 }
 0x2d2   : > { %9422 = vst [vmem:[#allocation36_spill] sm:$0xff] %v7219_v55  ;;  %v5677_v9 = vpop.eup %5676  ;;  %v2091_v34 = vsub.f32 %v6917_v30, %v7219_v55  ;;  %v2092_v61 = vsub.f32 %v6919_v31, %v7219_v55  ;;  %v2649_v16 = vpack.c.bf16 %v5675_v5, %v5673_v51  ;;  %v1895_v17 = vmax.f32 %v7225_v25, %v7227_v43 }
 0x2d3   : > { %4142 = vst [vmem:[#allocation3 + $0x60] sm:$0xff] %v7219_v55  ;;  %v5679_v12 = vpop.eup %5678  ;;  %5248 = vmatmul.msk.bf16.gmra.mxu0 %vm1194_vm2, %v5382_v4 }
 0x2d4   : > { %v2203_v47 = vpack.c.bf16 %v2091_v34, %v2089_v19  ;;  %v2204_v40 = vpack.c.bf16 %v2092_v61, %v2090_v54  ;;  %v2650_v62 = vpack.c.bf16 %v5679_v12, %v5677_v9  ;;  %5280 = vmatmul.msk.bf16.gmra.mxu1 %vm1194_vm2, %v5382_v4  ;;  %3571 = vmatmul.bf16.gmra.mxu2 %v2649_v16  ;;  %v2981_v30 = vunpack.c.l.bf16 %v2649_v16 }
 0x2d5   : > { %1896 = vmax.xlane.f32.xlu0 %v1895_v17  ;;  %v2983_v31 = vunpack.c.h.bf16 %v2649_v16 }
 0x2d6   : > { %v2281_v56 = vunpack.c.l.bf16 %v2203_v47  ;;  %v2283_v55 = vunpack.c.h.bf16 %v2203_v47  ;;  %v2282_v51 = vunpack.c.l.bf16 %v2204_v40  ;;  %3740 = vmatmul.bf16.gmra.mxu3 %v2650_v62  ;;  %v2284_v5 = vunpack.c.h.bf16 %v2204_v40 }
 0x2d7   : > { %v2982_v10 = vunpack.c.l.bf16 %v2650_v62  ;;  %v2984_v39 = vunpack.c.h.bf16 %v2650_v62  ;;  %v1855_v19 = vpop.xlane.xlu1 %1854 }
 0x2d8   : > { %v2437_v54 = vmul.f32 1.442695, %v2281_v56  ;;  %v2441_v9 = vmul.f32 1.442695, %v2283_v55  ;;  %v2439_v34 = vmul.f32 1.442695, %v2282_v51  ;;  %v7243_v61 = vmax.f32 %v7240_v46, %v1855_v19  ;;  %v7245_v4 = vpop.f32.mrf.mxu0 }
 0x2d9   : > { %v7247_v12 = vpop.f32.mrf.mxu1  ;;  %v2443_v16 = vmul.f32 1.442695, %v2284_v5  ;;  %v7249_v17 = vadd.f32 %v2982_v10, %v2981_v30  ;;  %v7251_v47 = vadd.f32 %v2984_v39, %v2983_v31  ;;  %v7258_v55 = vld [vmem:[#allocation3 + $0x188] sm:$0xff]  ;;  %v5383_v30 = vld [vmem:[#allocation2 + $0xc0] sm:$0xff] }
 0x2da   : > { %9424 = vst [vmem:[#allocation38_spill] sm:$0xff] %v7243_v61  ;;  %v1898_v40 = vmax.f32 %v7245_v4, %v7247_v12  ;;  %5680 = vpow2.f32 %v2437_v54  ;;  %v2093_v51 = vsub.f32 %v6931_v48, %v7243_v61  ;;  %v2094_v5 = vsub.f32 %v6933_v49, %v7243_v61 }
 0x2db   : > { %9425 = vst [vmem:[#allocation39_spill] sm:$0xff] %v7249_v17  ;;  %5682 = vpow2.f32 %v2441_v9 }
 0x2dc   : > { %9426 = vst [vmem:[#allocation40_spill] sm:$0xff] %v7251_v47  ;;  %1899 = vmax.xlane.f32.xlu1 %v1898_v40  ;;  %5684 = vpow2.f32 %v2439_v34 }
 0x2dd   : > { %4143 = vst [vmem:[#allocation3 + $0xe0] sm:$0xff] %v7243_v61  ;;  %5686 = vpow2.f32 %v2443_v16  ;;  %v7282_v61 = vld [vmem:[#allocation3 + $0x138] sm:$0xff] }
 0x2de   : > { %9427 = vst [vmem:[#allocation41_spill] sm:$0xff] %v7258_v55 }
 0x2df   : > { %v1858_v56 = vpop.xlane.xlu2 %1857 }
 0x2e0   : > { %v5681_v10 = vpop.eup %5680  ;;  %v7261_v39 = vmax.f32 %v7258_v55, %v1858_v56  ;;  %v7267_v19 = vpop.f32.mrf.mxu0 }
 0x2e1   : > { %v5683_v31 = vpop.eup %5682  ;;  %v7269_v54 = vpop.f32.mrf.mxu1 }
 0x2e2   : > { %9428 = vst [vmem:[#allocation42_spill] sm:$0xff] %v7261_v39  ;;  %v5685_v9 = vpop.eup %5684  ;;  %v2095_v34 = vsub.f32 %v6955_v1, %v7261_v39  ;;  %v2096_v16 = vsub.f32 %v6957_v2, %v7261_v39  ;;  %v2651_v48 = vpack.c.bf16 %v5683_v31, %v5681_v10  ;;  %v1901_v49 = vmax.f32 %v7267_v19, %v7269_v54 }
 0x2e3   : > { %4144 = vst [vmem:[#allocation3 + $0x188] sm:$0xff] %v7261_v39  ;;  %v5687_v56 = vpop.eup %5686  ;;  %5249 = vmatmul.msk.bf16.gmra.mxu0 %vm1194_vm2, %v5383_v30 }
 0x2e4   : > { %v2205_v62 = vpack.c.bf16 %v2095_v34, %v2093_v51  ;;  %v2206_v47 = vpack.c.bf16 %v2096_v16, %v2094_v5  ;;  %v2652_v17 = vpack.c.bf16 %v5687_v56, %v5685_v9  ;;  %5281 = vmatmul.msk.bf16.gmra.mxu1 %vm1194_vm2, %v5383_v30  ;;  %3576 = vmatmul.bf16.gmra.mxu2 %v2651_v48  ;;  %v2987_v1 = vunpack.c.h.bf16 %v2651_v48 }
 0x2e5   : > { %1902 = vmax.xlane.f32.xlu2 %v1901_v49  ;;  %v2985_v2 = vunpack.c.l.bf16 %v2651_v48 }
 0x2e6   : > { %v2285_v40 = vunpack.c.l.bf16 %v2205_v62  ;;  %v2287_v39 = vunpack.c.h.bf16 %v2205_v62  ;;  %v2286_v10 = vunpack.c.l.bf16 %v2206_v47  ;;  %3745 = vmatmul.bf16.gmra.mxu3 %v2652_v17  ;;  %v2288_v31 = vunpack.c.h.bf16 %v2206_v47 }
 0x2e7   : > { %v2988_v55 = vunpack.c.h.bf16 %v2652_v17  ;;  %v2986_v46 = vunpack.c.l.bf16 %v2652_v17 }
 0x2e8   : > { %v1861_v51 = vpop.xlane.xlu0 %1860  ;;  %v2445_v5 = vmul.f32 1.442695, %v2285_v40  ;;  %v2449_v9 = vmul.f32 1.442695, %v2287_v39  ;;  %v2447_v34 = vmul.f32 1.442695, %v2286_v10  ;;  %v7287_v30 = vpop.f32.mrf.mxu0  ;;  %v9432_v39 = vsub.f32 %v6912_v23, %v6915_v27 }
 0x2e9   : > { %v7285_v16 = vmax.f32 %v7282_v61, %v1861_v51  ;;  %v7289_v56 = vpop.f32.mrf.mxu1  ;;  %v2451_v48 = vmul.f32 1.442695, %v2288_v31  ;;  %v7291_v49 = vadd.f32 %v2988_v55, %v2987_v1  ;;  %v7293_v62 = vadd.f32 %v2986_v46, %v2985_v2  ;;  %v7303_v55 = vld [vmem:[#allocation3 + $0x140] sm:$0xff]  ;;  %v5384_v10 = vld [vmem:[#allocation2 + $0xc8] sm:$0xff] }
 0x2ea   : > { %v1904_v47 = vmax.f32 %v7287_v30, %v7289_v56  ;;  %5688 = vpow2.f32 %v2445_v5  ;;  %v2765_v40 = vmul.f32 1.442695, %v9432_v39  ;;  %9433 = vst [vmem:[#allocation46_spill] sm:$0xff] %v7303_v55 }
 0x2eb   : > { %9429 = vst [vmem:[#allocation43_spill] sm:$0xff] %v7285_v16  ;;  %5690 = vpow2.f32 %v2449_v9  ;;  %v2097_v51 = vsub.f32 %v6969_v44, %v7285_v16  ;;  %v2098_v5 = vsub.f32 %v6971_v50, %v7285_v16 }
 0x2ec   : > { %9430 = vst [vmem:[#allocation44_spill] sm:$0xff] %v7291_v49  ;;  %1905 = vmax.xlane.f32.xlu0 %v1904_v47  ;;  %5692 = vpow2.f32 %v2447_v34 }
 0x2ed   : > { %9431 = vst [vmem:[#allocation45_spill] sm:$0xff] %v7293_v62  ;;  %5694 = vpow2.f32 %v2451_v48 }
 0x2ee   : > { %4145 = vst [vmem:[#allocation3 + $0x138] sm:$0xff] %v7285_v16  ;;  %5696 = vpow2.f32 %v2765_v40  ;;  %v9435_v40 = vsub.f32 %v6926_v38, %v6929_v45 }
 0x2ef   : > { %v1864_v46 = vpop.xlane.xlu1 %1863 }
 0x2f0   : > { %v5689_v1 = vpop.eup %5688  ;;  %v7306_v2 = vmax.f32 %v7303_v55, %v1864_v46  ;;  %v7312_v9 = vpop.f32.mrf.mxu0  ;;  %v2767_v46 = vmul.f32 1.442695, %v9435_v40 }
 0x2f1   : > { %v5691_v31 = vpop.eup %5690  ;;  %v7314_v23 = vpop.f32.mrf.mxu1 }
 0x2f2   : > { %9434 = vst [vmem:[#allocation47_spill] sm:$0xff] %v7306_v2  ;;  %v5693_v27 = vpop.eup %5692  ;;  %v2099_v34 = vsub.f32 %v6993_v24, %v7306_v2  ;;  %v2100_v48 = vsub.f32 %v6995_v52, %v7306_v2  ;;  %v2653_v44 = vpack.c.bf16 %v5691_v31, %v5689_v1  ;;  %v1907_v50 = vmax.f32 %v7312_v9, %v7314_v23  ;;  %v7330_v1 = vld [vmem:[#allocation3 + $0x80] sm:$0xff] }
 0x2f3   : > { %4146 = vst [vmem:[#allocation3 + $0x140] sm:$0xff] %v7306_v2  ;;  %v5695_v39 = vpop.eup %5694  ;;  %5250 = vmatmul.msk.bf16.gmra.mxu0 %vm1194_vm2, %v5384_v10  ;;  %5698 = vpow2.f32 %v2767_v46 }
 0x2f4   : > { %v2207_v17 = vpack.c.bf16 %v2099_v34, %v2097_v51  ;;  %v2208_v62 = vpack.c.bf16 %v2100_v48, %v2098_v5  ;;  %v2654_v24 = vpack.c.bf16 %v5695_v39, %v5693_v27  ;;  %5282 = vmatmul.msk.bf16.gmra.mxu1 %vm1194_vm2, %v5384_v10  ;;  %3581 = vmatmul.bf16.gmra.mxu2 %v2653_v44  ;;  %v2989_v52 = vunpack.c.l.bf16 %v2653_v44  ;;  %v7332_v55 = vpop.eup %5696  ;;  %v3871_v27 = vld [vmem:[#allocation5] sm:$0xff] }
 0x2f5   : > { %1908 = vmax.xlane.f32.xlu1 %v1907_v50  ;;  %v2991_v47 = vunpack.c.h.bf16 %v2653_v44  ;;  %9436 = vst [vmem:[#allocation48_spill] sm:$0xff] %v7332_v55 }
 0x2f6   : > { %v2289_v31 = vunpack.c.l.bf16 %v2207_v17  ;;  %v2291_v49 = vunpack.c.h.bf16 %v2207_v17  ;;  %v2290_v2 = vunpack.c.l.bf16 %v2208_v62  ;;  %3750 = vmatmul.bf16.gmra.mxu3 %v2654_v24  ;;  %v2292_v38 = vunpack.c.h.bf16 %v2208_v62 }
 0x2f7   : > { %v2990_v45 = vunpack.c.l.bf16 %v2654_v24  ;;  %v2992_v51 = vunpack.c.h.bf16 %v2654_v24  ;;  %v3542_v5 = vpop.f32.mrf.mxu2 }
 0x2f8   : > { %v1867_v34 = vpop.xlane.xlu2 %1866  ;;  %v2453_v10 = vmul.f32 1.442695, %v2289_v31  ;;  %v2457_v48 = vmul.f32 1.442695, %v2291_v49  ;;  %v7337_v44 = vpop.f32.mrf.mxu0  ;;  %v2455_v17 = vmul.f32 1.442695, %v2290_v2  ;;  %v3935_v49 = vmul.f32 %v7332_v55, %v3871_v27 }
 0x2f9   : > { %v7335_v39 = vmax.f32 %v7330_v1, %v1867_v34  ;;  %v7339_v50 = vpop.f32.mrf.mxu1  ;;  %v7341_v40 = vadd.f32 %v2990_v45, %v2989_v52  ;;  %v7343_v16 = vadd.f32 %v2992_v51, %v2991_v47  ;;  %v3711_v62 = vpop.f32.mrf.mxu3  ;;  %v2459_v24 = vmul.f32 1.442695, %v2292_v38  ;;  %v7354_v45 = vld [vmem:[#allocation3 + $0x1a8] sm:$0xff] }
 0x2fa   : > { %v1910_v46 = vmax.f32 %v7337_v44, %v7339_v50  ;;  %5700 = vpow2.f32 %v2453_v10  ;;  %v3712_v31 = vadd.f32 %v3711_v62, %v3542_v5  ;;  %v9439_v2 = vsub.f32 %v6950_v59, %v6953_v15  ;;  %9440 = vst [vmem:[#allocation51_spill] sm:$0xff] %v7354_v45  ;;  %v7356_v51 = vpop.eup %5698  ;;  %v3872_v10 = vld [vmem:[#allocation5 + $0x8] sm:$0xff] }
 0x2fb   : > { %9437 = vst [vmem:[#allocation49_spill] sm:$0xff] %v7341_v40  ;;  %5702 = vpow2.f32 %v2457_v48  ;;  %v5385_v48 = vld [vmem:[#allocation2 + $0xd0] sm:$0xff]  ;;  %v2101_v59 = vsub.f32 %v7011_v22, %v7335_v39  ;;  %v2102_v15 = vsub.f32 %v7013_v8, %v7335_v39 }
 0x2fc   : > { %9438 = vst [vmem:[#allocation50_spill] sm:$0xff] %v7343_v16  ;;  %1911 = vmax.xlane.f32.xlu2 %v1910_v46  ;;  %v2769_v47 = vmul.f32 1.442695, %v9439_v2  ;;  %v3999_v52 = vadd.f32 %v3935_v49, %v3712_v31  ;;  %5704 = vpow2.f32 %v2455_v17 }
 0x2fd   : > { %4147 = vst [vmem:[#allocation3 + $0x80] sm:$0xff] %v7335_v39  ;;  %5706 = vpow2.f32 %v2459_v24 }
 0x2fe   : > { %9441 = vst [vmem:[#allocation52_spill] sm:$0xff] %v7356_v51  ;;  %5708 = vpow2.f32 %v2769_v47 }
 0x2ff   : > { %4063 = vst.msk [vmem:[#allocation5] sm:$0xff] %vm1194_vm2, %v3999_v52  ;;  %v1870_v38 = vpop.xlane.xlu0 %1869  ;;  %v3544_v27 = vpop.f32.mrf.mxu2 }
 0x300   : > { %v5701_v5 = vpop.eup %5700  ;;  %v7360_v62 = vmax.f32 %v7354_v45, %v1870_v38  ;;  %v7366_v17 = vpop.f32.mrf.mxu0  ;;  %v3936_v38 = vmul.f32 %v7356_v51, %v3872_v10 }
 0x301   : > { %v7368_v46 = vpop.f32.mrf.mxu1  ;;  %v5703_v24 = vpop.eup %5702 }
 0x302   : > { %9442 = vst [vmem:[#allocation53_spill] sm:$0xff] %v7360_v62  ;;  %v3713_v31 = vpop.f32.mrf.mxu3  ;;  %v2103_v49 = vsub.f32 %v7035_v6, %v7360_v62  ;;  %v2104_v2 = vsub.f32 %v7037_v20, %v7360_v62  ;;  %v1913_v22 = vmax.f32 %v7366_v17, %v7368_v46  ;;  %v5705_v8 = vpop.eup %5704  ;;  %v2655_v34 = vpack.c.bf16 %v5703_v24, %v5701_v5 }
 0x303   : > { %4148 = vst [vmem:[#allocation3 + $0x1a8] sm:$0xff] %v7360_v62  ;;  %v3714_v52 = vadd.f32 %v3713_v31, %v3544_v27  ;;  %v5707_v55 = vpop.eup %5706  ;;  %v9443_v6 = vsub.f32 %v6964_v13, %v6967_v41  ;;  %5251 = vmatmul.msk.bf16.gmra.mxu0 %vm1194_vm2, %v5385_v48  ;;  %v7385_v31 = vld [vmem:[#allocation3 + $0x1b8] sm:$0xff] }
 0x304   : > { %v2209_v40 = vpack.c.bf16 %v2103_v49, %v2101_v59  ;;  %v2210_v20 = vpack.c.bf16 %v2104_v2, %v2102_v15  ;;  %5283 = vmatmul.msk.bf16.gmra.mxu1 %vm1194_vm2, %v5385_v48  ;;  %3586 = vmatmul.bf16.gmra.mxu2 %v2655_v34  ;;  %v2656_v62 = vpack.c.bf16 %v5707_v55, %v5705_v8  ;;  %v2993_v45 = vunpack.c.l.bf16 %v2655_v34  ;;  %v7387_v51 = vpop.eup %5708  ;;  %v3873_v15 = vld [vmem:[#allocation5 + $0x10] sm:$0xff] }
 0x305   : > { %v2771_v16 = vmul.f32 1.442695, %v9443_v6  ;;  %v4000_v47 = vadd.f32 %v3936_v38, %v3714_v52  ;;  %1914 = vmax.xlane.f32.xlu0 %v1913_v22  ;;  %v2995_v27 = vunpack.c.h.bf16 %v2655_v34  ;;  %9444 = vst [vmem:[#allocation54_spill] sm:$0xff] %v7387_v51 }
 0x306   : > { %v2293_v5 = vunpack.c.l.bf16 %v2209_v40  ;;  %v2295_v10 = vunpack.c.h.bf16 %v2209_v40  ;;  %v2294_v24 = vunpack.c.l.bf16 %v2210_v20  ;;  %3755 = vmatmul.bf16.gmra.mxu3 %v2656_v62  ;;  %v2296_v13 = vunpack.c.h.bf16 %v2210_v20 }
 0x307   : > { %4064 = vst.msk [vmem:[#allocation5 + $0x8] sm:$0xff] %vm1194_vm2, %v4000_v47  ;;  %v2994_v41 = vunpack.c.l.bf16 %v2656_v62  ;;  %v2996_v59 = vunpack.c.h.bf16 %v2656_v62  ;;  %5710 = vpow2.f32 %v2771_v16  ;;  %v3547_v48 = vpop.f32.mrf.mxu2  ;;  %v3937_v20 = vmul.f32 %v7387_v51, %v3873_v15  ;;  %v3874_v15 = vld [vmem:[#allocation5 + $0x18] sm:$0xff] }
 0x308   : > { %v1873_v55 = vpop.xlane.xlu1 %1872  ;;  %v2461_v49 = vmul.f32 1.442695, %v2293_v5  ;;  %v2465_v2 = vmul.f32 1.442695, %v2295_v10  ;;  %v7393_v22 = vpop.f32.mrf.mxu0  ;;  %v2463_v8 = vmul.f32 1.442695, %v2294_v24 }
 0x309   : > { %v7391_v34 = vmax.f32 %v7385_v31, %v1873_v55  ;;  %v7395_v40 = vpop.f32.mrf.mxu1  ;;  %v7397_v52 = vadd.f32 %v2994_v41, %v2993_v45  ;;  %v7399_v47 = vadd.f32 %v2996_v59, %v2995_v27  ;;  %v2467_v62 = vmul.f32 1.442695, %v2296_v13  ;;  %v7410_v24 = vld [vmem:[#allocation3 + $0x28] sm:$0xff]  ;;  %v9450_v5 = vld [vmem:[#allocation8_spill] sm:$0xff] }
 0x30a   : > { %v3716_v38 = vpop.f32.mrf.mxu3  ;;  %v1916_v16 = vmax.f32 %v7393_v22, %v7395_v40  ;;  %5712 = vpow2.f32 %v2461_v49  ;;  %v9447_v45 = vsub.f32 %v6988_v21, %v6991_v60  ;;  %v5386_v49 = vld [vmem:[#allocation2 + $0xd8] sm:$0xff] }
 0x30b   : > { %9445 = vst [vmem:[#allocation55_spill] sm:$0xff] %v7397_v52  ;;  %v3717_v6 = vadd.f32 %v3716_v38, %v3547_v48  ;;  %5714 = vpow2.f32 %v2465_v2  ;;  %v2105_v60 = vsub.f32 %v7057_v0, %v7391_v34  ;;  %v2106_v21 = vsub.f32 %v7059_v29, %v7391_v34 }
 0x30c   : > { %9446 = vst [vmem:[#allocation56_spill] sm:$0xff] %v7399_v47  ;;  %1917 = vmax.xlane.f32.xlu1 %v1916_v16  ;;  %v2773_v27 = vmul.f32 1.442695, %v9447_v45  ;;  %5716 = vpow2.f32 %v2463_v8 }
 0x30d   : > { %4149 = vst [vmem:[#allocation3 + $0x1b8] sm:$0xff] %v7391_v34  ;;  %v4001_v10 = vadd.f32 %v3937_v20, %v3717_v6  ;;  %v7412_v41 = vpop.eup %5710  ;;  %5718 = vpow2.f32 %v2467_v62 }
 0x30e   : > { %9448 = vst [vmem:[#allocation57_spill] sm:$0xff] %v7412_v41  ;;  %5720 = vpow2.f32 %v2773_v27  ;;  %v3938_v27 = vmul.f32 %v7412_v41, %v3874_v15 }
 0x30f   : > { %4065 = vst.msk [vmem:[#allocation5 + $0x10] sm:$0xff] %vm1194_vm2, %v4001_v10  ;;  %v1876_v13 = vpop.xlane.xlu2 %1875  ;;  %v3549_v48 = vpop.f32.mrf.mxu2 }
 0x310   : > { %v5713_v59 = vpop.eup %5712  ;;  %v7416_v55 = vmax.f32 %v7410_v24, %v1876_v13  ;;  %v7422_v2 = vpop.f32.mrf.mxu0 }
 0x311   : > { %v7424_v8 = vpop.f32.mrf.mxu1  ;;  %v5715_v38 = vpop.eup %5714 }
 0x312   : > { %9449 = vst [vmem:[#allocation58_spill] sm:$0xff] %v7416_v55  ;;  %v3718_v16 = vpop.f32.mrf.mxu3  ;;  %v2107_v62 = vsub.f32 %v7077_v33, %v7416_v55  ;;  %v2108_v6 = vsub.f32 %v7079_v32, %v7416_v55  ;;  %v1919_v0 = vmax.f32 %v7422_v2, %v7424_v8  ;;  %v5717_v29 = vpop.eup %5716  ;;  %v2657_v10 = vpack.c.bf16 %v5715_v38, %v5713_v59 }
 0x313   : > { %4150 = vst [vmem:[#allocation3 + $0x28] sm:$0xff] %v7416_v55  ;;  %v3719_v45 = vadd.f32 %v3718_v16, %v3549_v48  ;;  %v5719_v13 = vpop.eup %5718  ;;  %v9451_v33 = vsub.f32 %v7006_v63, %v9450_v5  ;;  %5252 = vmatmul.msk.bf16.gmra.mxu0 %vm1194_vm2, %v5386_v49  ;;  %v7441_v16 = vld [vmem:[#allocation3 + $0x1e8] sm:$0xff] }
 0x314   : > { %v2211_v47 = vpack.c.bf16 %v2107_v62, %v2105_v60  ;;  %v2212_v32 = vpack.c.bf16 %v2108_v6, %v2106_v21  ;;  %5284 = vmatmul.msk.bf16.gmra.mxu1 %vm1194_vm2, %v5386_v49  ;;  %3591 = vmatmul.bf16.gmra.mxu2 %v2657_v10  ;;  %v2658_v52 = vpack.c.bf16 %v5719_v13, %v5717_v29  ;;  %v2999_v55 = vunpack.c.h.bf16 %v2657_v10  ;;  %v7443_v41 = vpop.eup %5720  ;;  %v3875_v21 = vld [vmem:[#allocation5 + $0x20] sm:$0xff] }
 0x315   : > { %v2775_v51 = vmul.f32 1.442695, %v9451_v33  ;;  %v4002_v20 = vadd.f32 %v3938_v27, %v3719_v45  ;;  %1920 = vmax.xlane.f32.xlu2 %v1919_v0  ;;  %v2997_v48 = vunpack.c.l.bf16 %v2657_v10  ;;  %9452 = vst [vmem:[#allocation8_spill] sm:$0xff] %v7443_v41 }
 0x316   : > { %v2297_v59 = vunpack.c.l.bf16 %v2211_v47  ;;  %v2299_v15 = vunpack.c.h.bf16 %v2211_v47  ;;  %v2298_v38 = vunpack.c.l.bf16 %v2212_v32  ;;  %3760 = vmatmul.bf16.gmra.mxu3 %v2658_v52  ;;  %v2300_v63 = vunpack.c.h.bf16 %v2212_v32 }
 0x317   : > { %4066 = vst.msk [vmem:[#allocation5 + $0x18] sm:$0xff] %vm1194_vm2, %v4002_v20  ;;  %v3000_v5 = vunpack.c.h.bf16 %v2658_v52  ;;  %v2998_v60 = vunpack.c.l.bf16 %v2658_v52  ;;  %5722 = vpow2.f32 %v2775_v51  ;;  %v3552_v49 = vpop.f32.mrf.mxu2  ;;  %v3939_v32 = vmul.f32 %v7443_v41, %v3875_v21  ;;  %v3876_v21 = vld [vmem:[#allocation5 + $0x28] sm:$0xff]  ;;  %v9460_v41 = vld [vmem:[#allocation12_spill] sm:$0xff] }
 0x318   : > { %v1879_v62 = vpop.xlane.xlu0 %1878  ;;  %v2469_v6 = vmul.f32 1.442695, %v2297_v59  ;;  %v2473_v0 = vmul.f32 1.442695, %v2299_v15  ;;  %v7449_v45 = vpop.f32.mrf.mxu0  ;;  %v2471_v27 = vmul.f32 1.442695, %v2298_v38 }
 0x319   : > { %v7447_v29 = vmax.f32 %v7441_v16, %v1879_v62  ;;  %v7451_v47 = vpop.f32.mrf.mxu1  ;;  %v7453_v10 = vadd.f32 %v3000_v5, %v2999_v55  ;;  %v7455_v20 = vadd.f32 %v2998_v60, %v2997_v48  ;;  %v2475_v52 = vmul.f32 1.442695, %v2300_v63  ;;  %v7466_v38 = vld [vmem:[#allocation3 + $0xf8] sm:$0xff]  ;;  %v9459_v59 = vld [vmem:[#allocation11_spill] sm:$0xff] }
 0x31a   : > { %v3721_v13 = vpop.f32.mrf.mxu3  ;;  %v1922_v51 = vmax.f32 %v7449_v45, %v7451_v47  ;;  %5724 = vpow2.f32 %v2469_v6  ;;  %v9455_v55 = vsub.f32 %v7030_v28, %v7033_v3  ;;  %9456 = vst [vmem:[#allocation61_spill] sm:$0xff] %v7466_v38  ;;  %v5387_v6 = vld [vmem:[#allocation2 + $0xe0] sm:$0xff] }
 0x31b   : > { %9453 = vst [vmem:[#allocation59_spill] sm:$0xff] %v7453_v10  ;;  %v3722_v33 = vadd.f32 %v3721_v13, %v3552_v49  ;;  %5726 = vpow2.f32 %v2473_v0  ;;  %v2109_v3 = vsub.f32 %v7099_v14, %v7447_v29  ;;  %v2110_v28 = vsub.f32 %v7101_v26, %v7447_v29 }
 0x31c   : > { %9454 = vst [vmem:[#allocation60_spill] sm:$0xff] %v7455_v20  ;;  %1923 = vmax.xlane.f32.xlu0 %v1922_v51  ;;  %v2777_v48 = vmul.f32 1.442695, %v9455_v55  ;;  %5728 = vpow2.f32 %v2471_v27 }
 0x31d   : > { %4151 = vst [vmem:[#allocation3 + $0x1e8] sm:$0xff] %v7447_v29  ;;  %v4003_v15 = vadd.f32 %v3939_v32, %v3722_v33  ;;  %v7468_v5 = vpop.eup %5722  ;;  %5730 = vpow2.f32 %v2475_v52 }
 0x31e   : > { %9457 = vst [vmem:[#allocation62_spill] sm:$0xff] %v7468_v5  ;;  %5732 = vpow2.f32 %v2777_v48  ;;  %v3940_v48 = vmul.f32 %v7468_v5, %v3876_v21 }
 0x31f   : > { %4067 = vst.msk [vmem:[#allocation5 + $0x20] sm:$0xff] %vm1194_vm2, %v4003_v15  ;;  %v1882_v63 = vpop.xlane.xlu1 %1881  ;;  %v3554_v49 = vpop.f32.mrf.mxu2 }
 0x320   : > { %v5725_v60 = vpop.eup %5724  ;;  %v7472_v62 = vmax.f32 %v7466_v38, %v1882_v63  ;;  %v7478_v0 = vpop.f32.mrf.mxu0 }
 0x321   : > { %v7480_v27 = vpop.f32.mrf.mxu1  ;;  %v5727_v13 = vpop.eup %5726 }
 0x322   : > { %9458 = vst [vmem:[#allocation63_spill] sm:$0xff] %v7472_v62  ;;  %v3723_v51 = vpop.f32.mrf.mxu3  ;;  %v2111_v52 = vsub.f32 %v7119_v35, %v7472_v62  ;;  %v2112_v33 = vsub.f32 %v7121_v18, %v7472_v62  ;;  %v1925_v14 = vmax.f32 %v7478_v0, %v7480_v27  ;;  %v5729_v26 = vpop.eup %5728  ;;  %v2659_v15 = vpack.c.bf16 %v5727_v13, %v5725_v60 }
 0x323   : > { %4152 = vst [vmem:[#allocation3 + $0xf8] sm:$0xff] %v7472_v62  ;;  %v3724_v55 = vadd.f32 %v3723_v51, %v3554_v49  ;;  %v5731_v63 = vpop.eup %5730  ;;  %v9461_v35 = vsub.f32 %v9459_v59, %v9460_v41  ;;  %5253 = vmatmul.msk.bf16.gmra.mxu0 %vm1194_vm2, %v5387_v6  ;;  %v7497_v51 = vld [vmem:[#allocation3 + $0x160] sm:$0xff] }
 0x324   : > { %v2213_v10 = vpack.c.bf16 %v2111_v52, %v2109_v3  ;;  %v2214_v18 = vpack.c.bf16 %v2112_v33, %v2110_v28  ;;  %5285 = vmatmul.msk.bf16.gmra.mxu1 %vm1194_vm2, %v5387_v6  ;;  %3596 = vmatmul.bf16.gmra.mxu2 %v2659_v15  ;;  %v2660_v62 = vpack.c.bf16 %v5731_v63, %v5729_v26  ;;  %v3001_v38 = vunpack.c.l.bf16 %v2659_v15  ;;  %v7499_v5 = vpop.eup %5732  ;;  %v3877_v28 = vld [vmem:[#allocation5 + $0x30] sm:$0xff] }
 0x325   : > { %v2779_v20 = vmul.f32 1.442695, %v9461_v35  ;;  %v4004_v32 = vadd.f32 %v3940_v48, %v3724_v55  ;;  %1926 = vmax.xlane.f32.xlu1 %v1925_v14  ;;  %v3003_v49 = vunpack.c.h.bf16 %v2659_v15  ;;  %9462 = vst [vmem:[#allocation11_spill] sm:$0xff] %v7497_v51 }
 0x326   : > { %v2301_v60 = vunpack.c.l.bf16 %v2213_v10  ;;  %v2303_v21 = vunpack.c.h.bf16 %v2213_v10  ;;  %v2302_v13 = vunpack.c.l.bf16 %v2214_v18  ;;  %9463 = vst [vmem:[#allocation12_spill] sm:$0xff] %v7499_v5  ;;  %3765 = vmatmul.bf16.gmra.mxu3 %v2660_v62  ;;  %v2304_v41 = vunpack.c.h.bf16 %v2214_v18 }
 0x327   : > { %4068 = vst.msk [vmem:[#allocation5 + $0x28] sm:$0xff] %vm1194_vm2, %v4004_v32  ;;  %v3002_v59 = vunpack.c.l.bf16 %v2660_v62  ;;  %v3004_v3 = vunpack.c.h.bf16 %v2660_v62  ;;  %5734 = vpow2.f32 %v2779_v20  ;;  %v3557_v6 = vpop.f32.mrf.mxu2  ;;  %v3941_v18 = vmul.f32 %v7499_v5, %v3877_v28 }
 0x328   : > { %v1885_v52 = vpop.xlane.xlu2 %1884  ;;  %v2477_v33 = vmul.f32 1.442695, %v2301_v60  ;;  %v2481_v14 = vmul.f32 1.442695, %v2303_v21  ;;  %v7505_v55 = vpop.f32.mrf.mxu0  ;;  %v2479_v48 = vmul.f32 1.442695, %v2302_v13 }
 0x329   : > { %v7503_v26 = vmax.f32 %v7497_v51, %v1885_v52  ;;  %v7507_v10 = vpop.f32.mrf.mxu1  ;;  %v7509_v15 = vadd.f32 %v3002_v59, %v3001_v38  ;;  %v7511_v32 = vadd.f32 %v3004_v3, %v3003_v49  ;;  %v2483_v62 = vmul.f32 1.442695, %v2304_v41  ;;  %v9467_v38 = vld [vmem:[#allocation13_spill] sm:$0xff]  ;;  %v9468_v21 = vld [vmem:[#allocation14_spill] sm:$0xff]  ;;  %v7522_v3 = vld [vmem:[#allocation3 + $0x30] sm:$0xff] }
 0x32a   : > { %v3726_v63 = vpop.f32.mrf.mxu3  ;;  %v1928_v20 = vmax.f32 %v7505_v55, %v7507_v10  ;;  %5736 = vpow2.f32 %v2477_v33  ;;  %v9469_v49 = vsub.f32 %v9467_v38, %v9468_v21  ;;  %9470 = vst [vmem:[#allocation13_spill] sm:$0xff] %v7522_v3  ;;  %v3878_v33 = vld [vmem:[#allocation5 + $0x38] sm:$0xff] }
 0x32b   : > { %9464 = vst [vmem:[#allocation64_spill] sm:$0xff] %v7503_v26  ;;  %v3727_v35 = vadd.f32 %v3726_v63, %v3557_v6  ;;  %5738 = vpow2.f32 %v2481_v14  ;;  %v5388_v14 = vld [vmem:[#allocation2 + $0xe8] sm:$0xff] }
 0x32c   : > { %9465 = vst [vmem:[#allocation65_spill] sm:$0xff] %v7509_v15  ;;  %1929 = vmax.xlane.f32.xlu2 %v1928_v20  ;;  %v2781_v13 = vmul.f32 1.442695, %v9469_v49  ;;  %5740 = vpow2.f32 %v2479_v48  ;;  %v2113_v20 = vsub.f32 %v7141_v58, %v7503_v26  ;;  %v2114_v48 = vsub.f32 %v7143_v7, %v7503_v26  ;;  %v9474_v15 = vld [vmem:[#allocation18_spill] sm:$0xff] }
 0x32d   : > { %9466 = vst [vmem:[#allocation66_spill] sm:$0xff] %v7511_v32  ;;  %v4005_v59 = vadd.f32 %v3941_v18, %v3727_v35  ;;  %v7524_v52 = vpop.eup %5734  ;;  %5742 = vpow2.f32 %v2483_v62  ;;  %v9473_v32 = vld [vmem:[#allocation17_spill] sm:$0xff] }
 0x32e   : > { %4153 = vst [vmem:[#allocation3 + $0x160] sm:$0xff] %v7503_v26  ;;  %5744 = vpow2.f32 %v2781_v13 }
 0x32f   : > { %9471 = vst [vmem:[#allocation14_spill] sm:$0xff] %v7524_v52  ;;  %v1888_v41 = vpop.xlane.xlu0 %1887  ;;  %v3559_v28 = vpop.f32.mrf.mxu2 }
 0x330   : > { %4069 = vst.msk [vmem:[#allocation5 + $0x30] sm:$0xff] %vm1194_vm2, %v4005_v59  ;;  %v5737_v6 = vpop.eup %5736  ;;  %v7528_v63 = vmax.f32 %v7522_v3, %v1888_v41  ;;  %v7534_v35 = vpop.f32.mrf.mxu0  ;;  %v3942_v41 = vmul.f32 %v7524_v52, %v3878_v33 }
 0x331   : > { %v7536_v62 = vpop.f32.mrf.mxu1  ;;  %v5739_v18 = vpop.eup %5738 }
 0x332   : > { %9472 = vst [vmem:[#allocation67_spill] sm:$0xff] %v7528_v63  ;;  %v3728_v38 = vpop.f32.mrf.mxu3  ;;  %v2115_v21 = vsub.f32 %v7161_v42, %v7528_v63  ;;  %v2116_v49 = vsub.f32 %v7163_v37, %v7528_v63  ;;  %v1931_v58 = vmax.f32 %v7534_v35, %v7536_v62  ;;  %v5741_v7 = vpop.eup %5740  ;;  %v2661_v60 = vpack.c.bf16 %v5739_v18, %v5737_v6 }
 0x333   : > { %4154 = vst [vmem:[#allocation3 + $0x30] sm:$0xff] %v7528_v63  ;;  %v3729_v59 = vadd.f32 %v3728_v38, %v3559_v28  ;;  %v5743_v5 = vpop.eup %5742  ;;  %v9475_v42 = vsub.f32 %v9473_v32, %v9474_v15  ;;  %5254 = vmatmul.msk.bf16.gmra.mxu0 %vm1194_vm2, %v5388_v14  ;;  %v7553_v38 = vld [vmem:[#allocation3 + $0x1e0] sm:$0xff] }
 0x334   : > { %v2215_v51 = vpack.c.bf16 %v2115_v21, %v2113_v20  ;;  %v2216_v37 = vpack.c.bf16 %v2116_v49, %v2114_v48  ;;  %5286 = vmatmul.msk.bf16.gmra.mxu1 %vm1194_vm2, %v5388_v14  ;;  %3601 = vmatmul.bf16.gmra.mxu2 %v2661_v60  ;;  %v2662_v63 = vpack.c.bf16 %v5743_v5, %v5741_v7  ;;  %v3005_v3 = vunpack.c.l.bf16 %v2661_v60  ;;  %v7555_v52 = vpop.eup %5744  ;;  %v3879_v48 = vld [vmem:[#allocation5 + $0x40] sm:$0xff] }
 0x335   : > { %v2783_v26 = vmul.f32 1.442695, %v9475_v42  ;;  %v4006_v13 = vadd.f32 %v3942_v41, %v3729_v59  ;;  %1932 = vmax.xlane.f32.xlu0 %v1931_v58  ;;  %v3007_v28 = vunpack.c.h.bf16 %v2661_v60  ;;  %9476 = vst [vmem:[#allocation17_spill] sm:$0xff] %v7553_v38 }
 0x336   : > { %v2305_v6 = vunpack.c.l.bf16 %v2215_v51  ;;  %v2307_v33 = vunpack.c.h.bf16 %v2215_v51  ;;  %v2306_v18 = vunpack.c.l.bf16 %v2216_v37  ;;  %9477 = vst [vmem:[#allocation18_spill] sm:$0xff] %v7555_v52  ;;  %3770 = vmatmul.bf16.gmra.mxu3 %v2662_v63  ;;  %v2308_v15 = vunpack.c.h.bf16 %v2216_v37 }
 0x337   : > { %4070 = vst.msk [vmem:[#allocation5 + $0x38] sm:$0xff] %vm1194_vm2, %v4006_v13  ;;  %v3006_v32 = vunpack.c.l.bf16 %v2662_v63  ;;  %v3008_v20 = vunpack.c.h.bf16 %v2662_v63  ;;  %5746 = vpow2.f32 %v2783_v26  ;;  %v3562_v14 = vpop.f32.mrf.mxu2  ;;  %v3943_v37 = vmul.f32 %v7555_v52, %v3879_v48 }
 0x338   : > { %v1891_v5 = vpop.xlane.xlu1 %1890  ;;  %v2485_v21 = vmul.f32 1.442695, %v2305_v6  ;;  %v2489_v49 = vmul.f32 1.442695, %v2307_v33  ;;  %v7561_v58 = vpop.f32.mrf.mxu0  ;;  %v2487_v7 = vmul.f32 1.442695, %v2306_v18 }
 0x339   : > { %v7559_v60 = vmax.f32 %v7553_v38, %v1891_v5  ;;  %v7563_v51 = vpop.f32.mrf.mxu1  ;;  %v7565_v59 = vadd.f32 %v3006_v32, %v3005_v3  ;;  %v7567_v13 = vadd.f32 %v3008_v20, %v3007_v28  ;;  %v2491_v63 = vmul.f32 1.442695, %v2308_v15  ;;  %v9481_v3 = vld [vmem:[#allocation19_spill] sm:$0xff]  ;;  %v9482_v33 = vld [vmem:[#allocation20_spill] sm:$0xff]  ;;  %v7578_v20 = vld [vmem:[#allocation3] sm:$0xff] }
 0x33a   : > { %v3731_v41 = vpop.f32.mrf.mxu3  ;;  %v1934_v26 = vmax.f32 %v7561_v58, %v7563_v51  ;;  %5748 = vpow2.f32 %v2485_v21  ;;  %v9483_v28 = vsub.f32 %v9481_v3, %v9482_v33  ;;  %9484 = vst [vmem:[#allocation19_spill] sm:$0xff] %v7578_v20  ;;  %v3880_v21 = vld [vmem:[#allocation5 + $0x48] sm:$0xff] }
 0x33b   : > { %9478 = vst [vmem:[#allocation68_spill] sm:$0xff] %v7559_v60  ;;  %v3732_v42 = vadd.f32 %v3731_v41, %v3562_v14  ;;  %5750 = vpow2.f32 %v2489_v49  ;;  %v5389_v49 = vld [vmem:[#allocation2 + $0xf0] sm:$0xff] }
 0x33c   : > { %9479 = vst [vmem:[#allocation69_spill] sm:$0xff] %v7565_v59  ;;  %1935 = vmax.xlane.f32.xlu1 %v1934_v26  ;;  %v2785_v18 = vmul.f32 1.442695, %v9483_v28  ;;  %5752 = vpow2.f32 %v2487_v7  ;;  %v2117_v26 = vsub.f32 %v7183_v57, %v7559_v60  ;;  %v2118_v7 = vsub.f32 %v7185_v36, %v7559_v60  ;;  %v9488_v59 = vld [vmem:[#allocation24_spill] sm:$0xff] }
 0x33d   : > { %9480 = vst [vmem:[#allocation70_spill] sm:$0xff] %v7567_v13  ;;  %v4007_v32 = vadd.f32 %v3943_v37, %v3732_v42  ;;  %v7580_v5 = vpop.eup %5746  ;;  %5754 = vpow2.f32 %v2491_v63  ;;  %v9487_v13 = vld [vmem:[#allocation23_spill] sm:$0xff] }
 0x33e   : > { %4155 = vst [vmem:[#allocation3 + $0x1e0] sm:$0xff] %v7559_v60  ;;  %5756 = vpow2.f32 %v2785_v18 }
 0x33f   : > { %9485 = vst [vmem:[#allocation20_spill] sm:$0xff] %v7580_v5  ;;  %v1894_v15 = vpop.xlane.xlu2 %1893  ;;  %v3564_v48 = vpop.f32.mrf.mxu2 }
 0x340   : > { %4071 = vst.msk [vmem:[#allocation5 + $0x40] sm:$0xff] %vm1194_vm2, %v4007_v32  ;;  %v5749_v14 = vpop.eup %5748  ;;  %v7584_v41 = vmax.f32 %v7578_v20, %v1894_v15  ;;  %v7590_v42 = vpop.f32.mrf.mxu0  ;;  %v3944_v15 = vmul.f32 %v7580_v5, %v3880_v21 }
 0x341   : > { %v7592_v63 = vpop.f32.mrf.mxu1  ;;  %v5751_v37 = vpop.eup %5750 }
 0x342   : > { %9486 = vst [vmem:[#allocation71_spill] sm:$0xff] %v7584_v41  ;;  %v3733_v3 = vpop.f32.mrf.mxu3  ;;  %v2119_v33 = vsub.f32 %v7203_v53, %v7584_v41  ;;  %v2120_v28 = vsub.f32 %v7205_v11, %v7584_v41  ;;  %v1937_v57 = vmax.f32 %v7590_v42, %v7592_v63  ;;  %v5753_v36 = vpop.eup %5752  ;;  %v2663_v6 = vpack.c.bf16 %v5751_v37, %v5749_v14 }
 0x343   : > { %4156 = vst [vmem:[#allocation3] sm:$0xff] %v7584_v41  ;;  %v3734_v32 = vadd.f32 %v3733_v3, %v3564_v48  ;;  %v5755_v52 = vpop.eup %5754  ;;  %v9489_v53 = vsub.f32 %v9487_v13, %v9488_v59  ;;  %5255 = vmatmul.msk.bf16.gmra.mxu0 %vm1194_vm2, %v5389_v49  ;;  %v7609_v3 = vld [vmem:[#allocation3 + $0xf0] sm:$0xff] }
 0x344   : > { %v2217_v38 = vpack.c.bf16 %v2119_v33, %v2117_v26  ;;  %v2218_v11 = vpack.c.bf16 %v2120_v28, %v2118_v7  ;;  %5287 = vmatmul.msk.bf16.gmra.mxu1 %vm1194_vm2, %v5389_v49  ;;  %3606 = vmatmul.bf16.gmra.mxu2 %v2663_v6  ;;  %v2664_v41 = vpack.c.bf16 %v5755_v52, %v5753_v36  ;;  %v3011_v20 = vunpack.c.h.bf16 %v2663_v6  ;;  %v7611_v5 = vpop.eup %5756  ;;  %v3881_v7 = vld [vmem:[#allocation5 + $0x50] sm:$0xff] }
 0x345   : > { %v2787_v60 = vmul.f32 1.442695, %v9489_v53  ;;  %v4008_v18 = vadd.f32 %v3944_v15, %v3734_v32  ;;  %1938 = vmax.xlane.f32.xlu2 %v1937_v57  ;;  %v3009_v48 = vunpack.c.l.bf16 %v2663_v6  ;;  %9490 = vst [vmem:[#allocation23_spill] sm:$0xff] %v7609_v3 }
 0x346   : > { %v2309_v14 = vunpack.c.l.bf16 %v2217_v38  ;;  %v2311_v21 = vunpack.c.h.bf16 %v2217_v38  ;;  %v2310_v37 = vunpack.c.l.bf16 %v2218_v11  ;;  %9491 = vst [vmem:[#allocation24_spill] sm:$0xff] %v7611_v5  ;;  %3775 = vmatmul.bf16.gmra.mxu3 %v2664_v41  ;;  %v2312_v59 = vunpack.c.h.bf16 %v2218_v11 }
 0x347   : > { %4072 = vst.msk [vmem:[#allocation5 + $0x48] sm:$0xff] %vm1194_vm2, %v4008_v18  ;;  %v3012_v13 = vunpack.c.h.bf16 %v2664_v41  ;;  %v3010_v26 = vunpack.c.l.bf16 %v2664_v41  ;;  %5758 = vpow2.f32 %v2787_v60  ;;  %v3567_v49 = vpop.f32.mrf.mxu2  ;;  %v3945_v11 = vmul.f32 %v7611_v5, %v3881_v7 }
 0x348   : > { %v1897_v52 = vpop.xlane.xlu0 %1896  ;;  %v2493_v33 = vmul.f32 1.442695, %v2309_v14  ;;  %v2497_v28 = vmul.f32 1.442695, %v2311_v21  ;;  %v7617_v57 = vpop.f32.mrf.mxu0  ;;  %v2495_v36 = vmul.f32 1.442695, %v2310_v37 }
 0x349   : > { %v7615_v6 = vmax.f32 %v7609_v3, %v1897_v52  ;;  %v7619_v38 = vpop.f32.mrf.mxu1  ;;  %v7621_v32 = vadd.f32 %v3012_v13, %v3011_v20  ;;  %v7623_v18 = vadd.f32 %v3010_v26, %v3009_v48  ;;  %v2499_v41 = vmul.f32 1.442695, %v2312_v59  ;;  %v9495_v20 = vld [vmem:[#allocation25_spill] sm:$0xff]  ;;  %v9496_v21 = vld [vmem:[#allocation26_spill] sm:$0xff]  ;;  %v7634_v26 = vld [vmem:[#allocation3 + $0x8] sm:$0xff] }
 0x34a   : > { %v3736_v15 = vpop.f32.mrf.mxu3  ;;  %v1940_v60 = vmax.f32 %v7617_v57, %v7619_v38  ;;  %5760 = vpow2.f32 %v2493_v33  ;;  %v9497_v48 = vsub.f32 %v9495_v20, %v9496_v21  ;;  %9498 = vst [vmem:[#allocation25_spill] sm:$0xff] %v7634_v26  ;;  %v3882_v33 = vld [vmem:[#allocation5 + $0x58] sm:$0xff] }
 0x34b   : > { %9492 = vst [vmem:[#allocation72_spill] sm:$0xff] %v7615_v6  ;;  %v3737_v53 = vadd.f32 %v3736_v15, %v3567_v49  ;;  %5762 = vpow2.f32 %v2497_v28  ;;  %v5390_v28 = vld [vmem:[#allocation2 + $0xf8] sm:$0xff] }
 0x34c   : > { %9493 = vst [vmem:[#allocation73_spill] sm:$0xff] %v7621_v32  ;;  %1941 = vmax.xlane.f32.xlu0 %v1940_v60  ;;  %v2789_v37 = vmul.f32 1.442695, %v9497_v48  ;;  %5764 = vpow2.f32 %v2495_v36  ;;  %v2121_v60 = vsub.f32 %v7225_v25, %v7615_v6  ;;  %v2122_v36 = vsub.f32 %v7227_v43, %v7615_v6  ;;  %v9502_v32 = vld [vmem:[#allocation30_spill] sm:$0xff] }
 0x34d   : > { %9494 = vst [vmem:[#allocation74_spill] sm:$0xff] %v7623_v18  ;;  %v4009_v13 = vadd.f32 %v3945_v11, %v3737_v53  ;;  %v7636_v52 = vpop.eup %5758  ;;  %5766 = vpow2.f32 %v2499_v41  ;;  %v9501_v18 = vld [vmem:[#allocation29_spill] sm:$0xff] }
 0x34e   : > { %4157 = vst [vmem:[#allocation3 + $0xf0] sm:$0xff] %v7615_v6  ;;  %5768 = vpow2.f32 %v2789_v37 }
 0x34f   : > { %9499 = vst [vmem:[#allocation26_spill] sm:$0xff] %v7636_v52  ;;  %v1900_v59 = vpop.xlane.xlu1 %1899  ;;  %v3569_v7 = vpop.f32.mrf.mxu2 }
 0x350   : > { %4073 = vst.msk [vmem:[#allocation5 + $0x50] sm:$0xff] %vm1194_vm2, %v4009_v13  ;;  %v5761_v49 = vpop.eup %5760  ;;  %v7640_v15 = vmax.f32 %v7634_v26, %v1900_v59  ;;  %v7646_v53 = vpop.f32.mrf.mxu0  ;;  %v3946_v59 = vmul.f32 %v7636_v52, %v3882_v33 }
 0x351   : > { %v7648_v41 = vpop.f32.mrf.mxu1  ;;  %v5763_v11 = vpop.eup %5762 }
 0x352   : > { %9500 = vst [vmem:[#allocation75_spill] sm:$0xff] %v7640_v15  ;;  %v3738_v20 = vpop.f32.mrf.mxu3  ;;  %v2123_v21 = vsub.f32 %v7245_v4, %v7640_v15  ;;  %v2124_v48 = vsub.f32 %v7247_v12, %v7640_v15  ;;  %v1943_v25 = vmax.f32 %v7646_v53, %v7648_v41  ;;  %v5765_v43 = vpop.eup %5764  ;;  %v2665_v14 = vpack.c.bf16 %v5763_v11, %v5761_v49 }
 0x353   : > { %4158 = vst [vmem:[#allocation3 + $0x8] sm:$0xff] %v7640_v15  ;;  %v3739_v13 = vadd.f32 %v3738_v20, %v3569_v7  ;;  %v5767_v5 = vpop.eup %5766  ;;  %v9503_v4 = vsub.f32 %v9501_v18, %v9502_v32  ;;  %5256 = vmatmul.msk.bf16.gmra.mxu0 %vm1194_vm2, %v5390_v28  ;;  %v7665_v20 = vld [vmem:[#allocation3 + $0x148] sm:$0xff] }
 0x354   : > { %v2219_v3 = vpack.c.bf16 %v2123_v21, %v2121_v60  ;;  %v2220_v12 = vpack.c.bf16 %v2124_v48, %v2122_v36  ;;  %5288 = vmatmul.msk.bf16.gmra.mxu1 %vm1194_vm2, %v5390_v28  ;;  %3611 = vmatmul.bf16.gmra.mxu2 %v2665_v14  ;;  %v2666_v15 = vpack.c.bf16 %v5767_v5, %v5765_v43  ;;  %v3013_v26 = vunpack.c.l.bf16 %v2665_v14  ;;  %v7667_v52 = vpop.eup %5768  ;;  %v3883_v36 = vld [vmem:[#allocation5 + $0x60] sm:$0xff] }
 0x355   : > { %v2791_v6 = vmul.f32 1.442695, %v9503_v4  ;;  %v4010_v37 = vadd.f32 %v3946_v59, %v3739_v13  ;;  %1944 = vmax.xlane.f32.xlu1 %v1943_v25  ;;  %v3015_v7 = vunpack.c.h.bf16 %v2665_v14  ;;  %9504 = vst [vmem:[#allocation29_spill] sm:$0xff] %v7665_v20 }
 0x356   : > { %v2313_v49 = vunpack.c.l.bf16 %v2219_v3  ;;  %v2315_v33 = vunpack.c.h.bf16 %v2219_v3  ;;  %v2314_v11 = vunpack.c.l.bf16 %v2220_v12  ;;  %9505 = vst [vmem:[#allocation30_spill] sm:$0xff] %v7667_v52  ;;  %3780 = vmatmul.bf16.gmra.mxu3 %v2666_v15  ;;  %v2316_v32 = vunpack.c.h.bf16 %v2220_v12 }
 0x357   : > { %4074 = vst.msk [vmem:[#allocation5 + $0x58] sm:$0xff] %vm1194_vm2, %v4010_v37  ;;  %v3014_v18 = vunpack.c.l.bf16 %v2666_v15  ;;  %v3016_v60 = vunpack.c.h.bf16 %v2666_v15  ;;  %5770 = vpow2.f32 %v2791_v6  ;;  %v3572_v28 = vpop.f32.mrf.mxu2  ;;  %v3947_v12 = vmul.f32 %v7667_v52, %v3883_v36  ;;  %v9517_v52 = vld [vmem:[#allocation35_spill] sm:$0xff] }
 0x358   : > { %v1903_v5 = vpop.xlane.xlu2 %1902  ;;  %v2501_v21 = vmul.f32 1.442695, %v2313_v49  ;;  %v2505_v48 = vmul.f32 1.442695, %v2315_v33  ;;  %v7673_v25 = vpop.f32.mrf.mxu0  ;;  %v2503_v43 = vmul.f32 1.442695, %v2314_v11 }
 0x359   : > { %v7671_v14 = vmax.f32 %v7665_v20, %v1903_v5  ;;  %v7675_v3 = vpop.f32.mrf.mxu1  ;;  %v7677_v13 = vadd.f32 %v3014_v18, %v3013_v26  ;;  %v7679_v37 = vadd.f32 %v3016_v60, %v3015_v7  ;;  %v2507_v15 = vmul.f32 1.442695, %v2316_v32  ;;  %v9510_v26 = vld [vmem:[#allocation31_spill] sm:$0xff]  ;;  %v9511_v33 = vld [vmem:[#allocation32_spill] sm:$0xff] }
 0x35a   : > { %9507 = vst [vmem:[#allocation77_spill] sm:$0xff] %v7675_v3  ;;  %v3741_v59 = vpop.f32.mrf.mxu3  ;;  %v1946_v6 = vmax.f32 %v7673_v25, %v7675_v3  ;;  %5772 = vpow2.f32 %v2501_v21  ;;  %v9512_v7 = vsub.f32 %v9510_v26, %v9511_v33  ;;  %v7690_v60 = vld [vmem:[#allocation3 + $0x1d0] sm:$0xff]  ;;  %v3884_v21 = vld [vmem:[#allocation5 + $0x68] sm:$0xff]  ;;  %v7719_v3 = vld [vmem:[#allocation3 + $0x100] sm:$0xff] }
 0x35b   : > { %9506 = vst [vmem:[#allocation76_spill] sm:$0xff] %v7671_v14  ;;  %v3742_v4 = vadd.f32 %v3741_v59, %v3572_v28  ;;  %5774 = vpow2.f32 %v2505_v48  ;;  %v2125_v48 = vsub.f32 %v7267_v19, %v7671_v14 }
 0x35c   : > { %9508 = vst [vmem:[#allocation78_spill] sm:$0xff] %v7677_v13  ;;  %1947 = vmax.xlane.f32.xlu2 %v1946_v6  ;;  %v2793_v11 = vmul.f32 1.442695, %v9512_v7  ;;  %5776 = vpow2.f32 %v2503_v43  ;;  %v2126_v6 = vsub.f32 %v7269_v54, %v7671_v14 }
 0x35d   : > { %9509 = vst [vmem:[#allocation79_spill] sm:$0xff] %v7679_v37  ;;  %v4011_v18 = vadd.f32 %v3947_v12, %v3742_v4  ;;  %v7692_v5 = vpop.eup %5770  ;;  %5778 = vpow2.f32 %v2507_v15  ;;  %v9518_v37 = vld [vmem:[#allocation36_spill] sm:$0xff] }
 0x35e   : > { %4159 = vst [vmem:[#allocation3 + $0x148] sm:$0xff] %v7671_v14  ;;  %5780 = vpow2.f32 %v2793_v11 }
 0x35f   : > { %9513 = vst [vmem:[#allocation31_spill] sm:$0xff] %v7690_v60  ;;  %v1906_v32 = vpop.xlane.xlu0 %1905  ;;  %v3574_v36 = vpop.f32.mrf.mxu2 }
 0x360   : > { %9514 = vst [vmem:[#allocation32_spill] sm:$0xff] %v7692_v5  ;;  %v5773_v28 = vpop.eup %5772  ;;  %v7696_v59 = vmax.f32 %v7690_v60, %v1906_v32  ;;  %v7702_v43 = vpop.f32.mrf.mxu0 }
 0x361   : > { %4075 = vst.msk [vmem:[#allocation5 + $0x60] sm:$0xff] %vm1194_vm2, %v4011_v18  ;;  %v7704_v4 = vpop.f32.mrf.mxu1  ;;  %v5775_v15 = vpop.eup %5774  ;;  %v3948_v18 = vmul.f32 %v7692_v5, %v3884_v21 }
 0x362   : > { %9515 = vst [vmem:[#allocation80_spill] sm:$0xff] %v7696_v59  ;;  %v3743_v12 = vpop.f32.mrf.mxu3  ;;  %v2127_v26 = vsub.f32 %v7287_v30, %v7696_v59  ;;  %v2128_v33 = vsub.f32 %v7289_v56, %v7696_v59  ;;  %v1949_v19 = vmax.f32 %v7702_v43, %v7704_v4  ;;  %v5777_v54 = vpop.eup %5776  ;;  %v2667_v32 = vpack.c.bf16 %v5775_v15, %v5773_v28 }
 0x363   : > { %9516 = vst [vmem:[#allocation81_spill] sm:$0xff] %v7704_v4  ;;  %v3744_v11 = vadd.f32 %v3743_v12, %v3574_v36  ;;  %v5779_v49 = vpop.eup %5778  ;;  %v9519_v30 = vsub.f32 %v9517_v52, %v9518_v37 }
 0x364   : > { %4160 = vst [vmem:[#allocation3 + $0x1d0] sm:$0xff] %v7696_v59  ;;  %v2221_v14 = vpack.c.bf16 %v2127_v26, %v2125_v48  ;;  %v2222_v56 = vpack.c.bf16 %v2128_v33, %v2126_v6  ;;  %1950 = vmax.xlane.f32.xlu0 %v1949_v19  ;;  %3616 = vmatmul.bf16.gmra.mxu2 %v2667_v32  ;;  %v3017_v59 = vunpack.c.l.bf16 %v2667_v32  ;;  %v3019_v60 = vunpack.c.h.bf16 %v2667_v32  ;;  %v7721_v21 = vpop.eup %5780  ;;  %v3885_v6 = vld [vmem:[#allocation5 + $0x70] sm:$0xff] }
 0x365   : > { %v2795_v13 = vmul.f32 1.442695, %v9519_v30  ;;  %v4012_v20 = vadd.f32 %v3948_v18, %v3744_v11  ;;  %v2668_v7 = vpack.c.bf16 %v5779_v49, %v5777_v54  ;;  %9520 = vst [vmem:[#allocation35_spill] sm:$0xff] %v7719_v3  ;;  %v3949_v32 = vmul.f32 %v7721_v21, %v3885_v6  ;;  %v9531_v30 = vld [vmem:[#allocation41_spill] sm:$0xff] }
 0x366   : > { %v2317_v4 = vunpack.c.l.bf16 %v2221_v14  ;;  %v2319_v36 = vunpack.c.h.bf16 %v2221_v14  ;;  %v2318_v12 = vunpack.c.l.bf16 %v2222_v56  ;;  %9521 = vst [vmem:[#allocation36_spill] sm:$0xff] %v7721_v21  ;;  %v2320_v52 = vunpack.c.h.bf16 %v2222_v56  ;;  %v9526_v56 = vld [vmem:[#allocation38_spill] sm:$0xff] }
 0x367   : > { %4076 = vst.msk [vmem:[#allocation5 + $0x68] sm:$0xff] %vm1194_vm2, %v4012_v20  ;;  %3785 = vmatmul.bf16.gmra.mxu3 %v2668_v7  ;;  %v3018_v37 = vunpack.c.l.bf16 %v2668_v7  ;;  %v3020_v28 = vunpack.c.h.bf16 %v2668_v7  ;;  %5782 = vpow2.f32 %v2795_v13  ;;  %v3577_v48 = vpop.f32.mrf.mxu2  ;;  %v9532_v21 = vld [vmem:[#allocation42_spill] sm:$0xff] }
 0x368   : > { %v1909_v15 = vpop.xlane.xlu1 %1908  ;;  %v2509_v49 = vmul.f32 1.442695, %v2317_v4  ;;  %v2513_v26 = vmul.f32 1.442695, %v2319_v36  ;;  %v7727_v19 = vpop.f32.mrf.mxu0  ;;  %v2511_v54 = vmul.f32 1.442695, %v2318_v12 }
 0x369   : > { %v7725_v33 = vmax.f32 %v7719_v3, %v1909_v15  ;;  %v7729_v14 = vpop.f32.mrf.mxu1  ;;  %v7731_v11 = vadd.f32 %v3018_v37, %v3017_v59  ;;  %v7733_v20 = vadd.f32 %v3020_v28, %v3019_v60  ;;  %v2515_v7 = vmul.f32 1.442695, %v2320_v52  ;;  %v9525_v59 = vld [vmem:[#allocation37_spill] sm:$0xff]  ;;  %v7744_v37 = vld [vmem:[#allocation3 + $0xc8] sm:$0xff] }
 0x36a   : > { %v3746_v18 = vpop.f32.mrf.mxu3  ;;  %v1952_v13 = vmax.f32 %v7727_v19, %v7729_v14  ;;  %5784 = vpow2.f32 %v2509_v49  ;;  %v9527_v60 = vsub.f32 %v9525_v59, %v9526_v56  ;;  %9528 = vst [vmem:[#allocation37_spill] sm:$0xff] %v7744_v37  ;;  %v3886_v15 = vld [vmem:[#allocation5 + $0x78] sm:$0xff] }
 0x36b   : > { %9522 = vst [vmem:[#allocation82_spill] sm:$0xff] %v7725_v33  ;;  %v3747_v4 = vadd.f32 %v3746_v18, %v3577_v48  ;;  %5786 = vpow2.f32 %v2513_v26  ;;  %v2129_v26 = vsub.f32 %v7312_v9, %v7725_v33  ;;  %v2130_v18 = vsub.f32 %v7314_v23, %v7725_v33 }
 0x36c   : > { %9523 = vst [vmem:[#allocation83_spill] sm:$0xff] %v7731_v11  ;;  %1953 = vmax.xlane.f32.xlu1 %v1952_v13  ;;  %v2797_v36 = vmul.f32 1.442695, %v9527_v60  ;;  %5788 = vpow2.f32 %v2511_v54 }
 0x36d   : > { %9524 = vst [vmem:[#allocation84_spill] sm:$0xff] %v7733_v20  ;;  %v4013_v12 = vadd.f32 %v3949_v32, %v3747_v4  ;;  %v7746_v28 = vpop.eup %5782  ;;  %5790 = vpow2.f32 %v2515_v7 }
 0x36e   : > { %4161 = vst [vmem:[#allocation3 + $0x100] sm:$0xff] %v7725_v33  ;;  %5792 = vpow2.f32 %v2797_v36  ;;  %v3950_v36 = vmul.f32 %v7746_v28, %v3886_v15  ;;  %v7773_v33 = vld [vmem:[#allocation3 + $0x40] sm:$0xff] }
 0x36f   : > { %9529 = vst [vmem:[#allocation38_spill] sm:$0xff] %v7746_v28  ;;  %v1912_v52 = vpop.xlane.xlu2 %1911  ;;  %v3579_v6 = vpop.f32.mrf.mxu2 }
 0x370   : > { %4077 = vst.msk [vmem:[#allocation5 + $0x70] sm:$0xff] %vm1194_vm2, %v4013_v12  ;;  %v5785_v48 = vpop.eup %5784  ;;  %v7750_v49 = vmax.f32 %v7744_v37, %v1912_v52  ;;  %v7756_v54 = vpop.f32.mrf.mxu0 }
 0x371   : > { %v7758_v13 = vpop.f32.mrf.mxu1  ;;  %v5787_v7 = vpop.eup %5786 }
 0x372   : > { %9530 = vst [vmem:[#allocation85_spill] sm:$0xff] %v7750_v49  ;;  %v3748_v4 = vpop.f32.mrf.mxu3  ;;  %v2131_v32 = vsub.f32 %v7337_v44, %v7750_v49  ;;  %v2132_v59 = vsub.f32 %v7339_v50, %v7750_v49  ;;  %v1955_v9 = vmax.f32 %v7756_v54, %v7758_v13  ;;  %v5789_v23 = vpop.eup %5788  ;;  %v2669_v12 = vpack.c.bf16 %v5787_v7, %v5785_v48 }
 0x373   : > { %4162 = vst [vmem:[#allocation3 + $0xc8] sm:$0xff] %v7750_v49  ;;  %v3749_v60 = vadd.f32 %v3748_v4, %v3579_v6  ;;  %v5791_v52 = vpop.eup %5790  ;;  %v9533_v44 = vsub.f32 %v9531_v30, %v9532_v21 }
 0x374   : > { %v2223_v20 = vpack.c.bf16 %v2131_v32, %v2129_v26  ;;  %v2224_v50 = vpack.c.bf16 %v2132_v59, %v2130_v18  ;;  %1956 = vmax.xlane.f32.xlu2 %v1955_v9  ;;  %3621 = vmatmul.bf16.gmra.mxu2 %v2669_v12  ;;  %v2670_v56 = vpack.c.bf16 %v5791_v52, %v5789_v23  ;;  %v3023_v49 = vunpack.c.h.bf16 %v2669_v12  ;;  %v7775_v15 = vpop.eup %5792  ;;  %v3887_v18 = vld [vmem:[#allocation5 + $0x80] sm:$0xff] }
 0x375   : > { %v2799_v5 = vmul.f32 1.442695, %v9533_v44  ;;  %v4014_v11 = vadd.f32 %v3950_v36, %v3749_v60  ;;  %v3021_v37 = vunpack.c.l.bf16 %v2669_v12  ;;  %9534 = vst [vmem:[#allocation41_spill] sm:$0xff] %v7775_v15  ;;  %v3951_v52 = vmul.f32 %v7775_v15, %v3887_v18  ;;  %v3888_v18 = vld [vmem:[#allocation5 + $0x88] sm:$0xff] }
 0x376   : > { %v2321_v3 = vunpack.c.l.bf16 %v2223_v20  ;;  %v2323_v6 = vunpack.c.h.bf16 %v2223_v20  ;;  %v2322_v4 = vunpack.c.l.bf16 %v2224_v50  ;;  %v2324_v21 = vunpack.c.h.bf16 %v2224_v50  ;;  %v9544_v44 = vld [vmem:[#allocation47_spill] sm:$0xff] }
 0x377   : > { %4078 = vst.msk [vmem:[#allocation5 + $0x78] sm:$0xff] %vm1194_vm2, %v4014_v11  ;;  %3790 = vmatmul.bf16.gmra.mxu3 %v2670_v56  ;;  %v3024_v30 = vunpack.c.h.bf16 %v2670_v56  ;;  %v3022_v48 = vunpack.c.l.bf16 %v2670_v56  ;;  %5794 = vpow2.f32 %v2799_v5  ;;  %v3582_v26 = vpop.f32.mrf.mxu2 }
 0x378   : > { %v1915_v7 = vpop.xlane.xlu0 %1914  ;;  %v2517_v32 = vmul.f32 1.442695, %v2321_v3  ;;  %v2521_v59 = vmul.f32 1.442695, %v2323_v6  ;;  %v7781_v23 = vpop.f32.mrf.mxu0  ;;  %v2519_v60 = vmul.f32 1.442695, %v2322_v4 }
 0x379   : > { %v7779_v9 = vmax.f32 %v7773_v33, %v1915_v7  ;;  %v7783_v20 = vpop.f32.mrf.mxu1  ;;  %v7785_v36 = vadd.f32 %v3024_v30, %v3023_v49  ;;  %v7787_v11 = vadd.f32 %v3022_v48, %v3021_v37  ;;  %v2523_v56 = vmul.f32 1.442695, %v2324_v21  ;;  %v9538_v49 = vld [vmem:[#allocation43_spill] sm:$0xff]  ;;  %v7798_v4 = vld [vmem:[#allocation3 + $0x1f8] sm:$0xff] }
 0x37a   : > { %v3751_v12 = vpop.f32.mrf.mxu3  ;;  %v1958_v5 = vmax.f32 %v7781_v23, %v7783_v20  ;;  %5796 = vpow2.f32 %v2517_v32  ;;  %v9539_v37 = vsub.f32 %v7282_v61, %v9538_v49  ;;  %9540 = vst [vmem:[#allocation43_spill] sm:$0xff] %v7798_v4 }
 0x37b   : > { %9535 = vst [vmem:[#allocation42_spill] sm:$0xff] %v7779_v9  ;;  %v3752_v3 = vadd.f32 %v3751_v12, %v3582_v26  ;;  %5798 = vpow2.f32 %v2521_v59  ;;  %v2133_v61 = vsub.f32 %v7366_v17, %v7779_v9  ;;  %v2134_v32 = vsub.f32 %v7368_v46, %v7779_v9 }
 0x37c   : > { %9536 = vst [vmem:[#allocation86_spill] sm:$0xff] %v7785_v36  ;;  %1959 = vmax.xlane.f32.xlu0 %v1958_v5  ;;  %v2801_v50 = vmul.f32 1.442695, %v9539_v37  ;;  %5800 = vpow2.f32 %v2519_v60 }
 0x37d   : > { %9537 = vst [vmem:[#allocation87_spill] sm:$0xff] %v7787_v11  ;;  %v4015_v6 = vadd.f32 %v3951_v52, %v3752_v3  ;;  %v7800_v30 = vpop.eup %5794  ;;  %5802 = vpow2.f32 %v2523_v56 }
 0x37e   : > { %4163 = vst [vmem:[#allocation3 + $0x40] sm:$0xff] %v7779_v9  ;;  %5804 = vpow2.f32 %v2801_v50  ;;  %v3952_v37 = vmul.f32 %v7800_v30, %v3888_v18 }
 0x37f   : > { %9541 = vst [vmem:[#allocation88_spill] sm:$0xff] %v7800_v30  ;;  %v1918_v21 = vpop.xlane.xlu1 %1917  ;;  %v3584_v26 = vpop.f32.mrf.mxu2 }
 0x380   : > { %4079 = vst.msk [vmem:[#allocation5 + $0x80] sm:$0xff] %vm1194_vm2, %v4015_v6  ;;  %v5797_v48 = vpop.eup %5796  ;;  %v7804_v7 = vmax.f32 %v7798_v4, %v1918_v21  ;;  %v7810_v59 = vpop.f32.mrf.mxu0  ;;  %v9543_v21 = vld [vmem:[#allocation46_spill] sm:$0xff] }
 0x381   : > { %v7812_v60 = vpop.f32.mrf.mxu1  ;;  %v5799_v12 = vpop.eup %5798  ;;  %v7827_v4 = vld [vmem:[#allocation3 + $0x20] sm:$0xff] }
 0x382   : > { %9542 = vst [vmem:[#allocation89_spill] sm:$0xff] %v7804_v7  ;;  %v3753_v5 = vpop.f32.mrf.mxu3  ;;  %v2135_v56 = vsub.f32 %v7393_v22, %v7804_v7  ;;  %v2136_v3 = vsub.f32 %v7395_v40, %v7804_v7  ;;  %v1961_v17 = vmax.f32 %v7810_v59, %v7812_v60  ;;  %v5801_v46 = vpop.eup %5800  ;;  %v2671_v50 = vpack.c.bf16 %v5799_v12, %v5797_v48  ;;  %v3889_v12 = vld [vmem:[#allocation5 + $0x90] sm:$0xff] }
 0x383   : > { %4164 = vst [vmem:[#allocation3 + $0x1f8] sm:$0xff] %v7804_v7  ;;  %v3754_v49 = vadd.f32 %v3753_v5, %v3584_v26  ;;  %v5803_v6 = vpop.eup %5802  ;;  %v9545_v22 = vsub.f32 %v9543_v21, %v9544_v44 }
 0x384   : > { %v2225_v28 = vpack.c.bf16 %v2135_v56, %v2133_v61  ;;  %v2226_v40 = vpack.c.bf16 %v2136_v3, %v2134_v32  ;;  %1962 = vmax.xlane.f32.xlu1 %v1961_v17  ;;  %3626 = vmatmul.bf16.gmra.mxu2 %v2671_v50  ;;  %v2672_v52 = vpack.c.bf16 %v5803_v6, %v5801_v46  ;;  %v3025_v36 = vunpack.c.l.bf16 %v2671_v50  ;;  %v7829_v18 = vpop.eup %5804 }
 0x385   : > { %v2803_v15 = vmul.f32 1.442695, %v9545_v22  ;;  %v4016_v11 = vadd.f32 %v3952_v37, %v3754_v49  ;;  %v3027_v7 = vunpack.c.h.bf16 %v2671_v50  ;;  %9546 = vst [vmem:[#allocation46_spill] sm:$0xff] %v7829_v18  ;;  %v3953_v21 = vmul.f32 %v7829_v18, %v3889_v12 }
 0x386   : > { %v2325_v9 = vunpack.c.l.bf16 %v2225_v28  ;;  %v2327_v26 = vunpack.c.h.bf16 %v2225_v28  ;;  %v2326_v5 = vunpack.c.l.bf16 %v2226_v40  ;;  %v2328_v44 = vunpack.c.h.bf16 %v2226_v40 }
 0x387   : > { %4080 = vst.msk [vmem:[#allocation5 + $0x88] sm:$0xff] %vm1194_vm2, %v4016_v11  ;;  %3795 = vmatmul.bf16.gmra.mxu3 %v2672_v52  ;;  %v3026_v48 = vunpack.c.l.bf16 %v2672_v52  ;;  %v3028_v61 = vunpack.c.h.bf16 %v2672_v52  ;;  %5806 = vpow2.f32 %v2803_v15  ;;  %v3587_v32 = vpop.f32.mrf.mxu2 }
 0x388   : > { %v1921_v56 = vpop.xlane.xlu2 %1920  ;;  %v2525_v3 = vmul.f32 1.442695, %v2325_v9  ;;  %v2529_v17 = vmul.f32 1.442695, %v2327_v26  ;;  %v7835_v49 = vpop.f32.mrf.mxu0  ;;  %v2527_v37 = vmul.f32 1.442695, %v2326_v5 }
 0x389   : > { %v7833_v46 = vmax.f32 %v7827_v4, %v1921_v56  ;;  %v7837_v28 = vpop.f32.mrf.mxu1  ;;  %v7839_v50 = vadd.f32 %v3026_v48, %v3025_v36  ;;  %v7841_v11 = vadd.f32 %v3028_v61, %v3027_v7  ;;  %v2531_v52 = vmul.f32 1.442695, %v2328_v44  ;;  %v7852_v26 = vld [vmem:[#allocation3 + $0x128] sm:$0xff] }
 0x38a   : > { %v3756_v6 = vpop.f32.mrf.mxu3  ;;  %v1964_v15 = vmax.f32 %v7835_v49, %v7837_v28  ;;  %5808 = vpow2.f32 %v2525_v3  ;;  %v9549_v36 = vsub.f32 %v7330_v1, %v7335_v39  ;;  %9550 = vst [vmem:[#allocation91_spill] sm:$0xff] %v7852_v26 }
 0x38b   : > { %9547 = vst [vmem:[#allocation47_spill] sm:$0xff] %v7839_v50  ;;  %v3757_v9 = vadd.f32 %v3756_v6, %v3587_v32  ;;  %5810 = vpow2.f32 %v2529_v17  ;;  %v3890_v32 = vld [vmem:[#allocation5 + $0x98] sm:$0xff]  ;;  %v2137_v1 = vsub.f32 %v7422_v2, %v7833_v46  ;;  %v2138_v39 = vsub.f32 %v7424_v8, %v7833_v46 }
 0x38c   : > { %9548 = vst [vmem:[#allocation90_spill] sm:$0xff] %v7841_v11  ;;  %1965 = vmax.xlane.f32.xlu2 %v1964_v15  ;;  %v2805_v7 = vmul.f32 1.442695, %v9549_v36  ;;  %5812 = vpow2.f32 %v2527_v37 }
 0x38d   : > { %4165 = vst [vmem:[#allocation3 + $0x20] sm:$0xff] %v7833_v46  ;;  %v4017_v40 = vadd.f32 %v3953_v21, %v3757_v9  ;;  %v7854_v5 = vpop.eup %5806  ;;  %5814 = vpow2.f32 %v2531_v52 }
 0x38e   : > { %9551 = vst [vmem:[#allocation92_spill] sm:$0xff] %v7854_v5  ;;  %5816 = vpow2.f32 %v2805_v7  ;;  %v3954_v21 = vmul.f32 %v7854_v5, %v3890_v32 }
 0x38f   : > { %4081 = vst.msk [vmem:[#allocation5 + $0x90] sm:$0xff] %vm1194_vm2, %v4017_v40  ;;  %v1924_v44 = vpop.xlane.xlu0 %1923  ;;  %v3589_v61 = vpop.f32.mrf.mxu2  ;;  %v9553_v40 = vld [vmem:[#allocation51_spill] sm:$0xff] }
 0x390   : > { %v5809_v48 = vpop.eup %5808  ;;  %v7858_v12 = vmax.f32 %v7852_v26, %v1924_v44  ;;  %v7864_v56 = vpop.f32.mrf.mxu0  ;;  %v9554_v44 = vld [vmem:[#allocation53_spill] sm:$0xff] }
 0x391   : > { %v7866_v3 = vpop.f32.mrf.mxu1  ;;  %v5811_v17 = vpop.eup %5810 }
 0x392   : > { %9552 = vst [vmem:[#allocation93_spill] sm:$0xff] %v7858_v12  ;;  %v3758_v37 = vpop.f32.mrf.mxu3  ;;  %v2139_v6 = vsub.f32 %v7449_v45, %v7858_v12  ;;  %v2140_v15 = vsub.f32 %v7451_v47, %v7858_v12  ;;  %v1967_v2 = vmax.f32 %v7864_v56, %v7866_v3  ;;  %v5813_v8 = vpop.eup %5812  ;;  %v2673_v36 = vpack.c.bf16 %v5811_v17, %v5809_v48 }
 0x393   : > { %4166 = vst [vmem:[#allocation3 + $0x128] sm:$0xff] %v7858_v12  ;;  %v3759_v9 = vadd.f32 %v3758_v37, %v3589_v61  ;;  %v5815_v7 = vpop.eup %5814  ;;  %v9555_v45 = vsub.f32 %v9553_v40, %v9554_v44  ;;  %v7881_v12 = vld [vmem:[#allocation3 + $0x1a0] sm:$0xff] }
 0x394   : > { %v2227_v30 = vpack.c.bf16 %v2139_v6, %v2137_v1  ;;  %v2228_v47 = vpack.c.bf16 %v2140_v15, %v2138_v39  ;;  %1968 = vmax.xlane.f32.xlu0 %v1967_v2  ;;  %3631 = vmatmul.bf16.gmra.mxu2 %v2673_v36  ;;  %v2674_v52 = vpack.c.bf16 %v5815_v7, %v5813_v8  ;;  %v3029_v11 = vunpack.c.l.bf16 %v2673_v36  ;;  %v7883_v32 = vpop.eup %5816  ;;  %v3891_v6 = vld [vmem:[#allocation5 + $0xa0] sm:$0xff] }
 0x395   : > { %v2807_v22 = vmul.f32 1.442695, %v9555_v45  ;;  %v4018_v18 = vadd.f32 %v3954_v21, %v3759_v9  ;;  %v3031_v50 = vunpack.c.h.bf16 %v2673_v36  ;;  %9556 = vst [vmem:[#allocation51_spill] sm:$0xff] %v7883_v32  ;;  %v3955_v44 = vmul.f32 %v7883_v32, %v3891_v6 }
 0x396   : > { %v2329_v26 = vunpack.c.l.bf16 %v2227_v30  ;;  %v2331_v61 = vunpack.c.h.bf16 %v2227_v30  ;;  %v2330_v37 = vunpack.c.l.bf16 %v2228_v47  ;;  %v2332_v48 = vunpack.c.h.bf16 %v2228_v47 }
 0x397   : > { %4082 = vst.msk [vmem:[#allocation5 + $0x98] sm:$0xff] %vm1194_vm2, %v4018_v18  ;;  %3800 = vmatmul.bf16.gmra.mxu3 %v2674_v52  ;;  %v3030_v17 = vunpack.c.l.bf16 %v2674_v52  ;;  %v3032_v1 = vunpack.c.h.bf16 %v2674_v52  ;;  %5818 = vpow2.f32 %v2807_v22  ;;  %v3592_v39 = vpop.f32.mrf.mxu2 }
 0x398   : > { %v1927_v15 = vpop.xlane.xlu1 %1926  ;;  %v2533_v2 = vmul.f32 1.442695, %v2329_v26  ;;  %v2537_v8 = vmul.f32 1.442695, %v2331_v61  ;;  %v7889_v21 = vpop.f32.mrf.mxu0  ;;  %v2535_v36 = vmul.f32 1.442695, %v2330_v37 }
 0x399   : > { %v7887_v9 = vmax.f32 %v7881_v12, %v1927_v15  ;;  %v7891_v30 = vpop.f32.mrf.mxu1  ;;  %v7893_v7 = vadd.f32 %v3030_v17, %v3029_v11  ;;  %v7895_v18 = vadd.f32 %v3032_v1, %v3031_v50  ;;  %v2539_v52 = vmul.f32 1.442695, %v2332_v48  ;;  %v7906_v61 = vld [vmem:[#allocation3 + $0x1f0] sm:$0xff] }
 0x39a   : > { %v3761_v40 = vpop.f32.mrf.mxu3  ;;  %v1970_v22 = vmax.f32 %v7889_v21, %v7891_v30  ;;  %5820 = vpow2.f32 %v2533_v2  ;;  %v9558_v50 = vsub.f32 %v7385_v31, %v7391_v34  ;;  %9559 = vst [vmem:[#allocation94_spill] sm:$0xff] %v7906_v61 }
 0x39b   : > { %9557 = vst [vmem:[#allocation53_spill] sm:$0xff] %v7895_v18  ;;  %v3762_v26 = vadd.f32 %v3761_v40, %v3592_v39  ;;  %5822 = vpow2.f32 %v2537_v8  ;;  %v3892_v39 = vld [vmem:[#allocation5 + $0xa8] sm:$0xff]  ;;  %v2141_v31 = vsub.f32 %v7478_v0, %v7887_v9  ;;  %v2142_v34 = vsub.f32 %v7480_v27, %v7887_v9 }
 0x39c   : > { %4167 = vst [vmem:[#allocation3 + $0x1a0] sm:$0xff] %v7887_v9  ;;  %1971 = vmax.xlane.f32.xlu1 %v1970_v22  ;;  %v2809_v11 = vmul.f32 1.442695, %v9558_v50  ;;  %5824 = vpow2.f32 %v2535_v36 }
 0x39d   : > { %v4019_v47 = vadd.f32 %v3955_v44, %v3762_v26  ;;  %v7908_v37 = vpop.eup %5818  ;;  %5826 = vpow2.f32 %v2539_v52 }
 0x39e   : > { %9560 = vst [vmem:[#allocation95_spill] sm:$0xff] %v7908_v37  ;;  %5828 = vpow2.f32 %v2809_v11  ;;  %v3956_v44 = vmul.f32 %v7908_v37, %v3892_v39 }
 0x39f   : > { %4083 = vst.msk [vmem:[#allocation5 + $0xa0] sm:$0xff] %vm1194_vm2, %v4019_v47  ;;  %v1930_v48 = vpop.xlane.xlu2 %1929  ;;  %v3594_v1 = vpop.f32.mrf.mxu2  ;;  %v9562_v47 = vld [vmem:[#allocation58_spill] sm:$0xff] }
 0x3a0   : > { %v5821_v17 = vpop.eup %5820  ;;  %v7912_v6 = vmax.f32 %v7906_v61, %v1930_v48  ;;  %v7918_v15 = vpop.f32.mrf.mxu0 }
 0x3a1   : > { %v7920_v2 = vpop.f32.mrf.mxu1  ;;  %v5823_v8 = vpop.eup %5822 }
 0x3a2   : > { %9561 = vst [vmem:[#allocation96_spill] sm:$0xff] %v7912_v6  ;;  %v3763_v36 = vpop.f32.mrf.mxu3  ;;  %v2143_v40 = vsub.f32 %v7505_v55, %v7912_v6  ;;  %v2144_v22 = vsub.f32 %v7507_v10, %v7912_v6  ;;  %v1973_v0 = vmax.f32 %v7918_v15, %v7920_v2  ;;  %v5825_v27 = vpop.eup %5824  ;;  %v2675_v50 = vpack.c.bf16 %v5823_v8, %v5821_v17  ;;  %v3893_v8 = vld [vmem:[#allocation5 + $0xb0] sm:$0xff] }
 0x3a3   : > { %4168 = vst [vmem:[#allocation3 + $0x1f0] sm:$0xff] %v7912_v6  ;;  %v3764_v26 = vadd.f32 %v3763_v36, %v3594_v1  ;;  %v5827_v11 = vpop.eup %5826  ;;  %v9563_v55 = vsub.f32 %v7410_v24, %v9562_v47  ;;  %v7935_v6 = vld [vmem:[#allocation3 + $0xe8] sm:$0xff] }
 0x3a4   : > { %v2229_v45 = vpack.c.bf16 %v2143_v40, %v2141_v31  ;;  %v2230_v10 = vpack.c.bf16 %v2144_v22, %v2142_v34  ;;  %1974 = vmax.xlane.f32.xlu2 %v1973_v0  ;;  %3636 = vmatmul.bf16.gmra.mxu2 %v2675_v50  ;;  %v2676_v52 = vpack.c.bf16 %v5827_v11, %v5825_v27  ;;  %v3035_v5 = vunpack.c.h.bf16 %v2675_v50  ;;  %v7937_v39 = vpop.eup %5828 }
 0x3a5   : > { %v2811_v48 = vmul.f32 1.442695, %v9563_v55  ;;  %v4020_v32 = vadd.f32 %v3956_v44, %v3764_v26  ;;  %v3033_v18 = vunpack.c.l.bf16 %v2675_v50  ;;  %9564 = vst [vmem:[#allocation58_spill] sm:$0xff] %v7937_v39  ;;  %v3957_v55 = vmul.f32 %v7937_v39, %v3893_v8 }
 0x3a6   : > { %v2333_v61 = vunpack.c.l.bf16 %v2229_v45  ;;  %v2335_v1 = vunpack.c.h.bf16 %v2229_v45  ;;  %v2334_v36 = vunpack.c.l.bf16 %v2230_v10  ;;  %v2336_v24 = vunpack.c.h.bf16 %v2230_v10 }
 0x3a7   : > { %4084 = vst.msk [vmem:[#allocation5 + $0xa8] sm:$0xff] %vm1194_vm2, %v4020_v32  ;;  %3805 = vmatmul.bf16.gmra.mxu3 %v2676_v52  ;;  %v3036_v17 = vunpack.c.h.bf16 %v2676_v52  ;;  %v3034_v31 = vunpack.c.l.bf16 %v2676_v52  ;;  %5830 = vpow2.f32 %v2811_v48  ;;  %v3597_v34 = vpop.f32.mrf.mxu2 }
 0x3a8   : > { %v1933_v40 = vpop.xlane.xlu0 %1932  ;;  %v2541_v22 = vmul.f32 1.442695, %v2333_v61  ;;  %v2545_v0 = vmul.f32 1.442695, %v2335_v1  ;;  %v7943_v26 = vpop.f32.mrf.mxu0  ;;  %v2543_v44 = vmul.f32 1.442695, %v2334_v36 }
 0x3a9   : > { %v7941_v27 = vmax.f32 %v7935_v6, %v1933_v40  ;;  %v7945_v45 = vpop.f32.mrf.mxu1  ;;  %v7947_v50 = vadd.f32 %v3036_v17, %v3035_v5  ;;  %v7949_v32 = vadd.f32 %v3034_v31, %v3033_v18  ;;  %v2547_v47 = vmul.f32 1.442695, %v2336_v24  ;;  %v7960_v1 = vld [vmem:[#allocation3 + $0x78] sm:$0xff] }
 0x3aa   : > { %v3766_v11 = vpop.f32.mrf.mxu3  ;;  %v1976_v52 = vmax.f32 %v7943_v26, %v7945_v45  ;;  %5832 = vpow2.f32 %v2541_v22  ;;  %v9567_v5 = vsub.f32 %v7441_v16, %v7447_v29  ;;  %9568 = vst [vmem:[#allocation99_spill] sm:$0xff] %v7960_v1 }
 0x3ab   : > { %9565 = vst [vmem:[#allocation97_spill] sm:$0xff] %v7941_v27  ;;  %v3767_v61 = vadd.f32 %v3766_v11, %v3597_v34  ;;  %5834 = vpow2.f32 %v2545_v0  ;;  %v3894_v34 = vld [vmem:[#allocation5 + $0xb8] sm:$0xff]  ;;  %v2145_v16 = vsub.f32 %v7534_v35, %v7941_v27  ;;  %v2146_v29 = vsub.f32 %v7536_v62, %v7941_v27 }
 0x3ac   : > { %9566 = vst [vmem:[#allocation98_spill] sm:$0xff] %v7949_v32  ;;  %1977 = vmax.xlane.f32.xlu0 %v1976_v52  ;;  %v2813_v18 = vmul.f32 1.442695, %v9567_v5  ;;  %5836 = vpow2.f32 %v2543_v44 }
 0x3ad   : > { %4169 = vst [vmem:[#allocation3 + $0xe8] sm:$0xff] %v7941_v27  ;;  %v4021_v10 = vadd.f32 %v3957_v55, %v3767_v61  ;;  %v7962_v36 = vpop.eup %5830  ;;  %5838 = vpow2.f32 %v2547_v47 }
 0x3ae   : > { %9569 = vst [vmem:[#allocation100_spill] sm:$0xff] %v7962_v36  ;;  %5840 = vpow2.f32 %v2813_v18  ;;  %v3958_v55 = vmul.f32 %v7962_v36, %v3894_v34  ;;  %v9586_v36 = vld [vmem:[#allocation67_spill] sm:$0xff] }
 0x3af   : > { %4085 = vst.msk [vmem:[#allocation5 + $0xb0] sm:$0xff] %vm1194_vm2, %v4021_v10  ;;  %v1936_v24 = vpop.xlane.xlu1 %1935  ;;  %v3599_v31 = vpop.f32.mrf.mxu2  ;;  %v9571_v10 = vld [vmem:[#allocation61_spill] sm:$0xff] }
 0x3b0   : > { %v5833_v17 = vpop.eup %5832  ;;  %v7966_v8 = vmax.f32 %v7960_v1, %v1936_v24  ;;  %v7972_v40 = vpop.f32.mrf.mxu0  ;;  %v9572_v24 = vld [vmem:[#allocation63_spill] sm:$0xff]  ;;  %v7989_v1 = vld [vmem:[#allocation3 + $0x70] sm:$0xff] }
 0x3b1   : > { %v7974_v22 = vpop.f32.mrf.mxu1  ;;  %v5835_v0 = vpop.eup %5834  ;;  %9574 = vst [vmem:[#allocation61_spill] sm:$0xff] %v7989_v1 }
 0x3b2   : > { %9570 = vst [vmem:[#allocation101_spill] sm:$0xff] %v7966_v8  ;;  %v3768_v44 = vpop.f32.mrf.mxu3  ;;  %v2147_v11 = vsub.f32 %v7561_v58, %v7966_v8  ;;  %v2148_v52 = vsub.f32 %v7563_v51, %v7966_v8  ;;  %v1979_v35 = vmax.f32 %v7972_v40, %v7974_v22  ;;  %v5837_v62 = vpop.eup %5836  ;;  %v2677_v5 = vpack.c.bf16 %v5835_v0, %v5833_v17 }
 0x3b3   : > { %4170 = vst [vmem:[#allocation3 + $0x78] sm:$0xff] %v7966_v8  ;;  %v3769_v61 = vadd.f32 %v3768_v44, %v3599_v31  ;;  %v5839_v18 = vpop.eup %5838  ;;  %v9573_v58 = vsub.f32 %v9571_v10, %v9572_v24 }
 0x3b4   : > { %v2231_v39 = vpack.c.bf16 %v2147_v11, %v2145_v16  ;;  %v2232_v51 = vpack.c.bf16 %v2148_v52, %v2146_v29  ;;  %1980 = vmax.xlane.f32.xlu1 %v1979_v35  ;;  %3641 = vmatmul.bf16.gmra.mxu2 %v2677_v5  ;;  %v2678_v47 = vpack.c.bf16 %v5839_v18, %v5837_v62  ;;  %v3037_v32 = vunpack.c.l.bf16 %v2677_v5  ;;  %v7991_v34 = vpop.eup %5840  ;;  %v3895_v11 = vld [vmem:[#allocation5 + $0xc0] sm:$0xff] }
 0x3b5   : > { %v2815_v48 = vmul.f32 1.442695, %v9573_v58  ;;  %v4022_v37 = vadd.f32 %v3958_v55, %v3769_v61  ;;  %v3039_v8 = vunpack.c.h.bf16 %v2677_v5  ;;  %9575 = vst [vmem:[#allocation63_spill] sm:$0xff] %v7991_v34  ;;  %v3959_v24 = vmul.f32 %v7991_v34, %v3895_v11  ;;  %v9585_v58 = vld [vmem:[#allocation13_spill] sm:$0xff] }
 0x3b6   : > { %v2337_v27 = vunpack.c.l.bf16 %v2231_v39  ;;  %v2339_v31 = vunpack.c.h.bf16 %v2231_v39  ;;  %v2338_v44 = vunpack.c.l.bf16 %v2232_v51  ;;  %v2340_v17 = vunpack.c.h.bf16 %v2232_v51  ;;  %v9580_v51 = vld [vmem:[#allocation64_spill] sm:$0xff] }
 0x3b7   : > { %4086 = vst.msk [vmem:[#allocation5 + $0xb8] sm:$0xff] %vm1194_vm2, %v4022_v37  ;;  %3810 = vmatmul.bf16.gmra.mxu3 %v2678_v47  ;;  %v3038_v0 = vunpack.c.l.bf16 %v2678_v47  ;;  %v3040_v16 = vunpack.c.h.bf16 %v2678_v47  ;;  %5842 = vpow2.f32 %v2815_v48  ;;  %v3602_v29 = vpop.f32.mrf.mxu2 }
 0x3b8   : > { %v1939_v52 = vpop.xlane.xlu2 %1938  ;;  %v2549_v35 = vmul.f32 1.442695, %v2337_v27  ;;  %v2553_v62 = vmul.f32 1.442695, %v2339_v31  ;;  %v7997_v55 = vpop.f32.mrf.mxu0  ;;  %v2551_v5 = vmul.f32 1.442695, %v2338_v44 }
 0x3b9   : > { %v7995_v61 = vmax.f32 %v7989_v1, %v1939_v52  ;;  %v7999_v39 = vpop.f32.mrf.mxu1  ;;  %v8001_v18 = vadd.f32 %v3038_v0, %v3037_v32  ;;  %v8003_v37 = vadd.f32 %v3040_v16, %v3039_v8  ;;  %v2555_v47 = vmul.f32 1.442695, %v2340_v17  ;;  %v9579_v32 = vld [vmem:[#allocation11_spill] sm:$0xff]  ;;  %v8014_v0 = vld [vmem:[#allocation3 + $0x90] sm:$0xff] }
 0x3ba   : > { %v3771_v10 = vpop.f32.mrf.mxu3  ;;  %v1982_v48 = vmax.f32 %v7997_v55, %v7999_v39  ;;  %5844 = vpow2.f32 %v2549_v35  ;;  %v9581_v8 = vsub.f32 %v9579_v32, %v9580_v51  ;;  %9582 = vst [vmem:[#allocation11_spill] sm:$0xff] %v8014_v0  ;;  %v3896_v52 = vld [vmem:[#allocation5 + $0xc8] sm:$0xff] }
 0x3bb   : > { %9576 = vst [vmem:[#allocation102_spill] sm:$0xff] %v7995_v61  ;;  %v3772_v27 = vadd.f32 %v3771_v10, %v3602_v29  ;;  %5846 = vpow2.f32 %v2553_v62  ;;  %v2149_v62 = vsub.f32 %v7590_v42, %v7995_v61  ;;  %v2150_v10 = vsub.f32 %v7592_v63, %v7995_v61 }
 0x3bc   : > { %9577 = vst [vmem:[#allocation103_spill] sm:$0xff] %v8001_v18  ;;  %1983 = vmax.xlane.f32.xlu2 %v1982_v48  ;;  %v2817_v31 = vmul.f32 1.442695, %v9581_v8  ;;  %5848 = vpow2.f32 %v2551_v5 }
 0x3bd   : > { %9578 = vst [vmem:[#allocation104_spill] sm:$0xff] %v8003_v37  ;;  %v4023_v44 = vadd.f32 %v3959_v24, %v3772_v27  ;;  %v8016_v16 = vpop.eup %5842  ;;  %5850 = vpow2.f32 %v2555_v47  ;;  %v8043_v37 = vld [vmem:[#allocation3 + $0x1d8] sm:$0xff] }
 0x3be   : > { %4171 = vst [vmem:[#allocation3 + $0x70] sm:$0xff] %v7995_v61  ;;  %5852 = vpow2.f32 %v2817_v31  ;;  %v3960_v31 = vmul.f32 %v8016_v16, %v3896_v52 }
 0x3bf   : > { %9583 = vst [vmem:[#allocation64_spill] sm:$0xff] %v8016_v16  ;;  %v1942_v17 = vpop.xlane.xlu0 %1941  ;;  %v3604_v11 = vpop.f32.mrf.mxu2 }
 0x3c0   : > { %4087 = vst.msk [vmem:[#allocation5 + $0xc0] sm:$0xff] %vm1194_vm2, %v4023_v44  ;;  %v5845_v29 = vpop.eup %5844  ;;  %v8020_v35 = vmax.f32 %v8014_v0, %v1942_v17  ;;  %v8026_v5 = vpop.f32.mrf.mxu0 }
 0x3c1   : > { %v8028_v48 = vpop.f32.mrf.mxu1  ;;  %v5847_v47 = vpop.eup %5846  ;;  %9588 = vst [vmem:[#allocation13_spill] sm:$0xff] %v8043_v37 }
 0x3c2   : > { %9584 = vst [vmem:[#allocation105_spill] sm:$0xff] %v8020_v35  ;;  %v3773_v27 = vpop.f32.mrf.mxu3  ;;  %v2151_v24 = vsub.f32 %v7617_v57, %v8020_v35  ;;  %v2152_v32 = vsub.f32 %v7619_v38, %v8020_v35  ;;  %v1985_v42 = vmax.f32 %v8026_v5, %v8028_v48  ;;  %v5849_v63 = vpop.eup %5848  ;;  %v2679_v44 = vpack.c.bf16 %v5847_v47, %v5845_v29 }
 0x3c3   : > { %4172 = vst [vmem:[#allocation3 + $0x90] sm:$0xff] %v8020_v35  ;;  %v3774_v8 = vadd.f32 %v3773_v27, %v3604_v11  ;;  %v5851_v17 = vpop.eup %5850  ;;  %v9587_v57 = vsub.f32 %v9585_v58, %v9586_v36 }
 0x3c4   : > { %v2233_v61 = vpack.c.bf16 %v2151_v24, %v2149_v62  ;;  %v2234_v38 = vpack.c.bf16 %v2152_v32, %v2150_v10  ;;  %1986 = vmax.xlane.f32.xlu0 %v1985_v42  ;;  %3646 = vmatmul.bf16.gmra.mxu2 %v2679_v44  ;;  %v2680_v51 = vpack.c.bf16 %v5851_v17, %v5849_v63  ;;  %v3041_v35 = vunpack.c.l.bf16 %v2679_v44  ;;  %v8045_v52 = vpop.eup %5852  ;;  %v3897_v10 = vld [vmem:[#allocation5 + $0xd0] sm:$0xff] }
 0x3c5   : > { %v2819_v34 = vmul.f32 1.442695, %v9587_v57  ;;  %v4024_v1 = vadd.f32 %v3960_v31, %v3774_v8  ;;  %v3043_v0 = vunpack.c.h.bf16 %v2679_v44  ;;  %9589 = vst [vmem:[#allocation67_spill] sm:$0xff] %v8045_v52  ;;  %v3961_v17 = vmul.f32 %v8045_v52, %v3897_v10 }
 0x3c6   : > { %v2341_v18 = vunpack.c.l.bf16 %v2233_v61  ;;  %v2343_v11 = vunpack.c.h.bf16 %v2233_v61  ;;  %v2342_v27 = vunpack.c.l.bf16 %v2234_v38  ;;  %v2344_v36 = vunpack.c.h.bf16 %v2234_v38  ;;  %v9592_v38 = vld [vmem:[#allocation68_spill] sm:$0xff] }
 0x3c7   : > { %4088 = vst.msk [vmem:[#allocation5 + $0xc8] sm:$0xff] %vm1194_vm2, %v4024_v1  ;;  %3815 = vmatmul.bf16.gmra.mxu3 %v2680_v51  ;;  %v3042_v58 = vunpack.c.l.bf16 %v2680_v51  ;;  %v3044_v29 = vunpack.c.h.bf16 %v2680_v51  ;;  %5854 = vpow2.f32 %v2819_v34  ;;  %v3607_v62 = vpop.f32.mrf.mxu2 }
 0x3c8   : > { %v1945_v47 = vpop.xlane.xlu1 %1944  ;;  %v2557_v24 = vmul.f32 1.442695, %v2341_v18  ;;  %v2561_v32 = vmul.f32 1.442695, %v2343_v11  ;;  %v8051_v63 = vpop.f32.mrf.mxu0  ;;  %v2559_v8 = vmul.f32 1.442695, %v2342_v27 }
 0x3c9   : > { %v8049_v42 = vmax.f32 %v8043_v37, %v1945_v47  ;;  %v8053_v61 = vpop.f32.mrf.mxu1  ;;  %v8055_v31 = vadd.f32 %v3042_v58, %v3041_v35  ;;  %v8057_v1 = vadd.f32 %v3044_v29, %v3043_v0  ;;  %v2563_v51 = vmul.f32 1.442695, %v2344_v36  ;;  %v9591_v35 = vld [vmem:[#allocation17_spill] sm:$0xff]  ;;  %v8068_v58 = vld [vmem:[#allocation3 + $0xd0] sm:$0xff]  ;;  %v9602_v37 = vld [vmem:[#allocation19_spill] sm:$0xff] }
 0x3ca   : > { %v3776_v44 = vpop.f32.mrf.mxu3  ;;  %v1988_v34 = vmax.f32 %v8051_v63, %v8053_v61  ;;  %5856 = vpow2.f32 %v2557_v24  ;;  %v9593_v0 = vsub.f32 %v9591_v35, %v9592_v38  ;;  %9594 = vst [vmem:[#allocation17_spill] sm:$0xff] %v8068_v58  ;;  %v3898_v47 = vld [vmem:[#allocation5 + $0xd8] sm:$0xff] }
 0x3cb   : > { %9590 = vst [vmem:[#allocation106_spill] sm:$0xff] %v8049_v42  ;;  %v3777_v18 = vadd.f32 %v3776_v44, %v3607_v62  ;;  %5858 = vpow2.f32 %v2561_v32  ;;  %v2153_v32 = vsub.f32 %v7646_v53, %v8049_v42  ;;  %v2154_v44 = vsub.f32 %v7648_v41, %v8049_v42  ;;  %v9599_v35 = vld [vmem:[#allocation77_spill] sm:$0xff] }
 0x3cc   : > { %4173 = vst [vmem:[#allocation3 + $0x1d8] sm:$0xff] %v8049_v42  ;;  %1989 = vmax.xlane.f32.xlu1 %v1988_v34  ;;  %v2821_v11 = vmul.f32 1.442695, %v9593_v0  ;;  %5860 = vpow2.f32 %v2559_v8  ;;  %v8095_v0 = vld [vmem:[#allocation3 + $0xb8] sm:$0xff] }
 0x3cd   : > { %v4025_v27 = vadd.f32 %v3961_v17, %v3777_v18  ;;  %v8070_v29 = vpop.eup %5854  ;;  %5862 = vpow2.f32 %v2563_v51  ;;  %9601 = vst [vmem:[#allocation77_spill] sm:$0xff] %v8095_v0 }
 0x3ce   : > { %9595 = vst [vmem:[#allocation68_spill] sm:$0xff] %v8070_v29  ;;  %5864 = vpow2.f32 %v2821_v11 }
 0x3cf   : > { %4089 = vst.msk [vmem:[#allocation5 + $0xd0] sm:$0xff] %vm1194_vm2, %v4025_v27  ;;  %v1948_v36 = vpop.xlane.xlu2 %1947  ;;  %v3609_v10 = vpop.f32.mrf.mxu2  ;;  %v3962_v27 = vmul.f32 %v8070_v29, %v3898_v47  ;;  %v9618_v29 = vld [vmem:[#allocation25_spill] sm:$0xff] }
 0x3d0   : > { %v5857_v62 = vpop.eup %5856  ;;  %v8074_v24 = vmax.f32 %v8068_v58, %v1948_v36  ;;  %v8080_v8 = vpop.f32.mrf.mxu0 }
 0x3d1   : > { %9597 = vst [vmem:[#allocation108_spill] sm:$0xff] %v8080_v8  ;;  %v8082_v34 = vpop.f32.mrf.mxu1  ;;  %v5859_v51 = vpop.eup %5858 }
 0x3d2   : > { %9596 = vst [vmem:[#allocation107_spill] sm:$0xff] %v8074_v24  ;;  %v3778_v18 = vpop.f32.mrf.mxu3  ;;  %v2155_v17 = vsub.f32 %v7673_v25, %v8074_v24  ;;  %v2156_v38 = vsub.f32 %v9599_v35, %v8074_v24  ;;  %v1991_v53 = vmax.f32 %v8080_v8, %v8082_v34  ;;  %v5861_v41 = vpop.eup %5860  ;;  %v2681_v36 = vpack.c.bf16 %v5859_v51, %v5857_v62  ;;  %v9600_v25 = vld [vmem:[#allocation6_spill] sm:$0xff] }
 0x3d3   : > { %9598 = vst [vmem:[#allocation109_spill] sm:$0xff] %v8082_v34  ;;  %v3779_v11 = vadd.f32 %v3778_v18, %v3609_v10  ;;  %v5863_v57 = vpop.eup %5862  ;;  %v9603_v34 = vld [vmem:[#allocation71_spill] sm:$0xff] }
 0x3d4   : > { %4174 = vst [vmem:[#allocation3 + $0xd0] sm:$0xff] %v8074_v24  ;;  %v2235_v52 = vpack.c.bf16 %v2155_v17, %v2153_v32  ;;  %v2236_v16 = vpack.c.bf16 %v2156_v38, %v2154_v44  ;;  %3086 = vadd.xlane.f32.xlu1 %v9600_v25  ;;  %1992 = vmax.xlane.f32.xlu2 %v1991_v53  ;;  %v3047_v24 = vunpack.c.h.bf16 %v2681_v36  ;;  %v3045_v58 = vunpack.c.l.bf16 %v2681_v36  ;;  %v8100_v51 = vpop.eup %5864  ;;  %v3899_v53 = vld [vmem:[#allocation5 + $0xe0] sm:$0xff] }
 0x3d5   : > { %v4026_v35 = vadd.f32 %v3962_v27, %v3779_v11  ;;  %3651 = vmatmul.bf16.gmra.mxu2 %v2681_v36  ;;  %v2682_v42 = vpack.c.bf16 %v5863_v57, %v5861_v41  ;;  %v9604_v8 = vsub.f32 %v9602_v37, %v9603_v34  ;;  %9605 = vst [vmem:[#allocation6_spill] sm:$0xff] %v8100_v51 }
 0x3d6   : > { %v2345_v18 = vunpack.c.l.bf16 %v2235_v52  ;;  %v2347_v47 = vunpack.c.h.bf16 %v2235_v52  ;;  %v2346_v62 = vunpack.c.l.bf16 %v2236_v16  ;;  %v2348_v44 = vunpack.c.h.bf16 %v2236_v16 }
 0x3d7   : > { %v2823_v10 = vmul.f32 1.442695, %v9604_v8  ;;  %4090 = vst.msk [vmem:[#allocation5 + $0xd8] sm:$0xff] %vm1194_vm2, %v4026_v35  ;;  %3820 = vmatmul.bf16.gmra.mxu3 %v2682_v42  ;;  %v1951_v32 = vpop.xlane.xlu0 %1950  ;;  %v3048_v17 = vunpack.c.h.bf16 %v2682_v42  ;;  %v3046_v57 = vunpack.c.l.bf16 %v2682_v42  ;;  %v3612_v38 = vpop.f32.mrf.mxu2  ;;  %v8125_v42 = vld [vmem:[#allocation3 + $0x88] sm:$0xff] }
 0x3d8   : > { %v8104_v41 = vmax.f32 %v8095_v0, %v1951_v32  ;;  %v2565_v11 = vmul.f32 1.442695, %v2345_v18  ;;  %v2569_v37 = vmul.f32 1.442695, %v2347_v47  ;;  %v8106_v8 = vpop.f32.mrf.mxu0  ;;  %v2567_v34 = vmul.f32 1.442695, %v2346_v62 }
 0x3d9   : > { %v8108_v52 = vpop.f32.mrf.mxu1  ;;  %v8110_v27 = vadd.f32 %v3048_v17, %v3047_v24  ;;  %v8112_v36 = vadd.f32 %v3046_v57, %v3045_v58  ;;  %5866 = vpow2.f32 %v2823_v10  ;;  %v3963_v18 = vmul.f32 %v8100_v51, %v3899_v53  ;;  %v9608_v62 = vld [vmem:[#allocation9_spill] sm:$0xff]  ;;  %v9609_v24 = vld [vmem:[#allocation7_spill] sm:$0xff]  ;;  %v9611_v10 = vld [vmem:[#allocation72_spill] sm:$0xff] }
 0x3da   : > { %9606 = vst [vmem:[#allocation19_spill] sm:$0xff] %v8104_v41  ;;  %v3781_v16 = vpop.f32.mrf.mxu3  ;;  %v1994_v25 = vmax.f32 %v8106_v8, %v8108_v52  ;;  %5868 = vpow2.f32 %v2565_v11  ;;  %v2571_v47 = vmul.f32 1.442695, %v2348_v44  ;;  %v9610_v58 = vld [vmem:[#allocation23_spill] sm:$0xff] }
 0x3db   : > { %9607 = vst [vmem:[#allocation71_spill] sm:$0xff] %v8112_v36  ;;  %v3782_v35 = vadd.f32 %v3781_v16, %v3612_v38  ;;  %5870 = vpow2.f32 %v2569_v37  ;;  %v9612_v32 = vsub.f32 %v9610_v58, %v9611_v10  ;;  %v3900_v11 = vld [vmem:[#allocation5 + $0xe8] sm:$0xff]  ;;  %v9621_v58 = vld [vmem:[#allocation10_spill] sm:$0xff] }
 0x3dc   : > { %4175 = vst [vmem:[#allocation3 + $0xb8] sm:$0xff] %v8104_v41  ;;  %3095 = vadd.xlane.f32.xlu1 %v9608_v62  ;;  %3089 = vadd.xlane.f32.xlu2 %v9609_v24  ;;  %5872 = vpow2.f32 %v2567_v34  ;;  %v9617_v51 = vld [vmem:[#allocation15_spill] sm:$0xff] }
 0x3dd   : > { %v2825_v17 = vmul.f32 1.442695, %v9612_v32  ;;  %v4027_v57 = vadd.f32 %v3963_v18, %v3782_v35  ;;  %1995 = vmax.xlane.f32.xlu0 %v1994_v25  ;;  %5874 = vpow2.f32 %v2571_v47  ;;  %v2157_v35 = vsub.f32 %v7702_v43, %v8104_v41  ;;  %v9615_v18 = vld [vmem:[#allocation81_spill] sm:$0xff] }
 0x3de   : > { %v2158_v34 = vsub.f32 %v9615_v18, %v8104_v41  ;;  %v9616_v18 = vld [vmem:[#allocation21_spill] sm:$0xff]  ;;  %v9619_v41 = vld [vmem:[#allocation75_spill] sm:$0xff] }
 0x3df   : > { %4091 = vst.msk [vmem:[#allocation5 + $0xe0] sm:$0xff] %vm1194_vm2, %v4027_v57  ;;  %v1954_v38 = vpop.xlane.xlu1 %1953  ;;  %v8128_v53 = vpop.eup %5866  ;;  %5876 = vpow2.f32 %v2825_v17 }
 0x3e0   : > { %9613 = vst [vmem:[#allocation9_spill] sm:$0xff] %v8128_v53  ;;  %v3614_v44 = vpop.f32.mrf.mxu2  ;;  %v8131_v16 = vmax.f32 %v8125_v42, %v1954_v38  ;;  %v5869_v37 = vpop.eup %5868  ;;  %v3964_v43 = vmul.f32 %v8128_v53, %v3900_v11  ;;  %v8173_v53 = vld [vmem:[#allocation3 + $0x1c8] sm:$0xff] }
 0x3e1   : > { %v5871_v25 = vpop.eup %5870 }
 0x3e2   : > { %9614 = vst [vmem:[#allocation7_spill] sm:$0xff] %v8131_v16  ;;  %v3783_v62 = vpop.f32.mrf.mxu3  ;;  %v2159_v47 = vsub.f32 %v7727_v19, %v8131_v16  ;;  %v2160_v24 = vsub.f32 %v7729_v14, %v8131_v16  ;;  %v5873_v10 = vpop.eup %5872  ;;  %v2683_v17 = vpack.c.bf16 %v5871_v25, %v5869_v37  ;;  %v9620_v14 = vsub.f32 %v9618_v29, %v9619_v41  ;;  %v3901_v25 = vld [vmem:[#allocation5 + $0xf0] sm:$0xff] }
 0x3e3   : > { %4176 = vst [vmem:[#allocation3 + $0x88] sm:$0xff] %v8131_v16  ;;  %v3784_v32 = vadd.f32 %v3783_v62, %v3614_v44  ;;  %v5875_v19 = vpop.eup %5874  ;;  %v8151_v16 = vld [vmem:[#allocation3 + $0xa8] sm:$0xff] }
 0x3e4   : > { %v2237_v57 = vpack.c.bf16 %v2159_v47, %v2157_v35  ;;  %v2238_v38 = vpack.c.bf16 %v2160_v24, %v2158_v34  ;;  %3104 = vadd.xlane.f32.xlu1 %v9616_v18  ;;  %3098 = vadd.xlane.f32.xlu2 %v9617_v51  ;;  %v2827_v0 = vmul.f32 1.442695, %v9620_v14  ;;  %9622 = vst [vmem:[#allocation23_spill] sm:$0xff] %v8151_v16  ;;  %v3049_v47 = vunpack.c.l.bf16 %v2683_v17 }
 0x3e5   : > { %v4028_v36 = vadd.f32 %v3964_v43, %v3784_v32  ;;  %3656 = vmatmul.bf16.gmra.mxu2 %v2683_v17  ;;  %3092 = vadd.xlane.f32.xlu0 %v9621_v58  ;;  %v2684_v44 = vpack.c.bf16 %v5875_v19, %v5873_v10  ;;  %v8153_v35 = vpop.eup %5876  ;;  %v3051_v29 = vunpack.c.h.bf16 %v2683_v17 }
 0x3e6   : > { %v2349_v11 = vunpack.c.l.bf16 %v2237_v57  ;;  %v2351_v37 = vunpack.c.h.bf16 %v2237_v57  ;;  %9623 = vst [vmem:[#allocation72_spill] sm:$0xff] %v8153_v35  ;;  %v2350_v34 = vunpack.c.l.bf16 %v2238_v38  ;;  %v2352_v62 = vunpack.c.h.bf16 %v2238_v38  ;;  %v9630_v38 = vld [vmem:[#allocation16_spill] sm:$0xff] }
 0x3e7   : > { %4092 = vst.msk [vmem:[#allocation5 + $0xe8] sm:$0xff] %vm1194_vm2, %v4028_v36  ;;  %v1957_v51 = vpop.xlane.xlu2 %1956  ;;  %3825 = vmatmul.bf16.gmra.mxu3 %v2684_v44  ;;  %v3050_v10 = vunpack.c.l.bf16 %v2684_v44  ;;  %5878 = vpow2.f32 %v2827_v0  ;;  %v3052_v18 = vunpack.c.h.bf16 %v2684_v44  ;;  %v3965_v36 = vmul.f32 %v8153_v35, %v3901_v25  ;;  %v9626_v0 = vld [vmem:[#allocation22_spill] sm:$0xff]  ;;  %v9627_v44 = vld [vmem:[#allocation29_spill] sm:$0xff]  ;;  %v9635_v35 = vld [vmem:[#allocation80_spill] sm:$0xff] }
 0x3e8   : > { %v3617_v41 = vpop.f32.mrf.mxu2  ;;  %v8157_v24 = vmax.f32 %v8151_v16, %v1957_v51  ;;  %v2573_v58 = vmul.f32 1.442695, %v2349_v11  ;;  %v2577_v32 = vmul.f32 1.442695, %v2351_v37  ;;  %v2575_v43 = vmul.f32 1.442695, %v2350_v34 }
 0x3e9   : > { %v2579_v57 = vmul.f32 1.442695, %v2352_v62  ;;  %v8163_v14 = vadd.f32 %v3050_v10, %v3049_v47  ;;  %v8165_v11 = vadd.f32 %v3052_v18, %v3051_v29  ;;  %v9625_v37 = vld [vmem:[#allocation27_spill] sm:$0xff]  ;;  %v9628_v51 = vld [vmem:[#allocation76_spill] sm:$0xff] }
 0x3ea   : > { %9624 = vst [vmem:[#allocation81_spill] sm:$0xff] %v8157_v24  ;;  %v3786_v19 = vpop.f32.mrf.mxu3  ;;  %5880 = vpow2.f32 %v2573_v58  ;;  %v9629_v25 = vsub.f32 %v9627_v44, %v9628_v51  ;;  %v2161_v18 = vsub.f32 %v7756_v54, %v8157_v24 }
 0x3eb   : > { %4177 = vst [vmem:[#allocation3 + $0xa8] sm:$0xff] %v8157_v24  ;;  %v3787_v17 = vadd.f32 %v3786_v19, %v3617_v41  ;;  %5882 = vpow2.f32 %v2577_v32  ;;  %v3902_v32 = vld [vmem:[#allocation5 + $0xf8] sm:$0xff]  ;;  %v2162_v19 = vsub.f32 %v7758_v13, %v8157_v24 }
 0x3ec   : > { %3113 = vadd.xlane.f32.xlu1 %v9625_v37  ;;  %3107 = vadd.xlane.f32.xlu2 %v9626_v0  ;;  %5884 = vpow2.f32 %v2575_v43  ;;  %v2829_v34 = vmul.f32 1.442695, %v9629_v25  ;;  %v9637_v37 = vld [vmem:[#allocation28_spill] sm:$0xff] }
 0x3ed   : > { %v4029_v62 = vadd.f32 %v3965_v36, %v3787_v17  ;;  %3101 = vadd.xlane.f32.xlu0 %v9630_v38  ;;  %5886 = vpow2.f32 %v2579_v57  ;;  %v8175_v41 = vpop.eup %5878 }
 0x3ee   : > { %9631 = vst [vmem:[#allocation21_spill] sm:$0xff] %v8175_v41  ;;  %5888 = vpow2.f32 %v2829_v34  ;;  %v3966_v54 = vmul.f32 %v8175_v41, %v3902_v32  ;;  %v9650_v41 = vld [vmem:[#allocation85_spill] sm:$0xff] }
 0x3ef   : > { %4093 = vst.msk [vmem:[#allocation5 + $0xf0] sm:$0xff] %vm1194_vm2, %v4029_v62  ;;  %v1960_v47 = vpop.xlane.xlu0 %1959  ;;  %v9632_v62 = vld [vmem:[#allocation39_spill] sm:$0xff] }
 0x3f0   : > { %v5881_v29 = vpop.eup %5880  ;;  %v3619_v58 = vpop.f32.mrf.mxu2  ;;  %v8179_v10 = vmax.f32 %v8173_v53, %v1960_v47  ;;  %v9633_v47 = vld [vmem:[#allocation33_spill] sm:$0xff] }
 0x3f1   : > { %v5883_v43 = vpop.eup %5882 }
 0x3f2   : > { %v5885_v57 = vpop.eup %5884  ;;  %v3788_v36 = vpop.f32.mrf.mxu3  ;;  %v2163_v38 = vsub.f32 %v7781_v23, %v8179_v10  ;;  %v2164_v17 = vsub.f32 %v7783_v20, %v8179_v10  ;;  %4178 = vst [vmem:[#allocation3 + $0x1c8] sm:$0xff] %v8179_v10  ;;  %v2685_v0 = vpack.c.bf16 %v5883_v43, %v5881_v29  ;;  %v9634_v23 = vld [vmem:[#allocation31_spill] sm:$0xff]  ;;  %v8199_v29 = vld [vmem:[#allocation3 + $0x170] sm:$0xff] }
 0x3f3   : > { %v5887_v44 = vpop.eup %5886  ;;  %v3789_v51 = vadd.f32 %v3788_v36, %v3619_v58  ;;  %v9636_v20 = vsub.f32 %v9634_v23, %v9635_v35  ;;  %9638 = vst [vmem:[#allocation15_spill] sm:$0xff] %v8199_v29  ;;  %v3903_v36 = vld [vmem:[#allocation5 + $0x100] sm:$0xff] }
 0x3f4   : > { %v2239_v25 = vpack.c.bf16 %v2163_v38, %v2161_v18  ;;  %v2240_v13 = vpack.c.bf16 %v2164_v17, %v2162_v19  ;;  %v2686_v34 = vpack.c.bf16 %v5887_v44, %v5885_v57  ;;  %3122 = vadd.xlane.f32.xlu1 %v9632_v62  ;;  %3116 = vadd.xlane.f32.xlu2 %v9633_v47  ;;  %v3053_v58 = vunpack.c.l.bf16 %v2685_v0  ;;  %v8201_v57 = vpop.eup %5888 }
 0x3f5   : > { %v2831_v24 = vmul.f32 1.442695, %v9636_v20  ;;  %v4030_v16 = vadd.f32 %v3966_v54, %v3789_v51  ;;  %3661 = vmatmul.bf16.gmra.mxu2 %v2685_v0  ;;  %3110 = vadd.xlane.f32.xlu0 %v9637_v37  ;;  %v3055_v43 = vunpack.c.h.bf16 %v2685_v0  ;;  %9639 = vst [vmem:[#allocation25_spill] sm:$0xff] %v8201_v57  ;;  %v3967_v20 = vmul.f32 %v8201_v57, %v3903_v36  ;;  %v9648_v57 = vld [vmem:[#allocation49_spill] sm:$0xff] }
 0x3f6   : > { %v2353_v32 = vunpack.c.l.bf16 %v2239_v25  ;;  %v2355_v18 = vunpack.c.h.bf16 %v2239_v25  ;;  %v2354_v19 = vunpack.c.l.bf16 %v2240_v13  ;;  %v2356_v17 = vunpack.c.h.bf16 %v2240_v13  ;;  %v9647_v13 = vld [vmem:[#allocation55_spill] sm:$0xff] }
 0x3f7   : > { %4094 = vst.msk [vmem:[#allocation5 + $0xf8] sm:$0xff] %vm1194_vm2, %v4030_v16  ;;  %v1963_v38 = vpop.xlane.xlu1 %1962  ;;  %v3054_v35 = vunpack.c.l.bf16 %v2686_v34  ;;  %v3056_v44 = vunpack.c.h.bf16 %v2686_v34  ;;  %3830 = vmatmul.bf16.gmra.mxu3 %v2686_v34  ;;  %5890 = vpow2.f32 %v2831_v24  ;;  %v9643_v24 = vld [vmem:[#allocation35_spill] sm:$0xff] }
 0x3f8   : > { %v3622_v51 = vpop.f32.mrf.mxu2  ;;  %v8205_v37 = vmax.f32 %v8199_v29, %v1963_v38  ;;  %v2581_v54 = vmul.f32 1.442695, %v2353_v32  ;;  %v2585_v62 = vmul.f32 1.442695, %v2355_v18  ;;  %v2583_v0 = vmul.f32 1.442695, %v2354_v19 }
 0x3f9   : > { %v2587_v25 = vmul.f32 1.442695, %v2356_v17  ;;  %v8207_v47 = vadd.f32 %v3054_v35, %v3053_v58  ;;  %v8209_v23 = vadd.f32 %v3056_v44, %v3055_v43  ;;  %v9641_v32 = vld [vmem:[#allocation44_spill] sm:$0xff]  ;;  %v9644_v58 = vld [vmem:[#allocation82_spill] sm:$0xff]  ;;  %v8221_v35 = vld [vmem:[#allocation3 + $0x178] sm:$0xff] }
 0x3fa   : > { %9640 = vst [vmem:[#allocation75_spill] sm:$0xff] %v8205_v37  ;;  %v3791_v16 = vpop.f32.mrf.mxu3  ;;  %5892 = vpow2.f32 %v2581_v54  ;;  %v9642_v18 = vld [vmem:[#allocation40_spill] sm:$0xff]  ;;  %v9645_v43 = vsub.f32 %v9643_v24, %v9644_v58  ;;  %v9646_v17 = vld [vmem:[#allocation34_spill] sm:$0xff]  ;;  %v9652_v58 = vld [vmem:[#allocation45_spill] sm:$0xff] }
 0x3fb   : > { %4179 = vst [vmem:[#allocation3 + $0x170] sm:$0xff] %v8205_v37  ;;  %v3792_v34 = vadd.f32 %v3791_v16, %v3622_v51  ;;  %5894 = vpow2.f32 %v2585_v62  ;;  %v3904_v62 = vld [vmem:[#allocation5 + $0x108] sm:$0xff] }
 0x3fc   : > { %3131 = vadd.xlane.f32.xlu1 %v9641_v32  ;;  %3125 = vadd.xlane.f32.xlu2 %v9642_v18  ;;  %5896 = vpow2.f32 %v2583_v0  ;;  %v2833_v19 = vmul.f32 1.442695, %v9645_v43 }
 0x3fd   : > { %v4031_v38 = vadd.f32 %v3967_v20, %v3792_v34  ;;  %3119 = vadd.xlane.f32.xlu0 %v9646_v17  ;;  %5898 = vpow2.f32 %v2587_v25  ;;  %v8223_v44 = vpop.eup %5890  ;;  %v2165_v34 = vsub.f32 %v7810_v59, %v8205_v37  ;;  %v2166_v20 = vsub.f32 %v7812_v60, %v8205_v37 }
 0x3fe   : > { %5900 = vpow2.f32 %v2833_v19  ;;  %v3968_v59 = vmul.f32 %v8223_v44, %v3904_v62 }
 0x3ff   : > { %4095 = vst.msk [vmem:[#allocation5 + $0x100] sm:$0xff] %vm1194_vm2, %v4031_v38  ;;  %v1966_v36 = vpop.xlane.xlu2 %1965 }
 0x400   : > { %v5893_v51 = vpop.eup %5892  ;;  %v3624_v54 = vpop.f32.mrf.mxu2  ;;  %v8227_v0 = vmax.f32 %v8221_v35, %v1966_v36 }
 0x401   : > { %v5895_v16 = vpop.eup %5894 }
 0x402   : > { %v5897_v25 = vpop.eup %5896  ;;  %v3793_v32 = vpop.f32.mrf.mxu3  ;;  %v2167_v18 = vsub.f32 %v7835_v49, %v8227_v0  ;;  %v2168_v24 = vsub.f32 %v7837_v28, %v8227_v0  ;;  %4180 = vst [vmem:[#allocation3 + $0x178] sm:$0xff] %v8227_v0  ;;  %v2687_v43 = vpack.c.bf16 %v5895_v16, %v5893_v51  ;;  %v9649_v49 = vld [vmem:[#allocation37_spill] sm:$0xff]  ;;  %v8247_v51 = vld [vmem:[#allocation3 + $0x68] sm:$0xff] }
 0x403   : > { %v5899_v19 = vpop.eup %5898  ;;  %v3794_v38 = vadd.f32 %v3793_v32, %v3624_v54  ;;  %v9651_v28 = vsub.f32 %v9649_v49, %v9650_v41  ;;  %9653 = vst [vmem:[#allocation10_spill] sm:$0xff] %v8247_v51 }
 0x404   : > { %v2241_v17 = vpack.c.bf16 %v2167_v18, %v2165_v34  ;;  %v2242_v60 = vpack.c.bf16 %v2168_v24, %v2166_v20  ;;  %v2688_v36 = vpack.c.bf16 %v5899_v19, %v5897_v25  ;;  %3140 = vadd.xlane.f32.xlu1 %v9647_v13  ;;  %3134 = vadd.xlane.f32.xlu2 %v9648_v57  ;;  %v3059_v54 = vunpack.c.h.bf16 %v2687_v43  ;;  %v8249_v25 = vpop.eup %5900  ;;  %v3905_v57 = vld [vmem:[#allocation5 + $0x110] sm:$0xff] }
 0x405   : > { %v2835_v37 = vmul.f32 1.442695, %v9651_v28  ;;  %v4032_v29 = vadd.f32 %v3968_v59, %v3794_v38  ;;  %3666 = vmatmul.bf16.gmra.mxu2 %v2687_v43  ;;  %3128 = vadd.xlane.f32.xlu0 %v9652_v58  ;;  %v3057_v16 = vunpack.c.l.bf16 %v2687_v43  ;;  %9654 = vst [vmem:[#allocation27_spill] sm:$0xff] %v8249_v25  ;;  %v3969_v28 = vmul.f32 %v8249_v25, %v3905_v57  ;;  %v9664_v25 = vld [vmem:[#allocation89_spill] sm:$0xff] }
 0x406   : > { %v2357_v62 = vunpack.c.l.bf16 %v2241_v17  ;;  %v2359_v34 = vunpack.c.h.bf16 %v2241_v17  ;;  %v2358_v20 = vunpack.c.l.bf16 %v2242_v60  ;;  %v2360_v32 = vunpack.c.h.bf16 %v2242_v60  ;;  %v9662_v60 = vld [vmem:[#allocation65_spill] sm:$0xff] }
 0x407   : > { %4096 = vst.msk [vmem:[#allocation5 + $0x108] sm:$0xff] %vm1194_vm2, %v4032_v29  ;;  %v1969_v13 = vpop.xlane.xlu0 %1968  ;;  %v3060_v41 = vunpack.c.h.bf16 %v2688_v36  ;;  %v3058_v18 = vunpack.c.l.bf16 %v2688_v36  ;;  %3835 = vmatmul.bf16.gmra.mxu3 %v2688_v36  ;;  %5902 = vpow2.f32 %v2835_v37  ;;  %v9658_v37 = vld [vmem:[#allocation42_spill] sm:$0xff] }
 0x408   : > { %v3627_v24 = vpop.f32.mrf.mxu2  ;;  %v8253_v58 = vmax.f32 %v8247_v51, %v1969_v13  ;;  %v2589_v19 = vmul.f32 1.442695, %v2357_v62  ;;  %v2593_v38 = vmul.f32 1.442695, %v2359_v34  ;;  %v2591_v43 = vmul.f32 1.442695, %v2358_v20 }
 0x409   : > { %v2595_v59 = vmul.f32 1.442695, %v2360_v32  ;;  %v8255_v17 = vadd.f32 %v3060_v41, %v3059_v54  ;;  %v8257_v49 = vadd.f32 %v3058_v18, %v3057_v16  ;;  %v9656_v62 = vld [vmem:[#allocation59_spill] sm:$0xff]  ;;  %v9657_v34 = vld [vmem:[#allocation56_spill] sm:$0xff]  ;;  %v9659_v54 = vsub.f32 %v7773_v33, %v9658_v37  ;;  %v9660_v13 = vld [vmem:[#allocation50_spill] sm:$0xff] }
 0x40a   : > { %9655 = vst [vmem:[#allocation22_spill] sm:$0xff] %v8253_v58  ;;  %v3796_v29 = vpop.f32.mrf.mxu3  ;;  %5904 = vpow2.f32 %v2589_v19  ;;  %v8269_v32 = vld [vmem:[#allocation3 + $0x190] sm:$0xff]  ;;  %v3906_v19 = vld [vmem:[#allocation5 + $0x118] sm:$0xff]  ;;  %v2169_v33 = vsub.f32 %v7864_v56, %v8253_v58 }
 0x40b   : > { %4181 = vst [vmem:[#allocation3 + $0x68] sm:$0xff] %v8253_v58  ;;  %v3797_v36 = vadd.f32 %v3796_v29, %v3627_v24  ;;  %5906 = vpow2.f32 %v2593_v38  ;;  %v2837_v16 = vmul.f32 1.442695, %v9659_v54  ;;  %v2170_v29 = vsub.f32 %v7866_v3, %v8253_v58 }
 0x40c   : > { %3149 = vadd.xlane.f32.xlu1 %v9656_v62  ;;  %3143 = vadd.xlane.f32.xlu2 %v9657_v34  ;;  %5908 = vpow2.f32 %v2591_v43  ;;  %v9666_v34 = vld [vmem:[#allocation60_spill] sm:$0xff] }
 0x40d   : > { %v4033_v20 = vadd.f32 %v3969_v28, %v3797_v36  ;;  %3137 = vadd.xlane.f32.xlu0 %v9660_v13  ;;  %5910 = vpow2.f32 %v2595_v59  ;;  %v8271_v41 = vpop.eup %5902 }
 0x40e   : > { %5912 = vpow2.f32 %v2837_v16  ;;  %v3970_v56 = vmul.f32 %v8271_v41, %v3906_v19 }
 0x40f   : > { %4097 = vst.msk [vmem:[#allocation5 + $0x110] sm:$0xff] %vm1194_vm2, %v4033_v20  ;;  %v1972_v57 = vpop.xlane.xlu1 %1971 }
 0x410   : > { %v5905_v18 = vpop.eup %5904  ;;  %v3629_v24 = vpop.f32.mrf.mxu2  ;;  %v8275_v38 = vmax.f32 %v8269_v32, %v1972_v57  ;;  %v9661_v57 = vld [vmem:[#allocation69_spill] sm:$0xff] }
 0x411   : > { %v5907_v43 = vpop.eup %5906 }
 0x412   : > { %v5909_v59 = vpop.eup %5908  ;;  %v3798_v36 = vpop.f32.mrf.mxu3  ;;  %v2171_v28 = vsub.f32 %v7889_v21, %v8275_v38  ;;  %v2172_v62 = vsub.f32 %v7891_v30, %v8275_v38  ;;  %4182 = vst [vmem:[#allocation3 + $0x190] sm:$0xff] %v8275_v38  ;;  %v2689_v37 = vpack.c.bf16 %v5907_v43, %v5905_v18  ;;  %v9663_v21 = vld [vmem:[#allocation43_spill] sm:$0xff]  ;;  %v8295_v18 = vld [vmem:[#allocation3 + $0x198] sm:$0xff] }
 0x413   : > { %v5911_v54 = vpop.eup %5910  ;;  %v3799_v16 = vadd.f32 %v3798_v36, %v3629_v24  ;;  %v9665_v30 = vsub.f32 %v9663_v21, %v9664_v25 }
 0x414   : > { %v2243_v20 = vpack.c.bf16 %v2171_v28, %v2169_v33  ;;  %v2244_v3 = vpack.c.bf16 %v2172_v62, %v2170_v29  ;;  %v2690_v13 = vpack.c.bf16 %v5911_v54, %v5909_v59  ;;  %3158 = vadd.xlane.f32.xlu1 %v9661_v57  ;;  %3152 = vadd.xlane.f32.xlu2 %v9662_v60  ;;  %v3061_v24 = vunpack.c.l.bf16 %v2689_v37  ;;  %v8297_v59 = vpop.eup %5912  ;;  %v3907_v60 = vld [vmem:[#allocation5 + $0x120] sm:$0xff] }
 0x415   : > { %v2839_v58 = vmul.f32 1.442695, %v9665_v30  ;;  %v4034_v51 = vadd.f32 %v3970_v56, %v3799_v16  ;;  %3671 = vmatmul.bf16.gmra.mxu2 %v2689_v37  ;;  %3146 = vadd.xlane.f32.xlu0 %v9666_v34  ;;  %v3063_v43 = vunpack.c.h.bf16 %v2689_v37  ;;  %v3971_v30 = vmul.f32 %v8297_v59, %v3907_v60 }
 0x416   : > { %v2361_v19 = vunpack.c.l.bf16 %v2243_v20  ;;  %v2363_v33 = vunpack.c.h.bf16 %v2243_v20  ;;  %v2362_v29 = vunpack.c.l.bf16 %v2244_v3  ;;  %v2364_v28 = vunpack.c.h.bf16 %v2244_v3 }
 0x417   : > { %4098 = vst.msk [vmem:[#allocation5 + $0x118] sm:$0xff] %vm1194_vm2, %v4034_v51  ;;  %v1975_v36 = vpop.xlane.xlu2 %1974  ;;  %v3062_v25 = vunpack.c.l.bf16 %v2690_v13  ;;  %v3064_v62 = vunpack.c.h.bf16 %v2690_v13  ;;  %3840 = vmatmul.bf16.gmra.mxu3 %v2690_v13  ;;  %5914 = vpow2.f32 %v2839_v58  ;;  %v9669_v58 = vsub.f32 %v7827_v4, %v7833_v46 }
 0x418   : > { %v3632_v54 = vpop.f32.mrf.mxu2  ;;  %v8301_v34 = vmax.f32 %v8295_v18, %v1975_v36  ;;  %v2597_v16 = vmul.f32 1.442695, %v2361_v19  ;;  %v2601_v56 = vmul.f32 1.442695, %v2363_v33  ;;  %v2599_v37 = vmul.f32 1.442695, %v2362_v29 }
 0x419   : > { %v2603_v20 = vmul.f32 1.442695, %v2364_v28  ;;  %v8303_v57 = vadd.f32 %v3062_v25, %v3061_v24  ;;  %v8305_v21 = vadd.f32 %v3064_v62, %v3063_v43  ;;  %v9667_v19 = vld [vmem:[#allocation73_spill] sm:$0xff]  ;;  %v9668_v33 = vld [vmem:[#allocation70_spill] sm:$0xff]  ;;  %v2841_v24 = vmul.f32 1.442695, %v9669_v58 }
 0x41a   : > { %v3801_v51 = vpop.f32.mrf.mxu3  ;;  %4183 = vst [vmem:[#allocation3 + $0x198] sm:$0xff] %v8301_v34  ;;  %5916 = vpow2.f32 %v2597_v16  ;;  %v9670_v29 = vld [vmem:[#allocation66_spill] sm:$0xff]  ;;  %v8317_v36 = vld [vmem:[#allocation3 + $0x38] sm:$0xff]  ;;  %v2173_v4 = vsub.f32 %v7918_v15, %v8301_v34  ;;  %v2174_v46 = vsub.f32 %v7920_v2, %v8301_v34 }
 0x41b   : > { %v3802_v13 = vadd.f32 %v3801_v51, %v3632_v54  ;;  %5918 = vpow2.f32 %v2601_v56  ;;  %9671 = vst [vmem:[#allocation29_spill] sm:$0xff] %v8317_v36  ;;  %v3908_v54 = vld [vmem:[#allocation5 + $0x128] sm:$0xff] }
 0x41c   : > { %3167 = vadd.xlane.f32.xlu1 %v9667_v19  ;;  %3161 = vadd.xlane.f32.xlu2 %v9668_v33  ;;  %5920 = vpow2.f32 %v2599_v37 }
 0x41d   : > { %v4035_v43 = vadd.f32 %v3971_v30, %v3802_v13  ;;  %3155 = vadd.xlane.f32.xlu0 %v9670_v29  ;;  %5922 = vpow2.f32 %v2603_v20  ;;  %v8319_v28 = vpop.eup %5914  ;;  %v9672_v29 = vld [vmem:[#allocation83_spill] sm:$0xff] }
 0x41e   : > { %5924 = vpow2.f32 %v2841_v24  ;;  %v3972_v58 = vmul.f32 %v8319_v28, %v3908_v54 }
 0x41f   : > { %4099 = vst.msk [vmem:[#allocation5 + $0x120] sm:$0xff] %vm1194_vm2, %v4035_v43  ;;  %v1978_v60 = vpop.xlane.xlu0 %1977 }
 0x420   : > { %v5917_v25 = vpop.eup %5916  ;;  %v3634_v62 = vpop.f32.mrf.mxu2  ;;  %v8323_v16 = vmax.f32 %v8317_v36, %v1978_v60  ;;  %v9675_v60 = vld [vmem:[#allocation93_spill] sm:$0xff] }
 0x421   : > { %v5919_v56 = vpop.eup %5918 }
 0x422   : > { %v5921_v37 = vpop.eup %5920  ;;  %v3803_v20 = vpop.f32.mrf.mxu3  ;;  %v2175_v51 = vsub.f32 %v7943_v26, %v8323_v16  ;;  %v2176_v13 = vsub.f32 %v7945_v45, %v8323_v16  ;;  %4184 = vst [vmem:[#allocation3 + $0x38] sm:$0xff] %v8323_v16  ;;  %v8336_v19 = vpack.c.bf16 %v5919_v56, %v5917_v25  ;;  %v9673_v26 = vld [vmem:[#allocation78_spill] sm:$0xff]  ;;  %v9674_v45 = vld [vmem:[#allocation91_spill] sm:$0xff] }
 0x423   : > { %v5923_v33 = vpop.eup %5922  ;;  %v3804_v15 = vadd.f32 %v3803_v20, %v3634_v62  ;;  %v9676_v3 = vsub.f32 %v9674_v45, %v9675_v60  ;;  %v9677_v25 = vld [vmem:[#allocation74_spill] sm:$0xff]  ;;  %v3909_v20 = vld [vmem:[#allocation5 + $0x130] sm:$0xff] }
 0x424   : > { %v2245_v2 = vpack.c.bf16 %v2175_v51, %v2173_v4  ;;  %v2246_v24 = vpack.c.bf16 %v2176_v13, %v2174_v46  ;;  %v8339_v43 = vpack.c.bf16 %v5923_v33, %v5921_v37  ;;  %3176 = vadd.xlane.f32.xlu1 %v9672_v29  ;;  %3170 = vadd.xlane.f32.xlu2 %v9673_v26  ;;  %v8348_v62 = vld [vmem:[#allocation3 + $0xc0] sm:$0xff]  ;;  %v3067_v54 = vunpack.c.h.bf16 %v8336_v19  ;;  %v8351_v37 = vpop.eup %5924 }
 0x425   : > { %v2843_v30 = vmul.f32 1.442695, %v9676_v3  ;;  %v4036_v36 = vadd.f32 %v3972_v58, %v3804_v15  ;;  %3676 = vmatmul.bf16.gmra.mxu2 %v8336_v19  ;;  %3164 = vadd.xlane.f32.xlu0 %v9677_v25  ;;  %v3973_v25 = vmul.f32 %v8351_v37, %v3909_v20 }
 0x426   : > { %v2365_v56 = vunpack.c.l.bf16 %v2245_v2  ;;  %v2367_v4 = vunpack.c.h.bf16 %v2245_v2  ;;  %v2366_v46 = vunpack.c.l.bf16 %v2246_v24  ;;  %v2368_v13 = vunpack.c.h.bf16 %v2246_v24 }
 0x427   : > { %4100 = vst.msk [vmem:[#allocation5 + $0x128] sm:$0xff] %vm1194_vm2, %v4036_v36  ;;  %v1981_v51 = vpop.xlane.xlu1 %1980  ;;  %v3068_v3 = vunpack.c.h.bf16 %v8339_v43  ;;  %3845 = vmatmul.bf16.gmra.mxu3 %v8339_v43  ;;  %5926 = vpow2.f32 %v2843_v30  ;;  %v9681_v30 = vsub.f32 %v7881_v12, %v7887_v9  ;;  %v9686_v36 = vld [vmem:[#allocation96_spill] sm:$0xff] }
 0x428   : > { %v3637_v33 = vpop.f32.mrf.mxu2  ;;  %v8357_v15 = vmax.f32 %v8348_v62, %v1981_v51  ;;  %v2605_v58 = vmul.f32 1.442695, %v2365_v56  ;;  %v2609_v29 = vmul.f32 1.442695, %v2367_v4  ;;  %v2607_v26 = vmul.f32 1.442695, %v2366_v46 }
 0x429   : > { %v2611_v2 = vmul.f32 1.442695, %v2368_v13  ;;  %v8359_v45 = vadd.f32 %v3068_v3, %v3067_v54  ;;  %v9679_v51 = vld [vmem:[#allocation86_spill] sm:$0xff]  ;;  %v9680_v56 = vld [vmem:[#allocation84_spill] sm:$0xff]  ;;  %v2845_v54 = vmul.f32 1.442695, %v9681_v30 }
 0x42a   : > { %9678 = vst [vmem:[#allocation76_spill] sm:$0xff] %v8357_v15  ;;  %v3806_v60 = vpop.f32.mrf.mxu3  ;;  %5928 = vpow2.f32 %v2605_v58  ;;  %v9682_v46 = vld [vmem:[#allocation79_spill] sm:$0xff]  ;;  %v8371_v13 = vld [vmem:[#allocation3 + $0x1c0] sm:$0xff]  ;;  %v2177_v12 = vsub.f32 %v7972_v40, %v8357_v15  ;;  %v2178_v9 = vsub.f32 %v7974_v22, %v8357_v15 }
 0x42b   : > { %4185 = vst [vmem:[#allocation3 + $0xc0] sm:$0xff] %v8357_v15  ;;  %v3807_v24 = vadd.f32 %v3806_v60, %v3637_v33  ;;  %5930 = vpow2.f32 %v2609_v29  ;;  %v3910_v29 = vld [vmem:[#allocation5 + $0x138] sm:$0xff] }
 0x42c   : > { %3185 = vadd.xlane.f32.xlu1 %v9679_v51  ;;  %3179 = vadd.xlane.f32.xlu2 %v9680_v56  ;;  %5932 = vpow2.f32 %v2607_v26  ;;  %9683 = vst [vmem:[#allocation16_spill] sm:$0xff] %v8371_v13 }
 0x42d   : > { %v4037_v4 = vadd.f32 %v3973_v25, %v3807_v24  ;;  %3173 = vadd.xlane.f32.xlu0 %v9682_v46  ;;  %5934 = vpow2.f32 %v2611_v2  ;;  %v8373_v3 = vpop.eup %5926 }
 0x42e   : > { %5936 = vpow2.f32 %v2845_v54 }
 0x42f   : > { %4101 = vst.msk [vmem:[#allocation5 + $0x130] sm:$0xff] %vm1194_vm2, %v4037_v4  ;;  %v1984_v20 = vpop.xlane.xlu2 %1983  ;;  %v3974_v4 = vmul.f32 %v8373_v3, %v3910_v29 }
 0x430   : > { %v5929_v33 = vpop.eup %5928  ;;  %v3639_v58 = vpop.f32.mrf.mxu2  ;;  %v8377_v26 = vmax.f32 %v8371_v13, %v1984_v20 }
 0x431   : > { %v5931_v60 = vpop.eup %5930 }
 0x432   : > { %v5933_v2 = vpop.eup %5932  ;;  %v3808_v24 = vpop.f32.mrf.mxu3  ;;  %v2179_v25 = vsub.f32 %v7997_v55, %v8377_v26  ;;  %v2180_v51 = vsub.f32 %v7999_v39, %v8377_v26  ;;  %4186 = vst [vmem:[#allocation3 + $0x1c0] sm:$0xff] %v8377_v26  ;;  %v8390_v30 = vpack.c.bf16 %v5931_v60, %v5929_v33  ;;  %v9684_v55 = vld [vmem:[#allocation47_spill] sm:$0xff]  ;;  %v9685_v39 = vld [vmem:[#allocation94_spill] sm:$0xff] }
 0x433   : > { %v5935_v54 = vpop.eup %5934  ;;  %v3809_v40 = vadd.f32 %v3808_v24, %v3639_v58  ;;  %v9687_v15 = vsub.f32 %v9685_v39, %v9686_v36  ;;  %v9688_v33 = vld [vmem:[#allocation87_spill] sm:$0xff]  ;;  %v8402_v58 = vld [vmem:[#allocation3 + $0x158] sm:$0xff] }
 0x434   : > { %v2247_v22 = vpack.c.bf16 %v2179_v25, %v2177_v12  ;;  %v2248_v46 = vpack.c.bf16 %v2180_v51, %v2178_v9  ;;  %v8393_v20 = vpack.c.bf16 %v5935_v54, %v5933_v2  ;;  %3194 = vadd.xlane.f32.xlu1 %v7893_v7  ;;  %3188 = vadd.xlane.f32.xlu2 %v9684_v55  ;;  %v8404_v9 = vpop.eup %5936  ;;  %v3911_v7 = vld [vmem:[#allocation5 + $0x140] sm:$0xff]  ;;  %v9691_v55 = vld [vmem:[#allocation53_spill] sm:$0xff] }
 0x435   : > { %v2847_v56 = vmul.f32 1.442695, %v9687_v15  ;;  %v4038_v13 = vadd.f32 %v3974_v4, %v3809_v40  ;;  %3681 = vmatmul.bf16.gmra.mxu2 %v8390_v30  ;;  %3182 = vadd.xlane.f32.xlu0 %v9688_v33  ;;  %9689 = vst [vmem:[#allocation39_spill] sm:$0xff] %v8402_v58  ;;  %v9692_v39 = vld [vmem:[#allocation97_spill] sm:$0xff] }
 0x436   : > { %v2369_v29 = vunpack.c.l.bf16 %v2247_v22  ;;  %v2371_v60 = vunpack.c.h.bf16 %v2247_v22  ;;  %v2370_v12 = vunpack.c.l.bf16 %v2248_v46  ;;  %v2372_v24 = vunpack.c.h.bf16 %v2248_v46  ;;  %v1741_v22 = vld [vmem:[#allocation4 + $0x68] sm:$0xff] }
 0x437   : > { %4102 = vst.msk [vmem:[#allocation5 + $0x138] sm:$0xff] %vm1194_vm2, %v4038_v13  ;;  %v1987_v2 = vpop.xlane.xlu0 %1986  ;;  %3850 = vmatmul.bf16.gmra.mxu3 %v8393_v20  ;;  %5938 = vpow2.f32 %v2847_v56  ;;  %v3975_v46 = vmul.f32 %v8404_v9, %v3911_v7  ;;  %v9693_v56 = vsub.f32 %v7935_v6, %v9692_v39 }
 0x438   : > { %v3642_v15 = vpop.f32.mrf.mxu2  ;;  %v8409_v36 = vmax.f32 %v8402_v58, %v1987_v2  ;;  %v2613_v25 = vmul.f32 1.442695, %v2369_v29  ;;  %v2617_v51 = vmul.f32 1.442695, %v2371_v60  ;;  %v2615_v54 = vmul.f32 1.442695, %v2370_v12 }
 0x439   : > { %v2619_v40 = vmul.f32 1.442695, %v2372_v24  ;;  %v2849_v33 = vmul.f32 1.442695, %v9693_v56  ;;  %v9694_v60 = vld [vmem:[#allocation90_spill] sm:$0xff]  ;;  %v8421_v12 = vld [vmem:[#allocation3 + $0x10] sm:$0xff] }
 0x43a   : > { %9690 = vst [vmem:[#allocation33_spill] sm:$0xff] %v8409_v36  ;;  %v3811_v4 = vpop.f32.mrf.mxu3  ;;  %5940 = vpow2.f32 %v2613_v25  ;;  %v2181_v6 = vsub.f32 %v8026_v5, %v8409_v36  ;;  %v9697_v5 = vld [vmem:[#allocation99_spill] sm:$0xff] }
 0x43b   : > { %4187 = vst [vmem:[#allocation3 + $0x158] sm:$0xff] %v8409_v36  ;;  %v3812_v13 = vadd.f32 %v3811_v4, %v3642_v15  ;;  %5942 = vpow2.f32 %v2617_v51  ;;  %v3912_v15 = vld [vmem:[#allocation5 + $0x148] sm:$0xff] }
 0x43c   : > { %3203 = vadd.xlane.f32.xlu1 %v7947_v50  ;;  %3197 = vadd.xlane.f32.xlu2 %v9691_v55  ;;  %5944 = vpow2.f32 %v2615_v54  ;;  %9695 = vst [vmem:[#allocation31_spill] sm:$0xff] %v8421_v12  ;;  %v2182_v54 = vsub.f32 %v8028_v48, %v8409_v36 }
 0x43d   : > { %v4039_v29 = vadd.f32 %v3975_v46, %v3812_v13  ;;  %3191 = vadd.xlane.f32.xlu0 %v9694_v60  ;;  %5946 = vpow2.f32 %v2619_v40  ;;  %v8423_v2 = vpop.eup %5938 }
 0x43e   : > { %5948 = vpow2.f32 %v2849_v33  ;;  %v9698_v33 = vld [vmem:[#allocation101_spill] sm:$0xff] }
 0x43f   : > { %4103 = vst.msk [vmem:[#allocation5 + $0x140] sm:$0xff] %vm1194_vm2, %v4039_v29  ;;  %v1990_v7 = vpop.xlane.xlu1 %1989  ;;  %v9699_v29 = vsub.f32 %v9697_v5, %v9698_v33  ;;  %v9703_v5 = vld [vmem:[#allocation48_spill] sm:$0xff] }
 0x440   : > { %v5941_v24 = vpop.eup %5940  ;;  %v3644_v50 = vpop.f32.mrf.mxu2  ;;  %v8427_v25 = vmax.f32 %v8421_v12, %v1990_v7  ;;  %v3976_v7 = vmul.f32 %v8423_v2, %v3912_v15  ;;  %v1750_v12 = vld [vmem:[#allocation4 + $0x50] sm:$0xff] }
 0x441   : > { %v5943_v51 = vpop.eup %5942  ;;  %v2851_v48 = vmul.f32 1.442695, %v9699_v29 }
 0x442   : > { %9696 = vst [vmem:[#allocation80_spill] sm:$0xff] %v8427_v25  ;;  %v5945_v40 = vpop.eup %5944  ;;  %v3813_v4 = vpop.f32.mrf.mxu3  ;;  %v2183_v13 = vsub.f32 %v8051_v63, %v8427_v25  ;;  %v2184_v46 = vsub.f32 %v8053_v61, %v8427_v25  ;;  %v8440_v39 = vpack.c.bf16 %v5943_v51, %v5941_v24  ;;  %v9700_v61 = vld [vmem:[#allocation103_spill] sm:$0xff]  ;;  %v9701_v24 = vld [vmem:[#allocation98_spill] sm:$0xff]  ;;  %v8452_v51 = vld [vmem:[#allocation3 + $0x58] sm:$0xff] }
 0x443   : > { %4188 = vst [vmem:[#allocation3 + $0x10] sm:$0xff] %v8427_v25  ;;  %v5947_v56 = vpop.eup %5946  ;;  %v3814_v60 = vadd.f32 %v3813_v4, %v3644_v50  ;;  %v2893_v50 = vmul.f32 %v9703_v5, %v1741_v22  ;;  %5950 = vpow2.f32 %v2851_v48  ;;  %v1742_v5 = vld [vmem:[#allocation4 + $0x150] sm:$0xff] }
 0x444   : > { %v2249_v63 = vpack.c.bf16 %v2183_v13, %v2181_v6  ;;  %v2250_v36 = vpack.c.bf16 %v2184_v46, %v2182_v54  ;;  %v8446_v58 = vpack.c.bf16 %v5947_v56, %v5945_v40  ;;  %3212 = vadd.xlane.f32.xlu1 %v8055_v31  ;;  %3206 = vadd.xlane.f32.xlu2 %v9700_v61  ;;  %v8455_v6 = vpop.eup %5948  ;;  %v3913_v46 = vld [vmem:[#allocation5 + $0x150] sm:$0xff] }
 0x445   : > { %v4040_v55 = vadd.f32 %v3976_v7, %v3814_v60  ;;  %3686 = vmatmul.bf16.gmra.mxu2 %v8440_v39  ;;  %3200 = vadd.xlane.f32.xlu0 %v9701_v24  ;;  %9702 = vst [vmem:[#allocation28_spill] sm:$0xff] %v8452_v51  ;;  %v1744_v24 = vld [vmem:[#allocation4 + $0x160] sm:$0xff] }
 0x446   : > { %v2373_v4 = vunpack.c.l.bf16 %v2249_v63  ;;  %v2375_v15 = vunpack.c.h.bf16 %v2249_v63  ;;  %v2374_v33 = vunpack.c.l.bf16 %v2250_v36  ;;  %v2376_v40 = vunpack.c.h.bf16 %v2250_v36 }
 0x447   : > { %4104 = vst.msk [vmem:[#allocation5 + $0x148] sm:$0xff] %vm1194_vm2, %v4040_v55  ;;  %v3087_v31 = vpop.xlane.xlu1 %3086  ;;  %v1993_v54 = vpop.xlane.xlu2 %1992  ;;  %3855 = vmatmul.bf16.gmra.mxu3 %v8446_v58  ;;  %v3977_v36 = vmul.f32 %v8455_v6, %v3913_v46  ;;  %v9709_v46 = vld [vmem:[#allocation57_spill] sm:$0xff] }
 0x448   : > { %v3647_v13 = vpop.f32.mrf.mxu2  ;;  %v3277_v56 = vadd.f32 %v3087_v31, %v2893_v50  ;;  %v8460_v29 = vmax.f32 %v8452_v51, %v1993_v54  ;;  %v2621_v22 = vmul.f32 1.442695, %v2373_v4  ;;  %v2625_v60 = vmul.f32 1.442695, %v2375_v15  ;;  %v9705_v15 = vld [vmem:[#allocation104_spill] sm:$0xff]  ;;  %v9707_v31 = vld [vmem:[#allocation102_spill] sm:$0xff] }
 0x449   : > { %v2623_v7 = vmul.f32 1.442695, %v2374_v33  ;;  %v2627_v63 = vmul.f32 1.442695, %v2376_v40  ;;  %v8468_v50 = vpop.eup %5950  ;;  %v9706_v33 = vld [vmem:[#allocation61_spill] sm:$0xff] }
 0x44a   : > { %9704 = vst [vmem:[#allocation44_spill] sm:$0xff] %v8460_v29  ;;  %v3816_v61 = vpop.f32.mrf.mxu3  ;;  %5952 = vpow2.f32 %v2621_v22  ;;  %v9708_v54 = vsub.f32 %v9706_v33, %v9707_v31  ;;  %v9710_v22 = vld [vmem:[#allocation52_spill] sm:$0xff] }
 0x44b   : > { %3341 = vst [vmem:[#allocation4 + $0x68] sm:$0xff] %v3277_v56  ;;  %v3817_v48 = vadd.f32 %v3816_v61, %v3647_v13  ;;  %5954 = vpow2.f32 %v2625_v60  ;;  %v3914_v13 = vld [vmem:[#allocation5 + $0x158] sm:$0xff]  ;;  %v2896_v56 = vmul.f32 %v9709_v46, %v1744_v24  ;;  %v2894_v60 = vmul.f32 %v9710_v22, %v1742_v5  ;;  %v8476_v61 = vld [vmem:[#allocation3 + $0xa0] sm:$0xff]  ;;  %v9713_v5 = vld [vmem:[#allocation108_spill] sm:$0xff] }
 0x44c   : > { %4189 = vst [vmem:[#allocation3 + $0x58] sm:$0xff] %v8460_v29  ;;  %3221 = vadd.xlane.f32.xlu1 %v8110_v27  ;;  %3215 = vadd.xlane.f32.xlu2 %v8057_v1  ;;  %5956 = vpow2.f32 %v2623_v7  ;;  %v2853_v40 = vmul.f32 1.442695, %v9708_v54  ;;  %v3978_v33 = vmul.f32 %v8468_v50, %v3914_v13  ;;  %v2185_v54 = vsub.f32 %v9713_v5, %v8460_v29 }
 0x44d   : > { %v4041_v4 = vadd.f32 %v3977_v36, %v3817_v48  ;;  %3209 = vadd.xlane.f32.xlu0 %v9705_v15  ;;  %5958 = vpow2.f32 %v2627_v63  ;;  %9711 = vst [vmem:[#allocation40_spill] sm:$0xff] %v8476_v61 }
 0x44e   : > { %5960 = vpow2.f32 %v2853_v40  ;;  %v9719_v40 = vld [vmem:[#allocation12_spill] sm:$0xff] }
 0x44f   : > { %4105 = vst.msk [vmem:[#allocation5 + $0x150] sm:$0xff] %vm1194_vm2, %v4041_v4  ;;  %v3096_v1 = vpop.xlane.xlu1 %3095  ;;  %v3090_v27 = vpop.xlane.xlu2 %3089  ;;  %v9714_v4 = vld [vmem:[#allocation109_spill] sm:$0xff] }
 0x450   : > { %v5953_v7 = vpop.eup %5952  ;;  %v3649_v48 = vpop.f32.mrf.mxu2  ;;  %v3280_v36 = vadd.f32 %v3096_v1, %v2896_v56  ;;  %v3278_v15 = vadd.f32 %v3090_v27, %v2894_v60  ;;  %v2186_v46 = vsub.f32 %v9714_v4, %v8460_v29  ;;  %v1747_v27 = vld [vmem:[#allocation4 + $0x1e0] sm:$0xff] }
 0x451   : > { %v1996_v63 = vpop.xlane.xlu0 %1995  ;;  %v5955_v55 = vpop.eup %5954 }
 0x452   : > { %v8481_v31 = vmax.f32 %v8476_v61, %v1996_v63  ;;  %v5957_v24 = vpop.eup %5956  ;;  %v3818_v22 = vpop.f32.mrf.mxu3  ;;  %3344 = vst [vmem:[#allocation4 + $0x160] sm:$0xff] %v3280_v36  ;;  %v8487_v51 = vpack.c.bf16 %v5955_v55, %v5953_v7  ;;  %v1745_v63 = vld [vmem:[#allocation4 + $0xd0] sm:$0xff]  ;;  %v9716_v36 = vld [vmem:[#allocation11_spill] sm:$0xff]  ;;  %v9721_v61 = vld [vmem:[#allocation54_spill] sm:$0xff] }
 0x453   : > { %v5959_v56 = vpop.eup %5958  ;;  %v3819_v60 = vadd.f32 %v3818_v22, %v3649_v48  ;;  %3342 = vst [vmem:[#allocation4 + $0x150] sm:$0xff] %v3278_v15  ;;  %v1743_v55 = vld [vmem:[#allocation4 + $0x70] sm:$0xff]  ;;  %v9717_v15 = vld [vmem:[#allocation105_spill] sm:$0xff] }
 0x454   : > { %9712 = vst [vmem:[#allocation35_spill] sm:$0xff] %v8481_v31  ;;  %v2187_v13 = vsub.f32 %v8106_v8, %v8481_v31  ;;  %v2188_v1 = vsub.f32 %v8108_v52, %v8481_v31  ;;  %v8496_v5 = vpack.c.bf16 %v5959_v56, %v5957_v24  ;;  %3230 = vadd.xlane.f32.xlu1 %v8207_v47  ;;  %v9715_v52 = vld [vmem:[#allocation71_spill] sm:$0xff]  ;;  %v9720_v24 = vld [vmem:[#allocation8_spill] sm:$0xff] }
 0x455   : > { %4190 = vst [vmem:[#allocation3 + $0xa0] sm:$0xff] %v8481_v31  ;;  %3224 = vadd.xlane.f32.xlu2 %v8163_v14  ;;  %v4042_v7 = vadd.f32 %v3978_v33, %v3819_v60  ;;  %3691 = vmatmul.bf16.gmra.mxu2 %v8487_v51  ;;  %v9718_v4 = vsub.f32 %v9716_v36, %v9717_v15 }
 0x456   : > { %v2251_v48 = vpack.c.bf16 %v2187_v13, %v2185_v54  ;;  %v2252_v8 = vpack.c.bf16 %v2188_v1, %v2186_v46  ;;  %3218 = vadd.xlane.f32.xlu0 %v9715_v52  ;;  %v2899_v31 = vmul.f32 %v9719_v40, %v1747_v27  ;;  %v2897_v56 = vmul.f32 %v9720_v24, %v1745_v63  ;;  %v8509_v13 = vpop.eup %5960  ;;  %v3915_v52 = vld [vmem:[#allocation5 + $0x160] sm:$0xff] }
 0x457   : > { %v2855_v22 = vmul.f32 1.442695, %v9718_v4  ;;  %4106 = vst.msk [vmem:[#allocation5 + $0x158] sm:$0xff] %vm1194_vm2, %v4042_v7  ;;  %v3105_v47 = vpop.xlane.xlu1 %3104  ;;  %v3099_v14 = vpop.xlane.xlu2 %3098  ;;  %v2895_v33 = vmul.f32 %v9721_v61, %v1743_v55  ;;  %3860 = vmatmul.bf16.gmra.mxu3 %v8496_v5  ;;  %v1748_v61 = vld [vmem:[#allocation4 + $0x30] sm:$0xff]  ;;  %v3979_v25 = vmul.f32 %v8509_v13, %v3915_v52 }
 0x458   : > { %v2377_v54 = vunpack.c.l.bf16 %v2251_v48  ;;  %v2379_v46 = vunpack.c.h.bf16 %v2251_v48  ;;  %v2378_v60 = vunpack.c.l.bf16 %v2252_v8  ;;  %v3652_v1 = vpop.f32.mrf.mxu2  ;;  %v3283_v36 = vadd.f32 %v3105_v47, %v2899_v31  ;;  %v1746_v31 = vld [vmem:[#allocation4 + $0xd8] sm:$0xff]  ;;  %v9723_v47 = vld [vmem:[#allocation20_spill] sm:$0xff] }
 0x459   : > { %v3281_v15 = vadd.f32 %v3099_v14, %v2897_v56  ;;  %v3093_v40 = vpop.xlane.xlu0 %3092  ;;  %v2380_v27 = vunpack.c.h.bf16 %v2252_v8  ;;  %5962 = vpow2.f32 %v2855_v22  ;;  %v9722_v22 = vld [vmem:[#allocation14_spill] sm:$0xff]  ;;  %v3065_v14 = vunpack.c.l.bf16 %v8336_v19 }
 0x45a   : > { %v3279_v63 = vadd.f32 %v3093_v40, %v2895_v33  ;;  %v2629_v4 = vmul.f32 1.442695, %v2377_v54  ;;  %v2633_v7 = vmul.f32 1.442695, %v2379_v46  ;;  %v2631_v24 = vmul.f32 1.442695, %v2378_v60  ;;  %v3821_v29 = vpop.f32.mrf.mxu3 }
 0x45b   : > { %3347 = vst [vmem:[#allocation4 + $0x1e0] sm:$0xff] %v3283_v36  ;;  %v2635_v55 = vmul.f32 1.442695, %v2380_v27  ;;  %v3822_v48 = vadd.f32 %v3821_v29, %v3652_v1  ;;  %v2900_v56 = vmul.f32 %v9722_v22, %v1748_v61  ;;  %v2902_v29 = vmul.f32 %v9723_v47, %v1750_v12  ;;  %v9724_v54 = vld [vmem:[#allocation13_spill] sm:$0xff]  ;;  %v9725_v46 = vld [vmem:[#allocation106_spill] sm:$0xff] }
 0x45c   : > { %3345 = vst [vmem:[#allocation4 + $0xd0] sm:$0xff] %v3281_v15  ;;  %5964 = vpow2.f32 %v2629_v4  ;;  %3239 = vadd.xlane.f32.xlu1 %v8255_v17  ;;  %v3066_v33 = vunpack.c.l.bf16 %v8339_v43  ;;  %v9726_v17 = vsub.f32 %v9724_v54, %v9725_v46  ;;  %v9727_v1 = vld [vmem:[#allocation62_spill] sm:$0xff]  ;;  %v3916_v15 = vld [vmem:[#allocation5 + $0x168] sm:$0xff]  ;;  %v9729_v54 = vld [vmem:[#allocation24_spill] sm:$0xff] }
 0x45d   : > { %3343 = vst [vmem:[#allocation4 + $0x70] sm:$0xff] %v3279_v63  ;;  %3233 = vadd.xlane.f32.xlu2 %v8209_v23  ;;  %5966 = vpow2.f32 %v2633_v7  ;;  %v4043_v8 = vadd.f32 %v3979_v25, %v3822_v48 }
 0x45e   : > { %3227 = vadd.xlane.f32.xlu0 %v8165_v11  ;;  %5968 = vpow2.f32 %v2631_v24  ;;  %v2857_v60 = vmul.f32 1.442695, %v9726_v17  ;;  %v2898_v11 = vmul.f32 %v9727_v1, %v1746_v31  ;;  %v3247_v7 = vadd.f32 %v3066_v33, %v3065_v14  ;;  %v1753_v31 = vld [vmem:[#allocation4 + $0x190] sm:$0xff]  ;;  %v9728_v14 = vld [vmem:[#allocation30_spill] sm:$0xff] }
 0x45f   : > { %5970 = vpow2.f32 %v2635_v55  ;;  %4107 = vst.msk [vmem:[#allocation5 + $0x160] sm:$0xff] %vm1194_vm2, %v4043_v8  ;;  %v3114_v23 = vpop.xlane.xlu1 %3113  ;;  %v3108_v25 = vpop.xlane.xlu2 %3107  ;;  %v1751_v8 = vld [vmem:[#allocation4 + $0x1f0] sm:$0xff]  ;;  %v2905_v33 = vmul.f32 %v9728_v14, %v1753_v31  ;;  %v3071_v17 = vunpack.c.h.bf16 %v8390_v30 }
 0x460   : > { %v8525_v52 = vpop.eup %5962  ;;  %v3654_v36 = vpop.f32.mrf.mxu2  ;;  %v3286_v12 = vadd.f32 %v3114_v23, %v2902_v29  ;;  %v3284_v40 = vadd.f32 %v3108_v25, %v2900_v56  ;;  %5972 = vpow2.f32 %v2857_v60  ;;  %v1749_v56 = vld [vmem:[#allocation4 + $0x148] sm:$0xff]  ;;  %v2903_v46 = vmul.f32 %v9729_v54, %v1751_v8  ;;  %v9730_v23 = vld [vmem:[#allocation17_spill] sm:$0xff]  ;;  %v9735_v14 = vld [vmem:[#allocation32_spill] sm:$0xff] }
 0x461   : > { %v3102_v27 = vpop.xlane.xlu0 %3101  ;;  %v3980_v55 = vmul.f32 %v8525_v52, %v3916_v15  ;;  %v3072_v60 = vunpack.c.h.bf16 %v8393_v20  ;;  %v9731_v25 = vld [vmem:[#allocation107_spill] sm:$0xff]  ;;  %v9733_v15 = vld [vmem:[#allocation18_spill] sm:$0xff]  ;;  %v3073_v54 = vunpack.c.l.bf16 %v8440_v39 }
 0x462   : > { %v5965_v19 = vpop.eup %5964  ;;  %v3282_v63 = vadd.f32 %v3102_v27, %v2898_v11  ;;  %v3823_v4 = vpop.f32.mrf.mxu3  ;;  %3350 = vst [vmem:[#allocation4 + $0x50] sm:$0xff] %v3286_v12  ;;  %v9732_v1 = vsub.f32 %v9730_v23, %v9731_v25  ;;  %v2901_v12 = vmul.f32 %v9733_v15, %v1749_v56  ;;  %v9734_v56 = vld [vmem:[#allocation38_spill] sm:$0xff]  ;;  %v3074_v23 = vunpack.c.l.bf16 %v8446_v58  ;;  %v9736_v25 = vld [vmem:[#allocation77_spill] sm:$0xff] }
 0x463   : > { %v5967_v43 = vpop.eup %5966  ;;  %v3824_v61 = vadd.f32 %v3823_v4, %v3654_v36  ;;  %3348 = vst [vmem:[#allocation4 + $0x30] sm:$0xff] %v3284_v40 }
 0x464   : > { %v5969_v24 = vpop.eup %5968  ;;  %v8528_v48 = vpack.c.bf16 %v5967_v43, %v5965_v19  ;;  %3346 = vst [vmem:[#allocation4 + $0xd8] sm:$0xff] %v3282_v63  ;;  %3248 = vadd.xlane.f32.xlu1 %v3247_v7  ;;  %v3917_v43 = vld [vmem:[#allocation5 + $0x170] sm:$0xff]  ;;  %v3256_v7 = vadd.f32 %v3072_v60, %v3071_v17  ;;  %v3077_v17 = vunpack.c.l.bf16 %v8487_v51  ;;  %v3078_v60 = vunpack.c.l.bf16 %v8496_v5 }
 0x465   : > { %v5971_v22 = vpop.eup %5970  ;;  %3242 = vadd.xlane.f32.xlu2 %v8303_v57  ;;  %v4044_v47 = vadd.f32 %v3980_v55, %v3824_v61  ;;  %v2859_v57 = vmul.f32 1.442695, %v9732_v1  ;;  %v1754_v61 = vld [vmem:[#allocation4 + $0x8] sm:$0xff] }
 0x466   : > { %3696 = vmatmul.bf16.gmra.mxu2 %v8528_v48  ;;  %v8532_v29 = vpack.c.bf16 %v5971_v22, %v5969_v24  ;;  %3236 = vadd.xlane.f32.xlu0 %v8257_v49  ;;  %v8545_v63 = vpop.eup %5972  ;;  %v1756_v24 = vld [vmem:[#allocation4 + $0x38] sm:$0xff]  ;;  %v1752_v22 = vld [vmem:[#allocation4 + $0x130] sm:$0xff]  ;;  %v9737_v1 = vld [vmem:[#allocation19_spill] sm:$0xff] }
 0x467   : > { %4108 = vst.msk [vmem:[#allocation5 + $0x168] sm:$0xff] %vm1194_vm2, %v4044_v47  ;;  %v3123_v11 = vpop.xlane.xlu1 %3122  ;;  %v3117_v36 = vpop.xlane.xlu2 %3116  ;;  %5974 = vpow2.f32 %v2859_v57  ;;  %v3981_v8 = vmul.f32 %v8545_v63, %v3917_v43  ;;  %v2908_v47 = vmul.f32 %v9734_v56, %v1756_v24  ;;  %v9738_v57 = vsub.f32 %v9736_v25, %v9737_v1 }
 0x468   : > { %3865 = vmatmul.bf16.gmra.mxu3 %v8532_v29  ;;  %v3657_v49 = vpop.f32.mrf.mxu2  ;;  %v3289_v40 = vadd.f32 %v3123_v11, %v2905_v33  ;;  %v3287_v27 = vadd.f32 %v3117_v36, %v2903_v46  ;;  %v2906_v33 = vmul.f32 %v9735_v14, %v1754_v61  ;;  %v3265_v61 = vadd.f32 %v3078_v60, %v3077_v17  ;;  %v9740_v14 = vld [vmem:[#allocation46_spill] sm:$0xff] }
 0x469   : > { %v3111_v19 = vpop.xlane.xlu0 %3110  ;;  %v3080_v60 = vunpack.c.h.bf16 %v8496_v5  ;;  %v3084_v1 = vunpack.c.h.bf16 %v8532_v29 }
 0x46a   : > { %v3285_v4 = vadd.f32 %v3111_v19, %v2901_v12  ;;  %3353 = vst [vmem:[#allocation4 + $0x190] sm:$0xff] %v3289_v40  ;;  %v3826_v55 = vpop.f32.mrf.mxu3  ;;  %v3069_v12 = vunpack.c.l.bf16 %v8390_v30 }
 0x46b   : > { %3351 = vst [vmem:[#allocation4 + $0x1f0] sm:$0xff] %v3287_v27  ;;  %v3827_v31 = vadd.f32 %v3826_v55, %v3657_v49  ;;  %v3070_v49 = vunpack.c.l.bf16 %v8393_v20  ;;  %v3259_v55 = vadd.f32 %v3074_v23, %v3073_v54  ;;  %v3079_v54 = vunpack.c.h.bf16 %v8487_v51 }
 0x46c   : > { %3349 = vst [vmem:[#allocation4 + $0x148] sm:$0xff] %v3285_v4  ;;  %3257 = vadd.xlane.f32.xlu1 %v3256_v7  ;;  %v3918_v7 = vld [vmem:[#allocation5 + $0x178] sm:$0xff]  ;;  %v3083_v23 = vunpack.c.h.bf16 %v8528_v48 }
 0x46d   : > { %3251 = vadd.xlane.f32.xlu2 %v8359_v45  ;;  %v4045_v46 = vadd.f32 %v3981_v8, %v3827_v31  ;;  %v2861_v45 = vmul.f32 1.442695, %v9738_v57  ;;  %v8563_v4 = vpop.eup %5974  ;;  %v1759_v31 = vld [vmem:[#allocation4 + $0x1a8] sm:$0xff]  ;;  %v1757_v8 = vld [vmem:[#allocation4 + $0xe0] sm:$0xff]  ;;  %v3253_v30 = vadd.f32 %v3070_v49, %v3069_v12  ;;  %v3075_v49 = vunpack.c.h.bf16 %v8440_v39  ;;  %v1762_v39 = vld [vmem:[#allocation4 + $0x78] sm:$0xff] }
 0x46e   : > { %3245 = vadd.xlane.f32.xlu0 %v8305_v21  ;;  %v9739_v21 = vld [vmem:[#allocation26_spill] sm:$0xff]  ;;  %v3982_v56 = vmul.f32 %v8563_v4, %v3918_v7  ;;  %v9742_v57 = vld [vmem:[#allocation7_spill] sm:$0xff] }
 0x46f   : > { %v3132_v11 = vpop.xlane.xlu1 %3131  ;;  %v3126_v36 = vpop.xlane.xlu2 %3125  ;;  %v2904_v15 = vmul.f32 %v9739_v21, %v1752_v22  ;;  %4109 = vst.msk [vmem:[#allocation5 + $0x170] sm:$0xff] %vm1194_vm2, %v4045_v46  ;;  %5976 = vpow2.f32 %v2861_v45  ;;  %v9741_v46 = vld [vmem:[#allocation41_spill] sm:$0xff]  ;;  %v9743_v45 = vsub.f32 %v8125_v42, %v9742_v57  ;;  %v3919_v7 = vld [vmem:[#allocation5 + $0x180] sm:$0xff]  ;;  %v3268_v42 = vadd.f32 %v3080_v60, %v3079_v54 }
 0x470   : > { %v3659_v40 = vpop.f32.mrf.mxu2  ;;  %v3292_v27 = vadd.f32 %v3132_v11, %v2908_v47  ;;  %v3290_v19 = vadd.f32 %v3126_v36, %v2906_v33  ;;  %v1755_v47 = vld [vmem:[#allocation4 + $0x88] sm:$0xff]  ;;  %v2911_v33 = vmul.f32 %v9740_v14, %v1759_v31  ;;  %v2909_v25 = vmul.f32 %v9741_v46, %v1757_v8  ;;  %v1760_v8 = vld [vmem:[#allocation4 + $0xa0] sm:$0xff]  ;;  %v9746_v14 = vld [vmem:[#allocation92_spill] sm:$0xff] }
 0x471   : > { %v3120_v43 = vpop.xlane.xlu0 %3119  ;;  %v2863_v11 = vmul.f32 1.442695, %v9743_v45  ;;  %v9747_v46 = vld [vmem:[#allocation23_spill] sm:$0xff]  ;;  %v3081_v45 = vunpack.c.l.bf16 %v8528_v48 }
 0x472   : > { %v3288_v24 = vadd.f32 %v3120_v43, %v2904_v15  ;;  %3356 = vst [vmem:[#allocation4 + $0x38] sm:$0xff] %v3292_v27  ;;  %v3828_v22 = vpop.f32.mrf.mxu3  ;;  %v9744_v15 = vld [vmem:[#allocation36_spill] sm:$0xff] }
 0x473   : > { %3354 = vst [vmem:[#allocation4 + $0x8] sm:$0xff] %v3290_v19  ;;  %v3829_v20 = vadd.f32 %v3828_v22, %v3659_v40  ;;  %v2907_v12 = vmul.f32 %v9744_v15, %v1755_v47  ;;  %v3076_v40 = vunpack.c.h.bf16 %v8446_v58  ;;  %5978 = vpow2.f32 %v2863_v11 }
 0x474   : > { %3352 = vst [vmem:[#allocation4 + $0x130] sm:$0xff] %v3288_v24  ;;  %3266 = vadd.xlane.f32.xlu1 %v3265_v61  ;;  %v3274_v61 = vadd.f32 %v3084_v1, %v3083_v23  ;;  %v9750_v1 = vld [vmem:[#allocation88_spill] sm:$0xff]  ;;  %v3082_v11 = vunpack.c.l.bf16 %v8532_v29 }
 0x475   : > { %3260 = vadd.xlane.f32.xlu2 %v3259_v55  ;;  %v4046_v17 = vadd.f32 %v3982_v56, %v3829_v20  ;;  %v8579_v43 = vpop.eup %5976  ;;  %v3262_v31 = vadd.f32 %v3076_v40, %v3075_v49  ;;  %v9745_v56 = vld [vmem:[#allocation95_spill] sm:$0xff] }
 0x476   : > { %3254 = vadd.xlane.f32.xlu0 %v3253_v30  ;;  %v3983_v22 = vmul.f32 %v8579_v43, %v3919_v7  ;;  %v1758_v30 = vld [vmem:[#allocation4 + $0x10] sm:$0xff]  ;;  %v2914_v47 = vmul.f32 %v9745_v56, %v1762_v39  ;;  %v3920_v40 = vld [vmem:[#allocation5 + $0x188] sm:$0xff] }
 0x477   : > { %v3141_v36 = vpop.xlane.xlu1 %3140  ;;  %v3135_v21 = vpop.xlane.xlu2 %3134  ;;  %4110 = vst.msk [vmem:[#allocation5 + $0x178] sm:$0xff] %vm1194_vm2, %v4046_v17  ;;  %v2910_v57 = vmul.f32 %v9750_v1, %v1758_v30  ;;  %v1763_v7 = vld [vmem:[#allocation4 + $0x108] sm:$0xff] }
 0x478   : > { %v3662_v51 = vpop.f32.mrf.mxu2  ;;  %v3295_v5 = vadd.f32 %v3141_v36, %v2911_v33  ;;  %v3293_v27 = vadd.f32 %v3135_v21, %v2909_v25  ;;  %v2912_v33 = vmul.f32 %v9746_v14, %v1760_v8  ;;  %v9748_v25 = vld [vmem:[#allocation81_spill] sm:$0xff]  ;;  %v9753_v8 = vsub.f32 %v8173_v53, %v8179_v10  ;;  %v1768_v53 = vld [vmem:[#allocation4 + $0x1a0] sm:$0xff]  ;;  %v1766_v10 = vld [vmem:[#allocation4 + $0x48] sm:$0xff] }
 0x479   : > { %v3129_v19 = vpop.xlane.xlu0 %3128  ;;  %v9749_v54 = vsub.f32 %v9747_v46, %v9748_v25  ;;  %v8591_v49 = vpop.eup %5978 }
 0x47a   : > { %v3291_v24 = vadd.f32 %v3129_v19, %v2907_v12  ;;  %3359 = vst [vmem:[#allocation4 + $0x1a8] sm:$0xff] %v3295_v5  ;;  %v3831_v55 = vpop.f32.mrf.mxu3  ;;  %v1765_v19 = vld [vmem:[#allocation4 + $0x58] sm:$0xff]  ;;  %v3984_v29 = vmul.f32 %v8591_v49, %v3920_v40  ;;  %v9758_v40 = vld [vmem:[#allocation75_spill] sm:$0xff] }
 0x47b   : > { %3357 = vst [vmem:[#allocation4 + $0xe0] sm:$0xff] %v3293_v27  ;;  %v3832_v58 = vadd.f32 %v3831_v55, %v3662_v51  ;;  %v2865_v17 = vmul.f32 1.442695, %v9749_v54  ;;  %v3271_v27 = vadd.f32 %v3082_v11, %v3081_v45  ;;  %v3921_v54 = vld [vmem:[#allocation5 + $0x190] sm:$0xff] }
 0x47c   : > { %3355 = vst [vmem:[#allocation4 + $0x88] sm:$0xff] %v3291_v24  ;;  %3275 = vadd.xlane.f32.xlu1 %v3274_v61  ;;  %v1761_v24 = vld [vmem:[#allocation4 + $0x1c0] sm:$0xff]  ;;  %v9751_v61 = vld [vmem:[#allocation63_spill] sm:$0xff]  ;;  %v9755_v11 = vld [vmem:[#allocation68_spill] sm:$0xff] }
 0x47d   : > { %3269 = vadd.xlane.f32.xlu2 %v3268_v42  ;;  %v4047_v20 = vadd.f32 %v3983_v22, %v3832_v58  ;;  %5980 = vpow2.f32 %v2865_v17  ;;  %v2917_v55 = vmul.f32 %v9751_v61, %v1765_v19  ;;  %v2867_v58 = vmul.f32 1.442695, %v9753_v8 }
 0x47e   : > { %3263 = vadd.xlane.f32.xlu0 %v3262_v31  ;;  %v9752_v31 = vld [vmem:[#allocation58_spill] sm:$0xff] }
 0x47f   : > { %v3150_v60 = vpop.xlane.xlu1 %3149  ;;  %v3144_v23 = vpop.xlane.xlu2 %3143  ;;  %4111 = vst.msk [vmem:[#allocation5 + $0x180] sm:$0xff] %vm1194_vm2, %v4047_v20  ;;  %v2915_v39 = vmul.f32 %v9752_v31, %v1763_v7  ;;  %v9754_v20 = vld [vmem:[#allocation51_spill] sm:$0xff]  ;;  %5982 = vpow2.f32 %v2867_v58  ;;  %v9760_v7 = vld [vmem:[#allocation100_spill] sm:$0xff]  ;;  %v3922_v31 = vld [vmem:[#allocation5 + $0x198] sm:$0xff] }
 0x480   : > { %v3664_v36 = vpop.f32.mrf.mxu2  ;;  %v3298_v21 = vadd.f32 %v3150_v60, %v2914_v47  ;;  %v3296_v15 = vadd.f32 %v3144_v23, %v2912_v33  ;;  %v2913_v56 = vmul.f32 %v9754_v20, %v1761_v24  ;;  %v1771_v58 = vld [vmem:[#allocation4 + $0x168] sm:$0xff] }
 0x481   : > { %v3138_v12 = vpop.xlane.xlu0 %3137 }
 0x482   : > { %v3294_v51 = vadd.f32 %v3138_v12, %v2910_v57  ;;  %3362 = vst [vmem:[#allocation4 + $0x78] sm:$0xff] %v3298_v21  ;;  %v3833_v5 = vpop.f32.mrf.mxu3  ;;  %v1764_v57 = vld [vmem:[#allocation4 + $0x80] sm:$0xff]  ;;  %v9756_v21 = vld [vmem:[#allocation64_spill] sm:$0xff]  ;;  %v9757_v12 = vld [vmem:[#allocation15_spill] sm:$0xff] }
 0x483   : > { %3360 = vst [vmem:[#allocation4 + $0xa0] sm:$0xff] %v3296_v15  ;;  %v3834_v48 = vadd.f32 %v3833_v5, %v3664_v36  ;;  %v8601_v25 = vpop.eup %5980  ;;  %v2920_v36 = vmul.f32 %v9755_v11, %v1768_v53  ;;  %v2918_v15 = vmul.f32 %v9756_v21, %v1766_v10 }
 0x484   : > { %3358 = vst [vmem:[#allocation4 + $0x10] sm:$0xff] %v3294_v51  ;;  %v3985_v1 = vmul.f32 %v8601_v25, %v3921_v54  ;;  %v9759_v51 = vsub.f32 %v9757_v12, %v9758_v40 }
 0x485   : > { %v4048_v42 = vadd.f32 %v3984_v29, %v3834_v48  ;;  %v2916_v48 = vmul.f32 %v9760_v7, %v1764_v57 }
 0x486   : > { %3272 = vadd.xlane.f32.xlu0 %v3271_v27  ;;  %v2869_v5 = vmul.f32 1.442695, %v9759_v51 }
 0x487   : > { %v3159_v22 = vpop.xlane.xlu1 %3158  ;;  %v3153_v30 = vpop.xlane.xlu2 %3152  ;;  %4112 = vst.msk [vmem:[#allocation5 + $0x188] sm:$0xff] %vm1194_vm2, %v4048_v42 }
 0x488   : > { %v3667_v47 = vpop.f32.mrf.mxu2  ;;  %v3301_v14 = vadd.f32 %v3159_v22, %v2917_v55  ;;  %v3299_v33 = vadd.f32 %v3153_v30, %v2915_v39  ;;  %v8611_v55 = vpop.eup %5982  ;;  %5984 = vpow2.f32 %v2869_v5  ;;  %v1769_v22 = vld [vmem:[#allocation4 + $0x198] sm:$0xff] }
 0x489   : > { %v3147_v46 = vpop.xlane.xlu0 %3146  ;;  %v3986_v20 = vmul.f32 %v8611_v55, %v3922_v31 }
 0x48a   : > { %v3297_v17 = vadd.f32 %v3147_v46, %v2913_v56  ;;  %3365 = vst [vmem:[#allocation4 + $0x58] sm:$0xff] %v3301_v14  ;;  %v3836_v60 = vpop.f32.mrf.mxu3  ;;  %v1767_v56 = vld [vmem:[#allocation4 + $0x40] sm:$0xff]  ;;  %v9761_v14 = vld [vmem:[#allocation72_spill] sm:$0xff] }
 0x48b   : > { %3363 = vst [vmem:[#allocation4 + $0x108] sm:$0xff] %v3299_v33  ;;  %v3837_v23 = vadd.f32 %v3836_v60, %v3667_v47  ;;  %v2923_v33 = vmul.f32 %v9761_v14, %v1771_v58  ;;  %v9762_v46 = vld [vmem:[#allocation6_spill] sm:$0xff]  ;;  %v9769_v58 = vld [vmem:[#allocation9_spill] sm:$0xff] }
 0x48c   : > { %3361 = vst [vmem:[#allocation4 + $0x1c0] sm:$0xff] %v3297_v17  ;;  %v2921_v54 = vmul.f32 %v9762_v46, %v1769_v22  ;;  %v9763_v17 = vsub.f32 %v8221_v35, %v8227_v0  ;;  %v1774_v35 = vld [vmem:[#allocation4 + $0x28] sm:$0xff]  ;;  %v1772_v0 = vld [vmem:[#allocation4 + $0x158] sm:$0xff] }
 0x48d   : > { %v4049_v45 = vadd.f32 %v3985_v1, %v3837_v23  ;;  %v9764_v23 = vld [vmem:[#allocation67_spill] sm:$0xff]  ;;  %v2926_v7 = vmul.f32 %v8223_v44, %v1774_v35 }
 0x48e   : > { %v2871_v60 = vmul.f32 1.442695, %v9763_v17  ;;  %v2919_v1 = vmul.f32 %v9764_v23, %v1767_v56  ;;  %v8621_v21 = vpop.eup %5984  ;;  %v1775_v17 = vld [vmem:[#allocation4] sm:$0xff] }
 0x48f   : > { %v3168_v27 = vpop.xlane.xlu1 %3167  ;;  %v3162_v19 = vpop.xlane.xlu2 %3161  ;;  %4113 = vst.msk [vmem:[#allocation5 + $0x190] sm:$0xff] %vm1194_vm2, %v4049_v45 }
 0x490   : > { %v3669_v29 = vpop.f32.mrf.mxu2  ;;  %v3304_v24 = vadd.f32 %v3168_v27, %v2920_v36  ;;  %v3302_v42 = vadd.f32 %v3162_v19, %v2918_v15  ;;  %v3923_v15 = vld [vmem:[#allocation5 + $0x1a0] sm:$0xff]  ;;  %5986 = vpow2.f32 %v2871_v60  ;;  %v1770_v27 = vld [vmem:[#allocation4 + $0xe8] sm:$0xff] }
 0x491   : > { %v3156_v61 = vpop.xlane.xlu0 %3155  ;;  %v3987_v5 = vmul.f32 %v8621_v21, %v3923_v15  ;;  %v2922_v22 = vmul.f32 %v9769_v58, %v1770_v27 }
 0x492   : > { %v3300_v39 = vadd.f32 %v3156_v61, %v2916_v48  ;;  %3368 = vst [vmem:[#allocation4 + $0x1a0] sm:$0xff] %v3304_v24  ;;  %v3838_v8 = vpop.f32.mrf.mxu3  ;;  %v9765_v48 = vld [vmem:[#allocation21_spill] sm:$0xff]  ;;  %v9766_v24 = vld [vmem:[#allocation10_spill] sm:$0xff] }
 0x493   : > { %3366 = vst [vmem:[#allocation4 + $0x48] sm:$0xff] %v3302_v42  ;;  %v3839_v30 = vadd.f32 %v3838_v8, %v3669_v29  ;;  %v2924_v29 = vmul.f32 %v9765_v48, %v1772_v0  ;;  %v9767_v42 = vld [vmem:[#allocation22_spill] sm:$0xff] }
 0x494   : > { %3364 = vst [vmem:[#allocation4 + $0x80] sm:$0xff] %v3300_v39  ;;  %v9768_v61 = vsub.f32 %v9766_v24, %v9767_v42  ;;  %v1776_v42 = vld [vmem:[#allocation4 + $0x1c8] sm:$0xff] }
 0x495   : > { %v4050_v47 = vadd.f32 %v3986_v20, %v3839_v30 }
 0x496   : > { %v2873_v31 = vmul.f32 1.442695, %v9768_v61  ;;  %v8631_v14 = vpop.eup %5986 }
 0x497   : > { %v3177_v53 = vpop.xlane.xlu1 %3176  ;;  %v3171_v10 = vpop.xlane.xlu2 %3170  ;;  %4114 = vst.msk [vmem:[#allocation5 + $0x198] sm:$0xff] %vm1194_vm2, %v4050_v47 }
 0x498   : > { %v3672_v57 = vpop.f32.mrf.mxu2  ;;  %v3307_v45 = vadd.f32 %v3177_v53, %v2923_v33  ;;  %v3305_v11 = vadd.f32 %v3171_v10, %v2921_v54  ;;  %v3924_v33 = vld [vmem:[#allocation5 + $0x1a8] sm:$0xff]  ;;  %5988 = vpow2.f32 %v2873_v31  ;;  %v1773_v10 = vld [vmem:[#allocation4 + $0x1d8] sm:$0xff] }
 0x499   : > { %v3165_v36 = vpop.xlane.xlu0 %3164  ;;  %v1777_v54 = vld [vmem:[#allocation4 + $0x1e8] sm:$0xff]  ;;  %v3988_v53 = vmul.f32 %v8631_v14, %v3924_v33 }
 0x49a   : > { %v3303_v12 = vadd.f32 %v3165_v36, %v2919_v1  ;;  %3371 = vst [vmem:[#allocation4 + $0x168] sm:$0xff] %v3307_v45  ;;  %v3841_v40 = vpop.f32.mrf.mxu3  ;;  %v2929_v1 = vmul.f32 %v8297_v59, %v1777_v54  ;;  %v3926_v54 = vld [vmem:[#allocation5 + $0x1b8] sm:$0xff] }
 0x49b   : > { %3369 = vst [vmem:[#allocation4 + $0x198] sm:$0xff] %v3305_v11  ;;  %v3842_v51 = vadd.f32 %v3841_v40, %v3672_v57  ;;  %v9770_v57 = vld [vmem:[#allocation27_spill] sm:$0xff]  ;;  %v9771_v11 = vsub.f32 %v8269_v32, %v8275_v38  ;;  %v9772_v40 = vld [vmem:[#allocation25_spill] sm:$0xff]  ;;  %v1778_v38 = vld [vmem:[#allocation4 + $0x140] sm:$0xff] }
 0x49c   : > { %3367 = vst [vmem:[#allocation4 + $0x40] sm:$0xff] %v3303_v12  ;;  %v2927_v45 = vmul.f32 %v9770_v57, %v1775_v17  ;;  %v2925_v35 = vmul.f32 %v9772_v40, %v1773_v10  ;;  %v1780_v32 = vld [vmem:[#allocation4 + $0x98] sm:$0xff] }
 0x49d   : > { %v4051_v19 = vadd.f32 %v3987_v5, %v3842_v51  ;;  %v2875_v36 = vmul.f32 1.442695, %v9771_v11  ;;  %v2932_v31 = vmul.f32 %v8373_v3, %v1780_v32 }
 0x49f   : > { %v3186_v39 = vpop.xlane.xlu1 %3185  ;;  %v3180_v8 = vpop.xlane.xlu2 %3179  ;;  %4115 = vst.msk [vmem:[#allocation5 + $0x1a0] sm:$0xff] %vm1194_vm2, %v4051_v19  ;;  %5990 = vpow2.f32 %v2875_v36 }
 0x4a0   : > { %v3674_v30 = vpop.f32.mrf.mxu2  ;;  %v3310_v20 = vadd.f32 %v3186_v39, %v2926_v7  ;;  %v3308_v56 = vadd.f32 %v3180_v8, %v2924_v29  ;;  %v8641_v19 = vpop.eup %5988  ;;  %v3925_v7 = vld [vmem:[#allocation5 + $0x1b0] sm:$0xff]  ;;  %v2930_v39 = vmul.f32 %v8319_v28, %v1778_v38  ;;  %v9773_v8 = vsub.f32 %v8295_v18, %v8301_v34  ;;  %v1783_v18 = vld [vmem:[#allocation4 + $0xc8] sm:$0xff]  ;;  %v1781_v34 = vld [vmem:[#allocation4 + $0x1b8] sm:$0xff] }
 0x4a1   : > { %v3174_v47 = vpop.xlane.xlu0 %3173  ;;  %v3989_v24 = vmul.f32 %v8641_v19, %v3925_v7  ;;  %v2935_v10 = vmul.f32 %v8455_v6, %v1783_v18  ;;  %v9778_v18 = vld [vmem:[#allocation16_spill] sm:$0xff] }
 0x4a2   : > { %v3306_v44 = vadd.f32 %v3174_v47, %v2922_v22  ;;  %3374 = vst [vmem:[#allocation4 + $0x28] sm:$0xff] %v3310_v20  ;;  %v3843_v46 = vpop.f32.mrf.mxu3  ;;  %v2877_v58 = vmul.f32 1.442695, %v9773_v8  ;;  %v2928_v20 = vmul.f32 %v8271_v41, %v1776_v42  ;;  %v1779_v41 = vld [vmem:[#allocation4 + $0x60] sm:$0xff] }
 0x4a3   : > { %3372 = vst [vmem:[#allocation4 + $0x158] sm:$0xff] %v3308_v56  ;;  %v3844_v60 = vadd.f32 %v3843_v46, %v3674_v30 }
 0x4a4   : > { %3370 = vst [vmem:[#allocation4 + $0xe8] sm:$0xff] %v3306_v44  ;;  %5992 = vpow2.f32 %v2877_v58 }
 0x4a5   : > { %v4052_v23 = vadd.f32 %v3988_v53, %v3844_v60  ;;  %v8651_v46 = vpop.eup %5990 }
 0x4a6   : > { %v3990_v60 = vmul.f32 %v8651_v46, %v3926_v54 }
 0x4a7   : > { %v3195_v15 = vpop.xlane.xlu1 %3194  ;;  %v3189_v12 = vpop.xlane.xlu2 %3188  ;;  %4116 = vst.msk [vmem:[#allocation5 + $0x1a8] sm:$0xff] %vm1194_vm2, %v4052_v23  ;;  %v2933_v23 = vmul.f32 %v8404_v9, %v1781_v34  ;;  %v9779_v34 = vsub.f32 %v9778_v18, %v8377_v26  ;;  %v1792_v26 = vld [vmem:[#allocation4 + $0x90] sm:$0xff]  ;;  %v3931_v18 = vld [vmem:[#allocation5 + $0x1e0] sm:$0xff] }
 0x4a8   : > { %v3677_v0 = vpop.f32.mrf.mxu2  ;;  %v3313_v51 = vadd.f32 %v3195_v15, %v2929_v1  ;;  %v3311_v5 = vadd.f32 %v3189_v12, %v2927_v45  ;;  %v9774_v1 = vld [vmem:[#allocation29_spill] sm:$0xff]  ;;  %v2931_v15 = vmul.f32 %v8351_v37, %v1779_v41  ;;  %v1782_v37 = vld [vmem:[#allocation4 + $0x100] sm:$0xff] }
 0x4a9   : > { %v3183_v27 = vpop.xlane.xlu0 %3182  ;;  %v9775_v57 = vsub.f32 %v9774_v1, %v8323_v16  ;;  %v1786_v16 = vld [vmem:[#allocation4 + $0x180] sm:$0xff] }
 0x4aa   : > { %v3309_v59 = vadd.f32 %v3183_v27, %v2925_v35  ;;  %3377 = vst [vmem:[#allocation4 + $0x1e8] sm:$0xff] %v3313_v51  ;;  %v3846_v48 = vpop.f32.mrf.mxu3  ;;  %v8661_v51 = vpop.eup %5992  ;;  %v1784_v27 = vld [vmem:[#allocation4 + $0xf8] sm:$0xff]  ;;  %v2938_v32 = vmul.f32 %v8525_v52, %v1786_v16 }
 0x4ab   : > { %3375 = vst [vmem:[#allocation4] sm:$0xff] %v3311_v5  ;;  %v3847_v29 = vadd.f32 %v3846_v48, %v3677_v0  ;;  %v2879_v45 = vmul.f32 1.442695, %v9775_v57  ;;  %v3927_v5 = vld [vmem:[#allocation5 + $0x1c0] sm:$0xff]  ;;  %v2936_v38 = vmul.f32 %v8468_v50, %v1784_v27 }
 0x4ac   : > { %3373 = vst [vmem:[#allocation4 + $0x1d8] sm:$0xff] %v3309_v59  ;;  %v3991_v59 = vmul.f32 %v8661_v51, %v3927_v5  ;;  %v9780_v5 = vld [vmem:[#allocation39_spill] sm:$0xff] }
 0x4ad   : > { %v4053_v61 = vadd.f32 %v3989_v24, %v3847_v29  ;;  %5994 = vpow2.f32 %v2879_v45  ;;  %v9776_v29 = vld [vmem:[#allocation76_spill] sm:$0xff] }
 0x4ae   : > { %v9777_v24 = vsub.f32 %v8348_v62, %v9776_v29  ;;  %v1789_v62 = vld [vmem:[#allocation4 + $0x20] sm:$0xff] }
 0x4af   : > { %v3204_v22 = vpop.xlane.xlu1 %3203  ;;  %v3198_v30 = vpop.xlane.xlu2 %3197  ;;  %4117 = vst.msk [vmem:[#allocation5 + $0x1b0] sm:$0xff] %vm1194_vm2, %v4053_v61 }
 0x4b0   : > { %v3679_v56 = vpop.f32.mrf.mxu2  ;;  %v3316_v47 = vadd.f32 %v3204_v22, %v2932_v31  ;;  %v3314_v33 = vadd.f32 %v3198_v30, %v2930_v39  ;;  %v2881_v42 = vmul.f32 1.442695, %v9777_v24  ;;  %v2934_v39 = vmul.f32 %v8423_v2, %v1782_v37  ;;  %v1785_v2 = vld [vmem:[#allocation4 + $0x178] sm:$0xff] }
 0x4b1   : > { %v3192_v44 = vpop.xlane.xlu0 %3191  ;;  %v3930_v24 = vld [vmem:[#allocation5 + $0x1d8] sm:$0xff] }
 0x4b2   : > { %v3312_v3 = vadd.f32 %v3192_v44, %v2928_v20  ;;  %3380 = vst [vmem:[#allocation4 + $0x98] sm:$0xff] %v3316_v47  ;;  %v3848_v28 = vpop.f32.mrf.mxu3  ;;  %5996 = vpow2.f32 %v2881_v42  ;;  %v1787_v47 = vld [vmem:[#allocation4 + $0xb0] sm:$0xff]  ;;  %v1795_v42 = vld [vmem:[#allocation4 + $0x138] sm:$0xff] }
 0x4b3   : > { %3378 = vst [vmem:[#allocation4 + $0x140] sm:$0xff] %v3314_v33  ;;  %v3849_v17 = vadd.f32 %v3848_v28, %v3679_v56  ;;  %v8671_v20 = vpop.eup %5994  ;;  %v3928_v56 = vld [vmem:[#allocation5 + $0x1c8] sm:$0xff]  ;;  %v2939_v28 = vmul.f32 %v8545_v63, %v1787_v47 }
 0x4b4   : > { %3376 = vst [vmem:[#allocation4 + $0x1c8] sm:$0xff] %v3312_v3  ;;  %v3992_v44 = vmul.f32 %v8671_v20, %v3928_v56  ;;  %v2941_v3 = vmul.f32 %v8579_v43, %v1789_v62  ;;  %v9784_v56 = vld [vmem:[#allocation80_spill] sm:$0xff] }
 0x4b5   : > { %v4054_v53 = vadd.f32 %v3990_v60, %v3849_v17  ;;  %v2883_v17 = vmul.f32 1.442695, %v9779_v34 }
 0x4b7   : > { %v3213_v11 = vpop.xlane.xlu1 %3212  ;;  %v3207_v36 = vpop.xlane.xlu2 %3206  ;;  %4118 = vst.msk [vmem:[#allocation5 + $0x1b8] sm:$0xff] %vm1194_vm2, %v4054_v53  ;;  %v2937_v53 = vmul.f32 %v8509_v13, %v1785_v2  ;;  %5998 = vpow2.f32 %v2883_v17  ;;  %v1788_v13 = vld [vmem:[#allocation4 + $0x110] sm:$0xff]  ;;  %v1796_v17 = vld [vmem:[#allocation4 + $0x188] sm:$0xff] }
 0x4b8   : > { %v3682_v12 = vpop.f32.mrf.mxu2  ;;  %v3319_v40 = vadd.f32 %v3213_v11, %v2935_v10  ;;  %v3317_v35 = vadd.f32 %v3207_v36, %v2933_v23  ;;  %v8681_v45 = vpop.eup %5996  ;;  %v3929_v11 = vld [vmem:[#allocation5 + $0x1d0] sm:$0xff]  ;;  %v1790_v36 = vld [vmem:[#allocation4 + $0xb8] sm:$0xff] }
 0x4b9   : > { %v3201_v0 = vpop.xlane.xlu0 %3200 }
 0x4ba   : > { %v3315_v6 = vadd.f32 %v3201_v0, %v2931_v15  ;;  %3383 = vst [vmem:[#allocation4 + $0xc8] sm:$0xff] %v3319_v40  ;;  %v3851_v9 = vpop.f32.mrf.mxu3  ;;  %v2942_v0 = vmul.f32 %v8591_v49, %v1790_v36 }
 0x4bb   : > { %3381 = vst [vmem:[#allocation4 + $0x1b8] sm:$0xff] %v3317_v35  ;;  %v3852_v7 = vadd.f32 %v3851_v9, %v3682_v12  ;;  %v3993_v12 = vmul.f32 %v8681_v45, %v3929_v11  ;;  %v2944_v35 = vmul.f32 %v8611_v55, %v1792_v26 }
 0x4bc   : > { %3379 = vst [vmem:[#allocation4 + $0x60] sm:$0xff] %v3315_v6  ;;  %v9781_v6 = vld [vmem:[#allocation33_spill] sm:$0xff] }
 0x4bd   : > { %v4055_v48 = vadd.f32 %v3991_v59, %v3852_v7  ;;  %v9782_v9 = vsub.f32 %v9780_v5, %v9781_v6  ;;  %v2940_v59 = vmul.f32 %v8563_v4, %v1788_v13  ;;  %v8691_v29 = vpop.eup %5998  ;;  %v1791_v4 = vld [vmem:[#allocation4 + $0x120] sm:$0xff]  ;;  %v9790_v5 = vld [vmem:[#allocation35_spill] sm:$0xff] }
 0x4bf   : > { %v3222_v61 = vpop.xlane.xlu1 %3221  ;;  %v3216_v31 = vpop.xlane.xlu2 %3215  ;;  %4119 = vst.msk [vmem:[#allocation5 + $0x1c0] sm:$0xff] %vm1194_vm2, %v4055_v48  ;;  %v2885_v16 = vmul.f32 1.442695, %v9782_v9 }
 0x4c0   : > { %v3684_v8 = vpop.f32.mrf.mxu2  ;;  %v3322_v58 = vadd.f32 %v3222_v61, %v2938_v32  ;;  %v3320_v22 = vadd.f32 %v3216_v31, %v2936_v38  ;;  %v1793_v61 = vld [vmem:[#allocation4 + $0xa8] sm:$0xff] }
 0x4c1   : > { %v3210_v30 = vpop.xlane.xlu0 %3209  ;;  %6000 = vpow2.f32 %v2885_v16 }
 0x4c2   : > { %v3318_v52 = vadd.f32 %v3210_v30, %v2934_v39  ;;  %3386 = vst [vmem:[#allocation4 + $0x180] sm:$0xff] %v3322_v58  ;;  %v3853_v50 = vpop.f32.mrf.mxu3  ;;  %v3994_v39 = vmul.f32 %v8691_v29, %v3930_v24  ;;  %v2947_v58 = vmul.f32 %v8641_v19, %v1795_v42  ;;  %v9783_v30 = vld [vmem:[#allocation31_spill] sm:$0xff]  ;;  %v1798_v19 = vld [vmem:[#allocation4 + $0x18] sm:$0xff] }
 0x4c3   : > { %3384 = vst [vmem:[#allocation4 + $0xf8] sm:$0xff] %v3320_v22  ;;  %v3854_v33 = vadd.f32 %v3853_v50, %v3684_v8  ;;  %v2945_v22 = vmul.f32 %v8621_v21, %v1793_v61 }
 0x4c4   : > { %3382 = vst [vmem:[#allocation4 + $0x100] sm:$0xff] %v3318_v52  ;;  %v9785_v52 = vsub.f32 %v9783_v30, %v9784_v56  ;;  %v1802_v56 = vld [vmem:[#allocation4 + $0x170] sm:$0xff] }
 0x4c5   : > { %v4056_v54 = vadd.f32 %v3992_v44, %v3854_v33  ;;  %v2943_v33 = vmul.f32 %v8601_v25, %v1791_v4 }
 0x4c6   : > { %v2887_v50 = vmul.f32 1.442695, %v9785_v52  ;;  %v1804_v52 = vld [vmem:[#allocation4 + $0x118] sm:$0xff] }
 0x4c7   : > { %v3231_v60 = vpop.xlane.xlu1 %3230  ;;  %4120 = vst.msk [vmem:[#allocation5 + $0x1c8] sm:$0xff] %vm1194_vm2, %v4056_v54 }
 0x4c8   : > { %v3225_v41 = vpop.xlane.xlu2 %3224  ;;  %v3687_v10 = vpop.f32.mrf.mxu2  ;;  %v3325_v23 = vadd.f32 %v3231_v60, %v2941_v3  ;;  %6002 = vpow2.f32 %v2887_v50 }
 0x4c9   : > { %v3323_v1 = vadd.f32 %v3225_v41, %v2939_v28  ;;  %v3219_v57 = vpop.xlane.xlu0 %3218  ;;  %v6001_v28 = vpop.eup %6000 }
 0x4ca   : > { %v3321_v43 = vadd.f32 %v3219_v57, %v2937_v53  ;;  %3389 = vst [vmem:[#allocation4 + $0x20] sm:$0xff] %v3325_v23  ;;  %v3856_v63 = vpop.f32.mrf.mxu3  ;;  %v3995_v41 = vmul.f32 %v6001_v28, %v3931_v18  ;;  %v1794_v53 = vld [vmem:[#allocation4 + $0xc0] sm:$0xff]  ;;  %v2948_v23 = vmul.f32 %v8651_v46, %v1796_v17  ;;  %v9787_v57 = vld [vmem:[#allocation44_spill] sm:$0xff]  ;;  %v3932_v46 = vld [vmem:[#allocation5 + $0x1e8] sm:$0xff] }
 0x4cb   : > { %3387 = vst [vmem:[#allocation4 + $0xb0] sm:$0xff] %v3323_v1  ;;  %v3857_v15 = vadd.f32 %v3856_v63, %v3687_v10  ;;  %v2950_v10 = vmul.f32 %v8671_v20, %v1798_v19  ;;  %v9786_v1 = vld [vmem:[#allocation28_spill] sm:$0xff]  ;;  %v2946_v36 = vmul.f32 %v8631_v14, %v1794_v53 }
 0x4cc   : > { %3385 = vst [vmem:[#allocation4 + $0x178] sm:$0xff] %v3321_v43  ;;  %v9788_v11 = vsub.f32 %v9786_v1, %v9787_v57  ;;  %v1803_v53 = vld [vmem:[#allocation4 + $0x1d0] sm:$0xff] }
 0x4cd   : > { %v4057_v40 = vadd.f32 %v3993_v12, %v3857_v15 }
 0x4ce   : > { %v2889_v43 = vmul.f32 1.442695, %v9788_v11 }
 0x4cf   : > { %v3240_v27 = vpop.xlane.xlu1 %3239  ;;  %4121 = vst.msk [vmem:[#allocation5 + $0x1d0] sm:$0xff] %vm1194_vm2, %v4057_v40 }
 0x4d0   : > { %v3234_v7 = vpop.xlane.xlu2 %3233  ;;  %v3689_v37 = vpop.f32.mrf.mxu2  ;;  %v3328_v48 = vadd.f32 %v3240_v27, %v2944_v35  ;;  %6004 = vpow2.f32 %v2889_v43  ;;  %v1801_v27 = vld [vmem:[#allocation4 + $0x1f8] sm:$0xff] }
 0x4d1   : > { %v3326_v32 = vadd.f32 %v3234_v7, %v2942_v0  ;;  %v3228_v38 = vpop.xlane.xlu0 %3227  ;;  %v6003_v35 = vpop.eup %6002  ;;  %v9789_v0 = vld [vmem:[#allocation40_spill] sm:$0xff] }
 0x4d2   : > { %v3324_v55 = vadd.f32 %v3228_v38, %v2940_v59  ;;  %3392 = vst [vmem:[#allocation4 + $0x90] sm:$0xff] %v3328_v48  ;;  %v3858_v49 = vpop.f32.mrf.mxu3  ;;  %v9791_v20 = vsub.f32 %v9789_v0, %v9790_v5  ;;  %v1799_v7 = vld [vmem:[#allocation4 + $0xf0] sm:$0xff]  ;;  %v3996_v59 = vmul.f32 %v6003_v35, %v3932_v46 }
 0x4d3   : > { %3390 = vst [vmem:[#allocation4 + $0xb8] sm:$0xff] %v3326_v32  ;;  %v3859_v31 = vadd.f32 %v3858_v49, %v3689_v37  ;;  %v1797_v37 = vld [vmem:[#allocation4 + $0x1b0] sm:$0xff]  ;;  %v2953_v32 = vmul.f32 %v6001_v28, %v1801_v27  ;;  %v2951_v38 = vmul.f32 %v8681_v45, %v1799_v7 }
 0x4d4   : > { %3388 = vst [vmem:[#allocation4 + $0x110] sm:$0xff] %v3324_v55  ;;  %v2891_v6 = vmul.f32 1.442695, %v9791_v20  ;;  %v2949_v49 = vmul.f32 %v8661_v51, %v1797_v37 }
 0x4d5   : > { %v4058_v8 = vadd.f32 %v3994_v39, %v3859_v31 }
 0x4d6   : > { %6006 = vpow2.f32 %v2891_v6  ;;  %v6005_v4 = vpop.eup %6004 }
 0x4d7   : > { %v3249_v62 = vpop.xlane.xlu1 %3248  ;;  %4122 = vst.msk [vmem:[#allocation5 + $0x1d8] sm:$0xff] %vm1194_vm2, %v4058_v8  ;;  %v3933_v8 = vld [vmem:[#allocation5 + $0x1f0] sm:$0xff] }
 0x4d8   : > { %v3243_v47 = vpop.xlane.xlu2 %3242  ;;  %v3692_v44 = vpop.f32.mrf.mxu2  ;;  %v3331_v2 = vadd.f32 %v3249_v62, %v2947_v58  ;;  %v3997_v50 = vmul.f32 %v6005_v4, %v3933_v8  ;;  %v1800_v62 = vld [vmem:[#allocation4 + $0x128] sm:$0xff] }
 0x4d9   : > { %v3329_v54 = vadd.f32 %v3243_v47, %v2945_v22  ;;  %v3237_v3 = vpop.xlane.xlu0 %3236  ;;  %v2954_v47 = vmul.f32 %v6003_v35, %v1802_v56 }
 0x4da   : > { %v3327_v34 = vadd.f32 %v3237_v3, %v2943_v33  ;;  %3395 = vst [vmem:[#allocation4 + $0x138] sm:$0xff] %v3331_v2  ;;  %v3861_v21 = vpop.f32.mrf.mxu3 }
 0x4db   : > { %3393 = vst [vmem:[#allocation4 + $0xa8] sm:$0xff] %v3329_v54  ;;  %v3862_v60 = vadd.f32 %v3861_v21, %v3692_v44  ;;  %v2952_v54 = vmul.f32 %v8691_v29, %v1800_v62  ;;  %v3934_v21 = vld [vmem:[#allocation5 + $0x1f8] sm:$0xff] }
 0x4dc   : > { %3391 = vst [vmem:[#allocation4 + $0x120] sm:$0xff] %v3327_v34  ;;  %v6007_v22 = vpop.eup %6006 }
 0x4dd   : > { %v4059_v25 = vadd.f32 %v3995_v41, %v3862_v60  ;;  %v2956_v33 = vmul.f32 %v6007_v22, %v1804_v52  ;;  %v3998_v41 = vmul.f32 %v6007_v22, %v3934_v21 }
 0x4df   : > { %v3258_v63 = vpop.xlane.xlu1 %3257  ;;  %4123 = vst.msk [vmem:[#allocation5 + $0x1e0] sm:$0xff] %vm1194_vm2, %v4059_v25 }
 0x4e0   : > { %v3252_v26 = vpop.xlane.xlu2 %3251  ;;  %v3694_v15 = vpop.f32.mrf.mxu2  ;;  %v3334_v12 = vadd.f32 %v3258_v63, %v2950_v10  ;;  %v2955_v10 = vmul.f32 %v6005_v4, %v1803_v53 }
 0x4e1   : > { %v3332_v13 = vadd.f32 %v3252_v26, %v2948_v23  ;;  %v3246_v40 = vpop.xlane.xlu0 %3245 }
 0x4e2   : > { %v3330_v9 = vadd.f32 %v3246_v40, %v2946_v36  ;;  %3398 = vst [vmem:[#allocation4 + $0x18] sm:$0xff] %v3334_v12  ;;  %v3863_v16 = vpop.f32.mrf.mxu3 }
 0x4e3   : > { %3396 = vst [vmem:[#allocation4 + $0x188] sm:$0xff] %v3332_v13  ;;  %v3864_v14 = vadd.f32 %v3863_v16, %v3694_v15 }
 0x4e4   : > { %3394 = vst [vmem:[#allocation4 + $0xc0] sm:$0xff] %v3330_v9 }
 0x4e5   : > { %v4060_v48 = vadd.f32 %v3996_v59, %v3864_v14 }
 0x4e7   : > { %v3267_v24 = vpop.xlane.xlu1 %3266  ;;  %4124 = vst.msk [vmem:[#allocation5 + $0x1e8] sm:$0xff] %vm1194_vm2, %v4060_v48 }
 0x4e8   : > { %v3261_v55 = vpop.xlane.xlu2 %3260  ;;  %v3337_v61 = vadd.f32 %v3267_v24, %v2953_v32 }
 0x4e9   : > { %v3697_v42 = vpop.f32.mrf.mxu2  ;;  %v3335_v31 = vadd.f32 %v3261_v55, %v2951_v38  ;;  %v3255_v39 = vpop.xlane.xlu0 %3254 }
 0x4ea   : > { %v3333_v58 = vadd.f32 %v3255_v39, %v2949_v49  ;;  %3401 = vst [vmem:[#allocation4 + $0x1f8] sm:$0xff] %v3337_v61 }
 0x4eb   : > { %v3866_v30 = vpop.f32.mrf.mxu3  ;;  %3399 = vst [vmem:[#allocation4 + $0xf0] sm:$0xff] %v3335_v31 }
 0x4ec   : > { %v3867_v45 = vadd.f32 %v3866_v30, %v3697_v42  ;;  %3397 = vst [vmem:[#allocation4 + $0x1b0] sm:$0xff] %v3333_v58 }
 0x4ee   : > { %v4061_v51 = vadd.f32 %v3997_v50, %v3867_v45 }
 0x4ef   : > { %v3276_v2 = vpop.xlane.xlu1 %3275 }
 0x4f0   : > { %v3270_v44 = vpop.xlane.xlu2 %3269  ;;  %4125 = vst.msk [vmem:[#allocation5 + $0x1f0] sm:$0xff] %vm1194_vm2, %v4061_v51  ;;  %v3340_v28 = vadd.f32 %v3276_v2, %v2956_v33 }
 0x4f1   : > { %v3338_v3 = vadd.f32 %v3270_v44, %v2954_v47  ;;  %v3264_v18 = vpop.xlane.xlu0 %3263  ;;  %v3699_v34 = vpop.f32.mrf.mxu2 }
 0x4f2   : > { %v3336_v19 = vadd.f32 %v3264_v18, %v2952_v54  ;;  %3404 = vst [vmem:[#allocation4 + $0x118] sm:$0xff] %v3340_v28 }
 0x4f3   : > { %3402 = vst [vmem:[#allocation4 + $0x170] sm:$0xff] %v3338_v3  ;;  %v3868_v17 = vpop.f32.mrf.mxu3 }
 0x4f4   : > { %v3869_v60 = vadd.f32 %v3868_v17, %v3699_v34  ;;  %3400 = vst [vmem:[#allocation4 + $0x128] sm:$0xff] %v3336_v19 }
 0x4f6   : > { %v4062_v25 = vadd.f32 %v3998_v41, %v3869_v60 }
 0x4f8   : > { %4126 = vst.msk [vmem:[#allocation5 + $0x1f8] sm:$0xff] %vm1194_vm2, %v4062_v25  ;;  %4194 = sbr.rel (%p5353_p8) target bundleno = 1430 (0x596), region = 40 }
 0x4f9   : > { %v3273_v29 = vpop.xlane.xlu0 %3272 }
 0x4fa   : > { %v3339_v23 = vadd.f32 %v3273_v29, %v2955_v10 }
 0x4fc   : > { %3403 = vst [vmem:[#allocation4 + $0x1d0] sm:$0xff] %v3339_v23 }
 0x4fd   : > { %v8718_v1 = vld [vmem:[#allocation4 + $0x68] sm:$0xff]  ;;  %v8721_v57 = vld [vmem:[#allocation4 + $0x150] sm:$0xff]  ;;  %v8727_v43 = vld [vmem:[#allocation4 + $0x160] sm:$0xff]  ;;  %vm4771_vm3 = vcmask 7168  }
 0x4fe   : > { %6008 = vrcp.f32 %v8718_v1  ;;  %v8724_v11 = vld [vmem:[#allocation4 + $0x70] sm:$0xff]  ;;  %v4323_v26 = vld [vmem:[#allocation5] sm:$0xff]  ;;  %v8733_v36 = vld [vmem:[#allocation4 + $0xd8] sm:$0xff] }
 0x4ff   : > { %6010 = vrcp.f32 %v8721_v57  ;;  %v8730_v63 = vld [vmem:[#allocation4 + $0xd0] sm:$0xff]  ;;  %v4324_v15 = vld [vmem:[#allocation5 + $0x8] sm:$0xff]  ;;  %v8736_v12 = vld [vmem:[#allocation4 + $0x1e0] sm:$0xff] }
 0x500   : > { %6012 = vrcp.f32 %v8724_v11  ;;  %v4325_v40 = vld [vmem:[#allocation5 + $0x10] sm:$0xff]  ;;  %v4326_v20 = vld [vmem:[#allocation5 + $0x18] sm:$0xff]  ;;  %v8742_v6 = vld [vmem:[#allocation4 + $0x148] sm:$0xff] }
 0x501   : > { %6014 = vrcp.f32 %v8727_v43  ;;  %v8739_v35 = vld [vmem:[#allocation4 + $0x30] sm:$0xff]  ;;  %v4327_v16 = vld [vmem:[#allocation5 + $0x20] sm:$0xff]  ;;  %v4328_v59 = vld [vmem:[#allocation5 + $0x28] sm:$0xff] }
 0x502   : > { %6016 = vrcp.f32 %v8730_v63  ;;  %v8745_v27 = vld [vmem:[#allocation4 + $0x50] sm:$0xff]  ;;  %v4330_v42 = vld [vmem:[#allocation5 + $0x38] sm:$0xff]  ;;  %v4331_v4 = vld [vmem:[#allocation5 + $0x40] sm:$0xff] }
 0x503   : > { %6018 = vrcp.f32 %v8733_v36  ;;  %v8750_v37 = vld [vmem:[#allocation4 + $0x1f0] sm:$0xff]  ;;  %v8765_v8 = vld [vmem:[#allocation4 + $0x8] sm:$0xff]  ;;  %v8775_v62 = vld [vmem:[#allocation4 + $0x38] sm:$0xff] }
 0x504   : > { %v6009_v13 = vpop.eup %6008  ;;  %6020 = vrcp.f32 %v8736_v12  ;;  %v4329_v38 = vld [vmem:[#allocation5 + $0x30] sm:$0xff]  ;;  %v4332_v30 = vld [vmem:[#allocation5 + $0x48] sm:$0xff]  ;;  %v4334_v33 = vld [vmem:[#allocation5 + $0x58] sm:$0xff] }
 0x505   : > { %v6011_v0 = vpop.eup %6010  ;;  %v4387_v5 = vmul.f32 %v6009_v13, %v4323_v26  ;;  %6022 = vrcp.f32 %v8739_v35  ;;  %v8755_v24 = vld [vmem:[#allocation4 + $0x130] sm:$0xff]  ;;  %v8770_v56 = vld [vmem:[#allocation4 + $0x88] sm:$0xff]  ;;  %v8780_v44 = vld [vmem:[#allocation4 + $0xe0] sm:$0xff] }
 0x506   : > { %v6013_v46 = vpop.eup %6012  ;;  %v4388_v9 = vmul.f32 %v6011_v0, %v4324_v15  ;;  %6024 = vrcp.f32 %v8742_v6  ;;  %v8760_v61 = vld [vmem:[#allocation4 + $0x190] sm:$0xff]  ;;  %v4335_v3 = vld [vmem:[#allocation5 + $0x60] sm:$0xff]  ;;  %v4336_v21 = vld [vmem:[#allocation5 + $0x68] sm:$0xff] }
 0x507   : > { %v6015_v7 = vpop.eup %6014  ;;  %4451 = vst.msk [vmem:[%s6382_s13] sm:$0xff] %vm1194_vm2, %v4387_v5  ;;  %v4389_v14 = vmul.f32 %v6013_v46, %v4325_v40  ;;  %6026 = vrcp.f32 %v8745_v27  ;;  %v4333_v50 = vld [vmem:[#allocation5 + $0x50] sm:$0xff]  ;;  %v8790_v19 = vld [vmem:[#allocation4 + $0x1a8] sm:$0xff]  ;;  %v8795_v53 = vld [vmem:[#allocation4 + $0xa0] sm:$0xff] }
 0x508   : > { %v6017_v48 = vpop.eup %6016  ;;  %4452 = vst.msk [vmem:[%s6382_s13 + $0x8] sm:$0xff] %vm1194_vm2, %v4388_v9  ;;  %v4390_v32 = vmul.f32 %v6015_v7, %v4326_v20  ;;  %6028 = vrcp.f32 %v8750_v37  ;;  %v8785_v28 = vld [vmem:[#allocation4 + $0x10] sm:$0xff]  ;;  %v4338_v29 = vld [vmem:[#allocation5 + $0x78] sm:$0xff]  ;;  %v8800_v23 = vld [vmem:[#allocation4 + $0x1c0] sm:$0xff] }
 0x509   : > { %v6019_v55 = vpop.eup %6018  ;;  %4453 = vst.msk [vmem:[%s6382_s13 + $0x10] sm:$0xff] %vm1194_vm2, %v4389_v14  ;;  %v4391_v49 = vmul.f32 %v6017_v48, %v4327_v16  ;;  %6030 = vrcp.f32 %v8755_v24  ;;  %v4337_v41 = vld [vmem:[#allocation5 + $0x70] sm:$0xff]  ;;  %v4339_v13 = vld [vmem:[#allocation5 + $0x80] sm:$0xff]  ;;  %v8805_v40 = vld [vmem:[#allocation4 + $0x78] sm:$0xff] }
 0x50a   : > { %v6021_v31 = vpop.eup %6020  ;;  %4454 = vst.msk [vmem:[%s6382_s13 + $0x18] sm:$0xff] %vm1194_vm2, %v4390_v32  ;;  %v4392_v39 = vmul.f32 %v6019_v55, %v4328_v59  ;;  %6032 = vrcp.f32 %v8760_v61  ;;  %v4340_v20 = vld [vmem:[#allocation5 + $0x88] sm:$0xff]  ;;  %v4341_v7 = vld [vmem:[#allocation5 + $0x90] sm:$0xff]  ;;  %v8815_v14 = vld [vmem:[#allocation4 + $0x80] sm:$0xff] }
 0x50b   : > { %v6023_v58 = vpop.eup %6022  ;;  %4455 = vst.msk [vmem:[%s6382_s13 + $0x20] sm:$0xff] %vm1194_vm2, %v4391_v49  ;;  %v4393_v22 = vmul.f32 %v6021_v31, %v4329_v38  ;;  %6034 = vrcp.f32 %v8765_v8  ;;  %v8810_v46 = vld [vmem:[#allocation4 + $0x108] sm:$0xff]  ;;  %v4342_v32 = vld [vmem:[#allocation5 + $0x98] sm:$0xff] }
 0x50c   : > { %v6025_v52 = vpop.eup %6024  ;;  %4456 = vst.msk [vmem:[%s6382_s13 + $0x28] sm:$0xff] %vm1194_vm2, %v4392_v39  ;;  %v4394_v45 = vmul.f32 %v6023_v58, %v4330_v42  ;;  %6036 = vrcp.f32 %v8770_v56  ;;  %v8820_v38 = vld [vmem:[#allocation4 + $0x58] sm:$0xff]  ;;  %v4343_v42 = vld [vmem:[#allocation5 + $0xa0] sm:$0xff]  ;;  %v8825_v31 = vld [vmem:[#allocation4 + $0x48] sm:$0xff] }
 0x50d   : > { %v6027_v51 = vpop.eup %6026  ;;  %4457 = vst.msk [vmem:[%s6382_s13 + $0x30] sm:$0xff] %vm1194_vm2, %v4393_v22  ;;  %v4395_v47 = vmul.f32 %v6025_v52, %v4331_v4  ;;  %6038 = vrcp.f32 %v8775_v62  ;;  %v4344_v58 = vld [vmem:[#allocation5 + $0xa8] sm:$0xff]  ;;  %v8830_v22 = vld [vmem:[#allocation4 + $0x40] sm:$0xff] }
 0x50e   : > { %v6029_v2 = vpop.eup %6028  ;;  %4458 = vst.msk [vmem:[%s6382_s13 + $0x38] sm:$0xff] %vm1194_vm2, %v4394_v45  ;;  %v4396_v54 = vmul.f32 %v6027_v51, %v4332_v30  ;;  %6040 = vrcp.f32 %v8780_v44  ;;  %v4345_v45 = vld [vmem:[#allocation5 + $0xb0] sm:$0xff] }
 0x50f   : > { %v6031_v18 = vpop.eup %6030  ;;  %4459 = vst.msk [vmem:[%s6382_s13 + $0x40] sm:$0xff] %vm1194_vm2, %v4395_v47  ;;  %v4397_v34 = vmul.f32 %v6029_v2, %v4333_v50  ;;  %6042 = vrcp.f32 %v8785_v28  ;;  %v8835_v50 = vld [vmem:[#allocation4 + $0x1a0] sm:$0xff]  ;;  %v8840_v2 = vld [vmem:[#allocation4 + $0x198] sm:$0xff] }
 0x510   : > { %v6033_v17 = vpop.eup %6032  ;;  %4460 = vst.msk [vmem:[%s6382_s13 + $0x48] sm:$0xff] %vm1194_vm2, %v4396_v54  ;;  %v4398_v60 = vmul.f32 %v6031_v18, %v4334_v33  ;;  %6044 = vrcp.f32 %v8790_v19  ;;  %v4346_v33 = vld [vmem:[#allocation5 + $0xb8] sm:$0xff]  ;;  %v4347_v18 = vld [vmem:[#allocation5 + $0xc0] sm:$0xff] }
 0x511   : > { %v6035_v25 = vpop.eup %6034  ;;  %4461 = vst.msk [vmem:[%s6382_s13 + $0x50] sm:$0xff] %vm1194_vm2, %v4397_v34  ;;  %v4399_v10 = vmul.f32 %v6033_v17, %v4335_v3  ;;  %6046 = vrcp.f32 %v8795_v53  ;;  %v8845_v34 = vld [vmem:[#allocation4 + $0xe8] sm:$0xff] }
 0x512   : > { %v6037_v26 = vpop.eup %6036  ;;  %4462 = vst.msk [vmem:[%s6382_s13 + $0x58] sm:$0xff] %vm1194_vm2, %v4398_v60  ;;  %v4400_v15 = vmul.f32 %v6035_v25, %v4336_v21  ;;  %6048 = vrcp.f32 %v8800_v23  ;;  %v4348_v60 = vld [vmem:[#allocation5 + $0xc8] sm:$0xff] }
 0x513   : > { %v6039_v0 = vpop.eup %6038  ;;  %4463 = vst.msk [vmem:[%s6382_s13 + $0x60] sm:$0xff] %vm1194_vm2, %v4399_v10  ;;  %v4401_v5 = vmul.f32 %v6037_v26, %v4337_v41  ;;  %6050 = vrcp.f32 %v8805_v40  ;;  %v8850_v41 = vld [vmem:[#allocation4 + $0x168] sm:$0xff]  ;;  %v8855_v26 = vld [vmem:[#allocation4 + $0x158] sm:$0xff] }
 0x514   : > { %v6041_v9 = vpop.eup %6040  ;;  %4464 = vst.msk [vmem:[%s6382_s13 + $0x68] sm:$0xff] %vm1194_vm2, %v4400_v15  ;;  %v4402_v16 = vmul.f32 %v6039_v0, %v4338_v29  ;;  %6052 = vrcp.f32 %v8810_v46  ;;  %v4349_v29 = vld [vmem:[#allocation5 + $0xd0] sm:$0xff]  ;;  %v4350_v0 = vld [vmem:[#allocation5 + $0xd8] sm:$0xff] }
 0x515   : > { %v6043_v59 = vpop.eup %6042  ;;  %4465 = vst.msk [vmem:[%s6382_s13 + $0x70] sm:$0xff] %vm1194_vm2, %v4401_v5  ;;  %v4403_v48 = vmul.f32 %v6041_v9, %v4339_v13  ;;  %6054 = vrcp.f32 %v8815_v14  ;;  %v8860_v5 = vld [vmem:[#allocation4 + $0x1d8] sm:$0xff] }
 0x516   : > { %v6045_v55 = vpop.eup %6044  ;;  %4466 = vst.msk [vmem:[%s6382_s13 + $0x78] sm:$0xff] %vm1194_vm2, %v4402_v16  ;;  %v4404_v49 = vmul.f32 %v6043_v59, %v4340_v20  ;;  %6056 = vrcp.f32 %v8820_v38  ;;  %v4351_v16 = vld [vmem:[#allocation5 + $0xe0] sm:$0xff] }
 0x517   : > { %v6047_v39 = vpop.eup %6046  ;;  %4467 = vst.msk [vmem:[%s6382_s13 + $0x80] sm:$0xff] %vm1194_vm2, %v4403_v48  ;;  %v4405_v4 = vmul.f32 %v6045_v55, %v4341_v7  ;;  %6058 = vrcp.f32 %v8825_v31  ;;  %v8865_v7 = vld [vmem:[#allocation4 + $0x28] sm:$0xff]  ;;  %v8870_v55 = vld [vmem:[#allocation4] sm:$0xff] }
 0x518   : > { %v6049_v30 = vpop.eup %6048  ;;  %4468 = vst.msk [vmem:[%s6382_s13 + $0x88] sm:$0xff] %vm1194_vm2, %v4404_v49  ;;  %v4406_v52 = vmul.f32 %v6047_v39, %v4342_v32  ;;  %6060 = vrcp.f32 %v8830_v22  ;;  %v4352_v32 = vld [vmem:[#allocation5 + $0xe8] sm:$0xff]  ;;  %v4353_v39 = vld [vmem:[#allocation5 + $0xf0] sm:$0xff] }
 0x519   : > { %v6051_v51 = vpop.eup %6050  ;;  %4469 = vst.msk [vmem:[%s6382_s13 + $0x90] sm:$0xff] %vm1194_vm2, %v4405_v4  ;;  %v4407_v47 = vmul.f32 %v6049_v30, %v4343_v42  ;;  %6062 = vrcp.f32 %v8835_v50  ;;  %v8875_v4 = vld [vmem:[#allocation4 + $0x1c8] sm:$0xff] }
 0x51a   : > { %v6053_v54 = vpop.eup %6052  ;;  %4470 = vst.msk [vmem:[%s6382_s13 + $0x98] sm:$0xff] %vm1194_vm2, %v4406_v52  ;;  %v4408_v3 = vmul.f32 %v6051_v51, %v4344_v58  ;;  %6064 = vrcp.f32 %v8840_v2  ;;  %v4354_v52 = vld [vmem:[#allocation5 + $0xf8] sm:$0xff] }
 0x51b   : > { %v6055_v21 = vpop.eup %6054  ;;  %4471 = vst.msk [vmem:[%s6382_s13 + $0xa0] sm:$0xff] %vm1194_vm2, %v4407_v47  ;;  %v4409_v17 = vmul.f32 %v6053_v54, %v4345_v45  ;;  %6066 = vrcp.f32 %v8845_v34  ;;  %v8880_v45 = vld [vmem:[#allocation4 + $0x1e8] sm:$0xff]  ;;  %v8885_v54 = vld [vmem:[#allocation4 + $0x140] sm:$0xff] }
 0x51c   : > { %v6057_v25 = vpop.eup %6056  ;;  %4472 = vst.msk [vmem:[%s6382_s13 + $0xa8] sm:$0xff] %vm1194_vm2, %v4408_v3  ;;  %v4410_v10 = vmul.f32 %v6055_v21, %v4346_v33  ;;  %6068 = vrcp.f32 %v8850_v41  ;;  %v4355_v33 = vld [vmem:[#allocation5 + $0x100] sm:$0xff]  ;;  %v4356_v21 = vld [vmem:[#allocation5 + $0x108] sm:$0xff] }
 0x51d   : > { %v6059_v15 = vpop.eup %6058  ;;  %4473 = vst.msk [vmem:[%s6382_s13 + $0xb0] sm:$0xff] %vm1194_vm2, %v4409_v17  ;;  %v4411_v13 = vmul.f32 %v6057_v25, %v4347_v18  ;;  %6070 = vrcp.f32 %v8855_v26  ;;  %v8890_v17 = vld [vmem:[#allocation4 + $0x60] sm:$0xff] }
 0x51e   : > { %v6061_v20 = vpop.eup %6060  ;;  %4474 = vst.msk [vmem:[%s6382_s13 + $0xb8] sm:$0xff] %vm1194_vm2, %v4410_v10  ;;  %v4412_v9 = vmul.f32 %v6059_v15, %v4348_v60  ;;  %6072 = vrcp.f32 %v8860_v5  ;;  %v4357_v10 = vld [vmem:[#allocation5 + $0x110] sm:$0xff] }
 0x51f   : > { %v6063_v59 = vpop.eup %6062  ;;  %4475 = vst.msk [vmem:[%s6382_s13 + $0xc0] sm:$0xff] %vm1194_vm2, %v4411_v13  ;;  %v4413_v48 = vmul.f32 %v6061_v20, %v4349_v29  ;;  %6074 = vrcp.f32 %v8865_v7  ;;  %v8895_v29 = vld [vmem:[#allocation4 + $0x98] sm:$0xff] }
 0x520   : > { %v6065_v49 = vpop.eup %6064  ;;  %4476 = vst.msk [vmem:[%s6382_s13 + $0xc8] sm:$0xff] %vm1194_vm2, %v4412_v9  ;;  %v4414_v42 = vmul.f32 %v6063_v59, %v4350_v0  ;;  %6076 = vrcp.f32 %v8870_v55  ;;  %v4358_v0 = vld [vmem:[#allocation5 + $0x118] sm:$0xff]  ;;  %v4359_v59 = vld [vmem:[#allocation5 + $0x120] sm:$0xff] }
 0x521   : > { %v6067_v58 = vpop.eup %6066  ;;  %4477 = vst.msk [vmem:[%s6382_s13 + $0xd0] sm:$0xff] %vm1194_vm2, %v4413_v48  ;;  %v4415_v30 = vmul.f32 %v6065_v49, %v4351_v16  ;;  %6078 = vrcp.f32 %v8875_v4  ;;  %v8900_v20 = vld [vmem:[#allocation4 + $0x1b8] sm:$0xff]  ;;  %v8905_v48 = vld [vmem:[#allocation4 + $0x100] sm:$0xff] }
 0x522   : > { %v6069_v51 = vpop.eup %6068  ;;  %4478 = vst.msk [vmem:[%s6382_s13 + $0xd8] sm:$0xff] %vm1194_vm2, %v4414_v42  ;;  %v4416_v47 = vmul.f32 %v6067_v58, %v4352_v32  ;;  %6080 = vrcp.f32 %v8880_v45  ;;  %v4360_v42 = vld [vmem:[#allocation5 + $0x128] sm:$0xff] }
 0x523   : > { %v6071_v3 = vpop.eup %6070  ;;  %4479 = vst.msk [vmem:[%s6382_s13 + $0xe0] sm:$0xff] %vm1194_vm2, %v4415_v30  ;;  %v4417_v18 = vmul.f32 %v6069_v51, %v4353_v39  ;;  %6082 = vrcp.f32 %v8885_v54  ;;  %v8910_v39 = vld [vmem:[#allocation4 + $0xc8] sm:$0xff]  ;;  %v8915_v51 = vld [vmem:[#allocation4 + $0xf8] sm:$0xff] }
 0x524   : > { %v6073_v60 = vpop.eup %6072  ;;  %4480 = vst.msk [vmem:[%s6382_s13 + $0xe8] sm:$0xff] %vm1194_vm2, %v4416_v47  ;;  %v4418_v25 = vmul.f32 %v6071_v3, %v4354_v52  ;;  %6084 = vrcp.f32 %v8890_v17  ;;  %v4361_v52 = vld [vmem:[#allocation5 + $0x130] sm:$0xff]  ;;  %v4362_v3 = vld [vmem:[#allocation5 + $0x138] sm:$0xff] }
 0x525   : > { %v6075_v15 = vpop.eup %6074  ;;  %4481 = vst.msk [vmem:[%s6382_s13 + $0xf0] sm:$0xff] %vm1194_vm2, %v4417_v18  ;;  %v4419_v13 = vmul.f32 %v6073_v60, %v4355_v33  ;;  %6086 = vrcp.f32 %v8895_v29  ;;  %v8920_v18 = vld [vmem:[#allocation4 + $0x178] sm:$0xff] }
 0x526   : > { %v6077_v9 = vpop.eup %6076  ;;  %4482 = vst.msk [vmem:[%s6382_s13 + $0xf8] sm:$0xff] %vm1194_vm2, %v4418_v25  ;;  %v4420_v16 = vmul.f32 %v6075_v15, %v4356_v21  ;;  %6088 = vrcp.f32 %v8900_v20  ;;  %v4363_v25 = vld [vmem:[#allocation5 + $0x140] sm:$0xff] }
 0x527   : > { %v6079_v32 = vpop.eup %6078  ;;  %4483 = vst.msk [vmem:[%s6382_s13 + $0x100] sm:$0xff] %vm1194_vm2, %v4419_v13  ;;  %v4421_v49 = vmul.f32 %v6077_v9, %v4357_v10  ;;  %6090 = vrcp.f32 %v8905_v48  ;;  %v8925_v10 = vld [vmem:[#allocation4 + $0x180] sm:$0xff]  ;;  %v8930_v9 = vld [vmem:[#allocation4 + $0xb0] sm:$0xff] }
 0x528   : > { %v6081_v58 = vpop.eup %6080  ;;  %4484 = vst.msk [vmem:[%s6382_s13 + $0x108] sm:$0xff] %vm1194_vm2, %v4420_v16  ;;  %v4422_v30 = vmul.f32 %v6079_v32, %v4358_v0  ;;  %6092 = vrcp.f32 %v8910_v39  ;;  %v4364_v0 = vld [vmem:[#allocation5 + $0x148] sm:$0xff]  ;;  %v4365_v32 = vld [vmem:[#allocation5 + $0x150] sm:$0xff] }
 0x529   : > { %v6083_v47 = vpop.eup %6082  ;;  %4485 = vst.msk [vmem:[%s6382_s13 + $0x110] sm:$0xff] %vm1194_vm2, %v4421_v49  ;;  %v4423_v33 = vmul.f32 %v6081_v58, %v4359_v59  ;;  %6094 = vrcp.f32 %v8915_v51  ;;  %v8935_v49 = vld [vmem:[#allocation4 + $0x110] sm:$0xff] }
 0x52a   : > { %v6085_v21 = vpop.eup %6084  ;;  %4486 = vst.msk [vmem:[%s6382_s13 + $0x118] sm:$0xff] %vm1194_vm2, %v4422_v30  ;;  %v4424_v60 = vmul.f32 %v6083_v47, %v4360_v42  ;;  %6096 = vrcp.f32 %v8920_v18  ;;  %v4366_v30 = vld [vmem:[#allocation5 + $0x158] sm:$0xff] }
 0x52b   : > { %v6087_v15 = vpop.eup %6086  ;;  %4487 = vst.msk [vmem:[%s6382_s13 + $0x120] sm:$0xff] %vm1194_vm2, %v4423_v33  ;;  %v4425_v13 = vmul.f32 %v6085_v21, %v4361_v52  ;;  %6098 = vrcp.f32 %v8925_v10  ;;  %v8940_v52 = vld [vmem:[#allocation4 + $0x20] sm:$0xff]  ;;  %v8945_v21 = vld [vmem:[#allocation4 + $0xb8] sm:$0xff] }
 0x52c   : > { %v6089_v16 = vpop.eup %6088  ;;  %4488 = vst.msk [vmem:[%s6382_s13 + $0x128] sm:$0xff] %vm1194_vm2, %v4424_v60  ;;  %v4426_v59 = vmul.f32 %v6087_v15, %v4362_v3  ;;  %6100 = vrcp.f32 %v8930_v9  ;;  %v4367_v3 = vld [vmem:[#allocation5 + $0x160] sm:$0xff]  ;;  %v4368_v15 = vld [vmem:[#allocation5 + $0x168] sm:$0xff] }
 0x52d   : > { %v6091_v42 = vpop.eup %6090  ;;  %4489 = vst.msk [vmem:[%s6382_s13 + $0x130] sm:$0xff] %vm1194_vm2, %v4425_v13  ;;  %v4427_v58 = vmul.f32 %v6089_v16, %v4363_v25  ;;  %6102 = vrcp.f32 %v8935_v49  ;;  %v8950_v13 = vld [vmem:[#allocation4 + $0x120] sm:$0xff] }
 0x52e   : > { %9792 = vst [vmem:[#allocation110_spill] sm:$0xff] %v8940_v52  ;;  %v6093_v47 = vpop.eup %6092  ;;  %v4428_v33 = vmul.f32 %v6091_v42, %v4364_v0  ;;  %6104 = vrcp.f32 %v8940_v52  ;;  %v8955_v42 = vld [vmem:[#allocation4 + $0x90] sm:$0xff] }
 0x52f   : > { %4490 = vst.msk [vmem:[%s6382_s13 + $0x138] sm:$0xff] %vm1194_vm2, %v4426_v59  ;;  %v6095_v60 = vpop.eup %6094  ;;  %v4429_v25 = vmul.f32 %v6093_v47, %v4365_v32  ;;  %6106 = vrcp.f32 %v8945_v21  ;;  %v4369_v59 = vld [vmem:[#allocation5 + $0x170] sm:$0xff]  ;;  %v8960_v47 = vld [vmem:[#allocation4 + $0xa8] sm:$0xff] }
 0x530   : > { %9793 = vst [vmem:[#allocation111_spill] sm:$0xff] %v8945_v21  ;;  %v6097_v16 = vpop.eup %6096  ;;  %v4430_v0 = vmul.f32 %v6095_v60, %v4366_v30  ;;  %6108 = vrcp.f32 %v8950_v13  ;;  %v8965_v60 = vld [vmem:[#allocation4 + $0xc0] sm:$0xff] }
 0x531   : > { %4491 = vst.msk [vmem:[%s6382_s13 + $0x140] sm:$0xff] %vm1194_vm2, %v4427_v58  ;;  %v6099_v52 = vpop.eup %6098  ;;  %v4431_v32 = vmul.f32 %v6097_v16, %v4367_v3  ;;  %v4370_v58 = vld [vmem:[#allocation5 + $0x178] sm:$0xff]  ;;  %6110 = vrcp.f32 %v8955_v42 }
 0x532   : > { %9794 = vst [vmem:[#allocation112_spill] sm:$0xff] %v8950_v13  ;;  %v6101_v21 = vpop.eup %6100  ;;  %v4432_v30 = vmul.f32 %v6099_v52, %v4368_v15  ;;  %6112 = vrcp.f32 %v8960_v47  ;;  %v8970_v16 = vld [vmem:[#allocation4 + $0x138] sm:$0xff]  ;;  %v4373_v15 = vld [vmem:[#allocation5 + $0x190] sm:$0xff] }
 0x533   : > { %4492 = vst.msk [vmem:[%s6382_s13 + $0x148] sm:$0xff] %vm1194_vm2, %v4428_v33  ;;  %v4371_v33 = vld [vmem:[#allocation5 + $0x180] sm:$0xff]  ;;  %v6103_v13 = vpop.eup %6102  ;;  %v4433_v3 = vmul.f32 %v6101_v21, %v4369_v59  ;;  %6114 = vrcp.f32 %v8965_v60  ;;  %v4374_v59 = vld [vmem:[#allocation5 + $0x198] sm:$0xff] }
 0x534   : > { %9795 = vst [vmem:[#allocation113_spill] sm:$0xff] %v8955_v42  ;;  %v6105_v42 = vpop.eup %6104  ;;  %v4434_v52 = vmul.f32 %v6103_v13, %v4370_v58  ;;  %6116 = vrcp.f32 %v8970_v16  ;;  %v4375_v58 = vld [vmem:[#allocation5 + $0x1a0] sm:$0xff] }
 0x535   : > { %4493 = vst.msk [vmem:[%s6382_s13 + $0x150] sm:$0xff] %vm1194_vm2, %v4429_v25  ;;  %v4372_v25 = vld [vmem:[#allocation5 + $0x188] sm:$0xff]  ;;  %v4435_v21 = vmul.f32 %v6105_v42, %v4371_v33 }
 0x536   : > { %9796 = vst [vmem:[#allocation114_spill] sm:$0xff] %v8960_v47  ;;  %v6107_v47 = vpop.eup %6106  ;;  %v4376_v33 = vld [vmem:[#allocation5 + $0x1a8] sm:$0xff] }
 0x537   : > { %4494 = vst.msk [vmem:[%s6382_s13 + $0x158] sm:$0xff] %vm1194_vm2, %v4430_v0  ;;  %v8975_v0 = vld [vmem:[#allocation4 + $0x188] sm:$0xff]  ;;  %v4436_v13 = vmul.f32 %v6107_v47, %v4372_v25  ;;  %v4377_v25 = vld [vmem:[#allocation5 + $0x1b0] sm:$0xff] }
 0x538   : > { %9797 = vst [vmem:[#allocation115_spill] sm:$0xff] %v8965_v60  ;;  %6118 = vrcp.f32 %v8975_v0  ;;  %v6109_v60 = vpop.eup %6108 }
 0x539   : > { %4495 = vst.msk [vmem:[%s6382_s13 + $0x160] sm:$0xff] %vm1194_vm2, %v4431_v32  ;;  %v8980_v32 = vld [vmem:[#allocation4 + $0x1b0] sm:$0xff]  ;;  %v4437_v42 = vmul.f32 %v6109_v60, %v4373_v15  ;;  %v4378_v15 = vld [vmem:[#allocation5 + $0x1b8] sm:$0xff] }
 0x53a   : > { %9798 = vst [vmem:[#allocation116_spill] sm:$0xff] %v8970_v16  ;;  %6120 = vrcp.f32 %v8980_v32  ;;  %v6111_v16 = vpop.eup %6110 }
 0x53b   : > { %4496 = vst.msk [vmem:[%s6382_s13 + $0x168] sm:$0xff] %vm1194_vm2, %v4432_v30  ;;  %v8985_v30 = vld [vmem:[#allocation4 + $0x18] sm:$0xff]  ;;  %v4438_v47 = vmul.f32 %v6111_v16, %v4374_v59  ;;  %v4379_v59 = vld [vmem:[#allocation5 + $0x1c0] sm:$0xff] }
 0x53c   : > { %9799 = vst [vmem:[#allocation117_spill] sm:$0xff] %v8975_v0  ;;  %6122 = vrcp.f32 %v8985_v30  ;;  %v6113_v0 = vpop.eup %6112 }
 0x53d   : > { %4497 = vst.msk [vmem:[%s6382_s13 + $0x170] sm:$0xff] %vm1194_vm2, %v4433_v3  ;;  %v8990_v3 = vld [vmem:[#allocation4 + $0xf0] sm:$0xff]  ;;  %v4439_v60 = vmul.f32 %v6113_v0, %v4375_v58  ;;  %v4380_v58 = vld [vmem:[#allocation5 + $0x1c8] sm:$0xff] }
 0x53e   : > { %9800 = vst [vmem:[#allocation118_spill] sm:$0xff] %v8980_v32  ;;  %6124 = vrcp.f32 %v8990_v3  ;;  %v6115_v32 = vpop.eup %6114 }
 0x53f   : > { %4498 = vst.msk [vmem:[%s6382_s13 + $0x178] sm:$0xff] %vm1194_vm2, %v4434_v52  ;;  %v8995_v52 = vld [vmem:[#allocation4 + $0x128] sm:$0xff]  ;;  %v4440_v16 = vmul.f32 %v6115_v32, %v4376_v33  ;;  %v4381_v33 = vld [vmem:[#allocation5 + $0x1d0] sm:$0xff] }
 0x540   : > { %9801 = vst [vmem:[#allocation119_spill] sm:$0xff] %v8985_v30  ;;  %6126 = vrcp.f32 %v8995_v52  ;;  %v6117_v30 = vpop.eup %6116 }
 0x541   : > { %4499 = vst.msk [vmem:[%s6382_s13 + $0x180] sm:$0xff] %vm1194_vm2, %v4435_v21  ;;  %v9000_v21 = vld [vmem:[#allocation4 + $0x1f8] sm:$0xff]  ;;  %v4441_v0 = vmul.f32 %v6117_v30, %v4377_v25 }
 0x542   : > { %9802 = vst [vmem:[#allocation120_spill] sm:$0xff] %v8990_v3  ;;  %6128 = vrcp.f32 %v9000_v21  ;;  %v6119_v3 = vpop.eup %6118  ;;  %v4382_v25 = vld [vmem:[#allocation5 + $0x1d8] sm:$0xff] }
 0x543   : > { %4500 = vst.msk [vmem:[%s6382_s13 + $0x188] sm:$0xff] %vm1194_vm2, %v4436_v13  ;;  %v9005_v13 = vld [vmem:[#allocation4 + $0x170] sm:$0xff]  ;;  %v4442_v32 = vmul.f32 %v6119_v3, %v4378_v15 }
 0x544   : > { %9803 = vst [vmem:[#allocation121_spill] sm:$0xff] %v8995_v52  ;;  %6130 = vrcp.f32 %v9005_v13  ;;  %v6121_v52 = vpop.eup %6120 }
 0x545   : > { %4501 = vst.msk [vmem:[%s6382_s13 + $0x190] sm:$0xff] %vm1194_vm2, %v4437_v42  ;;  %v9010_v42 = vld [vmem:[#allocation4 + $0x1d0] sm:$0xff]  ;;  %v4443_v30 = vmul.f32 %v6121_v52, %v4379_v59 }
 0x546   : > { %9804 = vst [vmem:[#allocation122_spill] sm:$0xff] %v9000_v21  ;;  %6132 = vrcp.f32 %v9010_v42  ;;  %v6123_v21 = vpop.eup %6122 }
 0x547   : > { %4502 = vst.msk [vmem:[%s6382_s13 + $0x198] sm:$0xff] %vm1194_vm2, %v4438_v47  ;;  %v9015_v47 = vld [vmem:[#allocation4 + $0x118] sm:$0xff] }
 0x548   : > { %9805 = vst [vmem:[#allocation123_spill] sm:$0xff] %v9005_v13  ;;  %6134 = vrcp.f32 %v9015_v47  ;;  %v4383_v13 = vld [vmem:[#allocation5 + $0x1e0] sm:$0xff] }
 0x549   : > { %4503 = vst.msk [vmem:[%s6382_s13 + $0x1a0] sm:$0xff] %vm1194_vm2, %v4439_v60  ;;  %v6125_v60 = vpop.eup %6124  ;;  %6136 = vlog2.f32 %v8718_v1 }
 0x54a   : > { %9806 = vst [vmem:[#allocation124_spill] sm:$0xff] %v9010_v42  ;;  %v6127_v3 = vpop.eup %6126  ;;  %v4445_v15 = vmul.f32 %v6125_v60, %v4381_v33  ;;  %v4384_v42 = vld [vmem:[#allocation5 + $0x1e8] sm:$0xff]  ;;  %6138 = vlog2.f32 %v8721_v57  ;;  %v4516_v60 = vld [vmem:[#allocation3 + $0x1b0] sm:$0xff] }
 0x54b   : > { %4504 = vst.msk [vmem:[%s6382_s13 + $0x1a8] sm:$0xff] %vm1194_vm2, %v4440_v16  ;;  %v4444_v16 = vmul.f32 %v6123_v21, %v4380_v58  ;;  %v6129_v52 = vpop.eup %6128  ;;  %v4446_v59 = vmul.f32 %v6127_v3, %v4382_v25  ;;  %6140 = vlog2.f32 %v8724_v11  ;;  %v4386_v58 = vld [vmem:[#allocation5 + $0x1f8] sm:$0xff]  ;;  %v4515_v25 = vld [vmem:[#allocation3 + $0xb0] sm:$0xff] }
 0x54c   : > { %4505 = vst.msk [vmem:[%s6382_s13 + $0x1b0] sm:$0xff] %vm1194_vm2, %v4441_v0  ;;  %v4385_v0 = vld [vmem:[#allocation5 + $0x1f0] sm:$0xff]  ;;  %v6131_v21 = vpop.eup %6130  ;;  %v4447_v1 = vmul.f32 %v6129_v52, %v4383_v13  ;;  %6142 = vlog2.f32 %v8727_v43  ;;  %v4518_v52 = vld [vmem:[#allocation3 + $0x18] sm:$0xff] }
 0x54d   : > { %4506 = vst.msk [vmem:[%s6382_s13 + $0x1b8] sm:$0xff] %vm1194_vm2, %v4442_v32  ;;  %v6133_v32 = vpop.eup %6132  ;;  %v4448_v57 = vmul.f32 %v6131_v21, %v4384_v42  ;;  %6144 = vlog2.f32 %v8730_v63 }
 0x54e   : > { %4507 = vst.msk [vmem:[%s6382_s13 + $0x1c0] sm:$0xff] %vm1194_vm2, %v4443_v30  ;;  %v6135_v33 = vpop.eup %6134  ;;  %v4449_v30 = vmul.f32 %v6133_v32, %v4385_v0  ;;  %6146 = vlog2.f32 %v8733_v36 }
 0x54f   : > { %4508 = vst.msk [vmem:[%s6382_s13 + $0x1c8] sm:$0xff] %vm1194_vm2, %v4444_v16  ;;  %v6137_v11 = vpop.eup %6136  ;;  %v4450_v13 = vmul.f32 %v6135_v33, %v4386_v58  ;;  %6148 = vlog2.f32 %v8736_v12  ;;  %v4517_v16 = vld [vmem:[#allocation3 + $0xd8] sm:$0xff] }
 0x550   : > { %4509 = vst.msk [vmem:[%s6382_s13 + $0x1d0] sm:$0xff] %vm1194_vm2, %v4445_v15  ;;  %v6139_v43 = vpop.eup %6138  ;;  %v4580_v42 = vmul.f32 0.6931472, %v6137_v11  ;;  %6150 = vlog2.f32 %v8739_v35  ;;  %v4519_v35 = vld [vmem:[#allocation3 + $0x50] sm:$0xff] }
 0x551   : > { %4510 = vst.msk [vmem:[%s6382_s13 + $0x1d8] sm:$0xff] %vm1194_vm2, %v4446_v59  ;;  %v6141_v63 = vpop.eup %6140  ;;  %v4582_v36 = vmul.f32 0.6931472, %v6139_v43  ;;  %6152 = vlog2.f32 %v8742_v6  ;;  %v4520_v6 = vld [vmem:[#allocation3 + $0x168] sm:$0xff] }
 0x552   : > { %4511 = vst.msk [vmem:[%s6382_s13 + $0x1e0] sm:$0xff] %vm1194_vm2, %v4447_v1  ;;  %v6143_v3 = vpop.eup %6142  ;;  %v4707_v15 = vadd.f32 %v4580_v42, %v4515_v25  ;;  %v4584_v12 = vmul.f32 0.6931472, %v6141_v63  ;;  %6154 = vlog2.f32 %v8745_v27  ;;  %v4522_v25 = vld [vmem:[#allocation3 + $0x48] sm:$0xff] }
 0x553   : > { %4512 = vst.msk [vmem:[%s6382_s13 + $0x1e8] sm:$0xff] %vm1194_vm2, %v4448_v57  ;;  %v6145_v59 = vpop.eup %6144  ;;  %v4708_v0 = vadd.f32 %v4582_v36, %v4516_v60  ;;  %v4586_v21 = vmul.f32 0.6931472, %v6143_v3  ;;  %6156 = vlog2.f32 %v8750_v37  ;;  %v4523_v60 = vld [vmem:[#allocation3 + $0x180] sm:$0xff] }
 0x554   : > { %4513 = vst.msk [vmem:[%s6382_s13 + $0x1f0] sm:$0xff] %vm1194_vm2, %v4449_v30  ;;  %v6147_v1 = vpop.eup %6146  ;;  %v4709_v58 = vadd.f32 %v4584_v12, %v4517_v16  ;;  %v4588_v32 = vmul.f32 0.6931472, %v6145_v59  ;;  %6158 = vlog2.f32 %v8755_v24  ;;  %v4521_v30 = vld [vmem:[#allocation3 + $0x130] sm:$0xff]  ;;  %v4525_v12 = vld [vmem:[#allocation3 + $0x118] sm:$0xff] }
 0x555   : > { %4514 = vst.msk [vmem:[%s6382_s13 + $0x1f8] sm:$0xff] %vm1194_vm2, %v4450_v13  ;;  %v6149_v57 = vpop.eup %6148  ;;  %v4710_v27 = vadd.f32 %v4586_v21, %v4518_v52  ;;  %v4590_v33 = vmul.f32 0.6931472, %v6147_v1  ;;  %6160 = vlog2.f32 %v8760_v61  ;;  %v4524_v16 = vld [vmem:[#allocation3 + $0x110] sm:$0xff]  ;;  %v4527_v1 = vld [vmem:[#allocation3 + $0x120] sm:$0xff] }
 0x556   : > { %4772 = vst.msk [vmem:[%s6387_s22] sm:$0xff] %vm4771_vm3, %v4707_v15  ;;  %v6151_v11 = vpop.eup %6150  ;;  %v4711_v37 = vadd.f32 %v4588_v32, %v4519_v35  ;;  %v4592_v13 = vmul.f32 0.6931472, %v6149_v57  ;;  %6162 = vlog2.f32 %v8765_v8 }
 0x557   : > { %4773 = vst.msk [vmem:[%s6387_s22 + $0x8] sm:$0xff] %vm4771_vm3, %v4708_v0  ;;  %v6153_v43 = vpop.eup %6152  ;;  %v4712_v24 = vadd.f32 %v4590_v33, %v4520_v6  ;;  %v4594_v42 = vmul.f32 0.6931472, %v6151_v11  ;;  %6164 = vlog2.f32 %v8770_v56  ;;  %v4526_v0 = vld [vmem:[#allocation3 + $0x98] sm:$0xff]  ;;  %v4528_v6 = vld [vmem:[#allocation3 + $0x150] sm:$0xff]  ;;  %v4529_v33 = vld [vmem:[#allocation3 + $0x108] sm:$0xff] }
 0x558   : > { %4774 = vst.msk [vmem:[%s6387_s22 + $0x10] sm:$0xff] %vm4771_vm3, %v4709_v58  ;;  %v6155_v63 = vpop.eup %6154  ;;  %v4713_v61 = vadd.f32 %v4592_v13, %v4521_v30  ;;  %v4596_v36 = vmul.f32 0.6931472, %v6153_v43  ;;  %6166 = vlog2.f32 %v8775_v62  ;;  %v4531_v43 = vld [vmem:[#allocation3 + $0xe0] sm:$0xff] }
 0x559   : > { %4775 = vst.msk [vmem:[%s6387_s22 + $0x18] sm:$0xff] %vm4771_vm3, %v4710_v27  ;;  %v6157_v3 = vpop.eup %6156  ;;  %v4714_v8 = vadd.f32 %v4594_v42, %v4522_v25  ;;  %v4598_v15 = vmul.f32 0.6931472, %v6155_v63  ;;  %6168 = vlog2.f32 %v8780_v44 }
 0x55a   : > { %4776 = vst.msk [vmem:[%s6387_s22 + $0x20] sm:$0xff] %vm4771_vm3, %v4711_v37  ;;  %v6159_v52 = vpop.eup %6158  ;;  %v4715_v56 = vadd.f32 %v4596_v36, %v4523_v60  ;;  %v4600_v59 = vmul.f32 0.6931472, %v6157_v3  ;;  %6170 = vlog2.f32 %v8785_v28  ;;  %v4530_v37 = vld [vmem:[#allocation3 + $0x60] sm:$0xff]  ;;  %v4532_v60 = vld [vmem:[#allocation3 + $0x188] sm:$0xff]  ;;  %v4533_v36 = vld [vmem:[#allocation3 + $0x138] sm:$0xff] }
 0x55b   : > { %4777 = vst.msk [vmem:[%s6387_s22 + $0x28] sm:$0xff] %vm4771_vm3, %v4712_v24  ;;  %v6161_v21 = vpop.eup %6160  ;;  %v4716_v62 = vadd.f32 %v4598_v15, %v4524_v16  ;;  %v4602_v35 = vmul.f32 0.6931472, %v6159_v52  ;;  %6172 = vlog2.f32 %v8790_v19  ;;  %v4535_v52 = vld [vmem:[#allocation3 + $0x80] sm:$0xff] }
 0x55c   : > { %4778 = vst.msk [vmem:[%s6387_s22 + $0x30] sm:$0xff] %vm4771_vm3, %v4713_v61  ;;  %v6163_v58 = vpop.eup %6162  ;;  %v4717_v44 = vadd.f32 %v4600_v59, %v4525_v12  ;;  %v4604_v32 = vmul.f32 0.6931472, %v6161_v21  ;;  %6174 = vlog2.f32 %v8795_v53 }
 0x55d   : > { %4779 = vst.msk [vmem:[%s6387_s22 + $0x38] sm:$0xff] %vm4771_vm3, %v4714_v8  ;;  %v6165_v57 = vpop.eup %6164  ;;  %v4718_v28 = vadd.f32 %v4602_v35, %v4526_v0  ;;  %v4606_v27 = vmul.f32 0.6931472, %v6163_v58  ;;  %6176 = vlog2.f32 %v8800_v23  ;;  %v4534_v8 = vld [vmem:[#allocation3 + $0x140] sm:$0xff]  ;;  %v4536_v0 = vld [vmem:[#allocation3 + $0x1a8] sm:$0xff]  ;;  %v4537_v35 = vld [vmem:[#allocation3 + $0x1b8] sm:$0xff] }
 0x55e   : > { %4780 = vst.msk [vmem:[%s6387_s22 + $0x40] sm:$0xff] %vm4771_vm3, %v4715_v56  ;;  %v6167_v30 = vpop.eup %6166  ;;  %v4719_v19 = vadd.f32 %v4604_v32, %v4527_v1  ;;  %v4608_v11 = vmul.f32 0.6931472, %v6165_v57  ;;  %6178 = vlog2.f32 %v8805_v40  ;;  %v4539_v57 = vld [vmem:[#allocation3 + $0x1e8] sm:$0xff] }
 0x55f   : > { %4781 = vst.msk [vmem:[%s6387_s22 + $0x48] sm:$0xff] %vm4771_vm3, %v4716_v62  ;;  %v6169_v13 = vpop.eup %6168  ;;  %v4720_v53 = vadd.f32 %v4606_v27, %v4528_v6  ;;  %v4610_v25 = vmul.f32 0.6931472, %v6167_v30  ;;  %6180 = vlog2.f32 %v8810_v46 }
 0x560   : > { %4782 = vst.msk [vmem:[%s6387_s22 + $0x50] sm:$0xff] %vm4771_vm3, %v4717_v44  ;;  %v6171_v24 = vpop.eup %6170  ;;  %v4721_v23 = vadd.f32 %v4608_v11, %v4529_v33  ;;  %v4612_v42 = vmul.f32 0.6931472, %v6169_v13  ;;  %6182 = vlog2.f32 %v8815_v14  ;;  %v4538_v44 = vld [vmem:[#allocation3 + $0x28] sm:$0xff]  ;;  %v4540_v33 = vld [vmem:[#allocation3 + $0xf8] sm:$0xff]  ;;  %v4541_v11 = vld [vmem:[#allocation3 + $0x160] sm:$0xff] }
 0x561   : > { %4783 = vst.msk [vmem:[%s6387_s22 + $0x58] sm:$0xff] %vm4771_vm3, %v4718_v28  ;;  %v6173_v63 = vpop.eup %6172  ;;  %v4722_v40 = vadd.f32 %v4610_v25, %v4530_v37  ;;  %v4614_v61 = vmul.f32 0.6931472, %v6171_v24  ;;  %6184 = vlog2.f32 %v8820_v38  ;;  %v4543_v24 = vld [vmem:[#allocation3 + $0x1e0] sm:$0xff] }
 0x562   : > { %4784 = vst.msk [vmem:[%s6387_s22 + $0x60] sm:$0xff] %vm4771_vm3, %v4719_v19  ;;  %v6175_v16 = vpop.eup %6174  ;;  %v4723_v46 = vadd.f32 %v4612_v42, %v4531_v43  ;;  %v4616_v3 = vmul.f32 0.6931472, %v6173_v63  ;;  %6186 = vlog2.f32 %v8825_v31 }
 0x563   : > { %4785 = vst.msk [vmem:[%s6387_s22 + $0x68] sm:$0xff] %vm4771_vm3, %v4720_v53  ;;  %v6177_v15 = vpop.eup %6176  ;;  %v4724_v14 = vadd.f32 %v4614_v61, %v4532_v60  ;;  %v4618_v12 = vmul.f32 0.6931472, %v6175_v16  ;;  %6188 = vlog2.f32 %v8830_v22  ;;  %v4542_v53 = vld [vmem:[#allocation3 + $0x30] sm:$0xff]  ;;  %v4544_v60 = vld [vmem:[#allocation3] sm:$0xff] }
 0x564   : > { %4786 = vst.msk [vmem:[%s6387_s22 + $0x70] sm:$0xff] %vm4771_vm3, %v4721_v23  ;;  %v6179_v56 = vpop.eup %6178  ;;  %v4725_v38 = vadd.f32 %v4616_v3, %v4533_v36  ;;  %v4620_v59 = vmul.f32 0.6931472, %v6177_v15  ;;  %6190 = vlog2.f32 %v8835_v50  ;;  %v4545_v61 = vld [vmem:[#allocation3 + $0xf0] sm:$0xff]  ;;  %v4547_v15 = vld [vmem:[#allocation3 + $0x148] sm:$0xff] }
 0x565   : > { %4787 = vst.msk [vmem:[%s6387_s22 + $0x78] sm:$0xff] %vm4771_vm3, %v4722_v40  ;;  %v6181_v21 = vpop.eup %6180  ;;  %v4726_v31 = vadd.f32 %v4618_v12, %v4534_v8  ;;  %v4622_v62 = vmul.f32 0.6931472, %v6179_v56  ;;  %6192 = vlog2.f32 %v8840_v2 }
 0x566   : > { %4788 = vst.msk [vmem:[%s6387_s22 + $0x80] sm:$0xff] %vm4771_vm3, %v4723_v46  ;;  %v6183_v1 = vpop.eup %6182  ;;  %v4727_v22 = vadd.f32 %v4620_v59, %v4535_v52  ;;  %v4624_v58 = vmul.f32 0.6931472, %v6181_v21  ;;  %6194 = vlog2.f32 %v8845_v34  ;;  %v4546_v46 = vld [vmem:[#allocation3 + $0x8] sm:$0xff]  ;;  %v4548_v52 = vld [vmem:[#allocation3 + $0x1d0] sm:$0xff]  ;;  %v4549_v59 = vld [vmem:[#allocation3 + $0x100] sm:$0xff] }
 0x567   : > { %4789 = vst.msk [vmem:[%s6387_s22 + $0x88] sm:$0xff] %vm4771_vm3, %v4724_v14  ;;  %v6185_v32 = vpop.eup %6184  ;;  %v4728_v50 = vadd.f32 %v4622_v62, %v4536_v0  ;;  %v4626_v6 = vmul.f32 0.6931472, %v6183_v1  ;;  %6196 = vlog2.f32 %v8850_v41  ;;  %v4551_v1 = vld [vmem:[#allocation3 + $0x40] sm:$0xff] }
 0x568   : > { %4790 = vst.msk [vmem:[%s6387_s22 + $0x90] sm:$0xff] %vm4771_vm3, %v4725_v38  ;;  %v6187_v28 = vpop.eup %6186  ;;  %v4729_v2 = vadd.f32 %v4624_v58, %v4537_v35  ;;  %v4628_v27 = vmul.f32 0.6931472, %v6185_v32  ;;  %6198 = vlog2.f32 %v8855_v26 }
 0x569   : > { %4791 = vst.msk [vmem:[%s6387_s22 + $0x98] sm:$0xff] %vm4771_vm3, %v4726_v31  ;;  %v6189_v30 = vpop.eup %6188  ;;  %v4730_v34 = vadd.f32 %v4626_v6, %v4538_v44  ;;  %v4630_v19 = vmul.f32 0.6931472, %v6187_v28  ;;  %6200 = vlog2.f32 %v8860_v5  ;;  %v4550_v31 = vld [vmem:[#allocation3 + $0xc8] sm:$0xff]  ;;  %v4552_v44 = vld [vmem:[#allocation3 + $0x1f8] sm:$0xff]  ;;  %v4553_v6 = vld [vmem:[#allocation3 + $0x20] sm:$0xff] }
 0x56a   : > { %4792 = vst.msk [vmem:[%s6387_s22 + $0xa0] sm:$0xff] %vm4771_vm3, %v4727_v22  ;;  %v6191_v37 = vpop.eup %6190  ;;  %v4731_v41 = vadd.f32 %v4628_v27, %v4539_v57  ;;  %v4632_v13 = vmul.f32 0.6931472, %v6189_v30  ;;  %6202 = vlog2.f32 %v8865_v7  ;;  %v4555_v30 = vld [vmem:[#allocation3 + $0x1a0] sm:$0xff] }
 0x56b   : > { %4793 = vst.msk [vmem:[%s6387_s22 + $0xa8] sm:$0xff] %vm4771_vm3, %v4728_v50  ;;  %v6193_v25 = vpop.eup %6192  ;;  %v4732_v26 = vadd.f32 %v4630_v19, %v4540_v33  ;;  %v4634_v43 = vmul.f32 0.6931472, %v6191_v37  ;;  %6204 = vlog2.f32 %v8870_v55 }
 0x56c   : > { %4794 = vst.msk [vmem:[%s6387_s22 + $0xb0] sm:$0xff] %vm4771_vm3, %v4729_v2  ;;  %v6195_v23 = vpop.eup %6194  ;;  %v4733_v5 = vadd.f32 %v4632_v13, %v4541_v11  ;;  %v4636_v42 = vmul.f32 0.6931472, %v6193_v25  ;;  %6206 = vlog2.f32 %v8875_v4  ;;  %v4554_v2 = vld [vmem:[#allocation3 + $0x128] sm:$0xff]  ;;  %v4556_v11 = vld [vmem:[#allocation3 + $0x1f0] sm:$0xff] }
 0x56d   : > { %4795 = vst.msk [vmem:[%s6387_s22 + $0xb8] sm:$0xff] %vm4771_vm3, %v4730_v34  ;;  %v6197_v63 = vpop.eup %6196  ;;  %v4734_v7 = vadd.f32 %v4634_v43, %v4542_v53  ;;  %v4638_v40 = vmul.f32 0.6931472, %v6195_v23  ;;  %6208 = vlog2.f32 %v8880_v45  ;;  %v4557_v13 = vld [vmem:[#allocation3 + $0xe8] sm:$0xff]  ;;  %v9807_v53 = vld [vmem:[#allocation110_spill] sm:$0xff]  ;;  %v4558_v43 = vld [vmem:[#allocation3 + $0x78] sm:$0xff] }
 0x56e   : > { %4796 = vst.msk [vmem:[%s6387_s22 + $0xc0] sm:$0xff] %vm4771_vm3, %v4731_v41  ;;  %v6199_v36 = vpop.eup %6198  ;;  %v4735_v55 = vadd.f32 %v4636_v42, %v4543_v24  ;;  %v4640_v16 = vmul.f32 0.6931472, %v6197_v63  ;;  %6210 = vlog2.f32 %v8885_v54  ;;  %v9808_v24 = vld [vmem:[#allocation111_spill] sm:$0xff]  ;;  %v4559_v42 = vld [vmem:[#allocation3 + $0x70] sm:$0xff] }
 0x56f   : > { %4797 = vst.msk [vmem:[%s6387_s22 + $0xc8] sm:$0xff] %vm4771_vm3, %v4732_v26  ;;  %v6201_v3 = vpop.eup %6200  ;;  %v4736_v4 = vadd.f32 %v4638_v40, %v4544_v60  ;;  %v4642_v8 = vmul.f32 0.6931472, %v6199_v36  ;;  %6212 = vlog2.f32 %v8890_v17  ;;  %v9809_v60 = vld [vmem:[#allocation112_spill] sm:$0xff]  ;;  %v9810_v36 = vld [vmem:[#allocation113_spill] sm:$0xff] }
 0x570   : > { %4798 = vst.msk [vmem:[%s6387_s22 + $0xd0] sm:$0xff] %vm4771_vm3, %v4733_v5  ;;  %v6203_v14 = vpop.eup %6202  ;;  %v4737_v45 = vadd.f32 %v4640_v16, %v4545_v61  ;;  %v4644_v12 = vmul.f32 0.6931472, %v6201_v3  ;;  %6214 = vlog2.f32 %v8895_v29  ;;  %v4560_v61 = vld [vmem:[#allocation3 + $0x90] sm:$0xff]  ;;  %v4561_v3 = vld [vmem:[#allocation3 + $0x1d8] sm:$0xff] }
 0x571   : > { %4799 = vst.msk [vmem:[%s6387_s22 + $0xd8] sm:$0xff] %vm4771_vm3, %v4734_v7  ;;  %v6205_v56 = vpop.eup %6204  ;;  %v4738_v54 = vadd.f32 %v4642_v8, %v4546_v46  ;;  %v4646_v38 = vmul.f32 0.6931472, %v6203_v14  ;;  %6216 = vlog2.f32 %v8900_v20 }
 0x572   : > { %4800 = vst.msk [vmem:[%s6387_s22 + $0xe0] sm:$0xff] %vm4771_vm3, %v4735_v55  ;;  %v6207_v0 = vpop.eup %6206  ;;  %v4739_v17 = vadd.f32 %v4644_v12, %v4547_v15  ;;  %v4648_v21 = vmul.f32 0.6931472, %v6205_v56  ;;  %6218 = vlog2.f32 %v8905_v48  ;;  %v9812_v12 = vld [vmem:[#allocation115_spill] sm:$0xff] }
 0x573   : > { %4801 = vst.msk [vmem:[%s6387_s22 + $0xe8] sm:$0xff] %vm4771_vm3, %v4736_v4  ;;  %v6209_v62 = vpop.eup %6208  ;;  %v4740_v29 = vadd.f32 %v4646_v38, %v4548_v52  ;;  %v4650_v35 = vmul.f32 0.6931472, %v6207_v0  ;;  %6220 = vlog2.f32 %v8910_v39  ;;  %v9811_v4 = vld [vmem:[#allocation114_spill] sm:$0xff]  ;;  %v4563_v38 = vld [vmem:[#allocation3 + $0xb8] sm:$0xff] }
 0x574   : > { %4802 = vst.msk [vmem:[%s6387_s22 + $0xf0] sm:$0xff] %vm4771_vm3, %v4737_v45  ;;  %v6211_v22 = vpop.eup %6210  ;;  %v4741_v20 = vadd.f32 %v4648_v21, %v4549_v59  ;;  %v4652_v58 = vmul.f32 0.6931472, %v6209_v62  ;;  %6222 = vlog2.f32 %v8915_v51  ;;  %v4562_v45 = vld [vmem:[#allocation3 + $0xd0] sm:$0xff]  ;;  %v9814_v62 = vld [vmem:[#allocation117_spill] sm:$0xff] }
 0x575   : > { %4803 = vst.msk [vmem:[%s6387_s22 + $0xf8] sm:$0xff] %vm4771_vm3, %v4738_v54  ;;  %v6213_v32 = vpop.eup %6212  ;;  %v4742_v48 = vadd.f32 %v4650_v35, %v4550_v31  ;;  %v4654_v50 = vmul.f32 0.6931472, %v6211_v22  ;;  %6224 = vlog2.f32 %v8920_v18  ;;  %v9813_v59 = vld [vmem:[#allocation116_spill] sm:$0xff]  ;;  %v4564_v31 = vld [vmem:[#allocation3 + $0x88] sm:$0xff] }
 0x576   : > { %4804 = vst.msk [vmem:[%s6387_s22 + $0x100] sm:$0xff] %vm4771_vm3, %v4739_v17  ;;  %v6215_v57 = vpop.eup %6214  ;;  %v4743_v39 = vadd.f32 %v4652_v58, %v4551_v1  ;;  %v4656_v28 = vmul.f32 0.6931472, %v6213_v32  ;;  %6226 = vlog2.f32 %v8925_v10  ;;  %v4565_v22 = vld [vmem:[#allocation3 + $0xa8] sm:$0xff] }
 0x577   : > { %4805 = vst.msk [vmem:[%s6387_s22 + $0x108] sm:$0xff] %vm4771_vm3, %v4740_v29  ;;  %v6217_v27 = vpop.eup %6216  ;;  %v4744_v51 = vadd.f32 %v4654_v50, %v4552_v44  ;;  %v4658_v33 = vmul.f32 0.6931472, %v6215_v57  ;;  %6228 = vlog2.f32 %v8930_v9  ;;  %v9816_v50 = vld [vmem:[#allocation119_spill] sm:$0xff] }
 0x578   : > { %4806 = vst.msk [vmem:[%s6387_s22 + $0x110] sm:$0xff] %vm4771_vm3, %v4741_v20  ;;  %v6219_v34 = vpop.eup %6218  ;;  %v4745_v18 = vadd.f32 %v4656_v28, %v4553_v6  ;;  %v4660_v19 = vmul.f32 0.6931472, %v6217_v27  ;;  %6230 = vlog2.f32 %v8935_v49  ;;  %v9815_v20 = vld [vmem:[#allocation118_spill] sm:$0xff]  ;;  %v4567_v28 = vld [vmem:[#allocation3 + $0x170] sm:$0xff] }
 0x579   : > { %4807 = vst.msk [vmem:[%s6387_s22 + $0x118] sm:$0xff] %vm4771_vm3, %v4742_v48  ;;  %v6221_v37 = vpop.eup %6220  ;;  %v4746_v10 = vadd.f32 %v4658_v33, %v4554_v2  ;;  %v4662_v41 = vmul.f32 0.6931472, %v6219_v34  ;;  %6232 = vlog2.f32 %v9807_v53  ;;  %v4566_v48 = vld [vmem:[#allocation3 + $0x1c8] sm:$0xff]  ;;  %v9817_v2 = vld [vmem:[#allocation120_spill] sm:$0xff]  ;;  %v9818_v34 = vld [vmem:[#allocation121_spill] sm:$0xff] }
 0x57a   : > { %4808 = vst.msk [vmem:[%s6387_s22 + $0x120] sm:$0xff] %vm4771_vm3, %v4743_v39  ;;  %v6223_v25 = vpop.eup %6222  ;;  %v4747_v9 = vadd.f32 %v4660_v19, %v4555_v30  ;;  %v4664_v26 = vmul.f32 0.6931472, %v6221_v37  ;;  %6234 = vlog2.f32 %v9808_v24  ;;  %v4568_v30 = vld [vmem:[#allocation3 + $0x178] sm:$0xff]  ;;  %v4569_v37 = vld [vmem:[#allocation3 + $0x68] sm:$0xff] }
 0x57b   : > { %4809 = vst.msk [vmem:[%s6387_s22 + $0x128] sm:$0xff] %vm4771_vm3, %v4744_v51  ;;  %v6225_v23 = vpop.eup %6224  ;;  %v4748_v49 = vadd.f32 %v4662_v41, %v4556_v11  ;;  %v4666_v5 = vmul.f32 0.6931472, %v6223_v25  ;;  %6236 = vlog2.f32 %v9809_v60  ;;  %v4570_v25 = vld [vmem:[#allocation3 + $0x190] sm:$0xff] }
 0x57c   : > { %4810 = vst.msk [vmem:[%s6387_s22 + $0x130] sm:$0xff] %vm4771_vm3, %v4745_v18  ;;  %v6227_v63 = vpop.eup %6226  ;;  %v4749_v7 = vadd.f32 %v4664_v26, %v4557_v13  ;;  %v4668_v40 = vmul.f32 0.6931472, %v6225_v23  ;;  %6238 = vlog2.f32 %v9810_v36  ;;  %v4571_v23 = vld [vmem:[#allocation3 + $0x198] sm:$0xff]  ;;  %v4573_v36 = vld [vmem:[#allocation3 + $0xc0] sm:$0xff] }
 0x57d   : > { %4811 = vst.msk [vmem:[%s6387_s22 + $0x138] sm:$0xff] %vm4771_vm3, %v4746_v10  ;;  %v6229_v55 = vpop.eup %6228  ;;  %v4750_v16 = vadd.f32 %v4666_v5, %v4558_v43  ;;  %v4670_v46 = vmul.f32 0.6931472, %v6227_v63  ;;  %6240 = vlog2.f32 %v9811_v4  ;;  %v9819_v10 = vld [vmem:[#allocation122_spill] sm:$0xff]  ;;  %v4572_v63 = vld [vmem:[#allocation3 + $0x38] sm:$0xff] }
 0x57e   : > { %4812 = vst.msk [vmem:[%s6387_s22 + $0x140] sm:$0xff] %vm4771_vm3, %v4747_v9  ;;  %v6231_v8 = vpop.eup %6230  ;;  %v4751_v15 = vadd.f32 %v4668_v40, %v4559_v42  ;;  %v4672_v14 = vmul.f32 0.6931472, %v6229_v55  ;;  %6242 = vlog2.f32 %v9812_v12  ;;  %v9820_v9 = vld [vmem:[#allocation123_spill] sm:$0xff] }
 0x57f   : > { %4813 = vst.msk [vmem:[%s6387_s22 + $0x148] sm:$0xff] %vm4771_vm3, %v4748_v49  ;;  %v6233_v52 = vpop.eup %6232  ;;  %v4752_v56 = vadd.f32 %v4670_v46, %v4560_v61  ;;  %v4674_v54 = vmul.f32 0.6931472, %v6231_v8  ;;  %6244 = vlog2.f32 %v9813_v59  ;;  %v9821_v49 = vld [vmem:[#allocation124_spill] sm:$0xff]  ;;  %v4577_v59 = vld [vmem:[#allocation3 + $0x58] sm:$0xff] }
 0x580   : > { %4814 = vst.msk [vmem:[%s6387_s22 + $0x150] sm:$0xff] %vm4771_vm3, %v4749_v7  ;;  %v6235_v0 = vpop.eup %6234  ;;  %v4753_v17 = vadd.f32 %v4672_v14, %v4561_v3  ;;  %v4676_v21 = vmul.f32 0.6931472, %v6233_v52  ;;  %6246 = vlog2.f32 %v9814_v62  ;;  %v4574_v3 = vld [vmem:[#allocation3 + $0x1c0] sm:$0xff]  ;;  %v4576_v52 = vld [vmem:[#allocation3 + $0x10] sm:$0xff] }
 0x581   : > { %4815 = vst.msk [vmem:[%s6387_s22 + $0x158] sm:$0xff] %vm4771_vm3, %v4750_v16  ;;  %v6237_v29 = vpop.eup %6236  ;;  %v4754_v35 = vadd.f32 %v4674_v54, %v4562_v45  ;;  %v4678_v1 = vmul.f32 0.6931472, %v6235_v0  ;;  %6248 = vlog2.f32 %v9815_v20 }
 0x582   : > { %4816 = vst.msk [vmem:[%s6387_s22 + $0x160] sm:$0xff] %vm4771_vm3, %v4751_v15  ;;  %v6239_v58 = vpop.eup %6238  ;;  %v4755_v44 = vadd.f32 %v4676_v21, %v4563_v38  ;;  %v4680_v32 = vmul.f32 0.6931472, %v6237_v29  ;;  %6250 = vlog2.f32 %v9816_v50  ;;  %v4575_v15 = vld [vmem:[#allocation3 + $0x158] sm:$0xff] }
 0x583   : > { %4817 = vst.msk [vmem:[%s6387_s22 + $0x168] sm:$0xff] %vm4771_vm3, %v4752_v56  ;;  %v6241_v6 = vpop.eup %6240  ;;  %v4756_v57 = vadd.f32 %v4678_v1, %v4564_v31  ;;  %v4682_v39 = vmul.f32 0.6931472, %v6239_v58  ;;  %6252 = vlog2.f32 %v9817_v2  ;;  %v4578_v31 = vld [vmem:[#allocation3 + $0xa0] sm:$0xff] }
 0x584   : > { %4818 = vst.msk [vmem:[%s6387_s22 + $0x170] sm:$0xff] %vm4771_vm3, %v4753_v17  ;;  %v6243_v27 = vpop.eup %6242  ;;  %v4757_v51 = vadd.f32 %v4680_v32, %v4565_v22  ;;  %v4684_v33 = vmul.f32 0.6931472, %v6241_v6  ;;  %6254 = vlog2.f32 %v9818_v34 }
 0x585   : > { %4819 = vst.msk [vmem:[%s6387_s22 + $0x178] sm:$0xff] %vm4771_vm3, %v4754_v35  ;;  %v6245_v18 = vpop.eup %6244  ;;  %v4758_v19 = vadd.f32 %v4682_v39, %v4566_v48  ;;  %v4686_v11 = vmul.f32 0.6931472, %v6243_v27  ;;  %6256 = vlog2.f32 %v9819_v10 }
 0x586   : > { %4820 = vst.msk [vmem:[%s6387_s22 + $0x180] sm:$0xff] %vm4771_vm3, %v4755_v44  ;;  %v6247_v41 = vpop.eup %6246  ;;  %v4759_v13 = vadd.f32 %v4684_v33, %v4567_v28  ;;  %v4688_v53 = vmul.f32 0.6931472, %v6245_v18  ;;  %6258 = vlog2.f32 %v9820_v9 }
 0x587   : > { %4821 = vst.msk [vmem:[%s6387_s22 + $0x188] sm:$0xff] %vm4771_vm3, %v4756_v57  ;;  %v6249_v26 = vpop.eup %6248  ;;  %v4760_v43 = vadd.f32 %v4686_v11, %v4568_v30  ;;  %v4690_v24 = vmul.f32 0.6931472, %v6247_v41  ;;  %6260 = vlog2.f32 %v9821_v49 }
 0x588   : > { %4822 = vst.msk [vmem:[%s6387_s22 + $0x190] sm:$0xff] %vm4771_vm3, %v4757_v51  ;;  %v6251_v5 = vpop.eup %6250  ;;  %v4761_v42 = vadd.f32 %v4688_v53, %v4569_v37  ;;  %v4692_v60 = vmul.f32 0.6931472, %v6249_v26  ;;  %6262 = vlog2.f32 %v9015_v47 }
 0x589   : > { %4823 = vst.msk [vmem:[%s6387_s22 + $0x198] sm:$0xff] %vm4771_vm3, %v4758_v19  ;;  %v6253_v7 = vpop.eup %6252  ;;  %v4762_v40 = vadd.f32 %v4690_v24, %v4570_v25  ;;  %v4694_v61 = vmul.f32 0.6931472, %v6251_v5 }
 0x58a   : > { %4824 = vst.msk [vmem:[%s6387_s22 + $0x1a0] sm:$0xff] %vm4771_vm3, %v4759_v13  ;;  %v6255_v55 = vpop.eup %6254  ;;  %v4763_v16 = vadd.f32 %v4692_v60, %v4571_v23  ;;  %v4696_v46 = vmul.f32 0.6931472, %v6253_v7 }
 0x58b   : > { %4825 = vst.msk [vmem:[%s6387_s22 + $0x1a8] sm:$0xff] %vm4771_vm3, %v4760_v43  ;;  %v6257_v4 = vpop.eup %6256  ;;  %v4764_v8 = vadd.f32 %v4694_v61, %v4572_v63  ;;  %v4698_v47 = vmul.f32 0.6931472, %v6255_v55 }
 0x58c   : > { %4826 = vst.msk [vmem:[%s6387_s22 + $0x1b0] sm:$0xff] %vm4771_vm3, %v4761_v42  ;;  %v6259_v14 = vpop.eup %6258  ;;  %v4765_v45 = vadd.f32 %v4696_v46, %v4573_v36  ;;  %v4700_v12 = vmul.f32 0.6931472, %v6257_v4 }
 0x58d   : > { %4827 = vst.msk [vmem:[%s6387_s22 + $0x1b8] sm:$0xff] %vm4771_vm3, %v4762_v40  ;;  %v6261_v56 = vpop.eup %6260  ;;  %v4766_v54 = vadd.f32 %v4698_v47, %v4574_v3  ;;  %v4702_v38 = vmul.f32 0.6931472, %v6259_v14 }
 0x58e   : > { %4828 = vst.msk [vmem:[%s6387_s22 + $0x1c0] sm:$0xff] %vm4771_vm3, %v4763_v16  ;;  %v6263_v0 = vpop.eup %6262  ;;  %v4767_v17 = vadd.f32 %v4700_v12, %v4575_v15  ;;  %v4704_v21 = vmul.f32 0.6931472, %v6261_v56 }
 0x58f   : > { %4829 = vst.msk [vmem:[%s6387_s22 + $0x1c8] sm:$0xff] %vm4771_vm3, %v4764_v8  ;;  %v4768_v62 = vadd.f32 %v4702_v38, %v4576_v52  ;;  %v4706_v29 = vmul.f32 0.6931472, %v6263_v0 }
 0x590   : > { %4830 = vst.msk [vmem:[%s6387_s22 + $0x1d0] sm:$0xff] %vm4771_vm3, %v4765_v45  ;;  %v4769_v35 = vadd.f32 %v4704_v21, %v4577_v59 }
 0x591   : > { %4831 = vst.msk [vmem:[%s6387_s22 + $0x1d8] sm:$0xff] %vm4771_vm3, %v4766_v54  ;;  %v4770_v1 = vadd.f32 %v4706_v29, %v4578_v31 }
 0x592   : > { %4832 = vst.msk [vmem:[%s6387_s22 + $0x1e0] sm:$0xff] %vm4771_vm3, %v4767_v17 }
 0x593   : > { %4833 = vst.msk [vmem:[%s6387_s22 + $0x1e8] sm:$0xff] %vm4771_vm3, %v4768_v62 }
 0x594   : > { %4834 = vst.msk [vmem:[%s6387_s22 + $0x1f0] sm:$0xff] %vm4771_vm3, %v4769_v35 }
 0x595   : > { %4835 = vst.msk [vmem:[%s6387_s22 + $0x1f8] sm:$0xff] %vm4771_vm3, %v4770_v1 }
 0x596 PF: > { %s15_s19 = sadd.s32 1, %s6302_s19   ;;  %s9822_s15 = smov %s6294_s17 }
 0x597   : > { %p12_p9 = scmp.ge.s32.totalorder %s15_s19, 18   ;;  %s9823_s16 = smov %s6298_s18 }
 0x598   : > { %s9824_s17 = smov %s9827_s20  ;;  %s9825_s18 = smov %s9831_s21 }
 0x599   :  { %14 = sbr.rel (!%p12_p9) target bundleno = 3 (0x3), region = 88 }

</bundles_post_ra>
